<compile_context>
chip_gen: v5e
topology: v5e:2x2
jax: 0.10.0
libtpu: 0.0.40
codegen_flags: <defaults>
</compile_context>

<pallas_src>
import numpy as np
import jax
import jax.numpy as jnp
from jax.experimental import pallas as pl
from jax.experimental.pallas import tpu as pltpu

# ---- constants implied by the module __init__ ----
SAMPLE_RATE = 48000
N_FFT = 3840
HOP = 960
N_FREQS = N_FFT // 2 + 1      # 1921 (onesided)
N_MELS = 128                  # torchaudio MelSpectrogram default
N_MFCC = 80
LOG_EPS = 1e-6                # torchaudio log_mels epsilon

F_PAD = 1920                  # freq bins kept (Nyquist bin dropped: mel weight == 0)
TF = 384                      # frequency tile -> K_TILES = 5 inner grid steps
K_TILES = F_PAD // TF         # 5
N_OUT = 128                   # lane-dense output width (>= N_MFCC)
TR_MAX = 1024                 # row tile (bounded by ~30 MiB VMEM use, fits v7x)


def _round_up(a, m):
    return -(-a // m) * m


# ---------------- deterministic parameter construction (plain numpy) --------

def _hann_window(n):
    # torch.hann_window(n, periodic=True)
    return 0.5 * (1.0 - np.cos(2.0 * np.pi * np.arange(n) / n))


def _dft_cossin_tiled():
    """Window-folded real-DFT matrices, pre-tiled for contiguous per-k DMA.

    Returns (K_TILES, N_FFT, 2*TF): tile k holds [cos tile k | sin tile k] with the
    Hann window folded in.  Frequency bins 0..F_PAD-1 (Nyquist bin 1920 dropped).
    """
    w = _hann_window(N_FFT)
    n = np.arange(N_FFT, dtype=np.float64)[:, None]
    f = np.arange(F_PAD, dtype=np.float64)[None, :]
    ang = 2.0 * np.pi * n * f / N_FFT
    cos = np.cos(ang) * w[:, None]                           # (N_FFT, F_PAD)
    sin = (-np.sin(ang)) * w[:, None]
    cos_t = cos.reshape(N_FFT, K_TILES, TF)
    sin_t = sin.reshape(N_FFT, K_TILES, TF)
    cossin = np.concatenate([cos_t, sin_t], axis=-1)          # (N_FFT, K_TILES, 2*TF)
    cossin = np.transpose(cossin, (1, 0, 2))                  # (K_TILES, N_FFT, 2*TF)
    return np.ascontiguousarray(cossin).astype(np.float32)


def _mel_fbanks_tiled():
    # torchaudio.functional.melscale_fbanks(n_freqs, 0, sr/2, n_mels, sr,
    #                                       norm=None, mel_scale='htk')
    all_freqs = np.linspace(0.0, SAMPLE_RATE / 2, N_FREQS)
    hz_to_mel = lambda f: 2595.0 * np.log10(1.0 + f / 700.0)
    mel_to_hz = lambda m: 700.0 * (10.0 ** (m / 2595.0) - 1.0)
    m_pts = np.linspace(hz_to_mel(0.0), hz_to_mel(SAMPLE_RATE / 2), N_MELS + 2)
    f_pts = mel_to_hz(m_pts)
    f_diff = f_pts[1:] - f_pts[:-1]                           # (N_MELS+1,)
    slopes = f_pts[None, :] - all_freqs[:, None]              # (N_FREQS, N_MELS+2)
    down = (-slopes[:, :-2]) / f_diff[:-1]
    up = slopes[:, 2:] / f_diff[1:]
    fb = np.maximum(0.0, np.minimum(down, up)).astype(np.float32)  # (N_FREQS, N_MELS)
    fb = fb[:F_PAD]                                           # drop Nyquist row (all zeros)
    return np.ascontiguousarray(fb.reshape(K_TILES, TF, N_MELS))


def _dct_mat_padded():
    # torchaudio.functional.create_dct(n_mfcc, n_mels, norm='ortho') -> (n_mels, n_mfcc)
    # zero-padded to N_OUT=128 columns so the kernel output is lane-dense.
    n = np.arange(N_MELS, dtype=np.float64)
    k = np.arange(N_MFCC, dtype=np.float64)[:, None]
    dct = np.cos(np.pi / N_MELS * (n + 0.5) * k)              # (N_MFCC, N_MELS)
    dct[0] *= 1.0 / np.sqrt(2.0)
    dct *= np.sqrt(2.0 / N_MELS)
    dct = dct.T.astype(np.float32)                            # (N_MELS, N_MFCC)
    return np.pad(dct, ((0, 0), (0, N_OUT - N_MFCC)))         # (N_MELS, N_OUT)


# ---------------------------- Pallas kernel ---------------------------------

def mfcc_kernel(frames_ref, cossin_ref, mel_ref, dct_ref, out_ref, mel_acc):
    # frames_ref: (TR, N_FFT) bf16        cossin_ref: (N_FFT, 2*TF) bf16 (k-tile)
    # mel_ref:    (K_TILES, TF, N_MELS) f32 (resident)   dct_ref: (N_MELS, N_OUT) f32
    k = pl.program_id(1)  # frequency-tile index (innermost, "arbitrary")

    @pl.when(k == 0)
    def _():
        mel_acc[...] = jnp.zeros_like(mel_acc)

    # Single MXU call: (TR, N_FFT) bf16 @ (N_FFT, 2*TF) bf16 -> (TR, 2*TF) f32
    reim = jnp.dot(frames_ref[...], cossin_ref[...],
                   preferred_element_type=jnp.float32)
    re = reim[:, :TF]
    im = reim[:, TF:]
    power = re * re + im * im                                 # (TR, TF) f32

    mel_tile = mel_ref[k]                                     # (TF, N_MELS), leading-axis index
    mel_acc[...] += jnp.dot(power, mel_tile,
                            preferred_element_type=jnp.float32)

    @pl.when(k == pl.num_programs(1) - 1)
    def _():
        logmel = jnp.log(mel_acc[...] + LOG_EPS)              # (TR, N_MELS) f32
        out_ref[...] = jnp.dot(logmel, dct_ref[...],
                               preferred_element_type=jnp.float32)


def mfcc_pallas(frames, cossin_mat, mel_fb, dct_mat, tr):
    rows = frames.shape[0]                                    # multiple of tr
    grid = (rows // tr, K_TILES)
    return pl.pallas_call(
        mfcc_kernel,
        out_shape=jax.ShapeDtypeStruct((rows, N_OUT), jnp.float32),
        grid_spec=pltpu.PrefetchScalarGridSpec(
            num_scalar_prefetch=0,
            grid=grid,
            in_specs=[
                # frames row tile: fetched once per i, resident across k
                pl.BlockSpec((tr, N_FFT), lambda i, k: (i, 0)),
                # [cos|sin] tile k: one contiguous DMA per k-step
                pl.BlockSpec((None, N_FFT, 2 * TF), lambda i, k: (k, 0, 0)),
                # mel filterbank: fully resident, indexed by k inside the kernel
                pl.BlockSpec((K_TILES, TF, N_MELS), lambda i, k: (0, 0, 0)),
                # DCT matrix: resident
                pl.BlockSpec((N_MELS, N_OUT), lambda i, k: (0, 0)),
            ],
            out_specs=pl.BlockSpec((tr, N_OUT), lambda i, k: (i, 0)),  # lane-dense out
            scratch_shapes=[pltpu.VMEM((tr, N_MELS), jnp.float32)],
        ),
        compiler_params=pltpu.CompilerParams(
            dimension_semantics=("parallel", "arbitrary"),
            vmem_limit_bytes=56 << 20,   # ~30 MiB used; safe on v7x (64 MiB/TC)
        ),
    )(frames, cossin_mat, mel_fb, dct_mat)


# ----------------------------- forward wrapper ------------------------------

def mfcc_forward(x, cossin_mat, mel_fb, dct_mat):
    """x: (B, T) float32 audio.  Returns (B, N_MFCC, n_frames - 1)."""
    B, T = x.shape
    pad = N_FFT // 2
    # center=True, pad_mode='reflect' (torch STFT default); cast to bf16 BEFORE the
    # frame gather so the expanded frame matrix is written/read in bf16.
    xp = jnp.pad(x, ((0, 0), (pad, pad)), mode="reflect").astype(jnp.bfloat16)
    n_frames = 1 + T // HOP
    idx = jnp.arange(n_frames)[:, None] * HOP + jnp.arange(N_FFT)[None, :]
    # Hann window is folded into cossin_mat -> no elementwise multiply here.
    frames = xp[:, idx]                                       # (B, n_frames, N_FFT) bf16

    rows = B * n_frames
    rows_16 = _round_up(rows, 16)                             # bf16 sublane packing
    if rows_16 >= 2 * TR_MAX:
        tr = TR_MAX
    elif rows_16 >= 32:
        # ensure >= 2 row tiles so the "parallel" axis spans both TCs (megacore)
        tr = _round_up(rows_16 // 2, 16)
    else:
        tr = rows_16
    rows_pad = _round_up(rows, tr)

    frames_flat = frames.reshape(rows, N_FFT)
    frames_flat = jnp.pad(frames_flat, ((0, rows_pad - rows), (0, 0)))

    out = mfcc_pallas(frames_flat, cossin_mat, mel_fb, dct_mat, tr)  # (rows_pad, N_OUT)
    out = out[:rows, :N_MFCC].reshape(B, n_frames, N_MFCC)
    mfcc = jnp.transpose(out, (0, 2, 1))                      # (B, N_MFCC, n_frames)
    return mfcc[:, :, 1:]                                     # module's forward slices off frame 0


# --------------------------------- main --------------------------------------

if __name__ == "__main__":
    cossin_mat = jnp.asarray(_dft_cossin_tiled(), dtype=jnp.bfloat16)  # bf16 MXU operand
    mel_fb = jnp.asarray(_mel_fbanks_tiled())                          # f32, resident
    dct_mat = jnp.asarray(_dct_mat_padded())                           # f32, lane-dense

    key = jax.random.PRNGKey(0)
    # small-but-consistent input: 2 waveforms of 8 hops => 9 STFT frames, 8 after slicing
    x = jax.random.normal(key, (2, 8 * HOP), dtype=jnp.float32)

    fwd = jax.jit(mfcc_forward)
    y = fwd(x, cossin_mat, mel_fb, dct_mat)
    jax.block_until_ready(y)

    assert y.shape == (2, N_MFCC, 8), y.shape
    assert y.dtype == jnp.float32
    print("KERNEL_OK")
</pallas_src>

<mosaic_0001>
module attributes {stable_mosaic.version = 11 : i64} {
  func.func @mfcc_kernel(%arg0: i32, %arg1: i32, %arg2: memref<16x3840xbf16, #tpu.memory_space<vmem>>, %arg3: memref<1x3840x768xbf16, #tpu.memory_space<vmem>>, %arg4: memref<5x384x128xf32, #tpu.memory_space<vmem>>, %arg5: memref<128x128xf32, #tpu.memory_space<vmem>>, %arg6: memref<16x128xf32, #tpu.memory_space<vmem>>, %arg7: memref<16x128xf32, #tpu.memory_space<vmem>>) attributes {dimension_semantics = [#tpu.dimension_semantics<parallel>, #tpu.dimension_semantics<arbitrary>], iteration_bounds = array<i64: 2, 5>, scalar_prefetch = 0 : i64, scratch_operands = 1 : i64, tpu.core_type = #tpu.core_type<tc>, window_params = [{transform_indices = @transform_0, window_bounds = array<i64: 16, 3840>}, {transform_indices = @transform_1, window_bounds = array<i64: 1, 3840, 768>}, {pipeline_mode = #tpu.pipeline_mode<synchronous>, transform_indices = @transform_2, window_bounds = array<i64: 5, 384, 128>}, {pipeline_mode = #tpu.pipeline_mode<synchronous>, transform_indices = @transform_3, window_bounds = array<i64: 128, 128>}, {transform_indices = @transform_4, window_bounds = array<i64: 16, 128>}]} {
    %c0_i32 = arith.constant 0 : i32
    %0 = arith.cmpi eq, %arg1, %c0_i32 : i32
    %1 = arith.extui %0 : i1 to i32
    %c0_i32_0 = arith.constant 0 : i32
    %2 = arith.cmpi ne, %1, %c0_i32_0 : i32
    scf.if %2 {
      %cst_13 = arith.constant 0.000000e+00 : f32
      %22 = vector.broadcast %cst_13 : f32 to vector<16x128xf32>
      %c0_14 = arith.constant 0 : index
      %c0_15 = arith.constant 0 : index
      %23 = vector.load %arg7[%c0_14, %c0_15] : memref<16x128xf32, #tpu.memory_space<vmem>>, vector<16x128xf32>
      tpu.vector_store %arg7[%c0_14, %c0_15], %22 {strides = array<i32>} : memref<16x128xf32, #tpu.memory_space<vmem>>, vector<16x128xf32>,
    } else {
    }
    %c0 = arith.constant 0 : index
    %c0_1 = arith.constant 0 : index
    %3 = vector.load %arg2[%c0, %c0_1] : memref<16x3840xbf16, #tpu.memory_space<vmem>>, vector<16x3840xbf16>
    %c0_2 = arith.constant 0 : index
    %c0_3 = arith.constant 0 : index
    %c0_4 = arith.constant 0 : index
    %4 = vector.load %arg3[%c0_2, %c0_3, %c0_4] : memref<1x3840x768xbf16, #tpu.memory_space<vmem>>, vector<1x3840x768xbf16>
    %5 = vector.shape_cast %4 : vector<1x3840x768xbf16> to vector<3840x768xbf16>
    %cst = arith.constant dense<0.000000e+00> : vector<16x768xf32>
    %6 = tpu.matmul %3, %5, %cst {dimension_numbers = #tpu.dot_dimension_numbers<[1], [0], [0], [1], [0, 0, 1, 1], [], []>} : vector<16x3840xbf16>, vector<3840x768xbf16>, vector<16x768xf32> -> vector<16x768xf32>
    %7 = vector.extract_strided_slice %6 {offsets = [0, 0], sizes = [16, 384], strides = [1, 1]} : vector<16x768xf32> to vector<16x384xf32>
    %8 = vector.extract_strided_slice %6 {offsets = [0, 384], sizes = [16, 384], strides = [1, 1]} : vector<16x768xf32> to vector<16x384xf32>
    %9 = arith.mulf %7, %7 : vector<16x384xf32>
    %10 = arith.mulf %8, %8 : vector<16x384xf32>
    %11 = arith.addf %9, %10 : vector<16x384xf32>
    %12 = arith.index_cast %arg1 : i32 to index
    %c0_5 = arith.constant 0 : index
    %c0_6 = arith.constant 0 : index
    %13 = vector.load %arg4[%12, %c0_5, %c0_6] : memref<5x384x128xf32, #tpu.memory_space<vmem>>, vector<1x384x128xf32>
    %14 = vector.shape_cast %13 : vector<1x384x128xf32> to vector<384x128xf32>
    %c0_7 = arith.constant 0 : index
    %c0_8 = arith.constant 0 : index
    %15 = vector.load %arg7[%c0_7, %c0_8] : memref<16x128xf32, #tpu.memory_space<vmem>>, vector<16x128xf32>
    %cst_9 = arith.constant dense<0.000000e+00> : vector<16x128xf32>
    %16 = tpu.matmul %11, %14, %cst_9 {dimension_numbers = #tpu.dot_dimension_numbers<[1], [0], [0], [1], [0, 0, 1, 1], [], []>} : vector<16x384xf32>, vector<384x128xf32>, vector<16x128xf32> -> vector<16x128xf32>
    %17 = arith.addf %15, %16 : vector<16x128xf32>
    %c0_10 = arith.constant 0 : index
    %c0_11 = arith.constant 0 : index
    %18 = vector.load %arg7[%c0_10, %c0_11] : memref<16x128xf32, #tpu.memory_space<vmem>>, vector<16x128xf32>
    tpu.vector_store %arg7[%c0_10, %c0_11], %17 {strides = array<i32>} : memref<16x128xf32, #tpu.memory_space<vmem>>, vector<16x128xf32>,
    %c4_i32 = arith.constant 4 : i32
    %19 = arith.cmpi eq, %arg1, %c4_i32 : i32
    %20 = arith.extui %19 : i1 to i32
    %c0_i32_12 = arith.constant 0 : i32
    %21 = arith.cmpi ne, %20, %c0_i32_12 : i32
    scf.if %21 {
      %c0_13 = arith.constant 0 : index
      %c0_14 = arith.constant 0 : index
      %22 = vector.load %arg7[%c0_13, %c0_14] : memref<16x128xf32, #tpu.memory_space<vmem>>, vector<16x128xf32>
      %cst_15 = arith.constant 9.99999997E-7 : f32
      %23 = vector.broadcast %cst_15 : f32 to vector<16x128xf32>
      %24 = arith.addf %22, %23 : vector<16x128xf32>
      %25 = math.log %24 : vector<16x128xf32>
      %c0_16 = arith.constant 0 : index
      %c0_17 = arith.constant 0 : index
      %26 = vector.load %arg5[%c0_16, %c0_17] : memref<128x128xf32, #tpu.memory_space<vmem>>, vector<128x128xf32>
      %cst_18 = arith.constant dense<0.000000e+00> : vector<16x128xf32>
      %27 = tpu.matmul %25, %26, %cst_18 {dimension_numbers = #tpu.dot_dimension_numbers<[1], [0], [0], [1], [0, 0, 1, 1], [], []>} : vector<16x128xf32>, vector<128x128xf32>, vector<16x128xf32> -> vector<16x128xf32>
      %c0_19 = arith.constant 0 : index
      %c0_20 = arith.constant 0 : index
      %28 = vector.load %arg6[%c0_19, %c0_20] : memref<16x128xf32, #tpu.memory_space<vmem>>, vector<16x128xf32>
      tpu.vector_store %arg6[%c0_19, %c0_20], %27 {strides = array<i32>} : memref<16x128xf32, #tpu.memory_space<vmem>>, vector<16x128xf32>,
    } else {
    }
    return
  }
  func.func @transform_0(%arg0: i32, %arg1: i32) -> (i32, i32) {
    %c0_i32 = arith.constant 0 : i32
    %c0_i32_0 = arith.constant 0 : i32
    return %arg0, %c0_i32 : i32, i32
  }
  func.func @transform_1(%arg0: i32, %arg1: i32) -> (i32, i32, i32) {
    %c0_i32 = arith.constant 0 : i32
    %c0_i32_0 = arith.constant 0 : i32
    %c0_i32_1 = arith.constant 0 : i32
    return %arg1, %c0_i32, %c0_i32_0 : i32, i32, i32
  }
  func.func @transform_2(%arg0: i32, %arg1: i32) -> (i32, i32, i32) {
    %c0_i32 = arith.constant 0 : i32
    %c0_i32_0 = arith.constant 0 : i32
    %c0_i32_1 = arith.constant 0 : i32
    %c0_i32_2 = arith.constant 0 : i32
    return %c0_i32, %c0_i32_0, %c0_i32_1 : i32, i32, i32
  }
  func.func @transform_3(%arg0: i32, %arg1: i32) -> (i32, i32) {
    %c0_i32 = arith.constant 0 : i32
    %c0_i32_0 = arith.constant 0 : i32
    %c0_i32_1 = arith.constant 0 : i32
    return %c0_i32, %c0_i32_0 : i32, i32
  }
  func.func @transform_4(%arg0: i32, %arg1: i32) -> (i32, i32) {
    %c0_i32 = arith.constant 0 : i32
    %c0_i32_0 = arith.constant 0 : i32
    return %arg0, %c0_i32 : i32, i32
  }
}

</mosaic_0001>

<bundles_post_ra>
// kernel: mfcc_forward.1
= control target key start
LH: loop header
LB: loop body
LE: loop exit
PB: predicated region body
PF: predicated region fallthrough
CT: control target
= control target key end

     0   :  { %9 = vsyncpa [#allocation4], 0  ;;  %s23529_s0 = inlined_call_operand.vmem [shape: bf16[32,3840], index: 0, kind: input, shape index: {}]   ;;  %s23530_s1 = inlined_call_operand.hbm [shape: bf16[5,3840,768], index: 1, kind: input, shape index: {}]   ;;  %s23531_s2 = inlined_call_operand.vmem [shape: f32[5,384,128], index: 2, kind: input, shape index: {}]   ;;  %s23532_s3 = inlined_call_operand.vmem [shape: f32[128,128], index: 3, kind: input, shape index: {}]   ;;  %s23533_s4 = inlined_call_operand.vmem [shape: f32[32,128], index: 4, kind: output, shape index: {}]  }
   0x1   :  { %11 = vsyncpa [#allocation4 + $0x1], 0  ;;  %s19497_s15 = smov 0   ;;  %s19499_s16 = smov 0  }
   0x2   :  { %s19501_s17 = smov 0   ;;  %s19503_s18 = smov 0  }
   0x3   :  { %s19505_s19 = smov 0   ;;  %s19507_s20 = smov 0  }
   0x4   :  { %s19509_s21 = smov 0   ;;  %s19511_s22 = smov 0  }
   0x5 LB: > { %s11893_s23 = sadd.s32 4294967295, %s19467_s22   ;;  %s26_s24 = sadd.s32 1, %s19459_s20  ;;  %s19467_s22 = sphi %s19511_s22, %s17_s22   ;;  %s19463_s21 = sphi %s19509_s21, %s23809_s21   ;;  %s19459_s20 = sphi %s19507_s20, %s23808_s20   ;;  %s19455_s19 = sphi %s19505_s19, %s23807_s19   ;;  %s19451_s18 = sphi %s19503_s18, %s23806_s18   ;;  %s19447_s17 = sphi %s19501_s17, %s23805_s17   ;;  %s19443_s16 = sphi %s19499_s16, %s23804_s16   ;;  %s19439_s15 = sphi %s19497_s15, %s23803_s15  }
   0x6   : > { %p27_p0 = scmp.ge.s32.totalorder %s26_s24, 5  ;;  %s29_s25 = sadd.s32 1, %s19463_s21 }
   0x7   : > { %s62_s26 = sadd.s32 1, %s19447_s17  ;;  %p69_p1 = scmp.ne.s32.totalorder %s19447_s17, %s19443_s16 }
   0x8   : > { %s23811_s24 = smov (%p27_p0, %s26_s24), 0  ;;  %s23813_s25 = smov (!%p27_p0, %s29_s25), %s19463_s21 }
   0x9   : > { %s59_s27 = ssub.s32 %s19459_s20, %s23811_s24  ;;  %p70_p2 = scmp.eq.s32.totalorder %s19467_s22, 0 }
   0xa   : > { %p31_p3 = scmp.ge.s32.totalorder %s23813_s25, 2  ;;  %p60_p4 = scmp.eq.s32.totalorder %s59_s27, 0 }
   0xb   : > { %p71_p5 = por %p70_p2, %p69_p1  ;;  %p75_p6 = scmp.ne.s32.totalorder %s19443_s16, %s19439_s15 }
   0xc   : > { %s23815_s25 = smov (%p31_p3, %s23813_s25), 0  ;;  %p76_p7 = scmp.eq.s32.totalorder %s11893_s23, 0 }
   0xd   : > { %s19551_s28 = scalar_select %p60_p4, %s19447_s17, %s62_s26  }
   0xe   : > { %p19299_p8 = scmp.lt.s32.totalorder %s19467_s22, 10  ;;  %s183_s29 = sand.u32 1, %s19447_s17  }
   0xf   : > { %p19555_p9 = por %p76_p7, %p75_p6  ;;  %s19289_s5 = smul.u32 11520, %s183_s29 }
  0x10   : > { %p19296_p10 = pnand %p19299_p8, %p71_p5  ;;  %s19290_s6 = smul.u32 11520, %s19459_s20 }
  0x11   : > { %s187_s10 = scalar_lea.vmem [#allocation3], %s19289_s5  ;;  %s184_s13 = scalar_lea.sflag [#allocation4], %s183_s29 }
  0x12   : > { %s192_s9 = scalar_lea.hbm %s23530_s1, %s19290_s6  ;;  %s195_s11 = sshll.u32 %s187_s10, 4  ;;  %s196_s11 = int_to_ptr.vmem [resolvable:$true] %s195_s11 }
  0x13   : > { %s193_s12 = sshll.u32 %s192_s9, 4  ;;  %s19469_s14 = smov 384   ;;  %s194_s12 = int_to_ptr.hbm [resolvable:$true] %s193_s12 }
  0x14   : > { %s19470_s15 = smov 24   ;;  %p11898_p11 = scmp.ge.s32.totalorder %s19467_s22, 1 }
  0x15   : > { %19298 = dma.hbm_to_vmem [thread:$0]  (!%p19296_p10), %s194_s12, 184320, %s196_s11, %s184_s13, %s19469_s14, %s19469_s14, %s19470_s15  }
  0x16   : > { %p203_p12 = scmp.lt.s32.totalorder %s19467_s22, 11 }
  0x18   : > { %p204_p13 = pnand %p11898_p11, %p203_p12 }
  0x1a   : > { %207 = sbr.rel (%p204_p13) target bundleno = 1935 (0x78f), region = 36 }
  0x1f   : > { %s209_s23 = sand.u32 1, %s19443_s16  }
  0x20   : > { %s19291_s26 = smul.u32 11520, %s209_s23  ;;  %s210_s27 = scalar_lea.sflag [#allocation4], %s209_s23 }
  0x22   : > { %s19566_s7 = scalar_lea.vmem [#allocation3], %s19291_s26 }
  0x23   : > { %19434 = dma.done.wait (%p19555_p9), %s210_s27, 184320  }
  0x24   : > { %19436 = vsyncadd (%p19555_p9), %s210_s27, 4294782976  ;;  %s11899_s29 = sshll.u32 %s19455_s19, 1  ;;  %p11903_p1 = scmp.ne.s32.totalorder %s19451_s18, 0 }
  0x25   : > { %p246_p0 = scmp.lt.s32.totalorder %s11899_s29, 3 }
  0x26   : > { %261 = sbr.rel (%p11903_p1) target bundleno = 46 (0x2e), region = 44 }
  0x27   : > { %s23817_s29 = smov (!%p246_p0, %s11899_s29), 3 }
  0x28   : > { %s19292_s5 = smul.u32 120, %s23817_s29  ;;  %s11902_s6 = sshll.u32 %s23817_s29, 3 }
  0x29   : > { %s19576_s10 = scalar_lea.vmem %s23533_s4, %s11902_s6 }
  0x2a   : > { %s19581_s13 = scalar_lea.vmem %s23529_s0, %s19292_s5 }
  0x2b   : > { %v19471_v0 = vmov 0.0  }
  0x2c   : > { %262 = vst [vmem:[#allocation2] sm:$0xff] %v19471_v0 }
  0x2d   : > { %263 = vst [vmem:[#allocation2 + $0x8] sm:$0xff] %v19471_v0 }
  0x2e PF: > { %v12194_v1 = vld [vmem:[%s19566_s7 + $0x150] sm:$0xf]  ;;  %v17862_v2 = vld [vmem:[%s19566_s7 + $0x164] sm:$0xf0]  ;;  %v12170_v12 = vld [vmem:[%s19566_s7 + $0x120] sm:$0xf] }
  0x2f   : > { %v12386_v3 = vld [vmem:[%s19566_s7 + $0x2d0] sm:$0xf]  ;;  %v12195_v4 = vor.u32 %v17862_v2, %v12194_v1  ;;  %v17910_v5 = vld [vmem:[%s19566_s7 + $0x2e4] sm:$0xf0]  ;;  %v17856_v14 = vld [vmem:[%s19566_s7 + $0x134] sm:$0xf0] }
  0x30   : > { %v12578_v6 = vld [vmem:[%s19566_s7 + $0x450] sm:$0xf]  ;;  %v17958_v7 = vld [vmem:[%s19566_s7 + $0x464] sm:$0xf0]  ;;  %v12387_v8 = vor.u32 %v17910_v5, %v12386_v3  ;;  %v12362_v15 = vld [vmem:[%s19566_s7 + $0x2a0] sm:$0xf]  ;;  %v12171_v17 = vor.u32 %v17856_v14, %v12170_v12 }
  0x31   : > { %v12579_v9 = vor.u32 %v17958_v7, %v12578_v6  ;;  %v12770_v10 = vld [vmem:[%s19566_s7 + $0x5d0] sm:$0xf]  ;;  %v18006_v11 = vld [vmem:[%s19566_s7 + $0x5e4] sm:$0xf0]  ;;  %9084 = vmatpush.bf16.msra.mxu0 %v12195_v4  ;;  %v17904_v16 = vld [vmem:[%s19566_s7 + $0x2b4] sm:$0xf0] }
  0x32   : > { %v12771_v13 = vor.u32 %v18006_v11, %v12770_v10  ;;  %9098 = vmatpush.bf16.msra.mxu1 %v12387_v8  ;;  %v12363_v18 = vor.u32 %v17904_v16, %v12362_v15  ;;  %v12554_v19 = vld [vmem:[%s19566_s7 + $0x420] sm:$0xf]  ;;  %v17952_v20 = vld [vmem:[%s19566_s7 + $0x434] sm:$0xf0]  ;;  %v12146_v24 = vld [vmem:[%s19566_s7 + $0xf0] sm:$0xf] }
  0x33   : > { %9112 = vmatpush.bf16.msra.mxu2 %v12579_v9  ;;  %v12746_v21 = vld [vmem:[%s19566_s7 + $0x5a0] sm:$0xf]  ;;  %v12555_v22 = vor.u32 %v17952_v20, %v12554_v19  ;;  %v18000_v23 = vld [vmem:[%s19566_s7 + $0x5b4] sm:$0xf0]  ;;  %v17850_v25 = vld [vmem:[%s19566_s7 + $0x104] sm:$0xf0] }
  0x34   : > { %9126 = vmatpush.bf16.msra.mxu3 %v12771_v13  ;;  %v12747_v26 = vor.u32 %v18000_v23, %v12746_v21  ;;  %v12338_v27 = vld [vmem:[%s19566_s7 + $0x270] sm:$0xf]  ;;  %v17898_v28 = vld [vmem:[%s19566_s7 + $0x284] sm:$0xf0]  ;;  %v12147_v30 = vor.u32 %v17850_v25, %v12146_v24  ;;  %v12122_v36 = vld [vmem:[%s19566_s7 + $0xc0] sm:$0xf] }
  0x35   : > { %v12530_v29 = vld [vmem:[%s19566_s7 + $0x3f0] sm:$0xf]  ;;  %9085 = vmatpush.bf16.msra.mxu0 %v12171_v17  ;;  %v17946_v31 = vld [vmem:[%s19566_s7 + $0x404] sm:$0xf0]  ;;  %v12339_v34 = vor.u32 %v17898_v28, %v12338_v27  ;;  %v17844_v37 = vld [vmem:[%s19566_s7 + $0xd4] sm:$0xf0] }
  0x36   : > { %v12722_v32 = vld [vmem:[%s19566_s7 + $0x570] sm:$0xf]  ;;  %v17994_v33 = vld [vmem:[%s19566_s7 + $0x584] sm:$0xf0]  ;;  %9099 = vmatpush.bf16.msra.mxu1 %v12363_v18  ;;  %v12531_v35 = vor.u32 %v17946_v31, %v12530_v29  ;;  %v12314_v38 = vld [vmem:[%s19566_s7 + $0x240] sm:$0xf]  ;;  %v12123_v45 = vor.u32 %v17844_v37, %v12122_v36 }
  0x37   : > { %9113 = vmatpush.bf16.msra.mxu2 %v12555_v22  ;;  %v12723_v39 = vor.u32 %v17994_v33, %v12722_v32  ;;  %v17892_v40 = vld [vmem:[%s19566_s7 + $0x254] sm:$0xf0]  ;;  %v12506_v41 = vld [vmem:[%s19566_s7 + $0x3c0] sm:$0xf]  ;;  %v12098_v48 = vld [vmem:[%s19566_s7 + $0x90] sm:$0xf] }
  0x38   : > { %9127 = vmatpush.bf16.msra.mxu3 %v12747_v26  ;;  %v17940_v42 = vld [vmem:[%s19566_s7 + $0x3d4] sm:$0xf0]  ;;  %v12698_v43 = vld [vmem:[%s19566_s7 + $0x540] sm:$0xf]  ;;  %v12315_v46 = vor.u32 %v17892_v40, %v12314_v38  ;;  %v17838_v49 = vld [vmem:[%s19566_s7 + $0xa4] sm:$0xf0] }
  0x39   : > { %v17988_v44 = vld [vmem:[%s19566_s7 + $0x554] sm:$0xf0]  ;;  %9086 = vmatpush.bf16.msra.mxu0 %v12147_v30  ;;  %v12507_v47 = vor.u32 %v17940_v42, %v12506_v41  ;;  %v12290_v50 = vld [vmem:[%s19566_s7 + $0x210] sm:$0xf]  ;;  %v17886_v52 = vld [vmem:[%s19566_s7 + $0x224] sm:$0xf0]  ;;  %v12099_v57 = vor.u32 %v17838_v49, %v12098_v48 }
  0x3a   : > { %9100 = vmatpush.bf16.msra.mxu1 %v12339_v34  ;;  %v12699_v51 = vor.u32 %v17988_v44, %v12698_v43  ;;  %v12482_v53 = vld [vmem:[%s19566_s7 + $0x390] sm:$0xf]  ;;  %v17934_v54 = vld [vmem:[%s19566_s7 + $0x3a4] sm:$0xf0]  ;;  %v12291_v58 = vor.u32 %v17886_v52, %v12290_v50  ;;  %v12074_v60 = vld [vmem:[%s19566_s7 + $0x60] sm:$0xf] }
  0x3b   : > { %9114 = vmatpush.bf16.msra.mxu2 %v12531_v35  ;;  %v12674_v55 = vld [vmem:[%s19566_s7 + $0x510] sm:$0xf]  ;;  %v17982_v56 = vld [vmem:[%s19566_s7 + $0x524] sm:$0xf0]  ;;  %v12483_v59 = vor.u32 %v17934_v54, %v12482_v53  ;;  %v17832_v61 = vld [vmem:[%s19566_s7 + $0x74] sm:$0xf0] }
  0x3c   : > { %9128 = vmatpush.bf16.msra.mxu3 %v12723_v39  ;;  %v12266_v62 = vld [vmem:[%s19566_s7 + $0x1e0] sm:$0xf]  ;;  %v12675_v63 = vor.u32 %v17982_v56, %v12674_v55  ;;  %v17880_v0 = vld [vmem:[%s19566_s7 + $0x1f4] sm:$0xf0]  ;;  %v12075_v5 = vor.u32 %v17832_v61, %v12074_v60  ;;  %v12050_v8 = vld [vmem:[%s19566_s7 + $0x30] sm:$0xf] }
  0x3d   : > { %9087 = vmatpush.bf16.msra.mxu0 %v12123_v45  ;;  %v12458_v1 = vld [vmem:[%s19566_s7 + $0x360] sm:$0xf]  ;;  %v17928_v2 = vld [vmem:[%s19566_s7 + $0x374] sm:$0xf0]  ;;  %v12267_v6 = vor.u32 %v17880_v0, %v12266_v62  ;;  %v17826_v9 = vld [vmem:[%s19566_s7 + $0x44] sm:$0xf0] }
  0x3e   : > { %9101 = vmatpush.bf16.msra.mxu1 %v12315_v46  ;;  %v12650_v3 = vld [vmem:[%s19566_s7 + $0x4e0] sm:$0xf]  ;;  %v17976_v4 = vld [vmem:[%s19566_s7 + $0x4f4] sm:$0xf0]  ;;  %v12459_v7 = vor.u32 %v17928_v2, %v12458_v1  ;;  %v12242_v10 = vld [vmem:[%s19566_s7 + $0x1b0] sm:$0xf]  ;;  %v12051_v17 = vor.u32 %v17826_v9, %v12050_v8 }
  0x3f   : > { %9115 = vmatpush.bf16.msra.mxu2 %v12507_v47  ;;  %v12651_v11 = vor.u32 %v17976_v4, %v12650_v3  ;;  %v17874_v12 = vld [vmem:[%s19566_s7 + $0x1c4] sm:$0xf0]  ;;  %v12434_v13 = vld [vmem:[%s19566_s7 + $0x330] sm:$0xf]  ;;  %v12026_v18 = vld [vmem:[%s19566_s7] sm:$0xf] }
  0x40   : > { %9129 = vmatpush.bf16.msra.mxu3 %v12699_v51  ;;  %v17922_v14 = vld [vmem:[%s19566_s7 + $0x344] sm:$0xf0]  ;;  %v12626_v15 = vld [vmem:[%s19566_s7 + $0x4b0] sm:$0xf]  ;;  %v17820_v19 = vld [vmem:[%s19566_s7 + $0x14] sm:$0xf0]  ;;  %v12243_v20 = vor.u32 %v17874_v12, %v12242_v10 }
  0x41   : > { %9088 = vmatpush.bf16.msra.mxu0 %v12099_v57  ;;  %v17970_v16 = vld [vmem:[%s19566_s7 + $0x4c4] sm:$0xf0]  ;;  %v12435_v21 = vor.u32 %v17922_v14, %v12434_v13  ;;  %v12218_v22 = vld [vmem:[%s19566_s7 + $0x180] sm:$0xf]  ;;  %v17868_v23 = vld [vmem:[%s19566_s7 + $0x194] sm:$0xf0]  ;;  %v12027_v32 = vor.u32 %v17820_v19, %v12026_v18 }
  0x42   : > { %9102 = vmatpush.bf16.msra.mxu1 %v12291_v58  ;;  %v12410_v24 = vld [vmem:[%s19566_s7 + $0x300] sm:$0xf]  ;;  %v12627_v25 = vor.u32 %v17970_v16, %v12626_v15  ;;  %v17916_v26 = vld [vmem:[%s19566_s7 + $0x314] sm:$0xf0]  ;;  %v12962_v29 = vld [vmem:[%s19566_s7 + $0x750] sm:$0xf]  ;;  %v12219_v36 = vor.u32 %v17868_v23, %v12218_v22 }
  0x43   : > { %9116 = vmatpush.bf16.msra.mxu2 %v12483_v59  ;;  %v12602_v27 = vld [vmem:[%s19566_s7 + $0x480] sm:$0xf]  ;;  %v17964_v28 = vld [vmem:[%s19566_s7 + $0x494] sm:$0xf0]  ;;  %v18054_v30 = vld [vmem:[%s19566_s7 + $0x764] sm:$0xf0]  ;;  %v12411_v37 = vor.u32 %v17916_v26, %v12410_v24 }
  0x44   : > { %9130 = vmatpush.bf16.msra.mxu3 %v12675_v63  ;;  %v13154_v31 = vld [vmem:[%s19566_s7 + $0x8d0] sm:$0xf]  ;;  %v18102_v33 = vld [vmem:[%s19566_s7 + $0x8e4] sm:$0xf0]  ;;  %v12603_v40 = vor.u32 %v17964_v28, %v12602_v27  ;;  %v12963_v41 = vor.u32 %v18054_v30, %v12962_v29  ;;  %v12938_v42 = vld [vmem:[%s19566_s7 + $0x720] sm:$0xf] }
  0x45   : > { %9089 = vmatpush.bf16.msra.mxu0 %v12075_v5  ;;  %v13346_v34 = vld [vmem:[%s19566_s7 + $0xa50] sm:$0xf]  ;;  %v18150_v35 = vld [vmem:[%s19566_s7 + $0xa64] sm:$0xf0]  ;;  %v18048_v43 = vld [vmem:[%s19566_s7 + $0x734] sm:$0xf0]  ;;  %v13155_v44 = vor.u32 %v18102_v33, %v13154_v31 }
  0x46   : > { %9103 = vmatpush.bf16.msra.mxu1 %v12267_v6  ;;  %v13538_v38 = vld [vmem:[%s19566_s7 + $0xbd0] sm:$0xf]  ;;  %v18198_v39 = vld [vmem:[%s19566_s7 + $0xbe4] sm:$0xf0]  ;;  %v13347_v45 = vor.u32 %v18150_v35, %v13346_v34  ;;  %v13130_v46 = vld [vmem:[%s19566_s7 + $0x8a0] sm:$0xf]  ;;  %v12939_v56 = vor.u32 %v18048_v43, %v12938_v42 }
  0x47   : > { %9117 = vmatpush.bf16.msra.mxu2 %v12459_v7  ;;  %v18096_v47 = vld [vmem:[%s19566_s7 + $0x8b4] sm:$0xf0]  ;;  %v13322_v48 = vld [vmem:[%s19566_s7 + $0xa20] sm:$0xf]  ;;  %v13539_v49 = vor.u32 %v18198_v39, %v13538_v38  ;;  %v11906_v53 = vld [vmem:[%s19581_s13] sm:$0xf] }
  0x48   : > { %9131 = vmatpush.bf16.msra.mxu3 %v12651_v11  ;;  %v18144_v50 = vld [vmem:[%s19566_s7 + $0xa34] sm:$0xf0]  ;;  %v13514_v51 = vld [vmem:[%s19566_s7 + $0xba0] sm:$0xf]  ;;  %v17802_v54 = vld [vmem:[%s19581_s13 + $0x74] sm:$0xf0]  ;;  %v13131_v61 = vor.u32 %v18096_v47, %v13130_v46 }
  0x49   : > { %9090 = vmatpush.bf16.msra.mxu0 %v12051_v17  ;;  %v18192_v52 = vld [vmem:[%s19566_s7 + $0xbb4] sm:$0xf0]  ;;  %v12914_v57 = vld [vmem:[%s19566_s7 + $0x6f0] sm:$0xf]  ;;  %v18042_v58 = vld [vmem:[%s19566_s7 + $0x704] sm:$0xf0]  ;;  %v19669_v59 = vor.u32 %v17802_v54, %v11906_v53  ;;  %v13323_v62 = vor.u32 %v18144_v50, %v13322_v48 }
  0x4a   : > { %9104 = vmatpush.bf16.msra.mxu1 %v12243_v20  ;;  %v11914_v55 = vld [vmem:[%s19581_s13 + $0x8] sm:$0xf]  ;;  %v17803_v60 = vld [vmem:[%s19581_s13 + $0x7c] sm:$0xf0]  ;;  %v18090_v0 = vld [vmem:[%s19566_s7 + $0x884] sm:$0xf0]  ;;  %v13515_v3 = vor.u32 %v18192_v52, %v13514_v51  ;;  %v12915_v10 = vor.u32 %v18042_v58, %v12914_v57 }
  0x4b   : > { %9118 = vmatpush.bf16.msra.mxu2 %v12435_v21  ;;  %v13106_v63 = vld [vmem:[%s19566_s7 + $0x870] sm:$0xf]  ;;  %v19675_v2 = vor.u32 %v17803_v60, %v11914_v55  ;;  %v18138_v4 = vld [vmem:[%s19566_s7 + $0xa04] sm:$0xf0]  ;;  %v17787_v7 = vld [vmem:[%s19581_s13 + $0x4] sm:$0xf] }
  0x4c   : > { %9132 = vmatpush.bf16.msra.mxu3 %v12627_v25  ;;  %v13298_v1 = vld [vmem:[%s19566_s7 + $0x9f0] sm:$0xf]  ;;  %v18186_v6 = vld [vmem:[%s19566_s7 + $0xb84] sm:$0xf0]  ;;  %v11908_v8 = vld [vmem:[%s19581_s13 + $0x78] sm:$0xf0]  ;;  %v13107_v13 = vor.u32 %v18090_v0, %v13106_v63 }
  0x4d   : > { %9091 = vmatpush.bf16.msra.mxu0 %v12027_v32  ;;  %v13490_v5 = vld [vmem:[%s19566_s7 + $0xb70] sm:$0xf]  ;;  %v17788_v9 = vld [vmem:[%s19581_s13 + $0xc] sm:$0xf]  ;;  %v19685_v11 = vor.u32 %v17787_v7, %v11908_v8  ;;  %v11916_v12 = vld [vmem:[%s19581_s13 + $0x80] sm:$0xf0]  ;;  %v13299_v14 = vor.u32 %v18138_v4, %v13298_v1 }
  0x4e   : > { %9105 = vmatpush.bf16.msra.mxu1 %v12219_v36  ;;  %v12890_v15 = vld [vmem:[%s19566_s7 + $0x6c0] sm:$0xf]  ;;  %v18036_v16 = vld [vmem:[%s19566_s7 + $0x6d4] sm:$0xf0]  ;;  %v19691_v18 = vor.u32 %v17788_v9, %v11916_v12  ;;  %v13491_v19 = vor.u32 %v18186_v6, %v13490_v5  ;;  %v12866_v28 = vld [vmem:[%s19566_s7 + $0x690] sm:$0xf] }
  0x4f   : > { %9119 = vmatpush.bf16.msra.mxu2 %v12411_v37  ;;  %v13082_v17 = vld [vmem:[%s19566_s7 + $0x840] sm:$0xf]  ;;  %v18084_v20 = vld [vmem:[%s19566_s7 + $0x854] sm:$0xf0]  ;;  %v12891_v25 = vor.u32 %v18036_v16, %v12890_v15  ;;  %v18030_v29 = vld [vmem:[%s19566_s7 + $0x6a4] sm:$0xf0] }
  0x50   : > { %9133 = vmatpush.bf16.msra.mxu3 %v12603_v40  ;;  %9092 = vmatmul.bf16.vlgmr.msra.gmra.mxu0 %v19669_v59  ;;  %v13274_v21 = vld [vmem:[%s19566_s7 + $0x9c0] sm:$0xf]  ;;  %v18132_v22 = vld [vmem:[%s19566_s7 + $0x9d4] sm:$0xf0]  ;;  %v13083_v26 = vor.u32 %v18084_v20, %v13082_v17  ;;  %v13058_v30 = vld [vmem:[%s19566_s7 + $0x810] sm:$0xf]  ;;  %v12867_v37 = vor.u32 %v18030_v29, %v12866_v28 }
  0x51   : > { %9140 = vmatpush.bf16.msrb.mxu0 %v12963_v41  ;;  %9106 = vmatmul.bf16.vlgmr.msra.gmra.mxu1 %v19685_v11  ;;  %v13466_v23 = vld [vmem:[%s19566_s7 + $0xb40] sm:$0xf]  ;;  %v18180_v24 = vld [vmem:[%s19566_s7 + $0xb54] sm:$0xf0]  ;;  %v13275_v27 = vor.u32 %v18132_v22, %v13274_v21  ;;  %v18078_v32 = vld [vmem:[%s19566_s7 + $0x824] sm:$0xf0] }
  0x52   : > { %9154 = vmatpush.bf16.msrb.mxu1 %v13155_v44  ;;  %9120 = vmatmul.bf16.vlgmr.msra.gmra.mxu2 %v19675_v2  ;;  %v13467_v31 = vor.u32 %v18180_v24, %v13466_v23  ;;  %v13250_v33 = vld [vmem:[%s19566_s7 + $0x990] sm:$0xf]  ;;  %v18126_v34 = vld [vmem:[%s19566_s7 + $0x9a4] sm:$0xf0]  ;;  %v13059_v38 = vor.u32 %v18078_v32, %v13058_v30  ;;  %v12842_v40 = vld [vmem:[%s19566_s7 + $0x660] sm:$0xf] }
  0x53   : > { %9168 = vmatpush.bf16.msrb.mxu2 %v13347_v45  ;;  %9134 = vmatmul.bf16.vlgmr.msra.gmra.mxu3 %v19691_v18  ;;  %v13442_v35 = vld [vmem:[%s19566_s7 + $0xb10] sm:$0xf]  ;;  %v18174_v36 = vld [vmem:[%s19566_s7 + $0xb24] sm:$0xf0]  ;;  %v13251_v39 = vor.u32 %v18126_v34, %v13250_v33  ;;  %v18024_v41 = vld [vmem:[%s19566_s7 + $0x674] sm:$0xf0] }
  0x54   : > { %9182 = vmatpush.bf16.msrb.mxu3 %v13539_v49  ;;  %v13034_v42 = vld [vmem:[%s19566_s7 + $0x7e0] sm:$0xf]  ;;  %v13443_v43 = vor.u32 %v18174_v36, %v13442_v35  ;;  %v18072_v44 = vld [vmem:[%s19566_s7 + $0x7f4] sm:$0xf0]  ;;  %v12843_v49 = vor.u32 %v18024_v41, %v12842_v40  ;;  %v12818_v50 = vld [vmem:[%s19566_s7 + $0x630] sm:$0xf] }
  0x55   : > { %9141 = vmatpush.bf16.msrb.mxu0 %v12939_v56  ;;  %v13226_v45 = vld [vmem:[%s19566_s7 + $0x960] sm:$0xf]  ;;  %v18120_v46 = vld [vmem:[%s19566_s7 + $0x974] sm:$0xf0]  ;;  %v13035_v51 = vor.u32 %v18072_v44, %v13034_v42  ;;  %v18018_v53 = vld [vmem:[%s19566_s7 + $0x644] sm:$0xf0] }
  0x56   : > { %9155 = vmatpush.bf16.msrb.mxu1 %v13131_v61  ;;  %v13418_v47 = vld [vmem:[%s19566_s7 + $0xae0] sm:$0xf]  ;;  %v18168_v48 = vld [vmem:[%s19566_s7 + $0xaf4] sm:$0xf0]  ;;  %v13227_v52 = vor.u32 %v18120_v46, %v13226_v45  ;;  %v13010_v54 = vld [vmem:[%s19566_s7 + $0x7b0] sm:$0xf]  ;;  %v12819_v0 = vor.u32 %v18018_v53, %v12818_v50 }
  0x57   : > { %9169 = vmatpush.bf16.msrb.mxu2 %v13323_v62  ;;  %v18066_v55 = vld [vmem:[%s19566_s7 + $0x7c4] sm:$0xf0]  ;;  %v13419_v56 = vor.u32 %v18168_v48, %v13418_v47  ;;  %v13202_v57 = vld [vmem:[%s19566_s7 + $0x930] sm:$0xf]  ;;  %v12794_v62 = vld [vmem:[%s19566_s7 + $0x600] sm:$0xf] }
  0x58   : > { %9183 = vmatpush.bf16.msrb.mxu3 %v13515_v3  ;;  %v18114_v58 = vld [vmem:[%s19566_s7 + $0x944] sm:$0xf0]  ;;  %v13394_v60 = vld [vmem:[%s19566_s7 + $0xab0] sm:$0xf]  ;;  %v18012_v63 = vld [vmem:[%s19566_s7 + $0x614] sm:$0xf0]  ;;  %v13011_v6 = vor.u32 %v18066_v55, %v13010_v54 }
  0x59   : > { %9142 = vmatpush.bf16.msrb.mxu0 %v12915_v10  ;;  %v18162_v61 = vld [vmem:[%s19566_s7 + $0xac4] sm:$0xf0]  ;;  %v12986_v1 = vld [vmem:[%s19566_s7 + $0x780] sm:$0xf]  ;;  %v18060_v3 = vld [vmem:[%s19566_s7 + $0x794] sm:$0xf0]  ;;  %v13203_v7 = vor.u32 %v18114_v58, %v13202_v57  ;;  %v12795_v20 = vor.u32 %v18012_v63, %v12794_v62 }
  0x5a   : > { %9156 = vmatpush.bf16.msrb.mxu1 %v13107_v13  ;;  %v13178_v4 = vld [vmem:[%s19566_s7 + $0x900] sm:$0xf]  ;;  %v18108_v5 = vld [vmem:[%s19566_s7 + $0x914] sm:$0xf0]  ;;  %v13730_v10 = vld [vmem:[%s19566_s7 + $0xd50] sm:$0xf]  ;;  %v13395_v12 = vor.u32 %v18162_v61, %v13394_v60  ;;  %v12987_v24 = vor.u32 %v18060_v3, %v12986_v1 }
  0x5b   : > { %9170 = vmatpush.bf16.msrb.mxu2 %v13299_v14  ;;  %v13370_v8 = vld [vmem:[%s19566_s7 + $0xa80] sm:$0xf]  ;;  %v18156_v9 = vld [vmem:[%s19566_s7 + $0xa94] sm:$0xf0]  ;;  %v18246_v13 = vld [vmem:[%s19566_s7 + $0xd64] sm:$0xf0] }
  0x5c   : > { %9184 = vmatpush.bf16.msrb.mxu3 %v13491_v19  ;;  %v13922_v14 = vld [vmem:[%s19566_s7 + $0xed0] sm:$0xf]  ;;  %v18294_v15 = vld [vmem:[%s19566_s7 + $0xee4] sm:$0xf0]  ;;  %v11922_v22 = vld [vmem:[%s19581_s13 + $0x10] sm:$0xf]  ;;  %v13371_v29 = vor.u32 %v18156_v9, %v13370_v8  ;;  %v13731_v30 = vor.u32 %v18246_v13, %v13730_v10 }
  0x5d   : > { %9143 = vmatpush.bf16.msrb.mxu0 %v12891_v25  ;;  %v14114_v16 = vld [vmem:[%s19566_s7 + $0x1050] sm:$0xf]  ;;  %v18342_v17 = vld [vmem:[%s19566_s7 + $0x1064] sm:$0xf0]  ;;  %v17804_v23 = vld [vmem:[%s19581_s13 + $0x84] sm:$0xf0]  ;;  %v13179_v25 = vor.u32 %v18108_v5, %v13178_v4  ;;  %v13923_v34 = vor.u32 %v18294_v15, %v13922_v14 }
  0x5e   : > { %9157 = vmatpush.bf16.msrb.mxu1 %v13083_v26  ;;  %v14306_v19 = vld [vmem:[%s19566_s7 + $0x11d0] sm:$0xf]  ;;  %v18390_v21 = vld [vmem:[%s19566_s7 + $0x11e4] sm:$0xf0]  ;;  %v17789_v28 = vld [vmem:[%s19581_s13 + $0x14] sm:$0xf]  ;;  %v14115_v35 = vor.u32 %v18342_v17, %v14114_v16  ;;  %v19751_v40 = vor.u32 %v17804_v23, %v11922_v22 }
  0x5f   : > { %9171 = vmatpush.bf16.msrb.mxu2 %v13275_v27  ;;  %v11930_v26 = vld [vmem:[%s19581_s13 + $0x18] sm:$0xf]  ;;  %v17805_v27 = vld [vmem:[%s19581_s13 + $0x8c] sm:$0xf0]  ;;  %v17790_v32 = vld [vmem:[%s19581_s13 + $0x1c] sm:$0xf] }
  0x60   : > { %9185 = vmatpush.bf16.msrb.mxu3 %v13467_v31  ;;  %v11924_v31 = vld [vmem:[%s19581_s13 + $0x88] sm:$0xf0]  ;;  %v11932_v33 = vld [vmem:[%s19581_s13 + $0x90] sm:$0xf0]  ;;  %v13706_v36 = vld [vmem:[%s19566_s7 + $0xd20] sm:$0xf]  ;;  %v19756_v44 = vor.u32 %v17805_v27, %v11930_v26 }
  0x61   : > { %9144 = vmatpush.bf16.msrb.mxu0 %v12867_v37  ;;  %v18240_v37 = vld [vmem:[%s19566_s7 + $0xd34] sm:$0xf0]  ;;  %v14090_v42 = vld [vmem:[%s19566_s7 + $0x1020] sm:$0xf]  ;;  %v19758_v45 = vor.u32 %v17789_v28, %v11924_v31  ;;  %v19762_v48 = vor.u32 %v17790_v32, %v11932_v33  ;;  %v18234_v53 = vld [vmem:[%s19566_s7 + $0xd04] sm:$0xf0] }
  0x62   : > { %9158 = vmatpush.bf16.msrb.mxu1 %v13059_v38  ;;  %v13898_v38 = vld [vmem:[%s19566_s7 + $0xea0] sm:$0xf]  ;;  %v18288_v41 = vld [vmem:[%s19566_s7 + $0xeb4] sm:$0xf0]  ;;  %v13874_v54 = vld [vmem:[%s19566_s7 + $0xe70] sm:$0xf] }
  0x63   : > { %9172 = vmatpush.bf16.msrb.mxu2 %v13251_v39  ;;  %v14307_v39 = vor.u32 %v18390_v21, %v14306_v19  ;;  %v14282_v46 = vld [vmem:[%s19566_s7 + $0x11a0] sm:$0xf]  ;;  %v18384_v47 = vld [vmem:[%s19566_s7 + $0x11b4] sm:$0xf0]  ;;  %v13899_v50 = vor.u32 %v18288_v41, %v13898_v38  ;;  %v14066_v57 = vld [vmem:[%s19566_s7 + $0xff0] sm:$0xf] }
  0x64   : > { %9186 = vmatpush.bf16.msrb.mxu3 %v13443_v43  ;;  %v18336_v43 = vld [vmem:[%s19566_s7 + $0x1034] sm:$0xf0]  ;;  %v14283_v55 = vor.u32 %v18384_v47, %v14282_v46  ;;  %v18330_v58 = vld [vmem:[%s19566_s7 + $0x1004] sm:$0xf0]  ;;  %v14258_v60 = vld [vmem:[%s19566_s7 + $0x1170] sm:$0xf] }
  0x65   : > { %9145 = vmatpush.bf16.msrb.mxu0 %v12843_v49  ;;  %v13707_v49 = vor.u32 %v18240_v37, %v13706_v36  ;;  %v18378_v61 = vld [vmem:[%s19566_s7 + $0x1184] sm:$0xf0]  ;;  %v13658_v1 = vld [vmem:[%s19566_s7 + $0xcc0] sm:$0xf]  ;;  %v18228_v3 = vld [vmem:[%s19566_s7 + $0xcd4] sm:$0xf0] }
  0x66   : > { %9159 = vmatpush.bf16.msrb.mxu1 %v13035_v51  ;;  %v14091_v51 = vor.u32 %v18336_v43, %v14090_v42  ;;  %v13850_v4 = vld [vmem:[%s19566_s7 + $0xe40] sm:$0xf]  ;;  %v14259_v5 = vor.u32 %v18378_v61, %v14258_v60  ;;  %v18324_v8 = vld [vmem:[%s19566_s7 + $0xfd4] sm:$0xf0]  ;;  %v13634_v15 = vld [vmem:[%s19566_s7 + $0xc90] sm:$0xf] }
  0x67   : > { %9173 = vmatpush.bf16.msrb.mxu2 %v13227_v52  ;;  %v13682_v52 = vld [vmem:[%s19566_s7 + $0xcf0] sm:$0xf]  ;;  %v14234_v9 = vld [vmem:[%s19566_s7 + $0x1140] sm:$0xf]  ;;  %v18372_v10 = vld [vmem:[%s19566_s7 + $0x1154] sm:$0xf0] }
  0x68   : > { %9187 = vmatpush.bf16.msrb.mxu3 %v13419_v56  ;;  %v18282_v56 = vld [vmem:[%s19566_s7 + $0xe84] sm:$0xf0]  ;;  %v13683_v62 = vor.u32 %v18234_v53, %v13682_v52  ;;  %v13826_v17 = vld [vmem:[%s19566_s7 + $0xe10] sm:$0xf]  ;;  %v14235_v19 = vor.u32 %v18372_v10, %v14234_v9  ;;  %v13610_v28 = vld [vmem:[%s19566_s7 + $0xc60] sm:$0xf] }
  0x69   : > { %9146 = vmatpush.bf16.msrb.mxu0 %v12819_v0  ;;  %v13875_v63 = vor.u32 %v18282_v56, %v13874_v54  ;;  %v14067_v0 = vor.u32 %v18330_v58, %v14066_v57  ;;  %v18222_v16 = vld [vmem:[%s19566_s7 + $0xca4] sm:$0xf0]  ;;  %v14018_v21 = vld [vmem:[%s19566_s7 + $0xf90] sm:$0xf]  ;;  %v18264_v32 = vld [vmem:[%s19566_s7 + $0xdf4] sm:$0xf0] }
  0x6a   : > { %9160 = vmatpush.bf16.msrb.mxu1 %v13011_v6  ;;  %v18276_v6 = vld [vmem:[%s19566_s7 + $0xe54] sm:$0xf0]  ;;  %v18318_v22 = vld [vmem:[%s19566_s7 + $0xfa4] sm:$0xf0]  ;;  %v14210_v23 = vld [vmem:[%s19566_s7 + $0x1110] sm:$0xf] }
  0x6b   : > { %9174 = vmatpush.bf16.msrb.mxu2 %v13203_v7  ;;  %v14042_v7 = vld [vmem:[%s19566_s7 + $0xfc0] sm:$0xf]  ;;  %v13851_v13 = vor.u32 %v18276_v6, %v13850_v4  ;;  %v14019_v27 = vor.u32 %v18318_v22, %v14018_v21  ;;  %v18360_v36 = vld [vmem:[%s19566_s7 + $0x10f4] sm:$0xf0]  ;;  %v13586_v38 = vld [vmem:[%s19566_s7 + $0xc30] sm:$0xf] }
  0x6c   : > { %9188 = vmatpush.bf16.msrb.mxu3 %v13395_v12  ;;  %v13659_v12 = vor.u32 %v18228_v3, %v13658_v1  ;;  %v14043_v14 = vor.u32 %v18324_v8, %v14042_v7  ;;  %v13994_v33 = vld [vmem:[%s19566_s7 + $0xf60] sm:$0xf]  ;;  %v18210_v42 = vld [vmem:[%s19566_s7 + $0xc44] sm:$0xf0]  ;;  %v13778_v43 = vld [vmem:[%s19566_s7 + $0xdb0] sm:$0xf] }
  0x6d   : > { %9147 = vmatpush.bf16.msrb.mxu0 %v12795_v20  ;;  %v18270_v20 = vld [vmem:[%s19566_s7 + $0xe24] sm:$0xf0]  ;;  %v13562_v53 = vld [vmem:[%s19566_s7 + $0xc00] sm:$0xf]  ;;  %v18204_v54 = vld [vmem:[%s19566_s7 + $0xc14] sm:$0xf0] }
  0x6e   : > { %9161 = vmatpush.bf16.msrb.mxu1 %v12987_v24  ;;  %v18366_v24 = vld [vmem:[%s19566_s7 + $0x1124] sm:$0xf0]  ;;  %v13827_v26 = vor.u32 %v18270_v20, %v13826_v17  ;;  %v13754_v56 = vld [vmem:[%s19566_s7 + $0xd80] sm:$0xf]  ;;  %v18252_v57 = vld [vmem:[%s19566_s7 + $0xd94] sm:$0xf0]  ;;  %v13563_v10 = vor.u32 %v18204_v54, %v13562_v53 }
  0x6f   : > { %9175 = vmatpush.bf16.msrb.mxu2 %v13179_v25  ;;  %v13635_v25 = vor.u32 %v18222_v16, %v13634_v15  ;;  %v14211_v31 = vor.u32 %v18366_v24, %v14210_v23  ;;  %v18258_v46 = vld [vmem:[%s19566_s7 + $0xdc4] sm:$0xf0]  ;;  %v13946_v58 = vld [vmem:[%s19566_s7 + $0xf00] sm:$0xf]  ;;  %v18300_v60 = vld [vmem:[%s19566_s7 + $0xf14] sm:$0xf0]  ;;  %v13755_v15 = vor.u32 %v18252_v57, %v13754_v56 }
  0x70   : > { %9189 = vmatpush.bf16.msrb.mxu3 %v13371_v29  ;;  %9148 = vmatmul.bf16.vlgmr.msrb.gmra.mxu0 %v19751_v40  ;;  %v18216_v29 = vld [vmem:[%s19566_s7 + $0xc74] sm:$0xf0]  ;;  %v18354_v52 = vld [vmem:[%s19566_s7 + $0x10c4] sm:$0xf0]  ;;  %v13779_v61 = vor.u32 %v18258_v46, %v13778_v43  ;;  %v14498_v1 = vld [vmem:[%s19566_s7 + $0x1350] sm:$0xf]  ;;  %v13947_v16 = vor.u32 %v18300_v60, %v13946_v58 }
  0x71   : > { %9196 = vmatpush.bf16.msra.mxu0 %v13731_v30  ;;  %9162 = vmatmul.bf16.vlgmr.msrb.gmra.mxu1 %v19758_v45  ;;  %v13802_v30 = vld [vmem:[%s19566_s7 + $0xde0] sm:$0xf]  ;;  %v13611_v37 = vor.u32 %v18216_v29, %v13610_v28  ;;  %v18438_v4 = vld [vmem:[%s19566_s7 + $0x1364] sm:$0xf0]  ;;  %v14882_v7 = vld [vmem:[%s19566_s7 + $0x1650] sm:$0xf] }
  0x72   : > { %9210 = vmatpush.bf16.msra.mxu1 %v13923_v34  ;;  %9176 = vmatmul.bf16.vlgmr.msrb.gmra.mxu2 %v19756_v44  ;;  %v18312_v34 = vld [vmem:[%s19566_s7 + $0xf74] sm:$0xf0]  ;;  %v18486_v6 = vld [vmem:[%s19566_s7 + $0x14e4] sm:$0xf0]  ;;  %v15074_v9 = vld [vmem:[%s19566_s7 + $0x17d0] sm:$0xf]  ;;  %v14499_v22 = vor.u32 %v18438_v4, %v14498_v1 }
  0x73   : > { %9224 = vmatpush.bf16.msra.mxu2 %v14115_v35  ;;  %9190 = vmatmul.bf16.vlgmr.msrb.gmra.mxu3 %v19762_v48  ;;  %v14186_v35 = vld [vmem:[%s19566_s7 + $0x10e0] sm:$0xf]  ;;  %v13995_v41 = vor.u32 %v18312_v34, %v13994_v33  ;;  %v18534_v8 = vld [vmem:[%s19566_s7 + $0x1664] sm:$0xf0]  ;;  %v11946_v17 = vld [vmem:[%s19581_s13 + $0x28] sm:$0xf] }
  0x74   : > { %9238 = vmatpush.bf16.msra.mxu3 %v14307_v39  ;;  %v13803_v39 = vor.u32 %v18264_v32, %v13802_v30  ;;  %v14187_v47 = vor.u32 %v18360_v36, %v14186_v35  ;;  %v17791_v20 = vld [vmem:[%s19581_s13 + $0x24] sm:$0xf]  ;;  %v11940_v23 = vld [vmem:[%s19581_s13 + $0x98] sm:$0xf0]  ;;  %v17792_v24 = vld [vmem:[%s19581_s13 + $0x2c] sm:$0xf] }
  0x75   : > { %9197 = vmatpush.bf16.msra.mxu0 %v13707_v49  ;;  %v13970_v49 = vld [vmem:[%s19566_s7 + $0xf30] sm:$0xf]  ;;  %v14474_v28 = vld [vmem:[%s19566_s7 + $0x1320] sm:$0xf]  ;;  %v18432_v29 = vld [vmem:[%s19566_s7 + $0x1334] sm:$0xf0] }
  0x76   : > { %9211 = vmatpush.bf16.msra.mxu1 %v13899_v50  ;;  %v18306_v50 = vld [vmem:[%s19566_s7 + $0xf44] sm:$0xf0]  ;;  %v14666_v30 = vld [vmem:[%s19566_s7 + $0x14a0] sm:$0xf]  ;;  %v18480_v33 = vld [vmem:[%s19566_s7 + $0x14b4] sm:$0xf0] }
  0x77   : > { %9225 = vmatpush.bf16.msra.mxu2 %v14091_v51  ;;  %v14162_v51 = vld [vmem:[%s19566_s7 + $0x10b0] sm:$0xf]  ;;  %v14858_v34 = vld [vmem:[%s19566_s7 + $0x1620] sm:$0xf]  ;;  %v18528_v35 = vld [vmem:[%s19566_s7 + $0x1634] sm:$0xf0]  ;;  %v14667_v43 = vor.u32 %v18480_v33, %v14666_v30 }
  0x78   : > { %9239 = vmatpush.bf16.msra.mxu3 %v14283_v55  ;;  %v13587_v55 = vor.u32 %v18210_v42, %v13586_v38  ;;  %v14163_v3 = vor.u32 %v18354_v52, %v14162_v51  ;;  %v15050_v38 = vld [vmem:[%s19566_s7 + $0x17a0] sm:$0xf]  ;;  %v14475_v42 = vor.u32 %v18432_v29, %v14474_v28  ;;  %v14859_v46 = vor.u32 %v18528_v35, %v14858_v34  ;;  %v18474_v52 = vld [vmem:[%s19566_s7 + $0x1484] sm:$0xf0]  ;;  %v14834_v53 = vld [vmem:[%s19566_s7 + $0x15f0] sm:$0xf] }
  0x79   : > { %9198 = vmatpush.bf16.msra.mxu0 %v13683_v62  ;;  %v13971_v62 = vor.u32 %v18306_v50, %v13970_v49  ;;  %v18426_v49 = vld [vmem:[%s19566_s7 + $0x1304] sm:$0xf0]  ;;  %v14642_v50 = vld [vmem:[%s19566_s7 + $0x1470] sm:$0xf]  ;;  %v18468_v1 = vld [vmem:[%s19566_s7 + $0x1454] sm:$0xf0] }
  0x7a   : > { %9212 = vmatpush.bf16.msra.mxu1 %v13875_v63  ;;  %v14138_v63 = vld [vmem:[%s19566_s7 + $0x1080] sm:$0xf]  ;;  %v18522_v54 = vld [vmem:[%s19566_s7 + $0x1604] sm:$0xf0]  ;;  %v14643_v58 = vor.u32 %v18474_v52, %v14642_v50  ;;  %v18516_v4 = vld [vmem:[%s19566_s7 + $0x15d4] sm:$0xf0] }
  0x7b   : > { %9226 = vmatpush.bf16.msra.mxu2 %v14067_v0  ;;  %v18348_v0 = vld [vmem:[%s19566_s7 + $0x1094] sm:$0xf0]  ;;  %v18570_v56 = vld [vmem:[%s19566_s7 + $0x1784] sm:$0xf0]  ;;  %v14835_v60 = vor.u32 %v18522_v54, %v14834_v53  ;;  %v14762_v29 = vld [vmem:[%s19566_s7 + $0x1560] sm:$0xf] }
  0x7c   : > { %9240 = vmatpush.bf16.msra.mxu3 %v14259_v5  ;;  %v14690_v5 = vld [vmem:[%s19566_s7 + $0x14d0] sm:$0xf]  ;;  %v14139_v21 = vor.u32 %v18348_v0, %v14138_v63  ;;  %v14618_v63 = vld [vmem:[%s19566_s7 + $0x1440] sm:$0xf]  ;;  %v18456_v28 = vld [vmem:[%s19566_s7 + $0x13f4] sm:$0xf0] }
  0x7d   : > { %9199 = vmatpush.bf16.msra.mxu0 %v13659_v12  ;;  %v18582_v12 = vld [vmem:[%s19566_s7 + $0x17e4] sm:$0xf0]  ;;  %v18504_v30 = vld [vmem:[%s19566_s7 + $0x1574] sm:$0xf0]  ;;  %v14354_v35 = vld [vmem:[%s19566_s7 + $0x1230] sm:$0xf] }
  0x7e   : > { %9213 = vmatpush.bf16.msra.mxu1 %v13851_v13  ;;  %v11938_v13 = vld [vmem:[%s19581_s13 + $0x20] sm:$0xf]  ;;  %v18552_v33 = vld [vmem:[%s19566_s7 + $0x16f4] sm:$0xf0]  ;;  %v18498_v50 = vld [vmem:[%s19566_s7 + $0x1544] sm:$0xf0] }
  0x7f   : > { %9227 = vmatpush.bf16.msra.mxu2 %v14043_v14  ;;  %v17806_v14 = vld [vmem:[%s19581_s13 + $0x94] sm:$0xf0]  ;;  %v14330_v53 = vld [vmem:[%s19566_s7 + $0x1200] sm:$0xf]  ;;  %v18396_v54 = vld [vmem:[%s19566_s7 + $0x1214] sm:$0xf0] }
  0x80   : > { %9241 = vmatpush.bf16.msra.mxu3 %v14235_v19  ;;  %v17807_v19 = vld [vmem:[%s19581_s13 + $0x9c] sm:$0xf0]  ;;  %v19835_v32 = vor.u32 %v17806_v14, %v11938_v13  ;;  %v18546_v52 = vld [vmem:[%s19566_s7 + $0x16c4] sm:$0xf0]  ;;  %s11622_s19 = smul.u32 384, %s19451_s18  ;;  %p17784_p2 = scmp.ne.s32.totalorder %s19451_s18, 4 }
  0x81   : > { %9200 = vmatpush.bf16.msra.mxu0 %v13635_v25  ;;  %v11948_v25 = vld [vmem:[%s19581_s13 + $0xa0] sm:$0xf0]  ;;  %v19840_v36 = vor.u32 %v17807_v19, %v11946_v17  ;;  %v14594_v13 = vld [vmem:[%s19566_s7 + $0x1410] sm:$0xf]  ;;  %v18510_v17 = vld [vmem:[%s19566_s7 + $0x15a4] sm:$0xf0] }
  0x82   : > { %9214 = vmatpush.bf16.msra.mxu1 %v13827_v26  ;;  %v14691_v26 = vor.u32 %v18486_v6, %v14690_v5  ;;  %v15002_v5 = vld [vmem:[%s19566_s7 + $0x1740] sm:$0xf]  ;;  %v18564_v6 = vld [vmem:[%s19566_s7 + $0x1754] sm:$0xf0]  ;;  %v14978_v19 = vld [vmem:[%s19566_s7 + $0x1710] sm:$0xf]  ;;  %s23293_s15 = scalar_lea.vmem %s23531_s2, %s11622_s19 }
  0x83   : > { %9228 = vmatpush.bf16.msra.mxu2 %v14019_v27  ;;  %v14883_v27 = vor.u32 %v18534_v8, %v14882_v7  ;;  %v14619_v8 = vor.u32 %v18468_v1, %v14618_v63  ;;  %v15003_v14 = vor.u32 %v18564_v6, %v15002_v5  ;;  %v14906_v63 = vld [vmem:[%s19566_s7 + $0x1680] sm:$0xf]  ;;  %v15266_v1 = vld [vmem:[%s19566_s7 + $0x1950] sm:$0xf]  ;;  %v18678_v6 = vld [vmem:[%s19566_s7 + $0x1ae4] sm:$0xf0] }
  0x84   : > { %9242 = vmatpush.bf16.msra.mxu3 %v14211_v31  ;;  %v15075_v31 = vor.u32 %v18582_v12, %v15074_v9  ;;  %v18414_v12 = vld [vmem:[%s19566_s7 + $0x12a4] sm:$0xf0]  ;;  %v15458_v5 = vld [vmem:[%s19566_s7 + $0x1ad0] sm:$0xf] }
  0x85   : > { %9201 = vmatpush.bf16.msra.mxu0 %v13611_v37  ;;  %v19842_v37 = vor.u32 %v17791_v20, %v11940_v23  ;;  %v18558_v20 = vld [vmem:[%s19566_s7 + $0x1724] sm:$0xf0] }
  0x86   : > { %9215 = vmatpush.bf16.msra.mxu1 %v13803_v39  ;;  %v18576_v39 = vld [vmem:[%s19566_s7 + $0x17b4] sm:$0xf0] }
  0x87   : > { %9229 = vmatpush.bf16.msra.mxu2 %v13995_v41  ;;  %v19846_v41 = vor.u32 %v17792_v24, %v11948_v25  ;;  %v15051_v51 = vor.u32 %v18576_v39, %v15050_v38  ;;  %v14378_v24 = vld [vmem:[%s19566_s7 + $0x1260] sm:$0xf]  ;;  %v18408_v25 = vld [vmem:[%s19566_s7 + $0x1274] sm:$0xf0]  ;;  %v14763_v39 = vor.u32 %v18504_v30, %v14762_v29 }
  0x88   : > { %9243 = vmatpush.bf16.msra.mxu3 %v14187_v47  ;;  %v14450_v47 = vld [vmem:[%s19566_s7 + $0x12f0] sm:$0xf]  ;;  %v14379_v34 = vor.u32 %v18408_v25, %v14378_v24  ;;  %v17794_v24 = vld [vmem:[%s19581_s13 + $0x3c] sm:$0xf]  ;;  %v11964_v25 = vld [vmem:[%s19581_s13 + $0xb0] sm:$0xf0] }
  0x89   : > { %9202 = vmatpush.bf16.msra.mxu0 %v13587_v55  ;;  %v15026_v55 = vld [vmem:[%s19566_s7 + $0x1770] sm:$0xf]  ;;  %v14451_v57 = vor.u32 %v18426_v49, %v14450_v47  ;;  %v18624_v29 = vld [vmem:[%s19566_s7 + $0x1934] sm:$0xf0]  ;;  %v15434_v30 = vld [vmem:[%s19566_s7 + $0x1aa0] sm:$0xf] }
  0x8a   : > { %9216 = vmatpush.bf16.msra.mxu1 %v13779_v61  ;;  %v14426_v61 = vld [vmem:[%s19566_s7 + $0x12c0] sm:$0xf]  ;;  %v15027_v0 = vor.u32 %v18570_v56, %v15026_v55  ;;  %v14738_v49 = vld [vmem:[%s19566_s7 + $0x1530] sm:$0xf] }
  0x8b   : > { %9230 = vmatpush.bf16.msra.mxu2 %v13971_v62  ;;  %v18420_v62 = vld [vmem:[%s19566_s7 + $0x12d4] sm:$0xf0]  ;;  %v14522_v56 = vld [vmem:[%s19566_s7 + $0x1380] sm:$0xf] }
  0x8c   : > { %9244 = vmatpush.bf16.msra.mxu3 %v14163_v3  ;;  %v14810_v3 = vld [vmem:[%s19566_s7 + $0x15c0] sm:$0xf]  ;;  %v14427_v7 = vor.u32 %v18420_v62, %v14426_v61  ;;  %v14739_v62 = vor.u32 %v18498_v50, %v14738_v49 }
  0x8d   : > { %9203 = vmatpush.bf16.msra.mxu0 %v13563_v10  ;;  %v14811_v9 = vor.u32 %v18516_v4, %v14810_v3  ;;  %v14402_v10 = vld [vmem:[%s19566_s7 + $0x1290] sm:$0xf]  ;;  %v18630_v4 = vld [vmem:[%s19566_s7 + $0x1964] sm:$0xf0] }
  0x8e   : > { %9217 = vmatpush.bf16.msra.mxu1 %v13755_v15  ;;  %v18462_v15 = vld [vmem:[%s19566_s7 + $0x1424] sm:$0xf0] }
  0x8f   : > { %9231 = vmatpush.bf16.msra.mxu2 %v13947_v16  ;;  %v14786_v16 = vld [vmem:[%s19566_s7 + $0x1590] sm:$0xf] }
  0x90   : > { %9245 = vmatpush.bf16.msra.mxu3 %v14139_v21  ;;  %9204 = vmatmul.bf16.vlgmr.msra.gmra.mxu0 %v19835_v32  ;;  %v14403_v21 = vor.u32 %v18414_v12, %v14402_v10  ;;  %v14787_v23 = vor.u32 %v18510_v17, %v14786_v16  ;;  %v14331_v10 = vor.u32 %v18396_v54, %v14330_v53  ;;  %v18774_v12 = vld [vmem:[%s19566_s7 + $0x1de4] sm:$0xf0]  ;;  %v15410_v54 = vld [vmem:[%s19566_s7 + $0x1a70] sm:$0xf] }
  0x91   : > { %9252 = vmatpush.bf16.msrb.mxu0 %v14499_v22  ;;  %9218 = vmatmul.bf16.vlgmr.msra.gmra.mxu1 %v19842_v37  ;;  %v14595_v22 = vor.u32 %v18462_v15, %v14594_v13  ;;  %v11954_v13 = vld [vmem:[%s19581_s13 + $0x30] sm:$0xf]  ;;  %v11962_v17 = vld [vmem:[%s19581_s13 + $0x38] sm:$0xf] }
  0x92   : > { %9266 = vmatpush.bf16.msrb.mxu1 %v14691_v26  ;;  %9232 = vmatmul.bf16.vlgmr.msra.gmra.mxu2 %v19840_v36  ;;  %v14570_v26 = vld [vmem:[%s19566_s7 + $0x13e0] sm:$0xf]  ;;  %v18618_v53 = vld [vmem:[%s19566_s7 + $0x1904] sm:$0xf0] }
  0x93   : > { %9280 = vmatpush.bf16.msrb.mxu2 %v14883_v27  ;;  %9246 = vmatmul.bf16.vlgmr.msra.gmra.mxu3 %v19846_v41  ;;  %v14979_v27 = vor.u32 %v18558_v20, %v14978_v19  ;;  %v14571_v38 = vor.u32 %v18456_v28, %v14570_v26  ;;  %v17809_v19 = vld [vmem:[%s19581_s13 + $0xac] sm:$0xf0]  ;;  %v17793_v20 = vld [vmem:[%s19581_s13 + $0x34] sm:$0xf]  ;;  %v15459_v26 = vor.u32 %v18678_v6, %v15458_v5  ;;  %v18660_v6 = vld [vmem:[%s19566_s7 + $0x1a54] sm:$0xf0] }
  0x94   : > { %9294 = vmatpush.bf16.msrb.mxu3 %v15075_v31  ;;  %v14954_v31 = vld [vmem:[%s19566_s7 + $0x16e0] sm:$0xf] }
  0x95   : > { %9253 = vmatpush.bf16.msrb.mxu0 %v14475_v42  ;;  %v18402_v42 = vld [vmem:[%s19566_s7 + $0x1244] sm:$0xf0]  ;;  %v14955_v47 = vor.u32 %v18552_v33, %v14954_v31  ;;  %v15242_v28 = vld [vmem:[%s19566_s7 + $0x1920] sm:$0xf] }
  0x96   : > { %9267 = vmatpush.bf16.msrb.mxu1 %v14667_v43  ;;  %v14546_v43 = vld [vmem:[%s19566_s7 + $0x13b0] sm:$0xf]  ;;  %v14355_v55 = vor.u32 %v18402_v42, %v14354_v35  ;;  %v15626_v35 = vld [vmem:[%s19566_s7 + $0x1c20] sm:$0xf]  ;;  %v15243_v49 = vor.u32 %v18624_v29, %v15242_v28  ;;  %v18600_v29 = vld [vmem:[%s19566_s7 + $0x1874] sm:$0xf0] }
  0x97   : > { %9281 = vmatpush.bf16.msrb.mxu2 %v14859_v46  ;;  %v18450_v46 = vld [vmem:[%s19566_s7 + $0x13c4] sm:$0xf0]  ;;  %v15146_v28 = vld [vmem:[%s19566_s7 + $0x1860] sm:$0xf] }
  0x98   : > { %9295 = vmatpush.bf16.msrb.mxu3 %v15051_v51  ;;  %v14930_v51 = vld [vmem:[%s19566_s7 + $0x16b0] sm:$0xf]  ;;  %v14547_v61 = vor.u32 %v18450_v46, %v14546_v43  ;;  %v15818_v43 = vld [vmem:[%s19566_s7 + $0x1da0] sm:$0xf]  ;;  %v18768_v46 = vld [vmem:[%s19566_s7 + $0x1db4] sm:$0xf0] }
  0x99   : > { %9254 = vmatpush.bf16.msrb.mxu0 %v14451_v57  ;;  %v18444_v57 = vld [vmem:[%s19566_s7 + $0x1394] sm:$0xf0]  ;;  %v14931_v3 = vor.u32 %v18546_v52, %v14930_v51  ;;  %v15218_v52 = vld [vmem:[%s19566_s7 + $0x18f0] sm:$0xf] }
  0x9a   : > { %9268 = vmatpush.bf16.msrb.mxu1 %v14643_v58  ;;  %v14714_v58 = vld [vmem:[%s19566_s7 + $0x1500] sm:$0xf]  ;;  %v14523_v15 = vor.u32 %v18444_v57, %v14522_v56  ;;  %v18666_v56 = vld [vmem:[%s19566_s7 + $0x1a84] sm:$0xf0]  ;;  %v15602_v57 = vld [vmem:[%s19566_s7 + $0x1bf0] sm:$0xf] }
  0x9b   : > { %9282 = vmatpush.bf16.msrb.mxu2 %v14835_v60  ;;  %v18492_v60 = vld [vmem:[%s19566_s7 + $0x1514] sm:$0xf0] }
  0x9c   : > { %9296 = vmatpush.bf16.msrb.mxu3 %v15027_v0  ;;  %v18540_v0 = vld [vmem:[%s19566_s7 + $0x1694] sm:$0xf0]  ;;  %v14715_v16 = vor.u32 %v18492_v60, %v14714_v58  ;;  %v18714_v58 = vld [vmem:[%s19566_s7 + $0x1c04] sm:$0xf0]  ;;  %v15794_v60 = vld [vmem:[%s19566_s7 + $0x1d70] sm:$0xf] }
  0x9d   : > { %9255 = vmatpush.bf16.msrb.mxu0 %v14427_v7  ;;  %v15650_v7 = vld [vmem:[%s19566_s7 + $0x1c50] sm:$0xf] }
  0x9e   : > { %9269 = vmatpush.bf16.msrb.mxu1 %v14619_v8  ;;  %v18726_v8 = vld [vmem:[%s19566_s7 + $0x1c64] sm:$0xf0] }
  0x9f   : > { %9283 = vmatpush.bf16.msrb.mxu2 %v14811_v9  ;;  %v15842_v9 = vld [vmem:[%s19566_s7 + $0x1dd0] sm:$0xf] }
  0xa0   : > { %9297 = vmatpush.bf16.msrb.mxu3 %v15003_v14  ;;  %v17808_v14 = vld [vmem:[%s19581_s13 + $0xa4] sm:$0xf0]  ;;  %v15843_v31 = vor.u32 %v18774_v12, %v15842_v9  ;;  %v15770_v9 = vld [vmem:[%s19566_s7 + $0x1d40] sm:$0xf] }
  0xa1   : > { %9256 = vmatpush.bf16.msrb.mxu0 %v14403_v21  ;;  %v14907_v21 = vor.u32 %v18540_v0, %v14906_v63  ;;  %v19919_v33 = vor.u32 %v17808_v14, %v11954_v13  ;;  %v15411_v63 = vor.u32 %v18666_v56, %v15410_v54  ;;  %v15603_v0 = vor.u32 %v18714_v58, %v15602_v57  ;;  %v15314_v54 = vld [vmem:[%s19566_s7 + $0x19b0] sm:$0xf]  ;;  %v18690_v58 = vld [vmem:[%s19566_s7 + $0x1b44] sm:$0xf0] }
  0xa2   : > { %9270 = vmatpush.bf16.msrb.mxu1 %v14595_v22  ;;  %v15267_v22 = vor.u32 %v18630_v4, %v15266_v1  ;;  %v15194_v1 = vld [vmem:[%s19566_s7 + $0x18c0] sm:$0xf]  ;;  %v15506_v57 = vld [vmem:[%s19566_s7 + $0x1b30] sm:$0xf] }
  0xa3   : > { %9284 = vmatpush.bf16.msrb.mxu2 %v14787_v23  ;;  %v11956_v23 = vld [vmem:[%s19581_s13 + $0xa8] sm:$0xf0]  ;;  %v15386_v4 = vld [vmem:[%s19566_s7 + $0x1a40] sm:$0xf] }
  0xa4   : > { %9298 = vmatpush.bf16.msrb.mxu3 %v14979_v27  ;;  %v15651_v27 = vor.u32 %v18726_v8, %v15650_v7  ;;  %v19926_v42 = vor.u32 %v17793_v20, %v11956_v23  ;;  %v15578_v7 = vld [vmem:[%s19566_s7 + $0x1bc0] sm:$0xf]  ;;  %v18708_v8 = vld [vmem:[%s19566_s7 + $0x1bd4] sm:$0xf0]  ;;  %v15387_v13 = vor.u32 %v18660_v6, %v15386_v4  ;;  %v18654_v20 = vld [vmem:[%s19566_s7 + $0x1a24] sm:$0xf0] }
  0xa5   : > { %9257 = vmatpush.bf16.msrb.mxu0 %v14379_v34  ;;  %v18672_v34 = vld [vmem:[%s19566_s7 + $0x1ab4] sm:$0xf0]  ;;  %v15579_v14 = vor.u32 %v18708_v8, %v15578_v7  ;;  %v15746_v23 = vld [vmem:[%s19566_s7 + $0x1d10] sm:$0xf]  ;;  %v15482_v4 = vld [vmem:[%s19566_s7 + $0x1b00] sm:$0xf]  ;;  %v15507_v7 = vor.u32 %v18690_v58, %v15506_v57 }
  0xa6   : > { %9271 = vmatpush.bf16.msrb.mxu1 %v14571_v38  ;;  %v18720_v38 = vld [vmem:[%s19566_s7 + $0x1c34] sm:$0xf0]  ;;  %v15435_v50 = vor.u32 %v18672_v34, %v15434_v30  ;;  %v15338_v30 = vld [vmem:[%s19566_s7 + $0x19e0] sm:$0xf] }
  0xa7   : > { %9285 = vmatpush.bf16.msrb.mxu2 %v14763_v39  ;;  %v19924_v39 = vor.u32 %v17809_v19, %v11962_v17  ;;  %v15627_v51 = vor.u32 %v18720_v38, %v15626_v35  ;;  %v15362_v17 = vld [vmem:[%s19566_s7 + $0x1a10] sm:$0xf]  ;;  %v18648_v34 = vld [vmem:[%s19566_s7 + $0x19f4] sm:$0xf0]  ;;  %v15530_v35 = vld [vmem:[%s19566_s7 + $0x1b60] sm:$0xf] }
  0xa8   : > { %9299 = vmatpush.bf16.msrb.mxu3 %v14955_v47  ;;  %v19930_v47 = vor.u32 %v17794_v24, %v11964_v25  ;;  %v18750_v24 = vld [vmem:[%s19566_s7 + $0x1d24] sm:$0xf0]  ;;  %v18696_v38 = vld [vmem:[%s19566_s7 + $0x1b74] sm:$0xf0]  ;;  %v15674_v8 = vld [vmem:[%s19566_s7 + $0x1c80] sm:$0xf] }
  0xa9   : > { %9258 = vmatpush.bf16.msrb.mxu0 %v14355_v55  ;;  %v15819_v55 = vor.u32 %v18768_v46, %v15818_v43  ;;  %v15722_v43 = vld [vmem:[%s19566_s7 + $0x1ce0] sm:$0xf]  ;;  %v18744_v46 = vld [vmem:[%s19566_s7 + $0x1cf4] sm:$0xf0] }
  0xaa   : > { %9272 = vmatpush.bf16.msrb.mxu1 %v14547_v61  ;;  %v18762_v61 = vld [vmem:[%s19566_s7 + $0x1d84] sm:$0xf0]  ;;  %v15723_v56 = vor.u32 %v18744_v46, %v15722_v43  ;;  %v16010_v46 = vld [vmem:[%s19566_s7 + $0x1f20] sm:$0xf] }
  0xab   : > { %9286 = vmatpush.bf16.msrb.mxu2 %v14739_v62  ;;  %v15219_v62 = vor.u32 %v18618_v53, %v15218_v52  ;;  %v15795_v5 = vor.u32 %v18762_v61, %v15794_v60  ;;  %v15531_v52 = vor.u32 %v18696_v38, %v15530_v35  ;;  %v18594_v53 = vld [vmem:[%s19566_s7 + $0x1844] sm:$0xf0]  ;;  %v15698_v60 = vld [vmem:[%s19566_s7 + $0x1cb0] sm:$0xf]  ;;  %v11980_v35 = vld [vmem:[%s19581_s13 + $0xc0] sm:$0xf0] }
  0xac   : > { %9300 = vmatpush.bf16.msrb.mxu3 %v14931_v3  ;;  %v18612_v3 = vld [vmem:[%s19566_s7 + $0x18d4] sm:$0xf0]  ;;  %v18738_v61 = vld [vmem:[%s19566_s7 + $0x1cc4] sm:$0xf0]  ;;  %v16586_v58 = vld [vmem:[%s19566_s7 + $0x23a0] sm:$0xf] }
  0xad   : > { %9259 = vmatpush.bf16.msrb.mxu0 %v14331_v10  ;;  %v18756_v10 = vld [vmem:[%s19566_s7 + $0x1d54] sm:$0xf0]  ;;  %v15195_v12 = vor.u32 %v18612_v3, %v15194_v1  ;;  %v15290_v1 = vld [vmem:[%s19566_s7 + $0x1980] sm:$0xf] }
  0xae   : > { %9273 = vmatpush.bf16.msrb.mxu1 %v14523_v15  ;;  %v15170_v15 = vld [vmem:[%s19566_s7 + $0x1890] sm:$0xf]  ;;  %v15771_v19 = vor.u32 %v18756_v10, %v15770_v9  ;;  %v18636_v3 = vld [vmem:[%s19566_s7 + $0x1994] sm:$0xf0] }
  0xaf   : > { %9287 = vmatpush.bf16.msrb.mxu2 %v14715_v16  ;;  %v18606_v16 = vld [vmem:[%s19566_s7 + $0x18a4] sm:$0xf0]  ;;  %v18732_v9 = vld [vmem:[%s19566_s7 + $0x1c94] sm:$0xf0]  ;;  %v16034_v10 = vld [vmem:[%s19566_s7 + $0x1f50] sm:$0xf] }
  0xb0   : > { %9301 = vmatpush.bf16.msrb.mxu3 %v14907_v21  ;;  %9260 = vmatmul.bf16.vlgmr.msrb.gmra.mxu0 %v19919_v33  ;;  %v15554_v21 = vld [vmem:[%s19566_s7 + $0x1b90] sm:$0xf]  ;;  %v15171_v25 = vor.u32 %v18606_v16, %v15170_v15  ;;  %v18870_v15 = vld [vmem:[%s19566_s7 + $0x20e4] sm:$0xf0] }
  0xb1   : > { %9308 = vmatpush.bf16.msra.mxu0 %v15267_v22  ;;  %9274 = vmatmul.bf16.vlgmr.msrb.gmra.mxu1 %v19926_v42  ;;  %v18702_v22 = vld [vmem:[%s19566_s7 + $0x1ba4] sm:$0xf0]  ;;  %v16418_v16 = vld [vmem:[%s19566_s7 + $0x2250] sm:$0xf] }
  0xb2   : > { %9322 = vmatpush.bf16.msra.mxu1 %v15459_v26  ;;  %9288 = vmatmul.bf16.vlgmr.msrb.gmra.mxu2 %v19924_v39  ;;  %v15363_v26 = vor.u32 %v18654_v20, %v15362_v17  ;;  %v18918_v17 = vld [vmem:[%s19566_s7 + $0x2264] sm:$0xf0] }
  0xb3   : > { %9336 = vmatpush.bf16.msra.mxu2 %v15651_v27  ;;  %9302 = vmatmul.bf16.vlgmr.msrb.gmra.mxu3 %v19930_v47  ;;  %v15555_v27 = vor.u32 %v18702_v22, %v15554_v21  ;;  %v18966_v21 = vld [vmem:[%s19566_s7 + $0x23e4] sm:$0xf0]  ;;  %v11970_v22 = vld [vmem:[%s19581_s13 + $0x40] sm:$0xf]  ;;  %v16419_v43 = vor.u32 %v18918_v17, %v16418_v16  ;;  %v18804_v16 = vld [vmem:[%s19566_s7 + $0x1ed4] sm:$0xf0] }
  0xb4   : > { %9350 = vmatpush.bf16.msra.mxu3 %v15843_v31  ;;  %v15747_v31 = vor.u32 %v18750_v24, %v15746_v23  ;;  %v17810_v23 = vld [vmem:[%s19581_s13 + $0xb4] sm:$0xf0]  ;;  %v15291_v24 = vor.u32 %v18636_v3, %v15290_v1  ;;  %v15986_v1 = vld [vmem:[%s19566_s7 + $0x1ef0] sm:$0xf]  ;;  %v16154_v17 = vld [vmem:[%s19566_s7 + $0x2040] sm:$0xf] }
  0xb5   : > { %9309 = vmatpush.bf16.msra.mxu0 %v15243_v49  ;;  %v15147_v49 = vor.u32 %v18600_v29, %v15146_v28  ;;  %v17795_v28 = vld [vmem:[%s19581_s13 + $0x44] sm:$0xf]  ;;  %v15675_v29 = vor.u32 %v18732_v9, %v15674_v8  ;;  %v18810_v3 = vld [vmem:[%s19566_s7 + $0x1f04] sm:$0xf0]  ;;  %v16562_v9 = vld [vmem:[%s19566_s7 + $0x2370] sm:$0xf] }
  0xb6   : > { %9323 = vmatpush.bf16.msra.mxu1 %v15435_v50  ;;  %v15122_v50 = vld [vmem:[%s19566_s7 + $0x1830] sm:$0xf]  ;;  %v18906_v8 = vld [vmem:[%s19566_s7 + $0x2204] sm:$0xf0] }
  0xb7   : > { %9337 = vmatpush.bf16.msra.mxu2 %v15627_v51  ;;  %v15339_v51 = vor.u32 %v18648_v34, %v15338_v30  ;;  %v17796_v34 = vld [vmem:[%s19581_s13 + $0x4c] sm:$0xf] }
  0xb8   : > { %9351 = vmatpush.bf16.msra.mxu3 %v15819_v55  ;;  %v18642_v55 = vld [vmem:[%s19566_s7 + $0x19c4] sm:$0xf0] }
  0xb9   : > { %9310 = vmatpush.bf16.msra.mxu0 %v15219_v62  ;;  %v15098_v62 = vld [vmem:[%s19566_s7 + $0x1800] sm:$0xf]  ;;  %v15315_v6 = vor.u32 %v18642_v55, %v15314_v54  ;;  %v18912_v55 = vld [vmem:[%s19566_s7 + $0x2234] sm:$0xf0] }
  0xba   : > { %9324 = vmatpush.bf16.msra.mxu1 %v15411_v63  ;;  %v18588_v63 = vld [vmem:[%s19566_s7 + $0x1814] sm:$0xf0]  ;;  %v16394_v54 = vld [vmem:[%s19566_s7 + $0x2220] sm:$0xf] }
  0xbb   : > { %9338 = vmatpush.bf16.msra.mxu2 %v15603_v0  ;;  %v15123_v0 = vor.u32 %v18594_v53, %v15122_v50  ;;  %v15099_v20 = vor.u32 %v18588_v63, %v15098_v62  ;;  %v16202_v50 = vld [vmem:[%s19566_s7 + $0x20a0] sm:$0xf]  ;;  %v18864_v53 = vld [vmem:[%s19566_s7 + $0x20b4] sm:$0xf0] }
  0xbc   : > { %9352 = vmatpush.bf16.msra.mxu3 %v15795_v5  ;;  %v18684_v5 = vld [vmem:[%s19566_s7 + $0x1b14] sm:$0xf0]  ;;  %v16203_v63 = vor.u32 %v18864_v53, %v16202_v50 }
  0xbd   : > { %9311 = vmatpush.bf16.msra.mxu0 %v15195_v12  ;;  %v15699_v12 = vor.u32 %v18738_v61, %v15698_v60  ;;  %v18960_v60 = vld [vmem:[%s19566_s7 + $0x23b4] sm:$0xf0]  ;;  %v20014_v61 = vor.u32 %v17796_v34, %v11980_v35  ;;  %v18846_v34 = vld [vmem:[%s19566_s7 + $0x2024] sm:$0xf0]  ;;  %v16322_v35 = vld [vmem:[%s19566_s7 + $0x2190] sm:$0xf] }
  0xbe   : > { %9325 = vmatpush.bf16.msra.mxu1 %v15387_v13  ;;  %v18822_v13 = vld [vmem:[%s19566_s7 + $0x1f64] sm:$0xf0] }
  0xbf   : > { %9339 = vmatpush.bf16.msra.mxu2 %v15579_v14  ;;  %v16226_v14 = vld [vmem:[%s19566_s7 + $0x20d0] sm:$0xf]  ;;  %v16035_v30 = vor.u32 %v18822_v13, %v16034_v10  ;;  %v18954_v10 = vld [vmem:[%s19566_s7 + $0x2384] sm:$0xf0] }
  0xc0   : > { %9353 = vmatpush.bf16.msra.mxu3 %v15771_v19  ;;  %v16610_v19 = vld [vmem:[%s19566_s7 + $0x23d0] sm:$0xf]  ;;  %v16227_v38 = vor.u32 %v18870_v15, %v16226_v14  ;;  %v15962_v15 = vld [vmem:[%s19566_s7 + $0x1ec0] sm:$0xf] }
  0xc1   : > { %9312 = vmatpush.bf16.msra.mxu0 %v15171_v25  ;;  %v15483_v25 = vor.u32 %v18684_v5, %v15482_v4  ;;  %v16178_v4 = vld [vmem:[%s19566_s7 + $0x2070] sm:$0xf]  ;;  %v16587_v5 = vor.u32 %v18960_v60, %v16586_v58  ;;  %v15914_v58 = vld [vmem:[%s19566_s7 + $0x1e60] sm:$0xf]  ;;  %v18792_v60 = vld [vmem:[%s19566_s7 + $0x1e74] sm:$0xf0] }
  0xc2   : > { %9326 = vmatpush.bf16.msra.mxu1 %v15363_v26  ;;  %v11978_v26 = vld [vmem:[%s19581_s13 + $0x48] sm:$0xf] }
  0xc3   : > { %9340 = vmatpush.bf16.msra.mxu2 %v15555_v27  ;;  %v17811_v27 = vld [vmem:[%s19581_s13 + $0xbc] sm:$0xf0] }
  0xc4   : > { %9354 = vmatpush.bf16.msra.mxu3 %v15747_v31  ;;  %v11972_v31 = vld [vmem:[%s19581_s13 + $0xb8] sm:$0xf0] }
  0xc5   : > { %9313 = vmatpush.bf16.msra.mxu0 %v15147_v49  ;;  %v18816_v49 = vld [vmem:[%s19566_s7 + $0x1f34] sm:$0xf0]  ;;  %v20010_v57 = vor.u32 %v17795_v28, %v11972_v31  ;;  %v15938_v28 = vld [vmem:[%s19566_s7 + $0x1e90] sm:$0xf] }
  0xc6   : > { %9327 = vmatpush.bf16.msra.mxu1 %v15339_v51  ;;  %v16611_v51 = vor.u32 %v18966_v21, %v16610_v19  ;;  %v16011_v62 = vor.u32 %v18816_v49, %v16010_v46  ;;  %v16563_v19 = vor.u32 %v18954_v10, %v16562_v9  ;;  %v16346_v21 = vld [vmem:[%s19566_s7 + $0x21c0] sm:$0xf]  ;;  %v18942_v46 = vld [vmem:[%s19566_s7 + $0x2324] sm:$0xf0]  ;;  %v15890_v9 = vld [vmem:[%s19566_s7 + $0x1e30] sm:$0xf] }
  0xc7   : > { %9341 = vmatpush.bf16.msra.mxu2 %v15531_v52  ;;  %v20003_v52 = vor.u32 %v17810_v23, %v11970_v22  ;;  %v18900_v22 = vld [vmem:[%s19566_s7 + $0x21d4] sm:$0xf0]  ;;  %v16538_v23 = vld [vmem:[%s19566_s7 + $0x2340] sm:$0xf] }
  0xc8   : > { %9355 = vmatpush.bf16.msra.mxu3 %v15723_v56  ;;  %v20008_v56 = vor.u32 %v17811_v27, %v11978_v26  ;;  %v16347_v27 = vor.u32 %v18900_v22, %v16346_v21  ;;  %v18930_v22 = vld [vmem:[%s19566_s7 + $0x22c4] sm:$0xf0] }
  0xc9   : > { %9314 = vmatpush.bf16.msra.mxu0 %v15123_v0  ;;  %v16395_v0 = vor.u32 %v18912_v55, %v16394_v54 }
  0xca   : > { %9328 = vmatpush.bf16.msra.mxu1 %v15315_v6  ;;  %v18858_v6 = vld [vmem:[%s19566_s7 + $0x2084] sm:$0xf0] }
  0xcb   : > { %9342 = vmatpush.bf16.msra.mxu2 %v15507_v7  ;;  %v16370_v7 = vld [vmem:[%s19566_s7 + $0x21f0] sm:$0xf]  ;;  %v16179_v13 = vor.u32 %v18858_v6, %v16178_v4  ;;  %v18936_v6 = vld [vmem:[%s19566_s7 + $0x22f4] sm:$0xf0] }
  0xcc   : > { %9356 = vmatpush.bf16.msra.mxu3 %v15699_v12  ;;  %v15987_v12 = vor.u32 %v18810_v3, %v15986_v1  ;;  %v16371_v14 = vor.u32 %v18906_v8, %v16370_v7  ;;  %v16298_v1 = vld [vmem:[%s19566_s7 + $0x2160] sm:$0xf]  ;;  %v18888_v3 = vld [vmem:[%s19566_s7 + $0x2174] sm:$0xf0]  ;;  %v15915_v8 = vor.u32 %v18792_v60, %v15914_v58  ;;  %v19158_v60 = vld [vmem:[%s19566_s7 + $0x29e4] sm:$0xf0] }
  0xcd   : > { %9315 = vmatpush.bf16.msra.mxu0 %v15099_v20  ;;  %v18852_v20 = vld [vmem:[%s19566_s7 + $0x2054] sm:$0xf0]  ;;  %v9093_v49 = vpop.f32.mrf.mxu0 }
  0xce   : > { %9329 = vmatpush.bf16.msra.mxu1 %v15291_v24  ;;  %v18948_v24 = vld [vmem:[%s19566_s7 + $0x2354] sm:$0xf0]  ;;  %v16155_v26 = vor.u32 %v18852_v20, %v16154_v17  ;;  %v9107_v50 = vpop.f32.mrf.mxu1  ;;  %v16274_v17 = vld [vmem:[%s19566_s7 + $0x2130] sm:$0xf] }
  0xcf   : > { %9343 = vmatpush.bf16.msra.mxu2 %v15483_v25  ;;  %v15963_v25 = vor.u32 %v18804_v16, %v15962_v15  ;;  %v16539_v31 = vor.u32 %v18948_v24, %v16538_v23  ;;  %v9108_v53 = vadd.f32 %v9107_v50, %v9093_v49  ;;  %v18834_v15 = vld [vmem:[%s19566_s7 + $0x1fc4] sm:$0xf0]  ;;  %v16466_v20 = vld [vmem:[%s19566_s7 + $0x22b0] sm:$0xf]  ;;  %v15866_v23 = vld [vmem:[%s19566_s7 + $0x1e00] sm:$0xf] }
  0xd0   : > { %9357 = vmatpush.bf16.msra.mxu3 %v15675_v29  ;;  %9316 = vmatmul.bf16.vlgmr.msra.gmra.mxu0 %v20003_v52  ;;  %v18798_v29 = vld [vmem:[%s19566_s7 + $0x1ea4] sm:$0xf0]  ;;  %v18780_v24 = vld [vmem:[%s19566_s7 + $0x1e14] sm:$0xf0]  ;;  %v16994_v50 = vld [vmem:[%s19566_s7 + $0x26d0] sm:$0xf] }
  0xd1   : > { %9364 = vmatpush.bf16.msrb.mxu0 %v16035_v30  ;;  %9330 = vmatmul.bf16.vlgmr.msra.gmra.mxu1 %v20010_v57  ;;  %v16130_v30 = vld [vmem:[%s19566_s7 + $0x2010] sm:$0xf]  ;;  %v19014_v49 = vld [vmem:[%s19566_s7 + $0x2564] sm:$0xf0]  ;;  %v15867_v58 = vor.u32 %v18780_v24, %v15866_v23  ;;  %v19104_v23 = vld [vmem:[%s19566_s7 + $0x2834] sm:$0xf0] }
  0xd2   : > { %9378 = vmatpush.bf16.msrb.mxu1 %v16227_v38  ;;  %9344 = vmatmul.bf16.vlgmr.msra.gmra.mxu2 %v20008_v56  ;;  %v18894_v38 = vld [vmem:[%s19566_s7 + $0x21a4] sm:$0xf0]  ;;  %v16131_v54 = vor.u32 %v18846_v34, %v16130_v30  ;;  %v18876_v30 = vld [vmem:[%s19566_s7 + $0x2114] sm:$0xf0] }
  0xd3   : > { %9392 = vmatpush.bf16.msrb.mxu2 %v16419_v43  ;;  %9358 = vmatmul.bf16.vlgmr.msra.gmra.mxu3 %v20014_v61  ;;  %v16514_v43 = vld [vmem:[%s19566_s7 + $0x2310] sm:$0xf]  ;;  %v16323_v55 = vor.u32 %v18894_v38, %v16322_v35  ;;  %v16442_v35 = vld [vmem:[%s19566_s7 + $0x2280] sm:$0xf]  ;;  %v18924_v38 = vld [vmem:[%s19566_s7 + $0x2294] sm:$0xf0] }
  0xd4   : > { %9406 = vmatpush.bf16.msrb.mxu3 %v16611_v51  ;;  %v15939_v51 = vor.u32 %v18798_v29, %v15938_v28  ;;  %v18828_v28 = vld [vmem:[%s19566_s7 + $0x1f94] sm:$0xf0]  ;;  %v16250_v29 = vld [vmem:[%s19566_s7 + $0x2100] sm:$0xf] }
  0xd5   : > { %9365 = vmatpush.bf16.msrb.mxu0 %v16011_v62  ;;  %v16106_v62 = vld [vmem:[%s19566_s7 + $0x1fe0] sm:$0xf]  ;;  %v9121_v4 = vpop.f32.mrf.mxu2 }
  0xd6   : > { %9379 = vmatpush.bf16.msrb.mxu1 %v16203_v63  ;;  %v16515_v63 = vor.u32 %v18942_v46, %v16514_v43  ;;  %v9122_v7 = vadd.f32 %v9121_v4, %v9108_v53  ;;  %v9135_v21 = vpop.f32.mrf.mxu3  ;;  %v16802_v43 = vld [vmem:[%s19566_s7 + $0x2550] sm:$0xf]  ;;  %v16467_v46 = vor.u32 %v18930_v22, %v16466_v20  ;;  %v17813_v4 = vld [vmem:[%s19581_s13 + $0xcc] sm:$0xf0] }
  0xd7   : > { %9393 = vmatpush.bf16.msrb.mxu2 %v16395_v0  ;;  %v18840_v0 = vld [vmem:[%s19566_s7 + $0x1ff4] sm:$0xf0]  ;;  %v17186_v53 = vld [vmem:[%s19566_s7 + $0x2850] sm:$0xf]  ;;  %v17162_v22 = vld [vmem:[%s19566_s7 + $0x2820] sm:$0xf] }
  0xd8   : > { %9407 = vmatpush.bf16.msrb.mxu3 %v16587_v5  ;;  %v16490_v5 = vld [vmem:[%s19566_s7 + $0x22e0] sm:$0xf]  ;;  %v16107_v10 = vor.u32 %v18840_v0, %v16106_v62 }
  0xd9   : > { %9366 = vmatpush.bf16.msrb.mxu0 %v15987_v12  ;;  %v16299_v12 = vor.u32 %v18888_v3, %v16298_v1  ;;  %v16491_v16 = vor.u32 %v18936_v6, %v16490_v5  ;;  %v11986_v62 = vld [vmem:[%s19581_s13 + $0x50] sm:$0xf]  ;;  %v16251_v1 = vor.u32 %v18876_v30, %v16250_v29  ;;  %v11994_v3 = vld [vmem:[%s19581_s13 + $0x58] sm:$0xf]  ;;  %v17797_v5 = vld [vmem:[%s19581_s13 + $0x54] sm:$0xf]  ;;  %v16443_v6 = vor.u32 %v18924_v38, %v16442_v35  ;;  %v20102_v29 = vpop.f32.mrf.mxu1 }
  0xda   : > { %9380 = vmatpush.bf16.msrb.mxu1 %v16179_v13  ;;  %v18786_v13 = vld [vmem:[%s19566_s7 + $0x1e44] sm:$0xf0]  ;;  %v20096_v24 = vor.u32 %v17813_v4, %v11994_v3  ;;  %v17163_v35 = vor.u32 %v19104_v23, %v17162_v22  ;;  %v16754_v38 = vld [vmem:[%s19566_s7 + $0x24f0] sm:$0xf]  ;;  %v16922_v3 = vld [vmem:[%s19566_s7 + $0x2640] sm:$0xf] }
  0xdb   : > { %9394 = vmatpush.bf16.msrb.mxu2 %v16371_v14  ;;  %v16082_v14 = vld [vmem:[%s19566_s7 + $0x1fb0] sm:$0xf]  ;;  %v18990_v22 = vld [vmem:[%s19566_s7 + $0x24a4] sm:$0xf0] }
  0xdc   : > { %9408 = vmatpush.bf16.msrb.mxu3 %v16563_v19  ;;  %v18882_v19 = vld [vmem:[%s19566_s7 + $0x2144] sm:$0xf0]  ;;  %23543 = vst [vmem:[#allocation6_spill] sm:$0xff] %v20096_v24  ;;  %v16898_v23 = vld [vmem:[%s19566_s7 + $0x2610] sm:$0xf] }
  0xdd   : > { %9367 = vmatpush.bf16.msrb.mxu0 %v15963_v25  ;;  %v20062_v25 = vadd.f32 %v9135_v21, %v9122_v7  ;;  %v16275_v34 = vor.u32 %v18882_v19, %v16274_v17  ;;  %v16803_v7 = vor.u32 %v19014_v49, %v16802_v43  ;;  %v16970_v17 = vld [vmem:[%s19566_s7 + $0x26a0] sm:$0xf]  ;;  %v19056_v21 = vld [vmem:[%s19566_s7 + $0x26b4] sm:$0xf0]  ;;  %v19002_v43 = vld [vmem:[%s19566_s7 + $0x2504] sm:$0xf0] }
  0xde   : > { %9381 = vmatpush.bf16.msrb.mxu1 %v16155_v26  ;;  %v15891_v26 = vor.u32 %v18786_v13, %v15890_v9  ;;  %v17798_v9 = vld [vmem:[%s19581_s13 + $0x5c] sm:$0xf] }
  0xdf   : > { %9395 = vmatpush.bf16.msrb.mxu2 %v16347_v27  ;;  %v16058_v27 = vld [vmem:[%s19566_s7 + $0x1f80] sm:$0xf] }
  0xe0   : > { %9409 = vmatpush.bf16.msrb.mxu3 %v16539_v31  ;;  %v16083_v31 = vor.u32 %v18834_v15, %v16082_v14  ;;  %v16059_v0 = vor.u32 %v18828_v28, %v16058_v27  ;;  %v20086_v14 = vpop.f32.mrf.mxu0  ;;  %v16778_v15 = vld [vmem:[%s19566_s7 + $0x2520] sm:$0xf]  ;;  %v19152_v28 = vld [vmem:[%s19566_s7 + $0x29b4] sm:$0xf0] }
  0xe1   : > { %9368 = vmatpush.bf16.msrb.mxu0 %v15939_v51  ;;  %v19062_v51 = vld [vmem:[%s19566_s7 + $0x26e4] sm:$0xf0]  ;;  %v17354_v27 = vld [vmem:[%s19566_s7 + $0x29a0] sm:$0xf] }
  0xe2   : > { %9382 = vmatpush.bf16.msrb.mxu1 %v16131_v54  ;;  %v19110_v54 = vld [vmem:[%s19566_s7 + $0x2864] sm:$0xf0]  ;;  %v17355_v49 = vor.u32 %v19152_v28, %v17354_v27 }
  0xe3   : > { %9396 = vmatpush.bf16.msrb.mxu2 %v16323_v55  ;;  %v17378_v55 = vld [vmem:[%s19566_s7 + $0x29d0] sm:$0xf]  ;;  %v17187_v13 = vor.u32 %v19110_v54, %v17186_v53  ;;  %v19098_v53 = vld [vmem:[%s19566_s7 + $0x2804] sm:$0xf0] }
  0xe4   : > { %9410 = vmatpush.bf16.msrb.mxu3 %v16515_v63  ;;  %v17812_v63 = vld [vmem:[%s19581_s13 + $0xc4] sm:$0xf0]  ;;  %v17379_v19 = vor.u32 %v19158_v60, %v17378_v55  ;;  %v17330_v54 = vld [vmem:[%s19566_s7 + $0x2970] sm:$0xf]  ;;  %v19146_v55 = vld [vmem:[%s19566_s7 + $0x2984] sm:$0xf0]  ;;  %v20118_v60 = vpop.f32.mrf.mxu2 }
  0xe5   : > { %9369 = vmatpush.bf16.msrb.mxu0 %v15915_v8  ;;  %v11988_v8 = vld [vmem:[%s19581_s13 + $0xc8] sm:$0xf0]  ;;  %v20091_v20 = vor.u32 %v17812_v63, %v11986_v62  ;;  %23545 = vst [vmem:[#allocation8_spill] sm:$0xff] %v20118_v60  ;;  %v17331_v4 = vor.u32 %v19146_v55, %v17330_v54  ;;  %v19150_v60 = vld [vmem:[%s19566_s7 + $0x29ac] sm:$0xf] }
  0xe6   : > { %9383 = vmatpush.bf16.msrb.mxu1 %v16107_v10  ;;  %v11996_v10 = vld [vmem:[%s19581_s13 + $0xd0] sm:$0xf0] }
  0xe7   : > { %9397 = vmatpush.bf16.msrb.mxu2 %v16299_v12  ;;  %v16995_v12 = vor.u32 %v19062_v51, %v16994_v50  ;;  %v20104_v30 = vor.u32 %v17798_v9, %v11996_v10  ;;  %v19050_v50 = vld [vmem:[%s19566_s7 + $0x2684] sm:$0xf0]  ;;  %v17138_v51 = vld [vmem:[%s19566_s7 + $0x27f0] sm:$0xf]  ;;  %v17306_v10 = vld [vmem:[%s19566_s7 + $0x2940] sm:$0xf] }
  0xe8   : > { %9411 = vmatpush.bf16.msrb.mxu3 %v16491_v16  ;;  %v19008_v16 = vld [vmem:[%s19566_s7 + $0x2534] sm:$0xf0]  ;;  %v17139_v63 = vor.u32 %v19098_v53, %v17138_v51  ;;  %v16874_v53 = vld [vmem:[%s19566_s7 + $0x25e0] sm:$0xf] }
  0xe9   : > { %9370 = vmatpush.bf16.msrb.mxu0 %v15891_v26  ;;  %v20098_v26 = vor.u32 %v17797_v5, %v11988_v8  ;;  %23544 = vst [vmem:[#allocation7_spill] sm:$0xff] %v20104_v30  ;;  %v20123_v5 = vpop.f32.mrf.mxu3  ;;  %v19092_v8 = vld [vmem:[%s19566_s7 + $0x27d4] sm:$0xf0] }
  0xea   : > { %9384 = vmatpush.bf16.msrb.mxu1 %v16083_v31  ;;  %v16779_v31 = vor.u32 %v19008_v16, %v16778_v15  ;;  %23546 = vst [vmem:[#allocation9_spill] sm:$0xff] %v20123_v5  ;;  %v18984_v51 = vld [vmem:[%s19566_s7 + $0x2474] sm:$0xf0]  ;;  %v19249_v5 = vld [vmem:[%s19566_s7 + $0x2cbc] sm:$0xf0] }
  0xeb   : > { %9398 = vmatpush.bf16.msrb.mxu2 %v16275_v34  ;;  %v16971_v34 = vor.u32 %v19056_v21, %v16970_v17  ;;  %v16706_v21 = vld [vmem:[%s19566_s7 + $0x2490] sm:$0xf] }
  0xec   : > { %9412 = vmatpush.bf16.msrb.mxu3 %v16467_v46  ;;  %v16946_v46 = vld [vmem:[%s19566_s7 + $0x2670] sm:$0xf] }
  0xed   : > { %9371 = vmatpush.bf16.msrb.mxu0 %v15867_v58  ;;  %v16755_v58 = vor.u32 %v19002_v43, %v16754_v38  ;;  %v16947_v62 = vor.u32 %v19050_v50, %v16946_v46  ;;  %v9149_v9 = vpop.f32.mrf.mxu0  ;;  %v19134_v38 = vld [vmem:[%s19566_s7 + $0x2924] sm:$0xf0]  ;;  %v16707_v43 = vor.u32 %v18990_v22, %v16706_v21  ;;  %v16682_v50 = vld [vmem:[%s19566_s7 + $0x2460] sm:$0xf]  ;;  %v17234_v21 = vld [vmem:[%s19566_s7 + $0x28b0] sm:$0xf] }
  0xee   : > { %9385 = vmatpush.bf16.msrb.mxu1 %v16059_v0  ;;  %v16730_v0 = vld [vmem:[%s19566_s7 + $0x24c0] sm:$0xf]  ;;  %v19122_v22 = vld [vmem:[%s19566_s7 + $0x28c4] sm:$0xf0] }
  0xef   : > { %9399 = vmatpush.bf16.msrb.mxu2 %v16251_v1  ;;  %v18996_v1 = vld [vmem:[%s19566_s7 + $0x24d4] sm:$0xf0] }
  0xf0   : > { %9413 = vmatpush.bf16.msrb.mxu3 %v16443_v6  ;;  %9372 = vmatmul.bf16.vlgmr.msrb.gmra.mxu0 %v20091_v20  ;;  %v19044_v6 = vld [vmem:[%s19566_s7 + $0x2654] sm:$0xf0]  ;;  %v16731_v15 = vor.u32 %v18996_v1, %v16730_v0  ;;  %v17258_v1 = vld [vmem:[%s19566_s7 + $0x28e0] sm:$0xf] }
  0xf1   : > { %9420 = vmatpush.bf16.msra.mxu0 %v16803_v7  ;;  %9386 = vmatmul.bf16.vlgmr.msrb.gmra.mxu1 %v20098_v26  ;;  %v17114_v7 = vld [vmem:[%s19566_s7 + $0x27c0] sm:$0xf]  ;;  %v16923_v16 = vor.u32 %v19044_v6, %v16922_v3  ;;  %v19128_v3 = vld [vmem:[%s19566_s7 + $0x28f4] sm:$0xf0]  ;;  %v16683_v6 = vor.u32 %v18984_v51, %v16682_v50  ;;  %v17570_v50 = vld [vmem:[%s19566_s7 + $0x2b50] sm:$0xf]  ;;  %v17235_v51 = vor.u32 %v19122_v22, %v17234_v21 }
  0xf2   : > { %9434 = vmatpush.bf16.msra.mxu1 %v16995_v12  ;;  %9400 = vmatmul.bf16.vlgmr.msrb.gmra.mxu2 %v20096_v24  ;;  %v19140_v12 = vld [vmem:[%s19566_s7 + $0x2954] sm:$0xf0]  ;;  %v17115_v17 = vor.u32 %v19092_v8, %v17114_v7  ;;  %v16658_v7 = vld [vmem:[%s19566_s7 + $0x2430] sm:$0xf] }
  0xf3   : > { %9448 = vmatpush.bf16.msra.mxu2 %v17187_v13  ;;  %9414 = vmatmul.bf16.vlgmr.msrb.gmra.mxu3 %v20104_v30  ;;  %v9150_v13 = vadd.f32 %v9149_v9, %v20062_v25  ;;  %v17307_v27 = vor.u32 %v19140_v12, %v17306_v10  ;;  %v19086_v25 = vld [vmem:[%s19566_s7 + $0x27a4] sm:$0xf0] }
  0xf4   : > { %9462 = vmatpush.bf16.msra.mxu3 %v17379_v19  ;;  %v9163_v19 = vpop.f32.mrf.mxu1  ;;  %v18978_v12 = vld [vmem:[%s19566_s7 + $0x2444] sm:$0xf0] }
  0xf5   : > { %9421 = vmatpush.bf16.msra.mxu0 %v16779_v31  ;;  %v9164_v28 = vadd.f32 %v9163_v19, %v9150_v13  ;;  %v19038_v31 = vld [vmem:[%s19566_s7 + $0x2624] sm:$0xf0]  ;;  %v9177_v55 = vpop.f32.mrf.mxu2  ;;  %v16850_v13 = vld [vmem:[%s19566_s7 + $0x25b0] sm:$0xf] }
  0xf6   : > { %9435 = vmatpush.bf16.msra.mxu1 %v16971_v34  ;;  %v17090_v34 = vld [vmem:[%s19566_s7 + $0x2790] sm:$0xf]  ;;  %v16899_v46 = vor.u32 %v19038_v31, %v16898_v23  ;;  %v19074_v19 = vld [vmem:[%s19566_s7 + $0x2744] sm:$0xf0]  ;;  %v16634_v23 = vld [vmem:[%s19566_s7 + $0x2400] sm:$0xf] }
  0xf7   : > { %9449 = vmatpush.bf16.msra.mxu2 %v17163_v35  ;;  %v17282_v35 = vld [vmem:[%s19566_s7 + $0x2910] sm:$0xf]  ;;  %v9178_v0 = vadd.f32 %v9177_v55, %v9164_v28  ;;  %v16659_v28 = vor.u32 %v18978_v12, %v16658_v7  ;;  %v16826_v31 = vld [vmem:[%s19566_s7 + $0x2580] sm:$0xf]  ;;  %v19254_v55 = vld [vmem:[%s19566_s7 + $0x2ce4] sm:$0xf0] }
  0xf8   : > { %9463 = vmatpush.bf16.msra.mxu3 %v17355_v49  ;;  %v17091_v49 = vor.u32 %v19086_v25, %v17090_v34  ;;  %v17283_v54 = vor.u32 %v19134_v38, %v17282_v35  ;;  %v19020_v34 = vld [vmem:[%s19566_s7 + $0x2594] sm:$0xf0]  ;;  %v17018_v25 = vld [vmem:[%s19566_s7 + $0x2700] sm:$0xf]  ;;  %v17799_v12 = vld [vmem:[%s19581_s13 + $0x64] sm:$0xf] }
  0xf9   : > { %9422 = vmatpush.bf16.msra.mxu0 %v16755_v58  ;;  %v19032_v58 = vld [vmem:[%s19566_s7 + $0x25f4] sm:$0xf0] }
  0xfa   : > { %9436 = vmatpush.bf16.msra.mxu1 %v16947_v62  ;;  %v17066_v62 = vld [vmem:[%s19566_s7 + $0x2760] sm:$0xf]  ;;  %v16875_v9 = vor.u32 %v19032_v58, %v16874_v53  ;;  %v19068_v35 = vld [vmem:[%s19566_s7 + $0x2714] sm:$0xf0]  ;;  %v19206_v53 = vld [vmem:[%s19566_s7 + $0x2b64] sm:$0xf0] }
  0xfb   : > { %9450 = vmatpush.bf16.msra.mxu2 %v17139_v63  ;;  %v19080_v63 = vld [vmem:[%s19566_s7 + $0x2774] sm:$0xf0]  ;;  %v17859_v58 = vld [vmem:[%s19566_s7 + $0x154] sm:$0xf]  ;;  %v17019_v7 = vor.u32 %v19068_v35, %v17018_v25  ;;  %v17853_v35 = vld [vmem:[%s19566_s7 + $0x124] sm:$0xf] }
  0xfc   : > { %9464 = vmatpush.bf16.msra.mxu3 %v17331_v4  ;;  %v9191_v4 = vpop.f32.mrf.mxu3  ;;  %v17067_v10 = vor.u32 %v19080_v63, %v17066_v62  ;;  %v12196_v62 = vld [vmem:[%s19566_s7 + $0x168] sm:$0xf0]  ;;  %v17907_v63 = vld [vmem:[%s19566_s7 + $0x2d4] sm:$0xf]  ;;  %v19248_v25 = vld [vmem:[%s19566_s7 + $0x2cb4] sm:$0xf0] }
  0xfd   : > { %9423 = vmatpush.bf16.msra.mxu0 %v16731_v15  ;;  %v20148_v8 = vadd.f32 %v9191_v4, %v9178_v0  ;;  %v19026_v15 = vld [vmem:[%s19566_s7 + $0x25c4] sm:$0xf0]  ;;  %v12199_v22 = vor.u32 %v17859_v58, %v12196_v62 }
  0xfe   : > { %9437 = vmatpush.bf16.msra.mxu1 %v16923_v16  ;;  %v17259_v16 = vor.u32 %v19128_v3, %v17258_v1  ;;  %v16851_v38 = vor.u32 %v19026_v15, %v16850_v13  ;;  %v12388_v1 = vld [vmem:[%s19566_s7 + $0x2e8] sm:$0xf0]  ;;  %v12002_v3 = vld [vmem:[%s19581_s13 + $0x60] sm:$0xf]  ;;  %v17814_v4 = vld [vmem:[%s19581_s13 + $0xd4] sm:$0xf0]  ;;  %v17571_v15 = vor.u32 %v19206_v53, %v17570_v50  ;;  %v20197_v53 = vpop.f32.mrf.mxu1 }
  0xff   : > { %9451 = vmatpush.bf16.msra.mxu2 %v17115_v17  ;;  %v17042_v17 = vld [vmem:[%s19566_s7 + $0x2730] sm:$0xf]  ;;  %v17901_v50 = vld [vmem:[%s19566_s7 + $0x2a4] sm:$0xf]  ;;  %23551 = vst [vmem:[#allocation14_spill] sm:$0xff] %v20197_v53 }
 0x100   : > { %9465 = vmatpush.bf16.msra.mxu3 %v17307_v27  ;;  %v18972_v27 = vld [vmem:[%s19566_s7 + $0x2414] sm:$0xf0]  ;;  %v12940_v53 = vld [vmem:[%s19566_s7 + $0x738] sm:$0xf0] }
 0x101   : > { %9424 = vmatpush.bf16.msra.mxu0 %v16707_v43  ;;  %v17043_v43 = vor.u32 %v19074_v19, %v17042_v17  ;;  %v16635_v0 = vor.u32 %v18972_v27, %v16634_v23  ;;  %v17800_v17 = vld [vmem:[%s19581_s13 + $0x6c] sm:$0xf]  ;;  %v12012_v19 = vld [vmem:[%s19581_s13 + $0xe0] sm:$0xf0]  ;;  %v17546_v23 = vld [vmem:[%s19566_s7 + $0x2b20] sm:$0xf] }
 0x102   : > { %9438 = vmatpush.bf16.msra.mxu1 %v16899_v46  ;;  %v17210_v46 = vld [vmem:[%s19566_s7 + $0x2880] sm:$0xf]  ;;  %v19200_v27 = vld [vmem:[%s19566_s7 + $0x2b34] sm:$0xf0] }
 0x103   : > { %9452 = vmatpush.bf16.msra.mxu2 %v17091_v49  ;;  %v19116_v49 = vld [vmem:[%s19566_s7 + $0x2894] sm:$0xf0] }
 0x104   : > { %9466 = vmatpush.bf16.msra.mxu3 %v17283_v54  ;;  %v17762_v54 = vld [vmem:[%s19566_s7 + $0x2cd0] sm:$0xf]  ;;  %v17211_v13 = vor.u32 %v19116_v49, %v17210_v46 }
 0x105   : > { %9425 = vmatpush.bf16.msra.mxu0 %v16683_v6  ;;  %v16827_v6 = vor.u32 %v19020_v34, %v16826_v31  ;;  %v17763_v21 = vor.u32 %v19254_v55, %v17762_v54  ;;  %v12391_v31 = vor.u32 %v17907_v63, %v12388_v1  ;;  %v20184_v34 = vor.u32 %v17814_v4, %v12002_v3  ;;  %v17522_v63 = vld [vmem:[%s19566_s7 + $0x2af0] sm:$0xf]  ;;  %v19242_v4 = vld [vmem:[%s19566_s7 + $0x2c84] sm:$0xf0] }
 0x106   : > { %9439 = vmatpush.bf16.msra.mxu1 %v16875_v9  ;;  %v12010_v9 = vld [vmem:[%s19581_s13 + $0x68] sm:$0xf]  ;;  %v20199_v54 = vor.u32 %v17800_v17, %v12012_v19  ;;  %v17547_v55 = vor.u32 %v19200_v27, %v17546_v23  ;;  %v17714_v1 = vld [vmem:[%s19566_s7 + $0x2c70] sm:$0xf]  ;;  %v17690_v19 = vld [vmem:[%s19566_s7 + $0x2c40] sm:$0xf] }
 0x107   : > { %9453 = vmatpush.bf16.msra.mxu2 %v17067_v10  ;;  %v17815_v10 = vld [vmem:[%s19581_s13 + $0xdc] sm:$0xf0]  ;;  %23547 = vst [vmem:[#allocation10_spill] sm:$0xff] %v20184_v34  ;;  %v19188_v17 = vld [vmem:[%s19566_s7 + $0x2ad4] sm:$0xf0] }
 0x108   : > { %9467 = vmatpush.bf16.msra.mxu3 %v17259_v16  ;;  %v12004_v16 = vld [vmem:[%s19581_s13 + $0xd8] sm:$0xf0]  ;;  %v20191_v46 = vor.u32 %v17815_v10, %v12010_v9  ;;  %23552 = vst [vmem:[#allocation15_spill] sm:$0xff] %v20199_v54  ;;  %v17895_v9 = vld [vmem:[%s19566_s7 + $0x274] sm:$0xf] }
 0x109   : > { %9426 = vmatpush.bf16.msra.mxu0 %v16659_v28  ;;  %v17738_v28 = vld [vmem:[%s19566_s7 + $0x2ca0] sm:$0xf]  ;;  %v20193_v49 = vor.u32 %v17799_v12, %v12004_v16  ;;  %v12340_v10 = vld [vmem:[%s19566_s7 + $0x288] sm:$0xf0]  ;;  %v19236_v23 = vld [vmem:[%s19566_s7 + $0x2c54] sm:$0xf0] }
 0x10a   : > { %9440 = vmatpush.bf16.msra.mxu1 %v16851_v38  ;;  %v12172_v38 = vld [vmem:[%s19566_s7 + $0x138] sm:$0xf0]  ;;  %23549 = vst [vmem:[#allocation12_spill] sm:$0xff] %v20191_v46  ;;  %v17739_v58 = vor.u32 %v19248_v25, %v17738_v28  ;;  %v17498_v16 = vld [vmem:[%s19566_s7 + $0x2ac0] sm:$0xf] }
 0x10b   : > { %9454 = vmatpush.bf16.msra.mxu2 %v17043_v43  ;;  %v20189_v43 = vpop.f32.mrf.mxu0  ;;  %23550 = vst [vmem:[#allocation13_spill] sm:$0xff] %v20193_v49  ;;  %v12175_v62 = vor.u32 %v17853_v35, %v12172_v38  ;;  %v17841_v27 = vld [vmem:[%s19566_s7 + $0xc4] sm:$0xf]  ;;  %v12124_v28 = vld [vmem:[%s19566_s7 + $0xd8] sm:$0xf0] }
 0x10c   : > { %9468 = vmatpush.bf16.msra.mxu3 %v17235_v51  ;;  %23548 = vst [vmem:[#allocation11_spill] sm:$0xff] %v20189_v43  ;;  %v12364_v51 = vld [vmem:[%s19566_s7 + $0x2b8] sm:$0xf0]  ;;  %v17889_v35 = vld [vmem:[%s19566_s7 + $0x244] sm:$0xf] }
 0x10d   : > { %9427 = vmatpush.bf16.msra.mxu0 %v16635_v0  ;;  %v19194_v0 = vld [vmem:[%s19566_s7 + $0x2b04] sm:$0xf0]  ;;  %v12367_v3 = vor.u32 %v17901_v50, %v12364_v51  ;;  %v12316_v38 = vld [vmem:[%s19566_s7 + $0x258] sm:$0xf0]  ;;  %v17499_v51 = vor.u32 %v19188_v17, %v17498_v16  ;;  %v17450_v16 = vld [vmem:[%s19566_s7 + $0x2a60] sm:$0xf] }
 0x10e   : > { %9441 = vmatpush.bf16.msra.mxu1 %v16827_v6  ;;  %v17847_v6 = vld [vmem:[%s19566_s7 + $0xf4] sm:$0xf]  ;;  %v17523_v12 = vor.u32 %v19194_v0, %v17522_v63  ;;  %v17474_v63 = vld [vmem:[%s19566_s7 + $0x2a90] sm:$0xf]  ;;  %v19182_v0 = vld [vmem:[%s19566_s7 + $0x2aa4] sm:$0xf0] }
 0x10f   : > { %9455 = vmatpush.bf16.msra.mxu2 %v17019_v7  ;;  %v12148_v7 = vld [vmem:[%s19566_s7 + $0x108] sm:$0xf0]  ;;  %v19176_v17 = vld [vmem:[%s19566_s7 + $0x2a74] sm:$0xf0]  ;;  %v16588_v43 = vld [vmem:[%s19566_s7 + $0x23b8] sm:$0xf0] }
 0x110   : > { %9469 = vmatpush.bf16.msra.mxu3 %v17211_v13  ;;  %9428 = vmatmul.bf16.vlgmr.msra.gmra.mxu0 %v20184_v34  ;;  %v17715_v13 = vor.u32 %v19242_v4, %v17714_v1  ;;  %v17666_v1 = vld [vmem:[%s19566_s7 + $0x2c10] sm:$0xf] }
 0x111   : > { %9476 = vmatpush.bf16.msrb.mxu0 %v17571_v15  ;;  %9442 = vmatmul.bf16.vlgmr.msra.gmra.mxu1 %v20193_v49  ;;  %v12151_v15 = vor.u32 %v17847_v6, %v12148_v7  ;;  %v19230_v6 = vld [vmem:[%s19566_s7 + $0x2c24] sm:$0xf0]  ;;  %v17835_v7 = vld [vmem:[%s19566_s7 + $0x94] sm:$0xf] }
 0x112   : > { %9490 = vmatpush.bf16.msrb.mxu1 %v17763_v21  ;;  %9456 = vmatmul.bf16.vlgmr.msra.gmra.mxu2 %v20191_v46  ;;  %v20216_v21 = vpop.f32.mrf.mxu2 }
 0x113   : > { %9504 = vmatpush.bf16.msrb.mxu2 %v12199_v22  ;;  %9470 = vmatmul.bf16.vlgmr.msra.gmra.mxu3 %v20199_v54  ;;  %23553 = vst [vmem:[#allocation16_spill] sm:$0xff] %v20216_v21  ;;  %v12343_v22 = vor.u32 %v17895_v9, %v12340_v10  ;;  %v9205_v25 = vpop.f32.mrf.mxu0  ;;  %v17883_v9 = vld [vmem:[%s19566_s7 + $0x214] sm:$0xf]  ;;  %v12292_v10 = vld [vmem:[%s19566_s7 + $0x228] sm:$0xf0] }
 0x114   : > { %9518 = vmatpush.bf16.msrb.mxu3 %v12391_v31  ;;  %v20221_v31 = vpop.f32.mrf.mxu3  ;;  %v9206_v50 = vadd.f32 %v9205_v25, %v20148_v8  ;;  %v12100_v8 = vld [vmem:[%s19566_s7 + $0xa8] sm:$0xf0]  ;;  %v12076_v25 = vld [vmem:[%s19566_s7 + $0x78] sm:$0xf0] }
 0x115   : > { %9477 = vmatpush.bf16.msrb.mxu0 %v17547_v55  ;;  %23554 = vst [vmem:[#allocation17_spill] sm:$0xff] %v20221_v31  ;;  %v9219_v55 = vpop.f32.mrf.mxu1  ;;  %v12556_v21 = vld [vmem:[%s19566_s7 + $0x438] sm:$0xf0] }
 0x116   : > { %9491 = vmatpush.bf16.msrb.mxu1 %v17739_v58  ;;  %v17691_v58 = vor.u32 %v19236_v23, %v17690_v19  ;;  %v9220_v4 = vadd.f32 %v9219_v55, %v9206_v50  ;;  %v17642_v19 = vld [vmem:[%s19566_s7 + $0x2be0] sm:$0xf]  ;;  %v17877_v50 = vld [vmem:[%s19566_s7 + $0x1e4] sm:$0xf]  ;;  %v17451_v55 = vor.u32 %v19176_v17, %v17450_v16 }
 0x117   : > { %9505 = vmatpush.bf16.msrb.mxu2 %v12175_v62  ;;  %v12127_v62 = vor.u32 %v17841_v27, %v12124_v28  ;;  %v19224_v27 = vld [vmem:[%s19566_s7 + $0x2bf4] sm:$0xf0]  ;;  %v17829_v28 = vld [vmem:[%s19566_s7 + $0x64] sm:$0xf]  ;;  %v17594_v16 = vld [vmem:[%s19566_s7 + $0x2b80] sm:$0xf] }
 0x118   : > { %9519 = vmatpush.bf16.msrb.mxu3 %v12367_v3  ;;  %v12319_v3 = vor.u32 %v17889_v35, %v12316_v38 }
 0x119   : > { %9478 = vmatpush.bf16.msrb.mxu0 %v17523_v12  ;;  %v17475_v12 = vor.u32 %v19182_v0, %v17474_v63  ;;  %v12079_v63 = vor.u32 %v17829_v28, %v12076_v25  ;;  %v17426_v0 = vld [vmem:[%s19566_s7 + $0x2a30] sm:$0xf]  ;;  %v17865_v25 = vld [vmem:[%s19566_s7 + $0x184] sm:$0xf] }
 0x11a   : > { %9492 = vmatpush.bf16.msrb.mxu1 %v17715_v13  ;;  %v17667_v13 = vor.u32 %v19230_v6, %v17666_v1  ;;  %v9233_v23 = vpop.f32.mrf.mxu2  ;;  %v19170_v1 = vld [vmem:[%s19566_s7 + $0x2a44] sm:$0xf0] }
 0x11b   : > { %9506 = vmatpush.bf16.msrb.mxu2 %v12151_v15  ;;  %v12103_v15 = vor.u32 %v17835_v7, %v12100_v8  ;;  %v9234_v35 = vadd.f32 %v9233_v23, %v9220_v4  ;;  %v19218_v6 = vld [vmem:[%s19566_s7 + $0x2bc4] sm:$0xf0]  ;;  %v17823_v7 = vld [vmem:[%s19566_s7 + $0x34] sm:$0xf]  ;;  %v12052_v8 = vld [vmem:[%s19566_s7 + $0x48] sm:$0xf0] }
 0x11c   : > { %9520 = vmatpush.bf16.msrb.mxu3 %v12343_v22  ;;  %v12295_v22 = vor.u32 %v17883_v9, %v12292_v10  ;;  %v9247_v38 = vpop.f32.mrf.mxu3  ;;  %v17871_v9 = vld [vmem:[%s19566_s7 + $0x1b4] sm:$0xf]  ;;  %v12244_v10 = vld [vmem:[%s19566_s7 + $0x1c8] sm:$0xf0]  ;;  %v17817_v23 = vld [vmem:[%s19566_s7 + $0x4] sm:$0xf] }
 0x11d   : > { %9479 = vmatpush.bf16.msrb.mxu0 %v17499_v51  ;;  %v12268_v51 = vld [vmem:[%s19566_s7 + $0x1f8] sm:$0xf0]  ;;  %v12247_v28 = vor.u32 %v17871_v9, %v12244_v10 }
 0x11e   : > { %9493 = vmatpush.bf16.msrb.mxu1 %v17691_v58  ;;  %v20242_v58 = vadd.f32 %v9247_v38, %v9234_v35  ;;  %v12271_v4 = vor.u32 %v17877_v50, %v12268_v51  ;;  %v12220_v35 = vld [vmem:[%s19566_s7 + $0x198] sm:$0xf0]  ;;  %v17955_v38 = vld [vmem:[%s19566_s7 + $0x454] sm:$0xf]  ;;  %v12580_v50 = vld [vmem:[%s19566_s7 + $0x468] sm:$0xf0] }
 0x11f   : > { %9507 = vmatpush.bf16.msrb.mxu2 %v12127_v62  ;;  %v17643_v62 = vor.u32 %v19224_v27, %v17642_v19  ;;  %v12055_v19 = vor.u32 %v17823_v7, %v12052_v8  ;;  %v12028_v27 = vld [vmem:[%s19566_s7 + $0x18] sm:$0xf0]  ;;  %v18003_v51 = vld [vmem:[%s19566_s7 + $0x5d4] sm:$0xf]  ;;  %v12018_v7 = vld [vmem:[%s19581_s13 + $0x70] sm:$0xf]  ;;  %v12223_v9 = vor.u32 %v17865_v25, %v12220_v35  ;;  %v12583_v10 = vor.u32 %v17955_v38, %v12580_v50  ;;  %v20286_v50 = vpop.f32.mrf.mxu1 }
 0x120   : > { %9521 = vmatpush.bf16.msrb.mxu3 %v12319_v3  ;;  %v17618_v3 = vld [vmem:[%s19566_s7 + $0x2bb0] sm:$0xf]  ;;  %v17816_v8 = vld [vmem:[%s19581_s13 + $0xe4] sm:$0xf0]  ;;  %v18093_v35 = vld [vmem:[%s19566_s7 + $0x8a4] sm:$0xf] }
 0x121   : > { %9480 = vmatpush.bf16.msrb.mxu0 %v17475_v12  ;;  %v17427_v12 = vor.u32 %v19170_v1, %v17426_v0  ;;  %v17619_v17 = vor.u32 %v19218_v6, %v17618_v3  ;;  %v12964_v0 = vld [vmem:[%s19566_s7 + $0x768] sm:$0xf0]  ;;  %v18099_v1 = vld [vmem:[%s19566_s7 + $0x8d4] sm:$0xf]  ;;  %v13132_v38 = vld [vmem:[%s19566_s7 + $0x8b8] sm:$0xf0] }
 0x122   : > { %9494 = vmatpush.bf16.msrb.mxu1 %v17667_v13  ;;  %v17402_v13 = vld [vmem:[%s19566_s7 + $0x2a00] sm:$0xf]  ;;  %v13156_v6 = vld [vmem:[%s19566_s7 + $0x8e8] sm:$0xf0]  ;;  %23558 = vst [vmem:[#allocation21_spill] sm:$0xff] %v20286_v50 }
 0x123   : > { %9508 = vmatpush.bf16.msrb.mxu2 %v12103_v15  ;;  %v19164_v15 = vld [vmem:[%s19566_s7 + $0x2a14] sm:$0xf0]  ;;  %v18189_v50 = vld [vmem:[%s19566_s7 + $0xba4] sm:$0xf] }
 0x124   : > { %9522 = vmatpush.bf16.msrb.mxu3 %v12295_v22  ;;  %v19212_v22 = vld [vmem:[%s19566_s7 + $0x2b94] sm:$0xf0] }
 0x125   : > { %9481 = vmatpush.bf16.msrb.mxu0 %v17451_v55  ;;  %v12772_v55 = vld [vmem:[%s19566_s7 + $0x5e8] sm:$0xf0]  ;;  %v17595_v3 = vor.u32 %v19212_v22, %v17594_v16  ;;  %v13159_v16 = vor.u32 %v18099_v1, %v13156_v6  ;;  %v20275_v22 = vor.u32 %v17816_v8, %v12018_v7  ;;  %v17991_v1 = vld [vmem:[%s19566_s7 + $0x574] sm:$0xf] }
 0x126   : > { %9495 = vmatpush.bf16.msrb.mxu1 %v17643_v62  ;;  %v17403_v62 = vor.u32 %v19164_v15, %v17402_v13  ;;  %v12020_v13 = vld [vmem:[%s19581_s13 + $0xe8] sm:$0xf0]  ;;  %v12775_v15 = vor.u32 %v18003_v51, %v12772_v55  ;;  %v18039_v6 = vld [vmem:[%s19566_s7 + $0x6f4] sm:$0xf]  ;;  %v12916_v7 = vld [vmem:[%s19566_s7 + $0x708] sm:$0xf0] }
 0x127   : > { %9509 = vmatpush.bf16.msrb.mxu2 %v12079_v63  ;;  %v18051_v63 = vld [vmem:[%s19566_s7 + $0x754] sm:$0xf]  ;;  %23555 = vst [vmem:[#allocation18_spill] sm:$0xff] %v20275_v22 }
 0x128   : > { %9523 = vmatpush.bf16.msrb.mxu3 %v12271_v4  ;;  %v12031_v4 = vor.u32 %v17817_v23, %v12028_v27  ;;  %v12967_v31 = vor.u32 %v18051_v63, %v12964_v0  ;;  %v12748_v23 = vld [vmem:[%s19566_s7 + $0x5b8] sm:$0xf0]  ;;  %v18045_v27 = vld [vmem:[%s19566_s7 + $0x724] sm:$0xf]  ;;  %v17943_v63 = vld [vmem:[%s19566_s7 + $0x3f4] sm:$0xf] }
 0x129   : > { %9482 = vmatpush.bf16.msrb.mxu0 %v17427_v12  ;;  %v17801_v12 = vld [vmem:[%s19581_s13 + $0x74] sm:$0xf]  ;;  %v12532_v0 = vld [vmem:[%s19566_s7 + $0x408] sm:$0xf0] }
 0x12a   : > { %9496 = vmatpush.bf16.msrb.mxu1 %v17619_v17  ;;  %v17949_v17 = vld [vmem:[%s19566_s7 + $0x424] sm:$0xf]  ;;  %v20282_v25 = vor.u32 %v17801_v12, %v12020_v13  ;;  %v12508_v12 = vld [vmem:[%s19566_s7 + $0x3d8] sm:$0xf0] }
 0x12b   : > { %9510 = vmatpush.bf16.msrb.mxu2 %v12055_v19  ;;  %v17997_v19 = vld [vmem:[%s19566_s7 + $0x5a4] sm:$0xf]  ;;  %v12559_v51 = vor.u32 %v17949_v17, %v12556_v21  ;;  %v18087_v21 = vld [vmem:[%s19566_s7 + $0x874] sm:$0xf] }
 0x12c   : > { %9524 = vmatpush.bf16.msrb.mxu3 %v12247_v28  ;;  %v20280_v28 = vpop.f32.mrf.mxu0  ;;  %23557 = vst [vmem:[#allocation20_spill] sm:$0xff] %v20282_v25  ;;  %v12751_v55 = vor.u32 %v17997_v19, %v12748_v23  ;;  %v17985_v13 = vld [vmem:[%s19566_s7 + $0x544] sm:$0xf]  ;;  %v12700_v19 = vld [vmem:[%s19566_s7 + $0x558] sm:$0xf0] }
 0x12d   : > { %9483 = vmatpush.bf16.msrb.mxu0 %v17403_v62  ;;  %23556 = vst [vmem:[#allocation19_spill] sm:$0xff] %v20280_v28  ;;  %v12943_v62 = vor.u32 %v18045_v27, %v12940_v53  ;;  %v12535_v53 = vor.u32 %v17943_v63, %v12532_v0  ;;  %v12892_v23 = vld [vmem:[%s19566_s7 + $0x6d8] sm:$0xf0]  ;;  %v20308_v27 = vpop.f32.mrf.mxu3  ;;  %v12703_v0 = vor.u32 %v17985_v13, %v12700_v19 }
 0x12e   : > { %9497 = vmatpush.bf16.msrb.mxu1 %v17595_v3  ;;  %v13135_v3 = vor.u32 %v18093_v35, %v13132_v38  ;;  %23560 = vst [vmem:[#allocation23_spill] sm:$0xff] %v20308_v27  ;;  %v18081_v38 = vld [vmem:[%s19566_s7 + $0x844] sm:$0xf]  ;;  %v9275_v63 = vpop.f32.mrf.mxu1  ;;  %v12460_v19 = vld [vmem:[%s19566_s7 + $0x378] sm:$0xf0] }
 0x12f   : > { %9511 = vmatpush.bf16.msrb.mxu2 %v12031_v4  ;;  %v12724_v4 = vld [vmem:[%s19566_s7 + $0x588] sm:$0xf0]  ;;  %v18141_v27 = vld [vmem:[%s19566_s7 + $0xa24] sm:$0xf]  ;;  %v13516_v28 = vld [vmem:[%s19566_s7 + $0xbb8] sm:$0xf0] }
 0x130   : > { %9525 = vmatpush.bf16.msrb.mxu3 %v12223_v9  ;;  %9484 = vmatmul.bf16.vlgmr.msrb.gmra.mxu0 %v20275_v22  ;;  %v12727_v8 = vor.u32 %v17991_v1, %v12724_v4  ;;  %v12919_v9 = vor.u32 %v18039_v6, %v12916_v7  ;;  %v12484_v4 = vld [vmem:[%s19566_s7 + $0x3a8] sm:$0xf0]  ;;  %v17979_v6 = vld [vmem:[%s19566_s7 + $0x514] sm:$0xf] }
 0x131   : > { %9532 = vmatpush.bf16.msra.mxu0 %v12583_v10  ;;  %9498 = vmatmul.bf16.vlgmr.msrb.gmra.mxu1 %v20282_v25  ;;  %v17937_v10 = vld [vmem:[%s19566_s7 + $0x3c4] sm:$0xf] }
 0x132   : > { %9546 = vmatpush.bf16.msra.mxu1 %v12775_v15  ;;  %9512 = vmatmul.bf16.vlgmr.msrb.gmra.mxu2 %v19669_v59  ;;  %v20303_v15 = vpop.f32.mrf.mxu2 }
 0x133   : > { %9560 = vmatpush.bf16.msra.mxu2 %v12967_v31  ;;  %v13108_v31 = vld [vmem:[%s19566_s7 + $0x888] sm:$0xf0]  ;;  %9526 = vmatmul.bf16.vlgmr.msrb.gmra.mxu3 %v19685_v11  ;;  %23559 = vst [vmem:[#allocation22_spill] sm:$0xff] %v20303_v15  ;;  %v13324_v15 = vld [vmem:[%s19566_s7 + $0xa38] sm:$0xf0] }
 0x134   : > { %9574 = vmatpush.bf16.msra.mxu3 %v13159_v16  ;;  %v13111_v17 = vor.u32 %v18087_v21, %v13108_v31  ;;  %v18033_v16 = vld [vmem:[%s19566_s7 + $0x6c4] sm:$0xf]  ;;  %v9261_v35 = vpop.f32.mrf.mxu0  ;;  %v12676_v31 = vld [vmem:[%s19566_s7 + $0x528] sm:$0xf0] }
 0x135   : > { %9533 = vmatpush.bf16.msra.mxu0 %v12559_v51  ;;  %v13084_v51 = vld [vmem:[%s19566_s7 + $0x858] sm:$0xf0]  ;;  %v12895_v1 = vor.u32 %v18033_v16, %v12892_v23  ;;  %v17973_v16 = vld [vmem:[%s19566_s7 + $0x4e4] sm:$0xf] }
 0x136   : > { %9547 = vmatpush.bf16.msra.mxu1 %v12751_v55  ;;  %v9262_v55 = vadd.f32 %v9261_v35, %v20242_v58  ;;  %v13087_v7 = vor.u32 %v18081_v38, %v13084_v51  ;;  %v12868_v58 = vld [vmem:[%s19566_s7 + $0x6a8] sm:$0xf0]  ;;  %v12652_v38 = vld [vmem:[%s19566_s7 + $0x4f8] sm:$0xf0]  ;;  %v18021_v51 = vld [vmem:[%s19566_s7 + $0x664] sm:$0xf] }
 0x137   : > { %9561 = vmatpush.bf16.msra.mxu2 %v12943_v62  ;;  %v12511_v62 = vor.u32 %v17937_v10, %v12508_v12  ;;  %v18075_v10 = vld [vmem:[%s19566_s7 + $0x814] sm:$0xf]  ;;  %v12679_v12 = vor.u32 %v17979_v6, %v12676_v31  ;;  %v12655_v6 = vor.u32 %v17973_v16, %v12652_v38  ;;  %v12412_v16 = vld [vmem:[%s19566_s7 + $0x318] sm:$0xf0]  ;;  %v17961_v38 = vld [vmem:[%s19566_s7 + $0x484] sm:$0xf] }
 0x138   : > { %9575 = vmatpush.bf16.msra.mxu3 %v13135_v3  ;;  %v17931_v3 = vld [vmem:[%s19566_s7 + $0x394] sm:$0xf]  ;;  %v9276_v21 = vadd.f32 %v9275_v63, %v9262_v55  ;;  %v12844_v55 = vld [vmem:[%s19566_s7 + $0x678] sm:$0xf0]  ;;  %v9303_v63 = vpop.f32.mrf.mxu3 }
 0x139   : > { %9534 = vmatpush.bf16.msra.mxu0 %v12535_v53  ;;  %v18027_v53 = vld [vmem:[%s19566_s7 + $0x694] sm:$0xf] }
 0x13a   : > { %9548 = vmatpush.bf16.msra.mxu1 %v12727_v8  ;;  %v13060_v8 = vld [vmem:[%s19566_s7 + $0x828] sm:$0xf0]  ;;  %v12871_v13 = vor.u32 %v18027_v53, %v12868_v58  ;;  %v9289_v35 = vpop.f32.mrf.mxu2  ;;  %v17919_v31 = vld [vmem:[%s19566_s7 + $0x334] sm:$0xf] }
 0x13b   : > { %9562 = vmatpush.bf16.msra.mxu2 %v12919_v9  ;;  %v12487_v9 = vor.u32 %v17931_v3, %v12484_v4  ;;  %v13063_v23 = vor.u32 %v18075_v10, %v13060_v8  ;;  %v17967_v53 = vld [vmem:[%s19566_s7 + $0x4b4] sm:$0xf]  ;;  %v12628_v10 = vld [vmem:[%s19566_s7 + $0x4c8] sm:$0xf0] }
 0x13c   : > { %9576 = vmatpush.bf16.msra.mxu3 %v13111_v17  ;;  %v17925_v17 = vld [vmem:[%s19566_s7 + $0x364] sm:$0xf]  ;;  %v18015_v8 = vld [vmem:[%s19566_s7 + $0x634] sm:$0xf] }
 0x13d   : > { %9535 = vmatpush.bf16.msra.mxu0 %v12511_v62  ;;  %v9290_v62 = vadd.f32 %v9289_v35, %v9276_v21  ;;  %v12463_v3 = vor.u32 %v17925_v17, %v12460_v19  ;;  %v12436_v21 = vld [vmem:[%s19566_s7 + $0x348] sm:$0xf0]  ;;  %v17913_v19 = vld [vmem:[%s19566_s7 + $0x304] sm:$0xf] }
 0x13e   : > { %9549 = vmatpush.bf16.msra.mxu1 %v12703_v0  ;;  %v18069_v0 = vld [vmem:[%s19566_s7 + $0x7e4] sm:$0xf]  ;;  %v12439_v17 = vor.u32 %v17919_v31, %v12436_v21  ;;  %v13348_v31 = vld [vmem:[%s19566_s7 + $0xa68] sm:$0xf0]  ;;  %v18195_v21 = vld [vmem:[%s19566_s7 + $0xbd4] sm:$0xf] }
 0x13f   : > { %9563 = vmatpush.bf16.msra.mxu2 %v12895_v1  ;;  %v13036_v1 = vld [vmem:[%s19566_s7 + $0x7f8] sm:$0xf0]  ;;  %v20329_v4 = vadd.f32 %v9303_v63, %v9290_v62 }
 0x140   : > { %9577 = vmatpush.bf16.msra.mxu3 %v13087_v7  ;;  %v12847_v7 = vor.u32 %v18021_v51, %v12844_v55  ;;  %v13039_v58 = vor.u32 %v18069_v0, %v13036_v1  ;;  %v12604_v51 = vld [vmem:[%s19566_s7 + $0x498] sm:$0xf0]  ;;  %v18009_v55 = vld [vmem:[%s19566_s7 + $0x604] sm:$0xf] }
 0x141   : > { %9536 = vmatpush.bf16.msra.mxu0 %v12487_v9  ;;  %v12820_v9 = vld [vmem:[%s19566_s7 + $0x648] sm:$0xf0]  ;;  %v12796_v63 = vld [vmem:[%s19566_s7 + $0x618] sm:$0xf0]  ;;  %v18057_v0 = vld [vmem:[%s19566_s7 + $0x784] sm:$0xf] }
 0x142   : > { %9550 = vmatpush.bf16.msra.mxu1 %v12679_v12  ;;  %v18063_v12 = vld [vmem:[%s19566_s7 + $0x7b4] sm:$0xf]  ;;  %v12823_v35 = vor.u32 %v18015_v8, %v12820_v9  ;;  %v12988_v1 = vld [vmem:[%s19566_s7 + $0x798] sm:$0xf0]  ;;  %v12799_v8 = vor.u32 %v18009_v55, %v12796_v63  ;;  %v18285_v55 = vld [vmem:[%s19566_s7 + $0xea4] sm:$0xf]  ;;  %v20365_v63 = vpop.f32.mrf.mxu1 }
 0x143   : > { %9564 = vmatpush.bf16.msra.mxu2 %v12871_v13  ;;  %v13012_v13 = vld [vmem:[%s19566_s7 + $0x7c8] sm:$0xf0]  ;;  %v18291_v9 = vld [vmem:[%s19566_s7 + $0xed4] sm:$0xf]  ;;  %23562 = vst [vmem:[#allocation25_spill] sm:$0xff] %v20365_v63 }
 0x144   : > { %9578 = vmatpush.bf16.msra.mxu3 %v13063_v23  ;;  %v12631_v23 = vor.u32 %v17967_v53, %v12628_v10  ;;  %v13015_v62 = vor.u32 %v18063_v12, %v13012_v13  ;;  %v18243_v53 = vld [vmem:[%s19566_s7 + $0xd54] sm:$0xf]  ;;  %v13732_v10 = vld [vmem:[%s19566_s7 + $0xd68] sm:$0xf0]  ;;  %v12991_v13 = vor.u32 %v18057_v0, %v12988_v1  ;;  %v13327_v0 = vor.u32 %v18141_v27, %v13324_v15  ;;  %v18381_v63 = vld [vmem:[%s19566_s7 + $0x11a4] sm:$0xf] }
 0x145   : > { %9537 = vmatpush.bf16.msra.mxu0 %v12463_v3  ;;  %v18147_v3 = vld [vmem:[%s19566_s7 + $0xa54] sm:$0xf]  ;;  %v13924_v12 = vld [vmem:[%s19566_s7 + $0xee8] sm:$0xf0]  ;;  %v13519_v1 = vor.u32 %v18189_v50, %v13516_v28 }
 0x146   : > { %9551 = vmatpush.bf16.msra.mxu1 %v12655_v6  ;;  %v12415_v6 = vor.u32 %v17913_v19, %v12412_v16  ;;  %v13735_v16 = vor.u32 %v18243_v53, %v13732_v10  ;;  %v13492_v53 = vld [vmem:[%s19566_s7 + $0xb88] sm:$0xf0]  ;;  %v18231_v10 = vld [vmem:[%s19566_s7 + $0xcf4] sm:$0xf] }
 0x147   : > { %9565 = vmatpush.bf16.msra.mxu2 %v12847_v7  ;;  %v13540_v7 = vld [vmem:[%s19566_s7 + $0xbe8] sm:$0xf0]  ;;  %v18279_v28 = vld [vmem:[%s19566_s7 + $0xe74] sm:$0xf] }
 0x148   : > { %9579 = vmatpush.bf16.msra.mxu3 %v13039_v58  ;;  %v12607_v58 = vor.u32 %v17961_v38, %v12604_v51  ;;  %v13543_v19 = vor.u32 %v18195_v21, %v13540_v7  ;;  %v13708_v38 = vld [vmem:[%s19566_s7 + $0xd38] sm:$0xf0]  ;;  %v20361_v51 = vpop.f32.mrf.mxu0  ;;  %v13300_v21 = vld [vmem:[%s19566_s7 + $0xa08] sm:$0xf0] }
 0x149   : > { %9538 = vmatpush.bf16.msra.mxu0 %v12439_v17  ;;  %v13351_v17 = vor.u32 %v18147_v3, %v13348_v31  ;;  %23561 = vst [vmem:[#allocation24_spill] sm:$0xff] %v20361_v51  ;;  %v18135_v31 = vld [vmem:[%s19566_s7 + $0x9f4] sm:$0xf]  ;;  %v13876_v50 = vld [vmem:[%s19566_s7 + $0xe88] sm:$0xf0] }
 0x14a   : > { %9552 = vmatpush.bf16.msra.mxu1 %v12631_v23  ;;  %v13927_v23 = vor.u32 %v18291_v9, %v13924_v12  ;;  %v13303_v15 = vor.u32 %v18135_v31, %v13300_v21  ;;  %v18129_v9 = vld [vmem:[%s19566_s7 + $0x9c4] sm:$0xf]  ;;  %v13276_v12 = vld [vmem:[%s19566_s7 + $0x9d8] sm:$0xf0] }
 0x14b   : > { %9566 = vmatpush.bf16.msra.mxu2 %v12823_v35  ;;  %v18237_v35 = vld [vmem:[%s19566_s7 + $0xd24] sm:$0xf]  ;;  %v14284_v51 = vld [vmem:[%s19566_s7 + $0x11b8] sm:$0xf0] }
 0x14c   : > { %9580 = vmatpush.bf16.msra.mxu3 %v13015_v62  ;;  %v13900_v62 = vld [vmem:[%s19566_s7 + $0xeb8] sm:$0xf0]  ;;  %v13711_v3 = vor.u32 %v18237_v35, %v13708_v38  ;;  %v20387_v38 = vpop.f32.mrf.mxu3 }
 0x14d   : > { %9539 = vmatpush.bf16.msra.mxu0 %v12415_v6  ;;  %v18183_v6 = vld [vmem:[%s19566_s7 + $0xb74] sm:$0xf]  ;;  %v13903_v7 = vor.u32 %v18285_v55, %v13900_v62  ;;  %v13660_v35 = vld [vmem:[%s19566_s7 + $0xcd8] sm:$0xf0]  ;;  %23564 = vst [vmem:[#allocation27_spill] sm:$0xff] %v20387_v38 }
 0x14e   : > { %9553 = vmatpush.bf16.msra.mxu1 %v12607_v58  ;;  %v13684_v58 = vld [vmem:[%s19566_s7 + $0xd08] sm:$0xf0]  ;;  %v13495_v27 = vor.u32 %v18183_v6, %v13492_v53  ;;  %v18273_v62 = vld [vmem:[%s19566_s7 + $0xe44] sm:$0xf]  ;;  %v9331_v31 = vpop.f32.mrf.mxu1 }
 0x14f   : > { %9567 = vmatpush.bf16.msra.mxu2 %v12799_v8  ;;  %v13687_v8 = vor.u32 %v18231_v10, %v13684_v58  ;;  %v13252_v53 = vld [vmem:[%s19566_s7 + $0x9a8] sm:$0xf0]  ;;  %v18171_v10 = vld [vmem:[%s19566_s7 + $0xb14] sm:$0xf]  ;;  %v18333_v38 = vld [vmem:[%s19566_s7 + $0x1024] sm:$0xf] }
 0x150   : > { %9581 = vmatpush.bf16.msra.mxu3 %v12991_v13  ;;  %9540 = vmatmul.bf16.vlgmr.msra.gmra.mxu0 %v19675_v2  ;;  %v18177_v13 = vld [vmem:[%s19566_s7 + $0xb44] sm:$0xf]  ;;  %v9317_v55 = vpop.f32.mrf.mxu0 }
 0x151   : > { %9588 = vmatpush.bf16.msrb.mxu0 %v13351_v17  ;;  %9554 = vmatmul.bf16.vlgmr.msra.gmra.mxu1 %v19691_v18  ;;  %v20382_v17 = vpop.f32.mrf.mxu2 }
 0x152   : > { %9602 = vmatpush.bf16.msrb.mxu1 %v13543_v19  ;;  %9568 = vmatmul.bf16.vlgmr.msra.gmra.mxu2 %v19751_v40  ;;  %23563 = vst [vmem:[#allocation26_spill] sm:$0xff] %v20382_v17  ;;  %v13879_v19 = vor.u32 %v18279_v28, %v13876_v50  ;;  %v13444_v50 = vld [vmem:[%s19566_s7 + $0xb28] sm:$0xf0]  ;;  %v14092_v17 = vld [vmem:[%s19566_s7 + $0x1038] sm:$0xf0] }
 0x153   : > { %9616 = vmatpush.bf16.msrb.mxu2 %v13735_v16  ;;  %9582 = vmatmul.bf16.vlgmr.msra.gmra.mxu3 %v19758_v45  ;;  %v13468_v16 = vld [vmem:[%s19566_s7 + $0xb58] sm:$0xf0] }
 0x154   : > { %9630 = vmatpush.bf16.msrb.mxu3 %v13927_v23  ;;  %v18225_v23 = vld [vmem:[%s19566_s7 + $0xcc4] sm:$0xf]  ;;  %v13471_v21 = vor.u32 %v18177_v13, %v13468_v16  ;;  %v13228_v16 = vld [vmem:[%s19566_s7 + $0x978] sm:$0xf0] }
 0x155   : > { %9589 = vmatpush.bf16.msrb.mxu0 %v13327_v0  ;;  %v13852_v0 = vld [vmem:[%s19566_s7 + $0xe58] sm:$0xf0]  ;;  %v13663_v6 = vor.u32 %v18225_v23, %v13660_v35  ;;  %v18165_v23 = vld [vmem:[%s19566_s7 + $0xae4] sm:$0xf] }
 0x156   : > { %9603 = vmatpush.bf16.msrb.mxu1 %v13519_v1  ;;  %v9318_v1 = vadd.f32 %v9317_v55, %v20329_v4  ;;  %v13855_v58 = vor.u32 %v18273_v62, %v13852_v0  ;;  %v13636_v4 = vld [vmem:[%s19566_s7 + $0xca8] sm:$0xf0]  ;;  %v13420_v62 = vld [vmem:[%s19566_s7 + $0xaf8] sm:$0xf0]  ;;  %v18213_v0 = vld [vmem:[%s19566_s7 + $0xc64] sm:$0xf] }
 0x157   : > { %9617 = vmatpush.bf16.msrb.mxu2 %v13711_v3  ;;  %v13279_v3 = vor.u32 %v18129_v9, %v13276_v12  ;;  %v18267_v9 = vld [vmem:[%s19566_s7 + $0xe14] sm:$0xf]  ;;  %v13447_v12 = vor.u32 %v18171_v10, %v13444_v50  ;;  %v13423_v10 = vor.u32 %v18165_v23, %v13420_v62  ;;  %v13180_v23 = vld [vmem:[%s19566_s7 + $0x918] sm:$0xf0]  ;;  %v18153_v62 = vld [vmem:[%s19566_s7 + $0xa84] sm:$0xf] }
 0x158   : > { %9631 = vmatpush.bf16.msrb.mxu3 %v13903_v7  ;;  %v18123_v7 = vld [vmem:[%s19566_s7 + $0x994] sm:$0xf]  ;;  %v9332_v28 = vadd.f32 %v9331_v31, %v9318_v1  ;;  %v13612_v1 = vld [vmem:[%s19566_s7 + $0xc78] sm:$0xf0]  ;;  %v9359_v31 = vpop.f32.mrf.mxu3 }
 0x159   : > { %9590 = vmatpush.bf16.msrb.mxu0 %v13303_v15  ;;  %v18219_v15 = vld [vmem:[%s19566_s7 + $0xc94] sm:$0xf]  ;;  %v9345_v55 = vpop.f32.mrf.mxu2 }
 0x15a   : > { %9604 = vmatpush.bf16.msrb.mxu1 %v13495_v27  ;;  %v13828_v27 = vld [vmem:[%s19566_s7 + $0xe28] sm:$0xf0]  ;;  %v13639_v13 = vor.u32 %v18219_v15, %v13636_v4  ;;  %v18111_v50 = vld [vmem:[%s19566_s7 + $0x934] sm:$0xf] }
 0x15b   : > { %9618 = vmatpush.bf16.msrb.mxu2 %v13687_v8  ;;  %v13255_v8 = vor.u32 %v18123_v7, %v13252_v53  ;;  %v13831_v35 = vor.u32 %v18267_v9, %v13828_v27  ;;  %v18159_v15 = vld [vmem:[%s19566_s7 + $0xab4] sm:$0xf]  ;;  %v13396_v9 = vld [vmem:[%s19566_s7 + $0xac8] sm:$0xf0] }
 0x15c   : > { %9632 = vmatpush.bf16.msrb.mxu3 %v13879_v19  ;;  %v18117_v19 = vld [vmem:[%s19566_s7 + $0x964] sm:$0xf]  ;;  %v18207_v27 = vld [vmem:[%s19566_s7 + $0xc34] sm:$0xf] }
 0x15d   : > { %9591 = vmatpush.bf16.msrb.mxu0 %v13279_v3  ;;  %v9346_v3 = vadd.f32 %v9345_v55, %v9332_v28  ;;  %v13231_v7 = vor.u32 %v18117_v19, %v13228_v16  ;;  %v13204_v28 = vld [vmem:[%s19566_s7 + $0x948] sm:$0xf0]  ;;  %v18105_v16 = vld [vmem:[%s19566_s7 + $0x904] sm:$0xf] }
 0x15e   : > { %9605 = vmatpush.bf16.msrb.mxu1 %v13471_v21  ;;  %v18261_v21 = vld [vmem:[%s19566_s7 + $0xde4] sm:$0xf]  ;;  %v13207_v19 = vor.u32 %v18111_v50, %v13204_v28  ;;  %v14116_v50 = vld [vmem:[%s19566_s7 + $0x1068] sm:$0xf0]  ;;  %v18387_v28 = vld [vmem:[%s19566_s7 + $0x11d4] sm:$0xf] }
 0x15f   : > { %9619 = vmatpush.bf16.msrb.mxu2 %v13663_v6  ;;  %v13804_v6 = vld [vmem:[%s19566_s7 + $0xdf8] sm:$0xf0]  ;;  %v20408_v53 = vadd.f32 %v9359_v31, %v9346_v3 }
 0x160   : > { %9633 = vmatpush.bf16.msrb.mxu3 %v13855_v58  ;;  %v13615_v58 = vor.u32 %v18213_v0, %v13612_v1  ;;  %v13807_v4 = vor.u32 %v18261_v21, %v13804_v6  ;;  %v13372_v0 = vld [vmem:[%s19566_s7 + $0xa98] sm:$0xf0]  ;;  %v18201_v1 = vld [vmem:[%s19566_s7 + $0xc04] sm:$0xf] }
 0x161   : > { %9592 = vmatpush.bf16.msrb.mxu0 %v13255_v8  ;;  %v13588_v8 = vld [vmem:[%s19566_s7 + $0xc48] sm:$0xf0]  ;;  %v13564_v31 = vld [vmem:[%s19566_s7 + $0xc18] sm:$0xf0]  ;;  %v18249_v21 = vld [vmem:[%s19566_s7 + $0xd84] sm:$0xf] }
 0x162   : > { %9606 = vmatpush.bf16.msrb.mxu1 %v13447_v12  ;;  %v18255_v12 = vld [vmem:[%s19566_s7 + $0xdb4] sm:$0xf]  ;;  %v13591_v55 = vor.u32 %v18207_v27, %v13588_v8  ;;  %v13756_v6 = vld [vmem:[%s19566_s7 + $0xd98] sm:$0xf0]  ;;  %v13567_v27 = vor.u32 %v18201_v1, %v13564_v31  ;;  %v18477_v1 = vld [vmem:[%s19566_s7 + $0x14a4] sm:$0xf]  ;;  %v20444_v31 = vpop.f32.mrf.mxu1 }
 0x163   : > { %9620 = vmatpush.bf16.msrb.mxu2 %v13639_v13  ;;  %v13780_v13 = vld [vmem:[%s19566_s7 + $0xdc8] sm:$0xf0]  ;;  %v18483_v8 = vld [vmem:[%s19566_s7 + $0x14d4] sm:$0xf]  ;;  %23566 = vst [vmem:[#allocation29_spill] sm:$0xff] %v20444_v31 }
 0x164   : > { %9634 = vmatpush.bf16.msrb.mxu3 %v13831_v35  ;;  %v13399_v35 = vor.u32 %v18159_v15, %v13396_v9  ;;  %v13783_v3 = vor.u32 %v18255_v12, %v13780_v13  ;;  %v18435_v15 = vld [vmem:[%s19566_s7 + $0x1354] sm:$0xf]  ;;  %v14500_v9 = vld [vmem:[%s19566_s7 + $0x1368] sm:$0xf0]  ;;  %v13759_v13 = vor.u32 %v18249_v21, %v13756_v6  ;;  %v14095_v21 = vor.u32 %v18333_v38, %v14092_v17  ;;  %v18573_v31 = vld [vmem:[%s19566_s7 + $0x17a4] sm:$0xf] }
 0x165   : > { %9593 = vmatpush.bf16.msrb.mxu0 %v13231_v7  ;;  %v18339_v7 = vld [vmem:[%s19566_s7 + $0x1054] sm:$0xf]  ;;  %v14692_v12 = vld [vmem:[%s19566_s7 + $0x14e8] sm:$0xf0]  ;;  %v14287_v6 = vor.u32 %v18381_v63, %v14284_v51 }
 0x166   : > { %9607 = vmatpush.bf16.msrb.mxu1 %v13423_v10  ;;  %v13183_v10 = vor.u32 %v18105_v16, %v13180_v23  ;;  %v14503_v23 = vor.u32 %v18435_v15, %v14500_v9  ;;  %v14260_v15 = vld [vmem:[%s19566_s7 + $0x1188] sm:$0xf0]  ;;  %v18423_v9 = vld [vmem:[%s19566_s7 + $0x12f4] sm:$0xf] }
 0x167   : > { %9621 = vmatpush.bf16.msrb.mxu2 %v13615_v58  ;;  %v14308_v58 = vld [vmem:[%s19566_s7 + $0x11e8] sm:$0xf0]  ;;  %v18471_v51 = vld [vmem:[%s19566_s7 + $0x1474] sm:$0xf] }
 0x168   : > { %9635 = vmatpush.bf16.msrb.mxu3 %v13807_v4  ;;  %v13375_v4 = vor.u32 %v18153_v62, %v13372_v0  ;;  %v14311_v16 = vor.u32 %v18387_v28, %v14308_v58  ;;  %v14476_v62 = vld [vmem:[%s19566_s7 + $0x1338] sm:$0xf0]  ;;  %v20440_v0 = vpop.f32.mrf.mxu0  ;;  %v14068_v28 = vld [vmem:[%s19566_s7 + $0x1008] sm:$0xf0] }
 0x169   : > { %9594 = vmatpush.bf16.msrb.mxu0 %v13207_v19  ;;  %v14119_v19 = vor.u32 %v18339_v7, %v14116_v50  ;;  %23565 = vst [vmem:[#allocation28_spill] sm:$0xff] %v20440_v0  ;;  %v18327_v50 = vld [vmem:[%s19566_s7 + $0xff4] sm:$0xf]  ;;  %v14644_v63 = vld [vmem:[%s19566_s7 + $0x1488] sm:$0xf0] }
 0x16a   : > { %9608 = vmatpush.bf16.msrb.mxu1 %v13399_v35  ;;  %v14695_v35 = vor.u32 %v18483_v8, %v14692_v12  ;;  %v14071_v17 = vor.u32 %v18327_v50, %v14068_v28  ;;  %v18321_v8 = vld [vmem:[%s19566_s7 + $0xfc4] sm:$0xf]  ;;  %v14044_v12 = vld [vmem:[%s19566_s7 + $0xfd8] sm:$0xf0] }
 0x16b   : > { %9622 = vmatpush.bf16.msrb.mxu2 %v13591_v55  ;;  %v18429_v55 = vld [vmem:[%s19566_s7 + $0x1324] sm:$0xf]  ;;  %v15052_v0 = vld [vmem:[%s19566_s7 + $0x17b8] sm:$0xf0] }
 0x16c   : > { %9636 = vmatpush.bf16.msrb.mxu3 %v13783_v3  ;;  %v14668_v3 = vld [vmem:[%s19566_s7 + $0x14b8] sm:$0xf0]  ;;  %v14479_v7 = vor.u32 %v18429_v55, %v14476_v62  ;;  %v20466_v62 = vpop.f32.mrf.mxu3 }
 0x16d   : > { %9595 = vmatpush.bf16.msrb.mxu0 %v13183_v10  ;;  %v18375_v10 = vld [vmem:[%s19566_s7 + $0x1174] sm:$0xf]  ;;  %v14671_v58 = vor.u32 %v18477_v1, %v14668_v3  ;;  %v14428_v55 = vld [vmem:[%s19566_s7 + $0x12d8] sm:$0xf0]  ;;  %23568 = vst [vmem:[#allocation31_spill] sm:$0xff] %v20466_v62 }
 0x16e   : > { %9609 = vmatpush.bf16.msrb.mxu1 %v13375_v4  ;;  %v14452_v4 = vld [vmem:[%s19566_s7 + $0x1308] sm:$0xf0]  ;;  %v14263_v38 = vor.u32 %v18375_v10, %v14260_v15  ;;  %v18465_v3 = vld [vmem:[%s19566_s7 + $0x1444] sm:$0xf]  ;;  %v9387_v50 = vpop.f32.mrf.mxu1 }
 0x16f   : > { %9623 = vmatpush.bf16.msrb.mxu2 %v13567_v27  ;;  %v14455_v27 = vor.u32 %v18423_v9, %v14452_v4  ;;  %v14020_v15 = vld [vmem:[%s19566_s7 + $0xfa8] sm:$0xf0]  ;;  %v18363_v9 = vld [vmem:[%s19566_s7 + $0x1114] sm:$0xf]  ;;  %v18525_v62 = vld [vmem:[%s19566_s7 + $0x1624] sm:$0xf] }
 0x170   : > { %9637 = vmatpush.bf16.msrb.mxu3 %v13759_v13  ;;  %9596 = vmatmul.bf16.vlgmr.msrb.gmra.mxu0 %v19756_v44  ;;  %v18369_v13 = vld [vmem:[%s19566_s7 + $0x1144] sm:$0xf]  ;;  %v9373_v1 = vpop.f32.mrf.mxu0 }
 0x171   : > { %9644 = vmatpush.bf16.msra.mxu0 %v14119_v19  ;;  %9610 = vmatmul.bf16.vlgmr.msrb.gmra.mxu1 %v19762_v48  ;;  %v20461_v19 = vpop.f32.mrf.mxu2 }
 0x172   : > { %9658 = vmatpush.bf16.msra.mxu1 %v14311_v16  ;;  %9624 = vmatmul.bf16.vlgmr.msrb.gmra.mxu2 %v19835_v32  ;;  %23567 = vst [vmem:[#allocation30_spill] sm:$0xff] %v20461_v19  ;;  %v14647_v16 = vor.u32 %v18471_v51, %v14644_v63  ;;  %v14212_v63 = vld [vmem:[%s19566_s7 + $0x1128] sm:$0xf0]  ;;  %v14860_v19 = vld [vmem:[%s19566_s7 + $0x1638] sm:$0xf0] }
 0x173   : > { %9672 = vmatpush.bf16.msra.mxu2 %v14503_v23  ;;  %9638 = vmatmul.bf16.vlgmr.msrb.gmra.mxu3 %v19842_v37  ;;  %v14236_v23 = vld [vmem:[%s19566_s7 + $0x1158] sm:$0xf0] }
 0x174   : > { %9686 = vmatpush.bf16.msra.mxu3 %v14695_v35  ;;  %v18417_v35 = vld [vmem:[%s19566_s7 + $0x12c4] sm:$0xf]  ;;  %v14239_v28 = vor.u32 %v18369_v13, %v14236_v23  ;;  %v13996_v23 = vld [vmem:[%s19566_s7 + $0xf78] sm:$0xf0] }
 0x175   : > { %9645 = vmatpush.bf16.msra.mxu0 %v14095_v21  ;;  %v14620_v21 = vld [vmem:[%s19566_s7 + $0x1458] sm:$0xf0]  ;;  %v14431_v10 = vor.u32 %v18417_v35, %v14428_v55  ;;  %v18357_v35 = vld [vmem:[%s19566_s7 + $0x10e4] sm:$0xf] }
 0x176   : > { %9659 = vmatpush.bf16.msra.mxu1 %v14287_v6  ;;  %v9374_v6 = vadd.f32 %v9373_v1, %v20408_v53  ;;  %v14623_v4 = vor.u32 %v18465_v3, %v14620_v21  ;;  %v14404_v53 = vld [vmem:[%s19566_s7 + $0x12a8] sm:$0xf0]  ;;  %v14188_v3 = vld [vmem:[%s19566_s7 + $0x10f8] sm:$0xf0]  ;;  %v18405_v21 = vld [vmem:[%s19566_s7 + $0x1264] sm:$0xf] }
 0x177   : > { %9673 = vmatpush.bf16.msra.mxu2 %v14479_v7  ;;  %v14047_v7 = vor.u32 %v18321_v8, %v14044_v12  ;;  %v18459_v8 = vld [vmem:[%s19566_s7 + $0x1414] sm:$0xf]  ;;  %v14215_v12 = vor.u32 %v18363_v9, %v14212_v63  ;;  %v14191_v9 = vor.u32 %v18357_v35, %v14188_v3  ;;  %v13948_v35 = vld [vmem:[%s19566_s7 + $0xf18] sm:$0xf0]  ;;  %v18345_v3 = vld [vmem:[%s19566_s7 + $0x1084] sm:$0xf] }
 0x178   : > { %9687 = vmatpush.bf16.msra.mxu3 %v14671_v58  ;;  %v18315_v58 = vld [vmem:[%s19566_s7 + $0xf94] sm:$0xf]  ;;  %v9388_v51 = vadd.f32 %v9387_v50, %v9374_v6  ;;  %v14380_v6 = vld [vmem:[%s19566_s7 + $0x1278] sm:$0xf0]  ;;  %v9415_v50 = vpop.f32.mrf.mxu3 }
 0x179   : > { %9646 = vmatpush.bf16.msra.mxu0 %v14071_v17  ;;  %v18411_v17 = vld [vmem:[%s19566_s7 + $0x1294] sm:$0xf]  ;;  %v9401_v1 = vpop.f32.mrf.mxu2 }
 0x17a   : > { %9660 = vmatpush.bf16.msra.mxu1 %v14263_v38  ;;  %v14596_v38 = vld [vmem:[%s19566_s7 + $0x1428] sm:$0xf0]  ;;  %v14407_v13 = vor.u32 %v18411_v17, %v14404_v53  ;;  %v18303_v63 = vld [vmem:[%s19566_s7 + $0xf34] sm:$0xf] }
 0x17b   : > { %9674 = vmatpush.bf16.msra.mxu2 %v14455_v27  ;;  %v14023_v27 = vor.u32 %v18315_v58, %v14020_v15  ;;  %v14599_v55 = vor.u32 %v18459_v8, %v14596_v38  ;;  %v18351_v17 = vld [vmem:[%s19566_s7 + $0x10b4] sm:$0xf]  ;;  %v14164_v8 = vld [vmem:[%s19566_s7 + $0x10c8] sm:$0xf0] }
 0x17c   : > { %9688 = vmatpush.bf16.msra.mxu3 %v14647_v16  ;;  %v18309_v16 = vld [vmem:[%s19566_s7 + $0xf64] sm:$0xf]  ;;  %v18399_v38 = vld [vmem:[%s19566_s7 + $0x1234] sm:$0xf] }
 0x17d   : > { %9647 = vmatpush.bf16.msra.mxu0 %v14047_v7  ;;  %v9402_v7 = vadd.f32 %v9401_v1, %v9388_v51  ;;  %v13999_v58 = vor.u32 %v18309_v16, %v13996_v23  ;;  %v13972_v51 = vld [vmem:[%s19566_s7 + $0xf48] sm:$0xf0]  ;;  %v18297_v23 = vld [vmem:[%s19566_s7 + $0xf04] sm:$0xf] }
 0x17e   : > { %9661 = vmatpush.bf16.msra.mxu1 %v14239_v28  ;;  %v18453_v28 = vld [vmem:[%s19566_s7 + $0x13e4] sm:$0xf]  ;;  %v13975_v16 = vor.u32 %v18303_v63, %v13972_v51  ;;  %v14884_v63 = vld [vmem:[%s19566_s7 + $0x1668] sm:$0xf0]  ;;  %v18579_v51 = vld [vmem:[%s19566_s7 + $0x17d4] sm:$0xf] }
 0x17f   : > { %9675 = vmatpush.bf16.msra.mxu2 %v14431_v10  ;;  %v14572_v10 = vld [vmem:[%s19566_s7 + $0x13f8] sm:$0xf0]  ;;  %v20487_v15 = vadd.f32 %v9415_v50, %v9402_v7 }
 0x180   : > { %9689 = vmatpush.bf16.msra.mxu3 %v14623_v4  ;;  %v14383_v4 = vor.u32 %v18405_v21, %v14380_v6  ;;  %v14575_v53 = vor.u32 %v18453_v28, %v14572_v10  ;;  %v14140_v21 = vld [vmem:[%s19566_s7 + $0x1098] sm:$0xf0]  ;;  %v18393_v6 = vld [vmem:[%s19566_s7 + $0x1204] sm:$0xf] }
 0x181   : > { %9648 = vmatpush.bf16.msra.mxu0 %v14023_v27  ;;  %v14356_v27 = vld [vmem:[%s19566_s7 + $0x1248] sm:$0xf0]  ;;  %v14332_v50 = vld [vmem:[%s19566_s7 + $0x1218] sm:$0xf0]  ;;  %v18441_v28 = vld [vmem:[%s19566_s7 + $0x1384] sm:$0xf] }
 0x182   : > { %9662 = vmatpush.bf16.msra.mxu1 %v14215_v12  ;;  %v18447_v12 = vld [vmem:[%s19566_s7 + $0x13b4] sm:$0xf]  ;;  %v14359_v1 = vor.u32 %v18399_v38, %v14356_v27  ;;  %v14524_v10 = vld [vmem:[%s19566_s7 + $0x1398] sm:$0xf0]  ;;  %v14335_v38 = vor.u32 %v18393_v6, %v14332_v50  ;;  %v18669_v6 = vld [vmem:[%s19566_s7 + $0x1aa4] sm:$0xf]  ;;  %v20523_v50 = vpop.f32.mrf.mxu1 }
 0x183   : > { %9676 = vmatpush.bf16.msra.mxu2 %v14407_v13  ;;  %v14548_v13 = vld [vmem:[%s19566_s7 + $0x13c8] sm:$0xf0]  ;;  %v18675_v27 = vld [vmem:[%s19566_s7 + $0x1ad4] sm:$0xf]  ;;  %23570 = vst [vmem:[#allocation33_spill] sm:$0xff] %v20523_v50 }
 0x184   : > { %9690 = vmatpush.bf16.msra.mxu3 %v14599_v55  ;;  %v14167_v55 = vor.u32 %v18351_v17, %v14164_v8  ;;  %v14551_v7 = vor.u32 %v18447_v12, %v14548_v13  ;;  %v18627_v17 = vld [vmem:[%s19566_s7 + $0x1954] sm:$0xf]  ;;  %v15268_v8 = vld [vmem:[%s19566_s7 + $0x1968] sm:$0xf0]  ;;  %v14527_v13 = vor.u32 %v18441_v28, %v14524_v10  ;;  %v14863_v28 = vor.u32 %v18525_v62, %v14860_v19  ;;  %v18765_v50 = vld [vmem:[%s19566_s7 + $0x1da4] sm:$0xf] }
 0x185   : > { %9649 = vmatpush.bf16.msra.mxu0 %v13999_v58  ;;  %v18531_v58 = vld [vmem:[%s19566_s7 + $0x1654] sm:$0xf]  ;;  %v15460_v12 = vld [vmem:[%s19566_s7 + $0x1ae8] sm:$0xf0]  ;;  %v15055_v10 = vor.u32 %v18573_v31, %v15052_v0 }
 0x186   : > { %9663 = vmatpush.bf16.msra.mxu1 %v14191_v9  ;;  %v13951_v9 = vor.u32 %v18297_v23, %v13948_v35  ;;  %v15271_v35 = vor.u32 %v18627_v17, %v15268_v8  ;;  %v15028_v17 = vld [vmem:[%s19566_s7 + $0x1788] sm:$0xf0]  ;;  %v18615_v8 = vld [vmem:[%s19566_s7 + $0x18f4] sm:$0xf] }
 0x187   : > { %9677 = vmatpush.bf16.msra.mxu2 %v14383_v4  ;;  %v15076_v4 = vld [vmem:[%s19566_s7 + $0x17e8] sm:$0xf0]  ;;  %v18663_v0 = vld [vmem:[%s19566_s7 + $0x1a74] sm:$0xf] }
 0x188   : > { %9691 = vmatpush.bf16.msra.mxu3 %v14575_v53  ;;  %v14143_v53 = vor.u32 %v18345_v3, %v14140_v21  ;;  %v15079_v23 = vor.u32 %v18579_v51, %v15076_v4  ;;  %v15244_v3 = vld [vmem:[%s19566_s7 + $0x1938] sm:$0xf0]  ;;  %v20519_v21 = vpop.f32.mrf.mxu0  ;;  %v14836_v51 = vld [vmem:[%s19566_s7 + $0x1608] sm:$0xf0] }
 0x189   : > { %9650 = vmatpush.bf16.msra.mxu0 %v13975_v16  ;;  %v14887_v16 = vor.u32 %v18531_v58, %v14884_v63  ;;  %23569 = vst [vmem:[#allocation32_spill] sm:$0xff] %v20519_v21  ;;  %v18519_v63 = vld [vmem:[%s19566_s7 + $0x15f4] sm:$0xf]  ;;  %v15412_v31 = vld [vmem:[%s19566_s7 + $0x1a88] sm:$0xf0] }
 0x18a   : > { %9664 = vmatpush.bf16.msra.mxu1 %v14167_v55  ;;  %v15463_v55 = vor.u32 %v18675_v27, %v15460_v12  ;;  %v14839_v19 = vor.u32 %v18519_v63, %v14836_v51  ;;  %v18513_v27 = vld [vmem:[%s19566_s7 + $0x15c4] sm:$0xf]  ;;  %v14812_v12 = vld [vmem:[%s19566_s7 + $0x15d8] sm:$0xf0] }
 0x18b   : > { %9678 = vmatpush.bf16.msra.mxu2 %v14359_v1  ;;  %v18621_v1 = vld [vmem:[%s19566_s7 + $0x1924] sm:$0xf]  ;;  %v15820_v21 = vld [vmem:[%s19566_s7 + $0x1db8] sm:$0xf0] }
 0x18c   : > { %9692 = vmatpush.bf16.msra.mxu3 %v14551_v7  ;;  %v15436_v7 = vld [vmem:[%s19566_s7 + $0x1ab8] sm:$0xf0]  ;;  %v15247_v58 = vor.u32 %v18621_v1, %v15244_v3  ;;  %v20545_v3 = vpop.f32.mrf.mxu3 }
 0x18d   : > { %9651 = vmatpush.bf16.msra.mxu0 %v13951_v9  ;;  %v18567_v9 = vld [vmem:[%s19566_s7 + $0x1774] sm:$0xf]  ;;  %v15439_v4 = vor.u32 %v18669_v6, %v15436_v7  ;;  %v15196_v1 = vld [vmem:[%s19566_s7 + $0x18d8] sm:$0xf0]  ;;  %23572 = vst [vmem:[#allocation35_spill] sm:$0xff] %v20545_v3 }
 0x18e   : > { %9665 = vmatpush.bf16.msra.mxu1 %v14143_v53  ;;  %v15220_v53 = vld [vmem:[%s19566_s7 + $0x1908] sm:$0xf0]  ;;  %v15031_v62 = vor.u32 %v18567_v9, %v15028_v17  ;;  %v18657_v7 = vld [vmem:[%s19566_s7 + $0x1a44] sm:$0xf]  ;;  %v9443_v63 = vpop.f32.mrf.mxu1 }
 0x18f   : > { %9679 = vmatpush.bf16.msra.mxu2 %v14335_v38  ;;  %v15223_v38 = vor.u32 %v18615_v8, %v15220_v53  ;;  %v14788_v17 = vld [vmem:[%s19566_s7 + $0x15a8] sm:$0xf0]  ;;  %v18555_v8 = vld [vmem:[%s19566_s7 + $0x1714] sm:$0xf]  ;;  %v18717_v3 = vld [vmem:[%s19566_s7 + $0x1c24] sm:$0xf] }
 0x190   : > { %9693 = vmatpush.bf16.msra.mxu3 %v14527_v13  ;;  %9652 = vmatmul.bf16.vlgmr.msra.gmra.mxu0 %v19840_v36  ;;  %v18561_v13 = vld [vmem:[%s19566_s7 + $0x1744] sm:$0xf]  ;;  %v9429_v6 = vpop.f32.mrf.mxu0 }
 0x191   : > { %9700 = vmatpush.bf16.msrb.mxu0 %v14887_v16  ;;  %9666 = vmatmul.bf16.vlgmr.msra.gmra.mxu1 %v19846_v41  ;;  %v20540_v16 = vpop.f32.mrf.mxu2 }
 0x192   : > { %9714 = vmatpush.bf16.msrb.mxu1 %v15079_v23  ;;  %9680 = vmatmul.bf16.vlgmr.msra.gmra.mxu2 %v19919_v33  ;;  %23571 = vst [vmem:[#allocation34_spill] sm:$0xff] %v20540_v16  ;;  %v15415_v23 = vor.u32 %v18663_v0, %v15412_v31  ;;  %v14980_v31 = vld [vmem:[%s19566_s7 + $0x1728] sm:$0xf0]  ;;  %v15628_v16 = vld [vmem:[%s19566_s7 + $0x1c38] sm:$0xf0] }
 0x193   : > { %9728 = vmatpush.bf16.msrb.mxu2 %v15271_v35  ;;  %9694 = vmatmul.bf16.vlgmr.msra.gmra.mxu3 %v19926_v42  ;;  %v15004_v35 = vld [vmem:[%s19566_s7 + $0x1758] sm:$0xf0] }
 0x194   : > { %9742 = vmatpush.bf16.msrb.mxu3 %v15463_v55  ;;  %v18609_v55 = vld [vmem:[%s19566_s7 + $0x18c4] sm:$0xf]  ;;  %v15007_v51 = vor.u32 %v18561_v13, %v15004_v35  ;;  %v14764_v35 = vld [vmem:[%s19566_s7 + $0x1578] sm:$0xf0] }
 0x195   : > { %9701 = vmatpush.bf16.msrb.mxu0 %v14863_v28  ;;  %v15388_v28 = vld [vmem:[%s19566_s7 + $0x1a58] sm:$0xf0]  ;;  %v15199_v9 = vor.u32 %v18609_v55, %v15196_v1  ;;  %v18549_v55 = vld [vmem:[%s19566_s7 + $0x16e4] sm:$0xf] }
 0x196   : > { %9715 = vmatpush.bf16.msrb.mxu1 %v15055_v10  ;;  %v9430_v10 = vadd.f32 %v9429_v6, %v20487_v15  ;;  %v15391_v53 = vor.u32 %v18657_v7, %v15388_v28  ;;  %v15172_v15 = vld [vmem:[%s19566_s7 + $0x18a8] sm:$0xf0]  ;;  %v14956_v7 = vld [vmem:[%s19566_s7 + $0x16f8] sm:$0xf0]  ;;  %v18597_v28 = vld [vmem:[%s19566_s7 + $0x1864] sm:$0xf] }
 0x197   : > { %9729 = vmatpush.bf16.msrb.mxu2 %v15247_v58  ;;  %v14815_v58 = vor.u32 %v18513_v27, %v14812_v12  ;;  %v18651_v27 = vld [vmem:[%s19566_s7 + $0x1a14] sm:$0xf]  ;;  %v14983_v12 = vor.u32 %v18555_v8, %v14980_v31  ;;  %v14959_v8 = vor.u32 %v18549_v55, %v14956_v7  ;;  %v14716_v55 = vld [vmem:[%s19566_s7 + $0x1518] sm:$0xf0]  ;;  %v18537_v7 = vld [vmem:[%s19566_s7 + $0x1684] sm:$0xf] }
 0x198   : > { %9743 = vmatpush.bf16.msrb.mxu3 %v15439_v4  ;;  %v18507_v4 = vld [vmem:[%s19566_s7 + $0x1594] sm:$0xf]  ;;  %v9444_v0 = vadd.f32 %v9443_v63, %v9430_v10  ;;  %v15148_v10 = vld [vmem:[%s19566_s7 + $0x1878] sm:$0xf0]  ;;  %v9471_v63 = vpop.f32.mrf.mxu3 }
 0x199   : > { %9702 = vmatpush.bf16.msrb.mxu0 %v14839_v19  ;;  %v18603_v19 = vld [vmem:[%s19566_s7 + $0x1894] sm:$0xf]  ;;  %v9457_v6 = vpop.f32.mrf.mxu2 }
 0x19a   : > { %9716 = vmatpush.bf16.msrb.mxu1 %v15031_v62  ;;  %v15364_v62 = vld [vmem:[%s19566_s7 + $0x1a28] sm:$0xf0]  ;;  %v15175_v13 = vor.u32 %v18603_v19, %v15172_v15  ;;  %v18495_v31 = vld [vmem:[%s19566_s7 + $0x1534] sm:$0xf] }
 0x19b   : > { %9730 = vmatpush.bf16.msrb.mxu2 %v15223_v38  ;;  %v14791_v38 = vor.u32 %v18507_v4, %v14788_v17  ;;  %v15367_v1 = vor.u32 %v18651_v27, %v15364_v62  ;;  %v18543_v19 = vld [vmem:[%s19566_s7 + $0x16b4] sm:$0xf]  ;;  %v14932_v27 = vld [vmem:[%s19566_s7 + $0x16c8] sm:$0xf0] }
 0x19c   : > { %9744 = vmatpush.bf16.msrb.mxu3 %v15415_v23  ;;  %v18501_v23 = vld [vmem:[%s19566_s7 + $0x1564] sm:$0xf]  ;;  %v18591_v62 = vld [vmem:[%s19566_s7 + $0x1834] sm:$0xf] }
 0x19d   : > { %9703 = vmatpush.bf16.msrb.mxu0 %v14815_v58  ;;  %v9458_v58 = vadd.f32 %v9457_v6, %v9444_v0  ;;  %v14767_v4 = vor.u32 %v18501_v23, %v14764_v35  ;;  %v14740_v0 = vld [vmem:[%s19566_s7 + $0x1548] sm:$0xf0]  ;;  %v18489_v35 = vld [vmem:[%s19566_s7 + $0x1504] sm:$0xf] }
 0x19e   : > { %9717 = vmatpush.bf16.msrb.mxu1 %v15007_v51  ;;  %v18645_v51 = vld [vmem:[%s19566_s7 + $0x19e4] sm:$0xf]  ;;  %v14743_v23 = vor.u32 %v18495_v31, %v14740_v0  ;;  %v15652_v31 = vld [vmem:[%s19566_s7 + $0x1c68] sm:$0xf0]  ;;  %v18771_v0 = vld [vmem:[%s19566_s7 + $0x1dd4] sm:$0xf] }
 0x19f   : > { %9731 = vmatpush.bf16.msrb.mxu2 %v15199_v9  ;;  %v15340_v9 = vld [vmem:[%s19566_s7 + $0x19f8] sm:$0xf0]  ;;  %v20566_v17 = vadd.f32 %v9471_v63, %v9458_v58 }
 0x1a0   : > { %9745 = vmatpush.bf16.msrb.mxu3 %v15391_v53  ;;  %v15151_v53 = vor.u32 %v18597_v28, %v15148_v10  ;;  %v15343_v15 = vor.u32 %v18645_v51, %v15340_v9  ;;  %v14908_v28 = vld [vmem:[%s19566_s7 + $0x1698] sm:$0xf0]  ;;  %v18585_v10 = vld [vmem:[%s19566_s7 + $0x1804] sm:$0xf] }
 0x1a1   : > { %9704 = vmatpush.bf16.msrb.mxu0 %v14791_v38  ;;  %v15124_v38 = vld [vmem:[%s19566_s7 + $0x1848] sm:$0xf0]  ;;  %v15100_v63 = vld [vmem:[%s19566_s7 + $0x1818] sm:$0xf0]  ;;  %v18633_v51 = vld [vmem:[%s19566_s7 + $0x1984] sm:$0xf] }
 0x1a2   : > { %9718 = vmatpush.bf16.msrb.mxu1 %v14983_v12  ;;  %v18639_v12 = vld [vmem:[%s19566_s7 + $0x19b4] sm:$0xf]  ;;  %v15127_v6 = vor.u32 %v18591_v62, %v15124_v38  ;;  %v15292_v9 = vld [vmem:[%s19566_s7 + $0x1998] sm:$0xf0]  ;;  %v15103_v62 = vor.u32 %v18585_v10, %v15100_v63  ;;  %v18861_v10 = vld [vmem:[%s19566_s7 + $0x20a4] sm:$0xf]  ;;  %v20602_v63 = vpop.f32.mrf.mxu1 }
 0x1a3   : > { %9732 = vmatpush.bf16.msrb.mxu2 %v15175_v13  ;;  %v15316_v13 = vld [vmem:[%s19566_s7 + $0x19c8] sm:$0xf0]  ;;  %v18867_v38 = vld [vmem:[%s19566_s7 + $0x20d4] sm:$0xf]  ;;  %23574 = vst [vmem:[#allocation37_spill] sm:$0xff] %v20602_v63 }
 0x1a4   : > { %9746 = vmatpush.bf16.msrb.mxu3 %v15367_v1  ;;  %v14935_v1 = vor.u32 %v18543_v19, %v14932_v27  ;;  %v15319_v58 = vor.u32 %v18639_v12, %v15316_v13  ;;  %v18819_v19 = vld [vmem:[%s19566_s7 + $0x1f54] sm:$0xf]  ;;  %v16036_v27 = vld [vmem:[%s19566_s7 + $0x1f68] sm:$0xf0]  ;;  %v15295_v13 = vor.u32 %v18633_v51, %v15292_v9  ;;  %v15631_v51 = vor.u32 %v18717_v3, %v15628_v16  ;;  %v16396_v63 = vld [vmem:[%s19566_s7 + $0x2238] sm:$0xf0] }
 0x1a5   : > { %9705 = vmatpush.bf16.msrb.mxu0 %v14767_v4  ;;  %v18723_v4 = vld [vmem:[%s19566_s7 + $0x1c54] sm:$0xf]  ;;  %v16228_v12 = vld [vmem:[%s19566_s7 + $0x20e8] sm:$0xf0]  ;;  %v15823_v9 = vor.u32 %v18765_v50, %v15820_v21 }
 0x1a6   : > { %9719 = vmatpush.bf16.msrb.mxu1 %v14959_v8  ;;  %v14719_v8 = vor.u32 %v18489_v35, %v14716_v55  ;;  %v16039_v55 = vor.u32 %v18819_v19, %v16036_v27  ;;  %v15796_v19 = vld [vmem:[%s19566_s7 + $0x1d88] sm:$0xf0]  ;;  %v18807_v27 = vld [vmem:[%s19566_s7 + $0x1ef4] sm:$0xf] }
 0x1a7   : > { %9733 = vmatpush.bf16.msrb.mxu2 %v15151_v53  ;;  %v15844_v53 = vld [vmem:[%s19566_s7 + $0x1de8] sm:$0xf0]  ;;  %v18855_v21 = vld [vmem:[%s19566_s7 + $0x2074] sm:$0xf] }
 0x1a8   : > { %9747 = vmatpush.bf16.msrb.mxu3 %v15343_v15  ;;  %v14911_v15 = vor.u32 %v18537_v7, %v14908_v28  ;;  %v15847_v35 = vor.u32 %v18771_v0, %v15844_v53  ;;  %v16012_v7 = vld [vmem:[%s19566_s7 + $0x1f38] sm:$0xf0]  ;;  %v20598_v28 = vpop.f32.mrf.mxu0  ;;  %v15604_v0 = vld [vmem:[%s19566_s7 + $0x1c08] sm:$0xf0] }
 0x1a9   : > { %9706 = vmatpush.bf16.msrb.mxu0 %v14743_v23  ;;  %v15655_v23 = vor.u32 %v18723_v4, %v15652_v31  ;;  %23573 = vst [vmem:[#allocation36_spill] sm:$0xff] %v20598_v28  ;;  %v18711_v31 = vld [vmem:[%s19566_s7 + $0x1bf4] sm:$0xf]  ;;  %v16180_v50 = vld [vmem:[%s19566_s7 + $0x2088] sm:$0xf0] }
 0x1aa   : > { %9720 = vmatpush.bf16.msrb.mxu1 %v14935_v1  ;;  %v16231_v1 = vor.u32 %v18867_v38, %v16228_v12  ;;  %v15607_v16 = vor.u32 %v18711_v31, %v15604_v0  ;;  %v18705_v38 = vld [vmem:[%s19566_s7 + $0x1bc4] sm:$0xf]  ;;  %v15580_v12 = vld [vmem:[%s19566_s7 + $0x1bd8] sm:$0xf0] }
 0x1ab   : > { %9734 = vmatpush.bf16.msrb.mxu2 %v15127_v6  ;;  %v18813_v6 = vld [vmem:[%s19566_s7 + $0x1f24] sm:$0xf] }
 0x1ac   : > { %9748 = vmatpush.bf16.msrb.mxu3 %v15319_v58  ;;  %v16204_v58 = vld [vmem:[%s19566_s7 + $0x20b8] sm:$0xf0]  ;;  %v16015_v4 = vor.u32 %v18813_v6, %v16012_v7  ;;  %v20624_v7 = vpop.f32.mrf.mxu3  ;;  %v18957_v28 = vld [vmem:[%s19566_s7 + $0x23a4] sm:$0xf] }
 0x1ad   : > { %9707 = vmatpush.bf16.msrb.mxu0 %v14719_v8  ;;  %v18759_v8 = vld [vmem:[%s19566_s7 + $0x1d74] sm:$0xf]  ;;  %v16207_v53 = vor.u32 %v18861_v10, %v16204_v58  ;;  %v15964_v6 = vld [vmem:[%s19566_s7 + $0x1ed8] sm:$0xf0]  ;;  %23576 = vst [vmem:[#allocation39_spill] sm:$0xff] %v20624_v7 }
 0x1ae   : > { %9721 = vmatpush.bf16.msrb.mxu1 %v14911_v15  ;;  %v15988_v15 = vld [vmem:[%s19566_s7 + $0x1f08] sm:$0xf0]  ;;  %v15799_v3 = vor.u32 %v18759_v8, %v15796_v19  ;;  %v18849_v58 = vld [vmem:[%s19566_s7 + $0x2044] sm:$0xf]  ;;  %v9499_v31 = vpop.f32.mrf.mxu1  ;;  %v18963_v7 = vld [vmem:[%s19566_s7 + $0x23d4] sm:$0xf] }
 0x1af   : > { %9735 = vmatpush.bf16.msrb.mxu2 %v15103_v62  ;;  %v15991_v62 = vor.u32 %v18807_v27, %v15988_v15  ;;  %v15556_v19 = vld [vmem:[%s19566_s7 + $0x1ba8] sm:$0xf0]  ;;  %v18747_v27 = vld [vmem:[%s19566_s7 + $0x1d14] sm:$0xf] }
 0x1b0   : > { %9749 = vmatpush.bf16.msrb.mxu3 %v15295_v13  ;;  %9708 = vmatmul.bf16.vlgmr.msrb.gmra.mxu0 %v19924_v39  ;;  %v18753_v13 = vld [vmem:[%s19566_s7 + $0x1d44] sm:$0xf]  ;;  %v9485_v10 = vpop.f32.mrf.mxu0 }
 0x1b1   : > { %9756 = vmatpush.bf16.msra.mxu0 %v15655_v23  ;;  %9722 = vmatmul.bf16.vlgmr.msrb.gmra.mxu1 %v19930_v47  ;;  %v20619_v23 = vpop.f32.mrf.mxu2 }
 0x1b2   : > { %9770 = vmatpush.bf16.msra.mxu1 %v15847_v35  ;;  %9736 = vmatmul.bf16.vlgmr.msrb.gmra.mxu2 %v20003_v52  ;;  %23575 = vst [vmem:[#allocation38_spill] sm:$0xff] %v20619_v23  ;;  %v16183_v35 = vor.u32 %v18855_v21, %v16180_v50  ;;  %v15748_v50 = vld [vmem:[%s19566_s7 + $0x1d28] sm:$0xf0]  ;;  %v18909_v23 = vld [vmem:[%s19566_s7 + $0x2224] sm:$0xf] }
 0x1b3   : > { %9784 = vmatpush.bf16.msra.mxu2 %v16039_v55  ;;  %9750 = vmatmul.bf16.vlgmr.msrb.gmra.mxu3 %v20010_v57  ;;  %v15772_v55 = vld [vmem:[%s19566_s7 + $0x1d58] sm:$0xf0] }
 0x1b4   : > { %9798 = vmatpush.bf16.msra.mxu3 %v16231_v1  ;;  %v18801_v1 = vld [vmem:[%s19566_s7 + $0x1ec4] sm:$0xf]  ;;  %v15775_v0 = vor.u32 %v18753_v13, %v15772_v55  ;;  %v15532_v55 = vld [vmem:[%s19566_s7 + $0x1b78] sm:$0xf0] }
 0x1b5   : > { %9757 = vmatpush.bf16.msra.mxu0 %v15631_v51  ;;  %v16156_v51 = vld [vmem:[%s19566_s7 + $0x2058] sm:$0xf0]  ;;  %v15967_v8 = vor.u32 %v18801_v1, %v15964_v6  ;;  %v18741_v1 = vld [vmem:[%s19566_s7 + $0x1ce4] sm:$0xf] }
 0x1b6   : > { %9771 = vmatpush.bf16.msra.mxu1 %v15823_v9  ;;  %v9486_v9 = vadd.f32 %v9485_v10, %v20566_v17  ;;  %v16159_v15 = vor.u32 %v18849_v58, %v16156_v51  ;;  %v18795_v17 = vld [vmem:[%s19566_s7 + $0x1e94] sm:$0xf]  ;;  %v15724_v10 = vld [vmem:[%s19566_s7 + $0x1cf8] sm:$0xf0]  ;;  %v18789_v58 = vld [vmem:[%s19566_s7 + $0x1e64] sm:$0xf] }
 0x1b7   : > { %9785 = vmatpush.bf16.msra.mxu2 %v16015_v4  ;;  %v15583_v4 = vor.u32 %v18705_v38, %v15580_v12  ;;  %v15751_v12 = vor.u32 %v18747_v27, %v15748_v50  ;;  %v15916_v51 = vld [vmem:[%s19566_s7 + $0x1e78] sm:$0xf0]  ;;  %v15508_v50 = vld [vmem:[%s19566_s7 + $0x1b48] sm:$0xf0] }
 0x1b8   : > { %9799 = vmatpush.bf16.msra.mxu3 %v16207_v53  ;;  %v18699_v53 = vld [vmem:[%s19566_s7 + $0x1b94] sm:$0xf]  ;;  %v20632_v21 = vadd.f32 %v9499_v31, %v9486_v9  ;;  %v18837_v9 = vld [vmem:[%s19566_s7 + $0x1fe4] sm:$0xf]  ;;  %v16108_v31 = vld [vmem:[%s19566_s7 + $0x1ff8] sm:$0xf0]  ;;  %v15919_v27 = vor.u32 %v18789_v58, %v15916_v51 }
 0x1b9   : > { %9758 = vmatpush.bf16.msra.mxu0 %v15607_v16  ;;  %v15940_v16 = vld [vmem:[%s19566_s7 + $0x1ea8] sm:$0xf0]  ;;  %v15559_v38 = vor.u32 %v18699_v53, %v15556_v19  ;;  %v15727_v19 = vor.u32 %v18741_v1, %v15724_v10  ;;  %v15484_v1 = vld [vmem:[%s19566_s7 + $0x1b18] sm:$0xf0]  ;;  %v18729_v58 = vld [vmem:[%s19566_s7 + $0x1c84] sm:$0xf] }
 0x1ba   : > { %9772 = vmatpush.bf16.msra.mxu1 %v15799_v3  ;;  %v18843_v3 = vld [vmem:[%s19566_s7 + $0x2014] sm:$0xf]  ;;  %v15943_v13 = vor.u32 %v18795_v17, %v15940_v16  ;;  %v16111_v16 = vor.u32 %v18837_v9, %v16108_v31  ;;  %v15676_v51 = vld [vmem:[%s19566_s7 + $0x1c98] sm:$0xf0]  ;;  %v18777_v9 = vld [vmem:[%s19566_s7 + $0x1e04] sm:$0xf] }
 0x1bb   : > { %9786 = vmatpush.bf16.msra.mxu2 %v15991_v62  ;;  %v16132_v62 = vld [vmem:[%s19566_s7 + $0x2028] sm:$0xf0]  ;;  %v18735_v17 = vld [vmem:[%s19566_s7 + $0x1cb4] sm:$0xf] }
 0x1bc   : > { %9800 = vmatpush.bf16.msra.mxu3 %v16183_v35  ;;  %v18693_v35 = vld [vmem:[%s19566_s7 + $0x1b64] sm:$0xf]  ;;  %v16135_v6 = vor.u32 %v18843_v3, %v16132_v62  ;;  %v15700_v3 = vld [vmem:[%s19566_s7 + $0x1cc8] sm:$0xf0]  ;;  %v18783_v62 = vld [vmem:[%s19566_s7 + $0x1e34] sm:$0xf] }
 0x1bd   : > { %9759 = vmatpush.bf16.msra.mxu0 %v15583_v4  ;;  %v9513_v4 = vpop.f32.mrf.mxu2 }
 0x1be   : > { %9773 = vmatpush.bf16.msra.mxu1 %v15775_v0  ;;  %v9527_v0 = vpop.f32.mrf.mxu3 }
 0x1bf   : > { %9787 = vmatpush.bf16.msra.mxu2 %v15967_v8  ;;  %v15535_v8 = vor.u32 %v18693_v35, %v15532_v55  ;;  %v20647_v53 = vadd.f32 %v9527_v0, %v9513_v4  ;;  %v18831_v35 = vld [vmem:[%s19566_s7 + $0x1fb4] sm:$0xf]  ;;  %v18681_v55 = vld [vmem:[%s19566_s7 + $0x1b04] sm:$0xf]  ;;  %v15868_v4 = vld [vmem:[%s19566_s7 + $0x1e18] sm:$0xf0] }
 0x1c0   : > { %9801 = vmatpush.bf16.msra.mxu3 %v16159_v15  ;;  %v18687_v15 = vld [vmem:[%s19566_s7 + $0x1b34] sm:$0xf]  ;;  %v18825_v0 = vld [vmem:[%s19566_s7 + $0x1f84] sm:$0xf] }
 0x1c1   : > { %9760 = vmatpush.bf16.msra.mxu0 %v15559_v38  ;;  %v15892_v38 = vld [vmem:[%s19566_s7 + $0x1e48] sm:$0xf0] }
 0x1c2   : > { %9774 = vmatpush.bf16.msra.mxu1 %v15751_v12  ;;  %v16084_v12 = vld [vmem:[%s19566_s7 + $0x1fc8] sm:$0xf0]  ;;  %v15895_v10 = vor.u32 %v18783_v62, %v15892_v38  ;;  %v15871_v62 = vor.u32 %v18777_v9, %v15868_v4  ;;  %v19059_v38 = vld [vmem:[%s19566_s7 + $0x26d4] sm:$0xf]  ;;  %v19053_v9 = vld [vmem:[%s19566_s7 + $0x26a4] sm:$0xf]  ;;  %v20683_v4 = vpop.f32.mrf.mxu1 }
 0x1c3   : > { %9788 = vmatpush.bf16.msra.mxu2 %v15943_v13  ;;  %v15511_v13 = vor.u32 %v18687_v15, %v15508_v50  ;;  %v16087_v31 = vor.u32 %v18831_v35, %v16084_v12  ;;  %v18915_v15 = vld [vmem:[%s19566_s7 + $0x2254] sm:$0xf]  ;;  %v16420_v50 = vld [vmem:[%s19566_s7 + $0x2268] sm:$0xf0]  ;;  %23578 = vst [vmem:[#allocation41_spill] sm:$0xff] %v20683_v4 }
 0x1c4   : > { %9802 = vmatpush.bf16.msra.mxu3 %v16135_v6  ;;  %v15703_v6 = vor.u32 %v18735_v17, %v15700_v3  ;;  %v19011_v17 = vld [vmem:[%s19566_s7 + $0x2554] sm:$0xf]  ;;  %v16804_v3 = vld [vmem:[%s19566_s7 + $0x2568] sm:$0xf0]  ;;  %v19101_v4 = vld [vmem:[%s19566_s7 + $0x2824] sm:$0xf] }
 0x1c5   : > { %9761 = vmatpush.bf16.msra.mxu0 %v15535_v8  ;;  %v16060_v8 = vld [vmem:[%s19566_s7 + $0x1f98] sm:$0xf0]  ;;  %v16996_v35 = vld [vmem:[%s19566_s7 + $0x26e8] sm:$0xf0] }
 0x1c6   : > { %9775 = vmatpush.bf16.msra.mxu1 %v15727_v19  ;;  %v15487_v19 = vor.u32 %v18681_v55, %v15484_v1  ;;  %v16063_v12 = vor.u32 %v18825_v0, %v16060_v8  ;;  %v16807_v1 = vor.u32 %v19011_v17, %v16804_v3  ;;  %v16591_v0 = vor.u32 %v18957_v28, %v16588_v43  ;;  %v16564_v17 = vld [vmem:[%s19566_s7 + $0x2388] sm:$0xf0]  ;;  %v18999_v3 = vld [vmem:[%s19566_s7 + $0x24f4] sm:$0xf] }
 0x1c7   : > { %9789 = vmatpush.bf16.msra.mxu2 %v15919_v27  ;;  %v16612_v27 = vld [vmem:[%s19566_s7 + $0x23e8] sm:$0xf0] }
 0x1c8   : > { %9803 = vmatpush.bf16.msra.mxu3 %v16111_v16  ;;  %v15679_v16 = vor.u32 %v18729_v58, %v15676_v51  ;;  %v16615_v55 = vor.u32 %v18963_v7, %v16612_v27  ;;  %v16780_v58 = vld [vmem:[%s19566_s7 + $0x2538] sm:$0xf0]  ;;  %v20679_v51 = vpop.f32.mrf.mxu0  ;;  %v16399_v7 = vor.u32 %v18909_v23, %v16396_v63  ;;  %v16756_v63 = vld [vmem:[%s19566_s7 + $0x2508] sm:$0xf0]  ;;  %v19047_v23 = vld [vmem:[%s19566_s7 + $0x2674] sm:$0xf] }
 0x1c9   : > { %9762 = vmatpush.bf16.msra.mxu0 %v15511_v13  ;;  %v16423_v13 = vor.u32 %v18915_v15, %v16420_v50  ;;  %23577 = vst [vmem:[#allocation40_spill] sm:$0xff] %v20679_v51  ;;  %v18903_v15 = vld [vmem:[%s19566_s7 + $0x21f4] sm:$0xf]  ;;  %v16372_v50 = vld [vmem:[%s19566_s7 + $0x2208] sm:$0xf0] }
 0x1ca   : > { %9776 = vmatpush.bf16.msra.mxu1 %v15703_v6  ;;  %v16999_v6 = vor.u32 %v19059_v38, %v16996_v35  ;;  %v16948_v43 = vld [vmem:[%s19566_s7 + $0x2688] sm:$0xf0]  ;;  %v16375_v28 = vor.u32 %v18903_v15, %v16372_v50  ;;  %v16759_v38 = vor.u32 %v18999_v3, %v16756_v63  ;;  %v18897_v35 = vld [vmem:[%s19566_s7 + $0x21c4] sm:$0xf]  ;;  %v18939_v3 = vld [vmem:[%s19566_s7 + $0x2314] sm:$0xf] }
 0x1cb   : > { %9790 = vmatpush.bf16.msra.mxu2 %v15895_v10  ;;  %v19005_v10 = vld [vmem:[%s19566_s7 + $0x2524] sm:$0xf]  ;;  %v17164_v51 = vld [vmem:[%s19566_s7 + $0x2838] sm:$0xf0] }
 0x1cc   : > { %9804 = vmatpush.bf16.msra.mxu3 %v16087_v31  ;;  %v16972_v31 = vld [vmem:[%s19566_s7 + $0x26b8] sm:$0xf0]  ;;  %v16783_v8 = vor.u32 %v19005_v10, %v16780_v58  ;;  %v18993_v10 = vld [vmem:[%s19566_s7 + $0x24c4] sm:$0xf] }
 0x1cd   : > { %9763 = vmatpush.bf16.msra.mxu0 %v15487_v19  ;;  %v18951_v19 = vld [vmem:[%s19566_s7 + $0x2374] sm:$0xf]  ;;  %v16975_v27 = vor.u32 %v19053_v9, %v16972_v31  ;;  %v16732_v58 = vld [vmem:[%s19566_s7 + $0x24d8] sm:$0xf0]  ;;  %v19041_v31 = vld [vmem:[%s19566_s7 + $0x2644] sm:$0xf] }
 0x1ce   : > { %9777 = vmatpush.bf16.msra.mxu1 %v15679_v16  ;;  %v20697_v16 = vpop.f32.mrf.mxu2  ;;  %v16735_v50 = vor.u32 %v18993_v10, %v16732_v58  ;;  %v18933_v10 = vld [vmem:[%s19566_s7 + $0x22e4] sm:$0xf] }
 0x1cf   : > { %9791 = vmatpush.bf16.msra.mxu2 %v15871_v62  ;;  %23579 = vst [vmem:[#allocation42_spill] sm:$0xff] %v20697_v16  ;;  %v16567_v62 = vor.u32 %v18951_v19, %v16564_v17  ;;  %v9555_v19 = vpop.f32.mrf.mxu1  ;;  %v16324_v17 = vld [vmem:[%s19566_s7 + $0x21a8] sm:$0xf0]  ;;  %v17356_v16 = vld [vmem:[%s19566_s7 + $0x29b8] sm:$0xf0] }
 0x1d0   : > { %9805 = vmatpush.bf16.msra.mxu3 %v16063_v12  ;;  %9764 = vmatmul.bf16.vlgmr.msra.gmra.mxu0 %v20008_v56  ;;  %v16348_v12 = vld [vmem:[%s19566_s7 + $0x21d8] sm:$0xf0]  ;;  %v9541_v9 = vpop.f32.mrf.mxu0 }
 0x1d1   : > { %9812 = vmatpush.bf16.msrb.mxu0 %v16423_v13  ;;  %9778 = vmatmul.bf16.vlgmr.msra.gmra.mxu1 %v20014_v61  ;;  %v18945_v13 = vld [vmem:[%s19566_s7 + $0x2344] sm:$0xf] }
 0x1d2   : > { %9826 = vmatpush.bf16.msrb.mxu1 %v16615_v55  ;;  %9792 = vmatmul.bf16.vlgmr.msra.gmra.mxu2 %v20091_v20  ;;  %v16951_v55 = vor.u32 %v19047_v23, %v16948_v43  ;;  %v16516_v43 = vld [vmem:[%s19566_s7 + $0x2328] sm:$0xf0] }
 0x1d3   : > { %9840 = vmatpush.bf16.msrb.mxu2 %v16807_v1  ;;  %9806 = vmatmul.bf16.vlgmr.msra.gmra.mxu3 %v20098_v26  ;;  %v20702_v1 = vpop.f32.mrf.mxu3 }
 0x1d4   : > { %9854 = vmatpush.bf16.msrb.mxu3 %v16999_v6  ;;  %23580 = vst [vmem:[#allocation43_spill] sm:$0xff] %v20702_v1  ;;  %v16540_v6 = vld [vmem:[%s19566_s7 + $0x2358] sm:$0xf0]  ;;  %v19149_v1 = vld [vmem:[%s19566_s7 + $0x29a4] sm:$0xf] }
 0x1d5   : > { %9813 = vmatpush.bf16.msrb.mxu0 %v16399_v7  ;;  %v16924_v7 = vld [vmem:[%s19566_s7 + $0x2658] sm:$0xf0]  ;;  %v16543_v15 = vor.u32 %v18945_v13, %v16540_v6 }
 0x1d6   : > { %9827 = vmatpush.bf16.msrb.mxu1 %v16591_v0  ;;  %v9542_v0 = vadd.f32 %v9541_v9, %v20647_v53  ;;  %v16927_v63 = vor.u32 %v19041_v31, %v16924_v7  ;;  %v16708_v53 = vld [vmem:[%s19566_s7 + $0x24a8] sm:$0xf0]  ;;  %v16300_v6 = vld [vmem:[%s19566_s7 + $0x2178] sm:$0xf0]  ;;  %v9569_v9 = vpop.f32.mrf.mxu2  ;;  %v18981_v7 = vld [vmem:[%s19566_s7 + $0x2464] sm:$0xf] }
 0x1d7   : > { %9841 = vmatpush.bf16.msrb.mxu2 %v16783_v8  ;;  %v16351_v8 = vor.u32 %v18897_v35, %v16348_v12  ;;  %v19035_v35 = vld [vmem:[%s19566_s7 + $0x2614] sm:$0xf]  ;;  %v16519_v12 = vor.u32 %v18939_v3, %v16516_v43  ;;  %v16492_v31 = vld [vmem:[%s19566_s7 + $0x22f8] sm:$0xf0] }
 0x1d8   : > { %9855 = vmatpush.bf16.msrb.mxu3 %v16975_v27  ;;  %v18891_v27 = vld [vmem:[%s19566_s7 + $0x2194] sm:$0xf]  ;;  %v9556_v23 = vadd.f32 %v9555_v19, %v9542_v0  ;;  %v16684_v0 = vld [vmem:[%s19566_s7 + $0x2478] sm:$0xf0]  ;;  %v19029_v19 = vld [vmem:[%s19566_s7 + $0x25e4] sm:$0xf]  ;;  %v16495_v3 = vor.u32 %v18933_v10, %v16492_v31 }
 0x1d9   : > { %9814 = vmatpush.bf16.msrb.mxu0 %v16375_v28  ;;  %v18987_v28 = vld [vmem:[%s19566_s7 + $0x2494] sm:$0xf]  ;;  %v16252_v10 = vld [vmem:[%s19566_s7 + $0x2118] sm:$0xf0]  ;;  %v18921_v31 = vld [vmem:[%s19566_s7 + $0x2284] sm:$0xf] }
 0x1da   : > { %9828 = vmatpush.bf16.msrb.mxu1 %v16567_v62  ;;  %v16900_v62 = vld [vmem:[%s19566_s7 + $0x2628] sm:$0xf0]  ;;  %v16711_v13 = vor.u32 %v18987_v28, %v16708_v53  ;;  %v18879_v43 = vld [vmem:[%s19566_s7 + $0x2134] sm:$0xf] }
 0x1db   : > { %9842 = vmatpush.bf16.msrb.mxu2 %v16759_v38  ;;  %v16327_v38 = vor.u32 %v18891_v27, %v16324_v17  ;;  %v16903_v58 = vor.u32 %v19035_v35, %v16900_v62  ;;  %v18927_v28 = vld [vmem:[%s19566_s7 + $0x22b4] sm:$0xf]  ;;  %v16468_v35 = vld [vmem:[%s19566_s7 + $0x22c8] sm:$0xf0] }
 0x1dc   : > { %9856 = vmatpush.bf16.msrb.mxu3 %v16951_v55  ;;  %v18885_v55 = vld [vmem:[%s19566_s7 + $0x2164] sm:$0xf]  ;;  %v18975_v62 = vld [vmem:[%s19566_s7 + $0x2434] sm:$0xf] }
 0x1dd   : > { %9815 = vmatpush.bf16.msrb.mxu0 %v16351_v8  ;;  %v9570_v8 = vadd.f32 %v9569_v9, %v9556_v23  ;;  %v16303_v27 = vor.u32 %v18885_v55, %v16300_v6  ;;  %v16276_v23 = vld [vmem:[%s19566_s7 + $0x2148] sm:$0xf0]  ;;  %v18873_v6 = vld [vmem:[%s19566_s7 + $0x2104] sm:$0xf] }
 0x1de   : > { %9829 = vmatpush.bf16.msrb.mxu1 %v16543_v15  ;;  %v16876_v15 = vld [vmem:[%s19566_s7 + $0x25f8] sm:$0xf0]  ;;  %v16279_v55 = vor.u32 %v18879_v43, %v16276_v23  ;;  %v17188_v43 = vld [vmem:[%s19566_s7 + $0x2868] sm:$0xf0]  ;;  %v19155_v23 = vld [vmem:[%s19566_s7 + $0x29d4] sm:$0xf] }
 0x1df   : > { %9843 = vmatpush.bf16.msrb.mxu2 %v16735_v50  ;;  %v9583_v50 = vpop.f32.mrf.mxu3  ;;  %v16879_v53 = vor.u32 %v19029_v19, %v16876_v15  ;;  %v16636_v19 = vld [vmem:[%s19566_s7 + $0x2418] sm:$0xf0]  ;;  %v19017_v15 = vld [vmem:[%s19566_s7 + $0x2584] sm:$0xf] }
 0x1e0   : > { %9857 = vmatpush.bf16.msrb.mxu3 %v16927_v63  ;;  %v20726_v17 = vadd.f32 %v9583_v50, %v9570_v8  ;;  %v16687_v63 = vor.u32 %v18981_v7, %v16684_v0  ;;  %v16444_v7 = vld [vmem:[%s19566_s7 + $0x2298] sm:$0xf0]  ;;  %v18969_v0 = vld [vmem:[%s19566_s7 + $0x2404] sm:$0xf] }
 0x1e1   : > { %9816 = vmatpush.bf16.msrb.mxu0 %v16327_v38  ;;  %v16660_v38 = vld [vmem:[%s19566_s7 + $0x2448] sm:$0xf0]  ;;  %v16828_v50 = vld [vmem:[%s19566_s7 + $0x2598] sm:$0xf0] }
 0x1e2   : > { %9830 = vmatpush.bf16.msrb.mxu1 %v16519_v12  ;;  %v19023_v12 = vld [vmem:[%s19566_s7 + $0x25b4] sm:$0xf]  ;;  %v16663_v9 = vor.u32 %v18975_v62, %v16660_v38  ;;  %v16639_v62 = vor.u32 %v18969_v0, %v16636_v19  ;;  %v19245_v0 = vld [vmem:[%s19566_s7 + $0x2ca4] sm:$0xf]  ;;  %v20762_v19 = vpop.f32.mrf.mxu1 }
 0x1e3   : > { %9844 = vmatpush.bf16.msrb.mxu2 %v16711_v13  ;;  %v16852_v13 = vld [vmem:[%s19566_s7 + $0x25c8] sm:$0xf0]  ;;  %v19251_v38 = vld [vmem:[%s19566_s7 + $0x2cd4] sm:$0xf]  ;;  %23582 = vst [vmem:[#allocation45_spill] sm:$0xff] %v20762_v19 }
 0x1e4   : > { %9858 = vmatpush.bf16.msrb.mxu3 %v16903_v58  ;;  %v16471_v58 = vor.u32 %v18927_v28, %v16468_v35  ;;  %v16855_v8 = vor.u32 %v19023_v12, %v16852_v13  ;;  %v19203_v28 = vld [vmem:[%s19566_s7 + $0x2b54] sm:$0xf]  ;;  %v17572_v35 = vld [vmem:[%s19566_s7 + $0x2b68] sm:$0xf0]  ;;  %v16831_v13 = vor.u32 %v19017_v15, %v16828_v50  ;;  %v17167_v15 = vor.u32 %v19101_v4, %v17164_v51  ;;  %v12370_v19 = vld [vmem:[%s19566_s7 + $0x2a8] sm:$0xf] }
 0x1e5   : > { %9817 = vmatpush.bf16.msrb.mxu0 %v16303_v27  ;;  %v19107_v27 = vld [vmem:[%s19566_s7 + $0x2854] sm:$0xf]  ;;  %v17764_v12 = vld [vmem:[%s19566_s7 + $0x2ce8] sm:$0xf0]  ;;  %v17359_v50 = vor.u32 %v19149_v1, %v17356_v16 }
 0x1e6   : > { %9831 = vmatpush.bf16.msrb.mxu1 %v16495_v3  ;;  %v16255_v3 = vor.u32 %v18873_v6, %v16252_v10  ;;  %v17575_v10 = vor.u32 %v19203_v28, %v17572_v35  ;;  %v17332_v28 = vld [vmem:[%s19566_s7 + $0x2988] sm:$0xf0]  ;;  %v19191_v35 = vld [vmem:[%s19566_s7 + $0x2af4] sm:$0xf] }
 0x1e7   : > { %9845 = vmatpush.bf16.msrb.mxu2 %v16687_v63  ;;  %v17380_v63 = vld [vmem:[%s19566_s7 + $0x29e8] sm:$0xf0]  ;;  %v19239_v51 = vld [vmem:[%s19566_s7 + $0x2c74] sm:$0xf] }
 0x1e8   : > { %9859 = vmatpush.bf16.msrb.mxu3 %v16879_v53  ;;  %v16447_v53 = vor.u32 %v18921_v31, %v16444_v7  ;;  %v17383_v6 = vor.u32 %v19155_v23, %v17380_v63  ;;  %v17548_v31 = vld [vmem:[%s19566_s7 + $0x2b38] sm:$0xf0]  ;;  %v20758_v7 = vpop.f32.mrf.mxu0  ;;  %v17140_v23 = vld [vmem:[%s19566_s7 + $0x2808] sm:$0xf0] }
 0x1e9   : > { %9818 = vmatpush.bf16.msrb.mxu0 %v16279_v55  ;;  %v17191_v55 = vor.u32 %v19107_v27, %v17188_v43  ;;  %23581 = vst [vmem:[#allocation44_spill] sm:$0xff] %v20758_v7  ;;  %v19095_v43 = vld [vmem:[%s19566_s7 + $0x27f4] sm:$0xf]  ;;  %v17716_v4 = vld [vmem:[%s19566_s7 + $0x2c88] sm:$0xf0] }
 0x1ea   : > { %9832 = vmatpush.bf16.msrb.mxu1 %v16471_v58  ;;  %v17767_v58 = vor.u32 %v19251_v38, %v17764_v12  ;;  %v17143_v16 = vor.u32 %v19095_v43, %v17140_v23  ;;  %v19089_v38 = vld [vmem:[%s19566_s7 + $0x27c4] sm:$0xf]  ;;  %v17116_v12 = vld [vmem:[%s19566_s7 + $0x27d8] sm:$0xf0]  ;;  %v17905_v7 = vld [vmem:[%s19566_s7 + $0x2bc] sm:$0xf0] }
 0x1eb   : > { %9846 = vmatpush.bf16.msrb.mxu2 %v16663_v9  ;;  %v19197_v9 = vld [vmem:[%s19566_s7 + $0x2b24] sm:$0xf] }
 0x1ec   : > { %9860 = vmatpush.bf16.msrb.mxu3 %v16855_v8  ;;  %v17740_v8 = vld [vmem:[%s19566_s7 + $0x2cb8] sm:$0xf0]  ;;  %v17551_v27 = vor.u32 %v19197_v9, %v17548_v31  ;;  %v20784_v31 = vpop.f32.mrf.mxu3 }
 0x1ed   : > { %9819 = vmatpush.bf16.msrb.mxu0 %v16255_v3  ;;  %v19143_v3 = vld [vmem:[%s19566_s7 + $0x2974] sm:$0xf]  ;;  %v17743_v63 = vor.u32 %v19245_v0, %v17740_v8  ;;  %v17500_v9 = vld [vmem:[%s19566_s7 + $0x2ad8] sm:$0xf0]  ;;  %23584 = vst [vmem:[#allocation47_spill] sm:$0xff] %v20784_v31 }
 0x1ee   : > { %9833 = vmatpush.bf16.msrb.mxu1 %v16447_v53  ;;  %v17524_v53 = vld [vmem:[%s19566_s7 + $0x2b08] sm:$0xf0]  ;;  %v17335_v1 = vor.u32 %v19143_v3, %v17332_v28  ;;  %v19233_v8 = vld [vmem:[%s19566_s7 + $0x2c44] sm:$0xf]  ;;  %v9611_v43 = vpop.f32.mrf.mxu1  ;;  %v12178_v31 = vld [vmem:[%s19566_s7 + $0x128] sm:$0xf] }
 0x1ef   : > { %9847 = vmatpush.bf16.msrb.mxu2 %v16639_v62  ;;  %v17527_v62 = vor.u32 %v19191_v35, %v17524_v53  ;;  %v17092_v28 = vld [vmem:[%s19566_s7 + $0x27a8] sm:$0xf0]  ;;  %v19131_v35 = vld [vmem:[%s19566_s7 + $0x2914] sm:$0xf] }
 0x1f0   : > { %9861 = vmatpush.bf16.msrb.mxu3 %v16831_v13  ;;  %9820 = vmatmul.bf16.vlgmr.msrb.gmra.mxu0 %v20096_v24  ;;  %v19137_v13 = vld [vmem:[%s19566_s7 + $0x2944] sm:$0xf]  ;;  %v9597_v0 = vpop.f32.mrf.mxu0 }
 0x1f1   : > { %9868 = vmatpush.bf16.msra.mxu0 %v17191_v55  ;;  %9834 = vmatmul.bf16.vlgmr.msrb.gmra.mxu1 %v20104_v30  ;;  %v20779_v55 = vpop.f32.mrf.mxu2 }
 0x1f2   : > { %9882 = vmatpush.bf16.msra.mxu1 %v17383_v6  ;;  %9848 = vmatmul.bf16.vlgmr.msrb.gmra.mxu2 %v20184_v34  ;;  %23583 = vst [vmem:[#allocation46_spill] sm:$0xff] %v20779_v55  ;;  %v17719_v6 = vor.u32 %v19239_v51, %v17716_v4  ;;  %v17284_v4 = vld [vmem:[%s19566_s7 + $0x2928] sm:$0xf0]  ;;  %v17857_v55 = vld [vmem:[%s19566_s7 + $0x13c] sm:$0xf0] }
 0x1f3   : > { %9896 = vmatpush.bf16.msra.mxu2 %v17575_v10  ;;  %9862 = vmatmul.bf16.vlgmr.msrb.gmra.mxu3 %v20193_v49  ;;  %v17308_v10 = vld [vmem:[%s19566_s7 + $0x2958] sm:$0xf0] }
 0x1f4   : > { %9910 = vmatpush.bf16.msra.mxu3 %v17767_v58  ;;  %v19185_v58 = vld [vmem:[%s19566_s7 + $0x2ac4] sm:$0xf]  ;;  %v17311_v23 = vor.u32 %v19137_v13, %v17308_v10  ;;  %v17068_v10 = vld [vmem:[%s19566_s7 + $0x2778] sm:$0xf0] }
 0x1f5   : > { %9869 = vmatpush.bf16.msra.mxu0 %v17167_v15  ;;  %v17692_v15 = vld [vmem:[%s19566_s7 + $0x2c58] sm:$0xf0]  ;;  %v17503_v3 = vor.u32 %v19185_v58, %v17500_v9  ;;  %v19125_v58 = vld [vmem:[%s19566_s7 + $0x28e4] sm:$0xf] }
 0x1f6   : > { %9883 = vmatpush.bf16.msra.mxu1 %v17359_v50  ;;  %v9598_v50 = vadd.f32 %v9597_v0, %v20726_v17  ;;  %v17695_v53 = vor.u32 %v19233_v8, %v17692_v15  ;;  %v17476_v17 = vld [vmem:[%s19566_s7 + $0x2aa8] sm:$0xf0]  ;;  %v17260_v8 = vld [vmem:[%s19566_s7 + $0x28f8] sm:$0xf0]  ;;  %v19173_v15 = vld [vmem:[%s19566_s7 + $0x2a64] sm:$0xf] }
 0x1f7   : > { %9897 = vmatpush.bf16.msra.mxu2 %v17551_v27  ;;  %v17119_v27 = vor.u32 %v19089_v38, %v17116_v12  ;;  %v19227_v38 = vld [vmem:[%s19566_s7 + $0x2c14] sm:$0xf]  ;;  %v17287_v12 = vor.u32 %v19131_v35, %v17284_v4  ;;  %v17263_v35 = vor.u32 %v19125_v58, %v17260_v8  ;;  %v17020_v58 = vld [vmem:[%s19566_s7 + $0x2718] sm:$0xf0]  ;;  %v19113_v8 = vld [vmem:[%s19566_s7 + $0x2884] sm:$0xf] }
 0x1f8   : > { %9911 = vmatpush.bf16.msra.mxu3 %v17743_v63  ;;  %v19083_v63 = vld [vmem:[%s19566_s7 + $0x2794] sm:$0xf]  ;;  %v9612_v51 = vadd.f32 %v9611_v43, %v9598_v50  ;;  %v17452_v50 = vld [vmem:[%s19566_s7 + $0x2a78] sm:$0xf0]  ;;  %v9639_v43 = vpop.f32.mrf.mxu3 }
 0x1f9   : > { %9870 = vmatpush.bf16.msra.mxu0 %v17143_v16  ;;  %v19179_v16 = vld [vmem:[%s19566_s7 + $0x2a94] sm:$0xf]  ;;  %v9625_v0 = vpop.f32.mrf.mxu2 }
 0x1fa   : > { %9884 = vmatpush.bf16.msra.mxu1 %v17335_v1  ;;  %v17668_v1 = vld [vmem:[%s19566_s7 + $0x2c28] sm:$0xf0]  ;;  %v17479_v13 = vor.u32 %v19179_v16, %v17476_v17  ;;  %v19071_v4 = vld [vmem:[%s19566_s7 + $0x2734] sm:$0xf] }
 0x1fb   : > { %9898 = vmatpush.bf16.msra.mxu2 %v17527_v62  ;;  %v17095_v62 = vor.u32 %v19083_v63, %v17092_v28  ;;  %v17671_v9 = vor.u32 %v19227_v38, %v17668_v1  ;;  %v19119_v16 = vld [vmem:[%s19566_s7 + $0x28b4] sm:$0xf]  ;;  %v17236_v38 = vld [vmem:[%s19566_s7 + $0x28c8] sm:$0xf0] }
 0x1fc   : > { %9912 = vmatpush.bf16.msra.mxu3 %v17719_v6  ;;  %v19077_v6 = vld [vmem:[%s19566_s7 + $0x2764] sm:$0xf]  ;;  %v19167_v1 = vld [vmem:[%s19566_s7 + $0x2a34] sm:$0xf] }
 0x1fd   : > { %9871 = vmatpush.bf16.msra.mxu0 %v17119_v27  ;;  %v9626_v27 = vadd.f32 %v9625_v0, %v9612_v51  ;;  %v17071_v63 = vor.u32 %v19077_v6, %v17068_v10  ;;  %v17044_v51 = vld [vmem:[%s19566_s7 + $0x2748] sm:$0xf0]  ;;  %v19065_v10 = vld [vmem:[%s19566_s7 + $0x2704] sm:$0xf] }
 0x1fe   : > { %9885 = vmatpush.bf16.msra.mxu1 %v17311_v23  ;;  %v19221_v23 = vld [vmem:[%s19566_s7 + $0x2be4] sm:$0xf]  ;;  %v17047_v6 = vor.u32 %v19071_v4, %v17044_v51  ;;  %v17863_v4 = vld [vmem:[%s19566_s7 + $0x16c] sm:$0xf0]  ;;  %v12394_v51 = vld [vmem:[%s19566_s7 + $0x2d8] sm:$0xf] }
 0x1ff   : > { %9899 = vmatpush.bf16.msra.mxu2 %v17503_v3  ;;  %v17644_v3 = vld [vmem:[%s19566_s7 + $0x2bf8] sm:$0xf0]  ;;  %v20805_v28 = vadd.f32 %v9639_v43, %v9626_v27 }
 0x200   : > { %9913 = vmatpush.bf16.msra.mxu3 %v17695_v53  ;;  %v17455_v53 = vor.u32 %v19173_v15, %v17452_v50  ;;  %v17647_v17 = vor.u32 %v19221_v23, %v17644_v3  ;;  %v17212_v15 = vld [vmem:[%s19566_s7 + $0x2898] sm:$0xf0]  ;;  %v19161_v50 = vld [vmem:[%s19566_s7 + $0x2a04] sm:$0xf] }
 0x201   : > { %9872 = vmatpush.bf16.msra.mxu0 %v17095_v62  ;;  %v17428_v62 = vld [vmem:[%s19566_s7 + $0x2a48] sm:$0xf0]  ;;  %v17404_v43 = vld [vmem:[%s19566_s7 + $0x2a18] sm:$0xf0]  ;;  %v19209_v23 = vld [vmem:[%s19566_s7 + $0x2b84] sm:$0xf] }
 0x202   : > { %9886 = vmatpush.bf16.msra.mxu1 %v17287_v12  ;;  %v19215_v12 = vld [vmem:[%s19566_s7 + $0x2bb4] sm:$0xf]  ;;  %v17431_v0 = vor.u32 %v19167_v1, %v17428_v62  ;;  %v17596_v3 = vld [vmem:[%s19566_s7 + $0x2b98] sm:$0xf0]  ;;  %v17407_v1 = vor.u32 %v19161_v50, %v17404_v43  ;;  %v12778_v62 = vld [vmem:[%s19566_s7 + $0x5d8] sm:$0xf]  ;;  %v20841_v43 = vpop.f32.mrf.mxu1 }
 0x203   : > { %9900 = vmatpush.bf16.msra.mxu2 %v17479_v13  ;;  %v17620_v13 = vld [vmem:[%s19566_s7 + $0x2bc8] sm:$0xf0]  ;;  %v12754_v50 = vld [vmem:[%s19566_s7 + $0x5a8] sm:$0xf]  ;;  %23586 = vst [vmem:[#allocation49_spill] sm:$0xff] %v20841_v43 }
 0x204   : > { %9914 = vmatpush.bf16.msra.mxu3 %v17671_v9  ;;  %v17239_v9 = vor.u32 %v19119_v16, %v17236_v38  ;;  %v17623_v27 = vor.u32 %v19215_v12, %v17620_v13  ;;  %v12586_v16 = vld [vmem:[%s19566_s7 + $0x458] sm:$0xf]  ;;  %v17959_v38 = vld [vmem:[%s19566_s7 + $0x46c] sm:$0xf0]  ;;  %v17599_v13 = vor.u32 %v19209_v23, %v17596_v3  ;;  %v12179_v23 = vor.u32 %v17857_v55, %v12178_v31  ;;  %v13138_v43 = vld [vmem:[%s19566_s7 + $0x8a8] sm:$0xf] }
 0x205   : > { %9873 = vmatpush.bf16.msra.mxu0 %v17071_v63  ;;  %v12202_v63 = vld [vmem:[%s19566_s7 + $0x158] sm:$0xf]  ;;  %v18007_v12 = vld [vmem:[%s19566_s7 + $0x5ec] sm:$0xf0]  ;;  %v12371_v3 = vor.u32 %v17905_v7, %v12370_v19 }
 0x206   : > { %9887 = vmatpush.bf16.msra.mxu1 %v17263_v35  ;;  %v17023_v35 = vor.u32 %v19065_v10, %v17020_v58  ;;  %v12587_v58 = vor.u32 %v17959_v38, %v12586_v16  ;;  %v17899_v16 = vld [vmem:[%s19566_s7 + $0x28c] sm:$0xf0]  ;;  %v12538_v38 = vld [vmem:[%s19566_s7 + $0x3f8] sm:$0xf] }
 0x207   : > { %9901 = vmatpush.bf16.msra.mxu2 %v17455_v53  ;;  %v17911_v53 = vld [vmem:[%s19566_s7 + $0x2ec] sm:$0xf0]  ;;  %v12730_v7 = vld [vmem:[%s19566_s7 + $0x578] sm:$0xf] }
 0x208   : > { %9915 = vmatpush.bf16.msra.mxu3 %v17647_v17  ;;  %v17215_v17 = vor.u32 %v19113_v8, %v17212_v15  ;;  %v12395_v10 = vor.u32 %v17911_v53, %v12394_v51  ;;  %v17953_v8 = vld [vmem:[%s19566_s7 + $0x43c] sm:$0xf0]  ;;  %v20837_v15 = vpop.f32.mrf.mxu0  ;;  %v17851_v51 = vld [vmem:[%s19566_s7 + $0x10c] sm:$0xf0] }
 0x209   : > { %9874 = vmatpush.bf16.msra.mxu0 %v17047_v6  ;;  %v12203_v6 = vor.u32 %v17863_v4, %v12202_v63  ;;  %23585 = vst [vmem:[#allocation48_spill] sm:$0xff] %v20837_v15  ;;  %v12154_v4 = vld [vmem:[%s19566_s7 + $0xf8] sm:$0xf]  ;;  %v17995_v19 = vld [vmem:[%s19566_s7 + $0x58c] sm:$0xf0] }
 0x20a   : > { %9888 = vmatpush.bf16.msra.mxu1 %v17239_v9  ;;  %v12779_v9 = vor.u32 %v18007_v12, %v12778_v62  ;;  %v12155_v55 = vor.u32 %v17851_v51, %v12154_v4  ;;  %v12130_v62 = vld [vmem:[%s19566_s7 + $0xc8] sm:$0xf]  ;;  %v17845_v12 = vld [vmem:[%s19566_s7 + $0xdc] sm:$0xf0] }
 0x20b   : > { %9902 = vmatpush.bf16.msra.mxu2 %v17431_v0  ;;  %v12562_v0 = vld [vmem:[%s19566_s7 + $0x428] sm:$0xf]  ;;  %v18097_v15 = vld [vmem:[%s19566_s7 + $0x8bc] sm:$0xf0] }
 0x20c   : > { %9916 = vmatpush.bf16.msra.mxu3 %v17623_v27  ;;  %v18001_v27 = vld [vmem:[%s19566_s7 + $0x5bc] sm:$0xf0]  ;;  %v12563_v63 = vor.u32 %v17953_v8, %v12562_v0  ;;  %v20863_v8 = vpop.f32.mrf.mxu3 }
 0x20d   : > { %9875 = vmatpush.bf16.msra.mxu0 %v17023_v35  ;;  %v12346_v35 = vld [vmem:[%s19566_s7 + $0x278] sm:$0xf]  ;;  %v12755_v53 = vor.u32 %v18001_v27, %v12754_v50  ;;  %v17941_v0 = vld [vmem:[%s19566_s7 + $0x3dc] sm:$0xf0]  ;;  %23588 = vst [vmem:[#allocation51_spill] sm:$0xff] %v20863_v8 }
 0x20e   : > { %9889 = vmatpush.bf16.msra.mxu1 %v17215_v17  ;;  %v17947_v17 = vld [vmem:[%s19566_s7 + $0x40c] sm:$0xf0]  ;;  %v12347_v31 = vor.u32 %v17899_v16, %v12346_v35  ;;  %v12706_v27 = vld [vmem:[%s19566_s7 + $0x548] sm:$0xf]  ;;  %v9667_v4 = vpop.f32.mrf.mxu1 }
 0x20f   : > { %9903 = vmatpush.bf16.msra.mxu2 %v17407_v1  ;;  %v12539_v1 = vor.u32 %v17947_v17, %v12538_v38  ;;  %v17839_v16 = vld [vmem:[%s19566_s7 + $0xac] sm:$0xf0]  ;;  %v12298_v38 = vld [vmem:[%s19566_s7 + $0x218] sm:$0xf]  ;;  %v12946_v8 = vld [vmem:[%s19566_s7 + $0x728] sm:$0xf] }
 0x210   : > { %9917 = vmatpush.bf16.msra.mxu3 %v17599_v13  ;;  %9876 = vmatmul.bf16.vlgmr.msra.gmra.mxu0 %v20191_v46  ;;  %v12322_v13 = vld [vmem:[%s19566_s7 + $0x248] sm:$0xf]  ;;  %v9653_v50 = vpop.f32.mrf.mxu0 }
 0x211   : > { %9924 = vmatpush.bf16.msrb.mxu0 %v12203_v6  ;;  %9890 = vmatmul.bf16.vlgmr.msra.gmra.mxu1 %v20199_v54  ;;  %v20858_v6 = vpop.f32.mrf.mxu2 }
 0x212   : > { %9938 = vmatpush.bf16.msrb.mxu1 %v12395_v10  ;;  %9904 = vmatmul.bf16.vlgmr.msra.gmra.mxu2 %v20275_v22  ;;  %23587 = vst [vmem:[#allocation50_spill] sm:$0xff] %v20858_v6  ;;  %v12731_v10 = vor.u32 %v17995_v19, %v12730_v7  ;;  %v17887_v19 = vld [vmem:[%s19566_s7 + $0x22c] sm:$0xf0]  ;;  %v18049_v6 = vld [vmem:[%s19566_s7 + $0x73c] sm:$0xf0] }
 0x213   : > { %9952 = vmatpush.bf16.msrb.mxu2 %v12587_v58  ;;  %9918 = vmatmul.bf16.vlgmr.msra.gmra.mxu3 %v20282_v25  ;;  %v17893_v58 = vld [vmem:[%s19566_s7 + $0x25c] sm:$0xf0] }
 0x214   : > { %9966 = vmatpush.bf16.msrb.mxu3 %v12779_v9  ;;  %v12514_v9 = vld [vmem:[%s19566_s7 + $0x3c8] sm:$0xf]  ;;  %v12323_v51 = vor.u32 %v17893_v58, %v12322_v13  ;;  %v17833_v58 = vld [vmem:[%s19566_s7 + $0x7c] sm:$0xf0] }
 0x215   : > { %9925 = vmatpush.bf16.msrb.mxu0 %v12179_v23  ;;  %v17989_v23 = vld [vmem:[%s19566_s7 + $0x55c] sm:$0xf0]  ;;  %v12515_v35 = vor.u32 %v17941_v0, %v12514_v9  ;;  %v12274_v9 = vld [vmem:[%s19566_s7 + $0x1e8] sm:$0xf] }
 0x216   : > { %9939 = vmatpush.bf16.msrb.mxu1 %v12371_v3  ;;  %v9654_v3 = vadd.f32 %v9653_v50, %v20805_v28  ;;  %v12707_v17 = vor.u32 %v17989_v23, %v12706_v27  ;;  %v17935_v28 = vld [vmem:[%s19566_s7 + $0x3ac] sm:$0xf0]  ;;  %v17881_v27 = vld [vmem:[%s19566_s7 + $0x1fc] sm:$0xf0]  ;;  %v12466_v23 = vld [vmem:[%s19566_s7 + $0x368] sm:$0xf] }
 0x217   : > { %9953 = vmatpush.bf16.msrb.mxu2 %v12563_v63  ;;  %v12131_v63 = vor.u32 %v17845_v12, %v12130_v62  ;;  %v12682_v62 = vld [vmem:[%s19566_s7 + $0x518] sm:$0xf]  ;;  %v12299_v12 = vor.u32 %v17887_v19, %v12298_v38  ;;  %v12275_v38 = vor.u32 %v17881_v27, %v12274_v9  ;;  %v17821_v9 = vld [vmem:[%s19566_s7 + $0x1c] sm:$0xf0]  ;;  %v12226_v27 = vld [vmem:[%s19566_s7 + $0x188] sm:$0xf] }
 0x218   : > { %9967 = vmatpush.bf16.msrb.mxu3 %v12755_v53  ;;  %v12106_v53 = vld [vmem:[%s19566_s7 + $0x98] sm:$0xf]  ;;  %v9668_v7 = vadd.f32 %v9667_v4, %v9654_v3  ;;  %v17929_v3 = vld [vmem:[%s19566_s7 + $0x37c] sm:$0xf0]  ;;  %v9695_v4 = vpop.f32.mrf.mxu3 }
 0x219   : > { %9926 = vmatpush.bf16.msrb.mxu0 %v12155_v55  ;;  %v12490_v55 = vld [vmem:[%s19566_s7 + $0x398] sm:$0xf]  ;;  %v9681_v50 = vpop.f32.mrf.mxu2 }
 0x21a   : > { %9940 = vmatpush.bf16.msrb.mxu1 %v12347_v31  ;;  %v17983_v31 = vld [vmem:[%s19566_s7 + $0x52c] sm:$0xf0]  ;;  %v12491_v13 = vor.u32 %v17935_v28, %v12490_v55  ;;  %v12058_v19 = vld [vmem:[%s19566_s7 + $0x38] sm:$0xf] }
 0x21b   : > { %9954 = vmatpush.bf16.msrb.mxu2 %v12539_v1  ;;  %v12107_v1 = vor.u32 %v17839_v16, %v12106_v53  ;;  %v12683_v0 = vor.u32 %v17983_v31, %v12682_v62  ;;  %v12250_v55 = vld [vmem:[%s19566_s7 + $0x1b8] sm:$0xf]  ;;  %v17875_v62 = vld [vmem:[%s19566_s7 + $0x1cc] sm:$0xf0] }
 0x21c   : > { %9968 = vmatpush.bf16.msrb.mxu3 %v12731_v10  ;;  %v12082_v10 = vld [vmem:[%s19566_s7 + $0x68] sm:$0xf]  ;;  %v12442_v31 = vld [vmem:[%s19566_s7 + $0x338] sm:$0xf] }
 0x21d   : > { %9927 = vmatpush.bf16.msrb.mxu0 %v12131_v63  ;;  %v9682_v63 = vadd.f32 %v9681_v50, %v9668_v7  ;;  %v12083_v53 = vor.u32 %v17833_v58, %v12082_v10  ;;  %v17827_v7 = vld [vmem:[%s19566_s7 + $0x4c] sm:$0xf0]  ;;  %v12034_v58 = vld [vmem:[%s19566_s7 + $0x8] sm:$0xf] }
 0x21e   : > { %9941 = vmatpush.bf16.msrb.mxu1 %v12323_v51  ;;  %v12658_v51 = vld [vmem:[%s19566_s7 + $0x4e8] sm:$0xf]  ;;  %v12059_v10 = vor.u32 %v17827_v7, %v12058_v19  ;;  %v18055_v19 = vld [vmem:[%s19566_s7 + $0x76c] sm:$0xf0]  ;;  %v13162_v7 = vld [vmem:[%s19566_s7 + $0x8d8] sm:$0xf] }
 0x21f   : > { %9955 = vmatpush.bf16.msrb.mxu2 %v12515_v35  ;;  %v17977_v35 = vld [vmem:[%s19566_s7 + $0x4fc] sm:$0xf0]  ;;  %v20884_v16 = vadd.f32 %v9695_v4, %v9682_v63 }
 0x220   : > { %9969 = vmatpush.bf16.msrb.mxu3 %v12707_v17  ;;  %v12467_v17 = vor.u32 %v17929_v3, %v12466_v23  ;;  %v12659_v28 = vor.u32 %v17977_v35, %v12658_v51  ;;  %v17869_v23 = vld [vmem:[%s19566_s7 + $0x19c] sm:$0xf0]  ;;  %v12418_v3 = vld [vmem:[%s19566_s7 + $0x308] sm:$0xf] }
 0x221   : > { %9928 = vmatpush.bf16.msrb.mxu0 %v12107_v1  ;;  %v17923_v1 = vld [vmem:[%s19566_s7 + $0x34c] sm:$0xf0]  ;;  %v17917_v4 = vld [vmem:[%s19566_s7 + $0x31c] sm:$0xf0]  ;;  %v12610_v51 = vld [vmem:[%s19566_s7 + $0x488] sm:$0xf] }
 0x222   : > { %9942 = vmatpush.bf16.msrb.mxu1 %v12299_v12  ;;  %v12634_v12 = vld [vmem:[%s19566_s7 + $0x4b8] sm:$0xf]  ;;  %v12443_v50 = vor.u32 %v17923_v1, %v12442_v31  ;;  %v17965_v35 = vld [vmem:[%s19566_s7 + $0x49c] sm:$0xf0]  ;;  %v12419_v31 = vor.u32 %v17917_v4, %v12418_v3  ;;  %v13522_v3 = vld [vmem:[%s19566_s7 + $0xba8] sm:$0xf]  ;;  %v20920_v4 = vpop.f32.mrf.mxu1 }
 0x223   : > { %9956 = vmatpush.bf16.msrb.mxu2 %v12491_v13  ;;  %v17971_v13 = vld [vmem:[%s19566_s7 + $0x4cc] sm:$0xf0]  ;;  %v13546_v1 = vld [vmem:[%s19566_s7 + $0xbd8] sm:$0xf]  ;;  %23590 = vst [vmem:[#allocation53_spill] sm:$0xff] %v20920_v4 }
 0x224   : > { %9970 = vmatpush.bf16.msrb.mxu3 %v12683_v0  ;;  %v12251_v0 = vor.u32 %v17875_v62, %v12250_v55  ;;  %v12635_v63 = vor.u32 %v17971_v13, %v12634_v12  ;;  %v13354_v55 = vld [vmem:[%s19566_s7 + $0xa58] sm:$0xf]  ;;  %v18151_v62 = vld [vmem:[%s19566_s7 + $0xa6c] sm:$0xf0]  ;;  %v12611_v13 = vor.u32 %v17965_v35, %v12610_v51  ;;  %v12947_v51 = vor.u32 %v18049_v6, %v12946_v8  ;;  %v12898_v8 = vld [vmem:[%s19566_s7 + $0x6c8] sm:$0xf] }
 0x225   : > { %9929 = vmatpush.bf16.msrb.mxu0 %v12083_v53  ;;  %v12970_v53 = vld [vmem:[%s19566_s7 + $0x758] sm:$0xf]  ;;  %v18199_v12 = vld [vmem:[%s19566_s7 + $0xbec] sm:$0xf0]  ;;  %v13139_v35 = vor.u32 %v18097_v15, %v13138_v43  ;;  %v13906_v4 = vld [vmem:[%s19566_s7 + $0xea8] sm:$0xf] }
 0x226   : > { %9943 = vmatpush.bf16.msrb.mxu1 %v12275_v38  ;;  %v12035_v38 = vor.u32 %v17821_v9, %v12034_v58  ;;  %v13355_v9 = vor.u32 %v18151_v62, %v13354_v55  ;;  %v18091_v55 = vld [vmem:[%s19566_s7 + $0x88c] sm:$0xf0]  ;;  %v13306_v62 = vld [vmem:[%s19566_s7 + $0x9f8] sm:$0xf] }
 0x227   : > { %9957 = vmatpush.bf16.msrb.mxu2 %v12467_v17  ;;  %v18103_v17 = vld [vmem:[%s19566_s7 + $0x8ec] sm:$0xf0] }
 0x228   : > { %9971 = vmatpush.bf16.msrb.mxu3 %v12659_v28  ;;  %v12227_v28 = vor.u32 %v17869_v23, %v12226_v27  ;;  %v13163_v58 = vor.u32 %v18103_v17, %v13162_v7  ;;  %v18145_v27 = vld [vmem:[%s19566_s7 + $0xa3c] sm:$0xf0]  ;;  %v20916_v23 = vpop.f32.mrf.mxu0  ;;  %v18043_v7 = vld [vmem:[%s19566_s7 + $0x70c] sm:$0xf0] }
 0x229   : > { %9930 = vmatpush.bf16.msrb.mxu0 %v12059_v10  ;;  %v12971_v10 = vor.u32 %v18055_v19, %v12970_v53  ;;  %23589 = vst [vmem:[#allocation52_spill] sm:$0xff] %v20916_v23  ;;  %v12922_v19 = vld [vmem:[%s19566_s7 + $0x6f8] sm:$0xf]  ;;  %v18289_v23 = vld [vmem:[%s19566_s7 + $0xebc] sm:$0xf0] }
 0x22a   : > { %9944 = vmatpush.bf16.msrb.mxu1 %v12251_v0  ;;  %v13547_v0 = vor.u32 %v18199_v12, %v13546_v1  ;;  %v18187_v1 = vld [vmem:[%s19566_s7 + $0xb8c] sm:$0xf0]  ;;  %v12923_v15 = vor.u32 %v18043_v7, %v12922_v19  ;;  %v18037_v12 = vld [vmem:[%s19566_s7 + $0x6dc] sm:$0xf0] }
 0x22b   : > { %9958 = vmatpush.bf16.msrb.mxu2 %v12443_v50  ;;  %v13330_v50 = vld [vmem:[%s19566_s7 + $0xa28] sm:$0xf] }
 0x22c   : > { %9972 = vmatpush.bf16.msrb.mxu3 %v12635_v63  ;;  %v18193_v63 = vld [vmem:[%s19566_s7 + $0xbbc] sm:$0xf0]  ;;  %v13331_v53 = vor.u32 %v18145_v27, %v13330_v50  ;;  %v20942_v27 = vpop.f32.mrf.mxu3 }
 0x22d   : > { %9931 = vmatpush.bf16.msrb.mxu0 %v12035_v38  ;;  %v13114_v38 = vld [vmem:[%s19566_s7 + $0x878] sm:$0xf]  ;;  %v13523_v17 = vor.u32 %v18193_v63, %v13522_v3  ;;  %v18133_v50 = vld [vmem:[%s19566_s7 + $0x9dc] sm:$0xf0]  ;;  %23592 = vst [vmem:[#allocation55_spill] sm:$0xff] %v20942_v27 }
 0x22e   : > { %9945 = vmatpush.bf16.msrb.mxu1 %v12227_v28  ;;  %v18139_v28 = vld [vmem:[%s19566_s7 + $0xa0c] sm:$0xf0]  ;;  %v13115_v43 = vor.u32 %v18091_v55, %v13114_v38  ;;  %v13474_v63 = vld [vmem:[%s19566_s7 + $0xb48] sm:$0xf]  ;;  %v9723_v19 = vpop.f32.mrf.mxu1 }
 0x22f   : > { %9959 = vmatpush.bf16.msrb.mxu2 %v12419_v31  ;;  %v13498_v31 = vld [vmem:[%s19566_s7 + $0xb78] sm:$0xf]  ;;  %v13307_v6 = vor.u32 %v18139_v28, %v13306_v62  ;;  %v18031_v55 = vld [vmem:[%s19566_s7 + $0x6ac] sm:$0xf0]  ;;  %v13714_v27 = vld [vmem:[%s19566_s7 + $0xd28] sm:$0xf] }
 0x230   : > { %9973 = vmatpush.bf16.msrb.mxu3 %v12611_v13  ;;  %9932 = vmatmul.bf16.vlgmr.msrb.gmra.mxu0 %v19669_v59  ;;  %v13090_v13 = vld [vmem:[%s19566_s7 + $0x848] sm:$0xf]  ;;  %v9709_v3 = vpop.f32.mrf.mxu0  ;;  %v13066_v62 = vld [vmem:[%s19566_s7 + $0x818] sm:$0xf] }
 0x231   : > { %9980 = vmatpush.bf16.msra.mxu0 %v12971_v10  ;;  %9946 = vmatmul.bf16.vlgmr.msrb.gmra.mxu1 %v19685_v11  ;;  %v20937_v10 = vpop.f32.mrf.mxu2 }
 0x232   : > { %9994 = vmatpush.bf16.msra.mxu1 %v13163_v58  ;;  %9960 = vmatmul.bf16.vlgmr.msrb.gmra.mxu2 %v19675_v2  ;;  %23591 = vst [vmem:[#allocation54_spill] sm:$0xff] %v20937_v10  ;;  %v13499_v58 = vor.u32 %v18187_v1, %v13498_v31  ;;  %v18079_v1 = vld [vmem:[%s19566_s7 + $0x82c] sm:$0xf0]  ;;  %v18241_v10 = vld [vmem:[%s19566_s7 + $0xd3c] sm:$0xf0] }
 0x233   : > { %10008 = vmatpush.bf16.msra.mxu2 %v13355_v9  ;;  %9974 = vmatmul.bf16.vlgmr.msrb.gmra.mxu3 %v19691_v18  ;;  %v18085_v9 = vld [vmem:[%s19566_s7 + $0x85c] sm:$0xf0] }
 0x234   : > { %10022 = vmatpush.bf16.msra.mxu3 %v13547_v0  ;;  %v13282_v0 = vld [vmem:[%s19566_s7 + $0x9c8] sm:$0xf]  ;;  %v13091_v7 = vor.u32 %v18085_v9, %v13090_v13  ;;  %v18025_v9 = vld [vmem:[%s19566_s7 + $0x67c] sm:$0xf0] }
 0x235   : > { %9981 = vmatpush.bf16.msra.mxu0 %v12947_v51  ;;  %v18181_v51 = vld [vmem:[%s19566_s7 + $0xb5c] sm:$0xf0]  ;;  %v13283_v38 = vor.u32 %v18133_v50, %v13282_v0  ;;  %v13042_v0 = vld [vmem:[%s19566_s7 + $0x7e8] sm:$0xf] }
 0x236   : > { %9995 = vmatpush.bf16.msra.mxu1 %v13139_v35  ;;  %v9710_v35 = vadd.f32 %v9709_v3, %v20884_v16  ;;  %v13475_v28 = vor.u32 %v18181_v51, %v13474_v63  ;;  %v18127_v16 = vld [vmem:[%s19566_s7 + $0x9ac] sm:$0xf0]  ;;  %v18073_v63 = vld [vmem:[%s19566_s7 + $0x7fc] sm:$0xf0]  ;;  %v13234_v51 = vld [vmem:[%s19566_s7 + $0x968] sm:$0xf] }
 0x237   : > { %10009 = vmatpush.bf16.msra.mxu2 %v13331_v53  ;;  %v12899_v53 = vor.u32 %v18037_v12, %v12898_v8  ;;  %v13450_v8 = vld [vmem:[%s19566_s7 + $0xb18] sm:$0xf]  ;;  %v13067_v12 = vor.u32 %v18079_v1, %v13066_v62  ;;  %v13043_v62 = vor.u32 %v18073_v63, %v13042_v0  ;;  %v18013_v0 = vld [vmem:[%s19566_s7 + $0x61c] sm:$0xf0]  ;;  %v12994_v63 = vld [vmem:[%s19566_s7 + $0x788] sm:$0xf] }
 0x238   : > { %10023 = vmatpush.bf16.msra.mxu3 %v13523_v17  ;;  %v12874_v17 = vld [vmem:[%s19566_s7 + $0x698] sm:$0xf]  ;;  %v9724_v31 = vadd.f32 %v9723_v19, %v9710_v35  ;;  %v18121_v35 = vld [vmem:[%s19566_s7 + $0x97c] sm:$0xf0]  ;;  %v9751_v19 = vpop.f32.mrf.mxu3 }
 0x239   : > { %9982 = vmatpush.bf16.msra.mxu0 %v12923_v15  ;;  %v13258_v15 = vld [vmem:[%s19566_s7 + $0x998] sm:$0xf]  ;;  %v9737_v3 = vpop.f32.mrf.mxu2 }
 0x23a   : > { %9996 = vmatpush.bf16.msra.mxu1 %v13115_v43  ;;  %v18175_v43 = vld [vmem:[%s19566_s7 + $0xb2c] sm:$0xf0]  ;;  %v13259_v13 = vor.u32 %v18127_v16, %v13258_v15  ;;  %v12826_v1 = vld [vmem:[%s19566_s7 + $0x638] sm:$0xf] }
 0x23b   : > { %10010 = vmatpush.bf16.msra.mxu2 %v13307_v6  ;;  %v12875_v6 = vor.u32 %v18031_v55, %v12874_v17  ;;  %v13451_v50 = vor.u32 %v18175_v43, %v13450_v8  ;;  %v13018_v15 = vld [vmem:[%s19566_s7 + $0x7b8] sm:$0xf]  ;;  %v18067_v8 = vld [vmem:[%s19566_s7 + $0x7cc] sm:$0xf0] }
 0x23c   : > { %10024 = vmatpush.bf16.msra.mxu3 %v13499_v58  ;;  %v12850_v58 = vld [vmem:[%s19566_s7 + $0x668] sm:$0xf]  ;;  %v13210_v43 = vld [vmem:[%s19566_s7 + $0x938] sm:$0xf] }
 0x23d   : > { %9983 = vmatpush.bf16.msra.mxu0 %v12899_v53  ;;  %v9738_v53 = vadd.f32 %v9737_v3, %v9724_v31  ;;  %v12851_v17 = vor.u32 %v18025_v9, %v12850_v58  ;;  %v18019_v31 = vld [vmem:[%s19566_s7 + $0x64c] sm:$0xf0]  ;;  %v12802_v9 = vld [vmem:[%s19566_s7 + $0x608] sm:$0xf] }
 0x23e   : > { %9997 = vmatpush.bf16.msra.mxu1 %v13091_v7  ;;  %v13426_v7 = vld [vmem:[%s19566_s7 + $0xae8] sm:$0xf]  ;;  %v12827_v58 = vor.u32 %v18019_v31, %v12826_v1  ;;  %v18247_v1 = vld [vmem:[%s19566_s7 + $0xd6c] sm:$0xf0]  ;;  %v13930_v31 = vld [vmem:[%s19566_s7 + $0xed8] sm:$0xf] }
 0x23f   : > { %10011 = vmatpush.bf16.msra.mxu2 %v13283_v38  ;;  %v18169_v38 = vld [vmem:[%s19566_s7 + $0xafc] sm:$0xf0]  ;;  %v20963_v55 = vadd.f32 %v9751_v19, %v9738_v53 }
 0x240   : > { %10025 = vmatpush.bf16.msra.mxu3 %v13475_v28  ;;  %v13235_v28 = vor.u32 %v18121_v35, %v13234_v51  ;;  %v13427_v16 = vor.u32 %v18169_v38, %v13426_v7  ;;  %v18061_v51 = vld [vmem:[%s19566_s7 + $0x79c] sm:$0xf0]  ;;  %v13186_v35 = vld [vmem:[%s19566_s7 + $0x908] sm:$0xf] }
 0x241   : > { %9984 = vmatpush.bf16.msra.mxu0 %v12875_v6  ;;  %v18115_v6 = vld [vmem:[%s19566_s7 + $0x94c] sm:$0xf0]  ;;  %v18109_v19 = vld [vmem:[%s19566_s7 + $0x91c] sm:$0xf0]  ;;  %v13378_v7 = vld [vmem:[%s19566_s7 + $0xa88] sm:$0xf] }
 0x242   : > { %9998 = vmatpush.bf16.msra.mxu1 %v13067_v12  ;;  %v13402_v12 = vld [vmem:[%s19566_s7 + $0xab8] sm:$0xf]  ;;  %v13211_v3 = vor.u32 %v18115_v6, %v13210_v43  ;;  %v18157_v38 = vld [vmem:[%s19566_s7 + $0xa9c] sm:$0xf0]  ;;  %v13187_v43 = vor.u32 %v18109_v19, %v13186_v35  ;;  %v14290_v35 = vld [vmem:[%s19566_s7 + $0x11a8] sm:$0xf]  ;;  %v20999_v19 = vpop.f32.mrf.mxu1 }
 0x243   : > { %10012 = vmatpush.bf16.msra.mxu2 %v13259_v13  ;;  %v18163_v13 = vld [vmem:[%s19566_s7 + $0xacc] sm:$0xf0]  ;;  %v14314_v6 = vld [vmem:[%s19566_s7 + $0x11d8] sm:$0xf]  ;;  %23594 = vst [vmem:[#allocation57_spill] sm:$0xff] %v20999_v19 }
 0x244   : > { %10026 = vmatpush.bf16.msra.mxu3 %v13451_v50  ;;  %v13019_v50 = vor.u32 %v18067_v8, %v13018_v15  ;;  %v13403_v53 = vor.u32 %v18163_v13, %v13402_v12  ;;  %v14122_v15 = vld [vmem:[%s19566_s7 + $0x1058] sm:$0xf]  ;;  %v18343_v8 = vld [vmem:[%s19566_s7 + $0x106c] sm:$0xf0]  ;;  %v13379_v13 = vor.u32 %v18157_v38, %v13378_v7  ;;  %v13715_v7 = vor.u32 %v18241_v10, %v13714_v27  ;;  %v14674_v19 = vld [vmem:[%s19566_s7 + $0x14a8] sm:$0xf] }
 0x245   : > { %9985 = vmatpush.bf16.msra.mxu0 %v12851_v17  ;;  %v13738_v17 = vld [vmem:[%s19566_s7 + $0xd58] sm:$0xf]  ;;  %v18391_v12 = vld [vmem:[%s19566_s7 + $0x11ec] sm:$0xf0]  ;;  %v13907_v38 = vor.u32 %v18289_v23, %v13906_v4 }
 0x246   : > { %9999 = vmatpush.bf16.msra.mxu1 %v13043_v62  ;;  %v12803_v62 = vor.u32 %v18013_v0, %v12802_v9  ;;  %v14123_v0 = vor.u32 %v18343_v8, %v14122_v15  ;;  %v18283_v15 = vld [vmem:[%s19566_s7 + $0xe8c] sm:$0xf0]  ;;  %v14074_v8 = vld [vmem:[%s19566_s7 + $0xff8] sm:$0xf] }
 0x247   : > { %10013 = vmatpush.bf16.msra.mxu2 %v13235_v28  ;;  %v18295_v28 = vld [vmem:[%s19566_s7 + $0xeec] sm:$0xf0]  ;;  %v14266_v23 = vld [vmem:[%s19566_s7 + $0x1178] sm:$0xf] }
 0x248   : > { %10027 = vmatpush.bf16.msra.mxu3 %v13427_v16  ;;  %v12995_v16 = vor.u32 %v18061_v51, %v12994_v63  ;;  %v13931_v9 = vor.u32 %v18295_v28, %v13930_v31  ;;  %v18337_v63 = vld [vmem:[%s19566_s7 + $0x103c] sm:$0xf0]  ;;  %v20995_v51 = vpop.f32.mrf.mxu0  ;;  %v18235_v31 = vld [vmem:[%s19566_s7 + $0xd0c] sm:$0xf0] }
 0x249   : > { %9986 = vmatpush.bf16.msra.mxu0 %v12827_v58  ;;  %v13739_v58 = vor.u32 %v18247_v1, %v13738_v17  ;;  %23593 = vst [vmem:[#allocation56_spill] sm:$0xff] %v20995_v51  ;;  %v13690_v1 = vld [vmem:[%s19566_s7 + $0xcf8] sm:$0xf]  ;;  %v18379_v4 = vld [vmem:[%s19566_s7 + $0x118c] sm:$0xf0] }
 0x24a   : > { %10000 = vmatpush.bf16.msra.mxu1 %v13019_v50  ;;  %v14315_v50 = vor.u32 %v18391_v12, %v14314_v6  ;;  %v13691_v10 = vor.u32 %v18235_v31, %v13690_v1  ;;  %v13666_v6 = vld [vmem:[%s19566_s7 + $0xcc8] sm:$0xf]  ;;  %v18229_v12 = vld [vmem:[%s19566_s7 + $0xcdc] sm:$0xf0] }
 0x24b   : > { %10014 = vmatpush.bf16.msra.mxu2 %v13211_v3  ;;  %v14098_v3 = vld [vmem:[%s19566_s7 + $0x1028] sm:$0xf]  ;;  %v18481_v51 = vld [vmem:[%s19566_s7 + $0x14bc] sm:$0xf0] }
 0x24c   : > { %10028 = vmatpush.bf16.msra.mxu3 %v13403_v53  ;;  %v18385_v53 = vld [vmem:[%s19566_s7 + $0x11bc] sm:$0xf0]  ;;  %v14099_v17 = vor.u32 %v18337_v63, %v14098_v3  ;;  %v21021_v63 = vpop.f32.mrf.mxu3 }
 0x24d   : > { %9987 = vmatpush.bf16.msra.mxu0 %v12803_v62  ;;  %v13882_v62 = vld [vmem:[%s19566_s7 + $0xe78] sm:$0xf]  ;;  %v14291_v28 = vor.u32 %v18385_v53, %v14290_v35  ;;  %v18325_v3 = vld [vmem:[%s19566_s7 + $0xfdc] sm:$0xf0]  ;;  %23596 = vst [vmem:[#allocation59_spill] sm:$0xff] %v21021_v63 }
 0x24e   : > { %10001 = vmatpush.bf16.msra.mxu1 %v12995_v16  ;;  %v18331_v16 = vld [vmem:[%s19566_s7 + $0x100c] sm:$0xf0]  ;;  %v13883_v27 = vor.u32 %v18283_v15, %v13882_v62  ;;  %v14242_v53 = vld [vmem:[%s19566_s7 + $0x1148] sm:$0xf]  ;;  %v9779_v1 = vpop.f32.mrf.mxu1 }
 0x24f   : > { %10015 = vmatpush.bf16.msra.mxu2 %v13187_v43  ;;  %v14075_v43 = vor.u32 %v18331_v16, %v14074_v8  ;;  %v18223_v15 = vld [vmem:[%s19566_s7 + $0xcac] sm:$0xf0]  ;;  %v13834_v8 = vld [vmem:[%s19566_s7 + $0xe18] sm:$0xf]  ;;  %v14482_v63 = vld [vmem:[%s19566_s7 + $0x1328] sm:$0xf] }
 0x250   : > { %10029 = vmatpush.bf16.msra.mxu3 %v13379_v13  ;;  %9988 = vmatmul.bf16.vlgmr.msra.gmra.mxu0 %v19751_v40  ;;  %v13858_v13 = vld [vmem:[%s19566_s7 + $0xe48] sm:$0xf]  ;;  %v9765_v35 = vpop.f32.mrf.mxu0 }
 0x251   : > { %10036 = vmatpush.bf16.msrb.mxu0 %v13739_v58  ;;  %10002 = vmatmul.bf16.vlgmr.msra.gmra.mxu1 %v19758_v45  ;;  %v21016_v58 = vpop.f32.mrf.mxu2 }
 0x252   : > { %10050 = vmatpush.bf16.msrb.mxu1 %v13931_v9  ;;  %10016 = vmatmul.bf16.vlgmr.msra.gmra.mxu2 %v19756_v44  ;;  %23595 = vst [vmem:[#allocation58_spill] sm:$0xff] %v21016_v58  ;;  %v14267_v9 = vor.u32 %v18379_v4, %v14266_v23  ;;  %v18271_v4 = vld [vmem:[%s19566_s7 + $0xe2c] sm:$0xf0]  ;;  %v18433_v58 = vld [vmem:[%s19566_s7 + $0x133c] sm:$0xf0] }
 0x253   : > { %10064 = vmatpush.bf16.msrb.mxu2 %v14123_v0  ;;  %10030 = vmatmul.bf16.vlgmr.msra.gmra.mxu3 %v19762_v48  ;;  %v18277_v0 = vld [vmem:[%s19566_s7 + $0xe5c] sm:$0xf0] }
 0x254   : > { %10078 = vmatpush.bf16.msrb.mxu3 %v14315_v50  ;;  %v14050_v50 = vld [vmem:[%s19566_s7 + $0xfc8] sm:$0xf]  ;;  %v13859_v31 = vor.u32 %v18277_v0, %v13858_v13  ;;  %v18217_v0 = vld [vmem:[%s19566_s7 + $0xc7c] sm:$0xf0] }
 0x255   : > { %10037 = vmatpush.bf16.msrb.mxu0 %v13715_v7  ;;  %v18373_v7 = vld [vmem:[%s19566_s7 + $0x115c] sm:$0xf0]  ;;  %v14051_v62 = vor.u32 %v18325_v3, %v14050_v50  ;;  %v13810_v50 = vld [vmem:[%s19566_s7 + $0xde8] sm:$0xf] }
 0x256   : > { %10051 = vmatpush.bf16.msrb.mxu1 %v13907_v38  ;;  %v9766_v38 = vadd.f32 %v9765_v35, %v20963_v55  ;;  %v14243_v16 = vor.u32 %v18373_v7, %v14242_v53  ;;  %v18319_v55 = vld [vmem:[%s19566_s7 + $0xfac] sm:$0xf0]  ;;  %v18265_v53 = vld [vmem:[%s19566_s7 + $0xdfc] sm:$0xf0]  ;;  %v14002_v7 = vld [vmem:[%s19566_s7 + $0xf68] sm:$0xf] }
 0x257   : > { %10065 = vmatpush.bf16.msrb.mxu2 %v14099_v17  ;;  %v13667_v17 = vor.u32 %v18229_v12, %v13666_v6  ;;  %v14218_v6 = vld [vmem:[%s19566_s7 + $0x1118] sm:$0xf]  ;;  %v13835_v12 = vor.u32 %v18271_v4, %v13834_v8  ;;  %v13811_v8 = vor.u32 %v18265_v53, %v13810_v50  ;;  %v18205_v50 = vld [vmem:[%s19566_s7 + $0xc1c] sm:$0xf0]  ;;  %v13762_v53 = vld [vmem:[%s19566_s7 + $0xd88] sm:$0xf] }
 0x258   : > { %10079 = vmatpush.bf16.msrb.mxu3 %v14291_v28  ;;  %v13642_v28 = vld [vmem:[%s19566_s7 + $0xc98] sm:$0xf]  ;;  %v9780_v23 = vadd.f32 %v9779_v1, %v9766_v38  ;;  %v18313_v38 = vld [vmem:[%s19566_s7 + $0xf7c] sm:$0xf0]  ;;  %v9807_v1 = vpop.f32.mrf.mxu3 }
 0x259   : > { %10038 = vmatpush.bf16.msrb.mxu0 %v13691_v10  ;;  %v14026_v10 = vld [vmem:[%s19566_s7 + $0xf98] sm:$0xf]  ;;  %v9793_v35 = vpop.f32.mrf.mxu2 }
 0x25a   : > { %10052 = vmatpush.bf16.msrb.mxu1 %v13883_v27  ;;  %v18367_v27 = vld [vmem:[%s19566_s7 + $0x112c] sm:$0xf0]  ;;  %v14027_v13 = vor.u32 %v18319_v55, %v14026_v10  ;;  %v13594_v4 = vld [vmem:[%s19566_s7 + $0xc38] sm:$0xf] }
 0x25b   : > { %10066 = vmatpush.bf16.msrb.mxu2 %v14075_v43  ;;  %v13643_v43 = vor.u32 %v18223_v15, %v13642_v28  ;;  %v14219_v3 = vor.u32 %v18367_v27, %v14218_v6  ;;  %v13786_v10 = vld [vmem:[%s19566_s7 + $0xdb8] sm:$0xf]  ;;  %v18259_v6 = vld [vmem:[%s19566_s7 + $0xdcc] sm:$0xf0] }
 0x25c   : > { %10080 = vmatpush.bf16.msrb.mxu3 %v14267_v9  ;;  %v13618_v9 = vld [vmem:[%s19566_s7 + $0xc68] sm:$0xf]  ;;  %v13978_v27 = vld [vmem:[%s19566_s7 + $0xf38] sm:$0xf] }
 0x25d   : > { %10039 = vmatpush.bf16.msrb.mxu0 %v13667_v17  ;;  %v9794_v17 = vadd.f32 %v9793_v35, %v9780_v23  ;;  %v13619_v28 = vor.u32 %v18217_v0, %v13618_v9  ;;  %v18211_v23 = vld [vmem:[%s19566_s7 + $0xc4c] sm:$0xf0]  ;;  %v13570_v0 = vld [vmem:[%s19566_s7 + $0xc08] sm:$0xf] }
 0x25e   : > { %10053 = vmatpush.bf16.msrb.mxu1 %v13859_v31  ;;  %v14194_v31 = vld [vmem:[%s19566_s7 + $0x10e8] sm:$0xf]  ;;  %v13595_v9 = vor.u32 %v18211_v23, %v13594_v4  ;;  %v18439_v4 = vld [vmem:[%s19566_s7 + $0x136c] sm:$0xf0]  ;;  %v14698_v23 = vld [vmem:[%s19566_s7 + $0x14d8] sm:$0xf] }
 0x25f   : > { %10067 = vmatpush.bf16.msrb.mxu2 %v14051_v62  ;;  %v18361_v62 = vld [vmem:[%s19566_s7 + $0x10fc] sm:$0xf0]  ;;  %v21042_v15 = vadd.f32 %v9807_v1, %v9794_v17 }
 0x260   : > { %10081 = vmatpush.bf16.msrb.mxu3 %v14243_v16  ;;  %v14003_v16 = vor.u32 %v18313_v38, %v14002_v7  ;;  %v14195_v55 = vor.u32 %v18361_v62, %v14194_v31  ;;  %v18253_v7 = vld [vmem:[%s19566_s7 + $0xd9c] sm:$0xf0]  ;;  %v13954_v38 = vld [vmem:[%s19566_s7 + $0xf08] sm:$0xf] }
 0x261   : > { %10040 = vmatpush.bf16.msrb.mxu0 %v13643_v43  ;;  %v18307_v43 = vld [vmem:[%s19566_s7 + $0xf4c] sm:$0xf0]  ;;  %v18301_v1 = vld [vmem:[%s19566_s7 + $0xf1c] sm:$0xf0]  ;;  %v14146_v31 = vld [vmem:[%s19566_s7 + $0x1088] sm:$0xf] }
 0x262   : > { %10054 = vmatpush.bf16.msrb.mxu1 %v13835_v12  ;;  %v14170_v12 = vld [vmem:[%s19566_s7 + $0x10b8] sm:$0xf]  ;;  %v13979_v35 = vor.u32 %v18307_v43, %v13978_v27  ;;  %v18349_v62 = vld [vmem:[%s19566_s7 + $0x109c] sm:$0xf0]  ;;  %v13955_v27 = vor.u32 %v18301_v1, %v13954_v38  ;;  %v15058_v38 = vld [vmem:[%s19566_s7 + $0x17a8] sm:$0xf]  ;;  %v21078_v1 = vpop.f32.mrf.mxu1 }
 0x263   : > { %10068 = vmatpush.bf16.msrb.mxu2 %v14027_v13  ;;  %v18355_v13 = vld [vmem:[%s19566_s7 + $0x10cc] sm:$0xf0]  ;;  %v15082_v43 = vld [vmem:[%s19566_s7 + $0x17d8] sm:$0xf]  ;;  %23598 = vst [vmem:[#allocation61_spill] sm:$0xff] %v21078_v1 }
 0x264   : > { %10082 = vmatpush.bf16.msrb.mxu3 %v14219_v3  ;;  %v13787_v3 = vor.u32 %v18259_v6, %v13786_v10  ;;  %v14171_v17 = vor.u32 %v18355_v13, %v14170_v12  ;;  %v14890_v10 = vld [vmem:[%s19566_s7 + $0x1658] sm:$0xf]  ;;  %v18535_v6 = vld [vmem:[%s19566_s7 + $0x166c] sm:$0xf0]  ;;  %v14147_v13 = vor.u32 %v18349_v62, %v14146_v31  ;;  %v14483_v31 = vor.u32 %v18433_v58, %v14482_v63  ;;  %v15442_v1 = vld [vmem:[%s19566_s7 + $0x1aa8] sm:$0xf] }
 0x265   : > { %10041 = vmatpush.bf16.msrb.mxu0 %v13619_v28  ;;  %v14506_v28 = vld [vmem:[%s19566_s7 + $0x1358] sm:$0xf]  ;;  %v18583_v12 = vld [vmem:[%s19566_s7 + $0x17ec] sm:$0xf0]  ;;  %v14675_v62 = vor.u32 %v18481_v51, %v14674_v19 }
 0x266   : > { %10055 = vmatpush.bf16.msrb.mxu1 %v13811_v8  ;;  %v13571_v8 = vor.u32 %v18205_v50, %v13570_v0  ;;  %v14891_v50 = vor.u32 %v18535_v6, %v14890_v10  ;;  %v18475_v10 = vld [vmem:[%s19566_s7 + $0x148c] sm:$0xf0]  ;;  %v14842_v6 = vld [vmem:[%s19566_s7 + $0x15f8] sm:$0xf] }
 0x267   : > { %10069 = vmatpush.bf16.msrb.mxu2 %v14003_v16  ;;  %v18487_v16 = vld [vmem:[%s19566_s7 + $0x14ec] sm:$0xf0]  ;;  %v15034_v51 = vld [vmem:[%s19566_s7 + $0x1778] sm:$0xf] }
 0x268   : > { %10083 = vmatpush.bf16.msrb.mxu3 %v14195_v55  ;;  %v13763_v55 = vor.u32 %v18253_v7, %v13762_v53  ;;  %v14699_v0 = vor.u32 %v18487_v16, %v14698_v23  ;;  %v18529_v53 = vld [vmem:[%s19566_s7 + $0x163c] sm:$0xf0]  ;;  %v21074_v7 = vpop.f32.mrf.mxu0  ;;  %v18427_v23 = vld [vmem:[%s19566_s7 + $0x130c] sm:$0xf0] }
 0x269   : > { %10042 = vmatpush.bf16.msrb.mxu0 %v13595_v9  ;;  %v14507_v9 = vor.u32 %v18439_v4, %v14506_v28  ;;  %23597 = vst [vmem:[#allocation60_spill] sm:$0xff] %v21074_v7  ;;  %v14458_v4 = vld [vmem:[%s19566_s7 + $0x12f8] sm:$0xf]  ;;  %v18571_v19 = vld [vmem:[%s19566_s7 + $0x178c] sm:$0xf0] }
 0x26a   : > { %10056 = vmatpush.bf16.msrb.mxu1 %v13787_v3  ;;  %v15083_v3 = vor.u32 %v18583_v12, %v15082_v43  ;;  %v14459_v58 = vor.u32 %v18427_v23, %v14458_v4  ;;  %v14434_v43 = vld [vmem:[%s19566_s7 + $0x12c8] sm:$0xf]  ;;  %v18421_v12 = vld [vmem:[%s19566_s7 + $0x12dc] sm:$0xf0] }
 0x26b   : > { %10070 = vmatpush.bf16.msrb.mxu2 %v13979_v35  ;;  %v14866_v35 = vld [vmem:[%s19566_s7 + $0x1628] sm:$0xf]  ;;  %v18673_v7 = vld [vmem:[%s19566_s7 + $0x1abc] sm:$0xf0] }
 0x26c   : > { %10084 = vmatpush.bf16.msrb.mxu3 %v14171_v17  ;;  %v18577_v17 = vld [vmem:[%s19566_s7 + $0x17bc] sm:$0xf0]  ;;  %v14867_v28 = vor.u32 %v18529_v53, %v14866_v35  ;;  %v21100_v53 = vpop.f32.mrf.mxu3 }
 0x26d   : > { %10043 = vmatpush.bf16.msrb.mxu0 %v13571_v8  ;;  %v14650_v8 = vld [vmem:[%s19566_s7 + $0x1478] sm:$0xf]  ;;  %v15059_v16 = vor.u32 %v18577_v17, %v15058_v38  ;;  %v18517_v35 = vld [vmem:[%s19566_s7 + $0x15dc] sm:$0xf0]  ;;  %23600 = vst [vmem:[#allocation63_spill] sm:$0xff] %v21100_v53 }
 0x26e   : > { %10057 = vmatpush.bf16.msrb.mxu1 %v13763_v55  ;;  %v18523_v55 = vld [vmem:[%s19566_s7 + $0x160c] sm:$0xf0]  ;;  %v14651_v63 = vor.u32 %v18475_v10, %v14650_v8  ;;  %v15010_v17 = vld [vmem:[%s19566_s7 + $0x1748] sm:$0xf]  ;;  %v9835_v4 = vpop.f32.mrf.mxu1 }
 0x26f   : > { %10071 = vmatpush.bf16.msrb.mxu2 %v13955_v27  ;;  %v14843_v27 = vor.u32 %v18523_v55, %v14842_v6  ;;  %v18415_v10 = vld [vmem:[%s19566_s7 + $0x12ac] sm:$0xf0]  ;;  %v14602_v6 = vld [vmem:[%s19566_s7 + $0x1418] sm:$0xf]  ;;  %v15250_v53 = vld [vmem:[%s19566_s7 + $0x1928] sm:$0xf] }
 0x270   : > { %10085 = vmatpush.bf16.msrb.mxu3 %v14147_v13  ;;  %10044 = vmatmul.bf16.vlgmr.msrb.gmra.mxu0 %v19835_v32  ;;  %v14626_v13 = vld [vmem:[%s19566_s7 + $0x1448] sm:$0xf]  ;;  %v9821_v38 = vpop.f32.mrf.mxu0 }
 0x271   : > { %10092 = vmatpush.bf16.msra.mxu0 %v14507_v9  ;;  %10058 = vmatmul.bf16.vlgmr.msrb.gmra.mxu1 %v19842_v37  ;;  %v21095_v9 = vpop.f32.mrf.mxu2 }
 0x272   : > { %10106 = vmatpush.bf16.msra.mxu1 %v14699_v0  ;;  %10072 = vmatmul.bf16.vlgmr.msrb.gmra.mxu2 %v19840_v36  ;;  %23599 = vst [vmem:[#allocation62_spill] sm:$0xff] %v21095_v9  ;;  %v15035_v0 = vor.u32 %v18571_v19, %v15034_v51  ;;  %v18463_v19 = vld [vmem:[%s19566_s7 + $0x142c] sm:$0xf0]  ;;  %v18625_v9 = vld [vmem:[%s19566_s7 + $0x193c] sm:$0xf0] }
 0x273   : > { %10120 = vmatpush.bf16.msra.mxu2 %v14891_v50  ;;  %10086 = vmatmul.bf16.vlgmr.msrb.gmra.mxu3 %v19846_v41  ;;  %v18469_v50 = vld [vmem:[%s19566_s7 + $0x145c] sm:$0xf0] }
 0x274   : > { %10134 = vmatpush.bf16.msra.mxu3 %v15083_v3  ;;  %v14818_v3 = vld [vmem:[%s19566_s7 + $0x15c8] sm:$0xf]  ;;  %v14627_v23 = vor.u32 %v18469_v50, %v14626_v13  ;;  %v18409_v50 = vld [vmem:[%s19566_s7 + $0x127c] sm:$0xf0] }
 0x275   : > { %10093 = vmatpush.bf16.msra.mxu0 %v14483_v31  ;;  %v18565_v31 = vld [vmem:[%s19566_s7 + $0x175c] sm:$0xf0]  ;;  %v14819_v8 = vor.u32 %v18517_v35, %v14818_v3  ;;  %v14578_v3 = vld [vmem:[%s19566_s7 + $0x13e8] sm:$0xf] }
 0x276   : > { %10107 = vmatpush.bf16.msra.mxu1 %v14675_v62  ;;  %v9822_v62 = vadd.f32 %v9821_v38, %v21042_v15  ;;  %v15011_v55 = vor.u32 %v18565_v31, %v15010_v17  ;;  %v18511_v15 = vld [vmem:[%s19566_s7 + $0x15ac] sm:$0xf0]  ;;  %v18457_v17 = vld [vmem:[%s19566_s7 + $0x13fc] sm:$0xf0]  ;;  %v14770_v31 = vld [vmem:[%s19566_s7 + $0x1568] sm:$0xf] }
 0x277   : > { %10121 = vmatpush.bf16.msra.mxu2 %v14867_v28  ;;  %v14435_v28 = vor.u32 %v18421_v12, %v14434_v43  ;;  %v14986_v43 = vld [vmem:[%s19566_s7 + $0x1718] sm:$0xf]  ;;  %v14603_v12 = vor.u32 %v18463_v19, %v14602_v6  ;;  %v14579_v6 = vor.u32 %v18457_v17, %v14578_v3  ;;  %v18397_v3 = vld [vmem:[%s19566_s7 + $0x121c] sm:$0xf0]  ;;  %v14530_v17 = vld [vmem:[%s19566_s7 + $0x1388] sm:$0xf] }
 0x278   : > { %10135 = vmatpush.bf16.msra.mxu3 %v15059_v16  ;;  %v14410_v16 = vld [vmem:[%s19566_s7 + $0x1298] sm:$0xf]  ;;  %v9836_v51 = vadd.f32 %v9835_v4, %v9822_v62  ;;  %v18505_v62 = vld [vmem:[%s19566_s7 + $0x157c] sm:$0xf0]  ;;  %v9863_v4 = vpop.f32.mrf.mxu3 }
 0x279   : > { %10094 = vmatpush.bf16.msra.mxu0 %v14459_v58  ;;  %v14794_v58 = vld [vmem:[%s19566_s7 + $0x1598] sm:$0xf]  ;;  %v9849_v38 = vpop.f32.mrf.mxu2 }
 0x27a   : > { %10108 = vmatpush.bf16.msra.mxu1 %v14651_v63  ;;  %v18559_v63 = vld [vmem:[%s19566_s7 + $0x172c] sm:$0xf0]  ;;  %v14795_v13 = vor.u32 %v18511_v15, %v14794_v58  ;;  %v14362_v19 = vld [vmem:[%s19566_s7 + $0x1238] sm:$0xf] }
 0x27b   : > { %10122 = vmatpush.bf16.msra.mxu2 %v14843_v27  ;;  %v14411_v27 = vor.u32 %v18415_v10, %v14410_v16  ;;  %v14987_v35 = vor.u32 %v18559_v63, %v14986_v43  ;;  %v14554_v58 = vld [vmem:[%s19566_s7 + $0x13b8] sm:$0xf]  ;;  %v18451_v43 = vld [vmem:[%s19566_s7 + $0x13cc] sm:$0xf0] }
 0x27c   : > { %10136 = vmatpush.bf16.msra.mxu3 %v15035_v0  ;;  %v14386_v0 = vld [vmem:[%s19566_s7 + $0x1268] sm:$0xf]  ;;  %v14746_v63 = vld [vmem:[%s19566_s7 + $0x1538] sm:$0xf] }
 0x27d   : > { %10095 = vmatpush.bf16.msra.mxu0 %v14435_v28  ;;  %v9850_v28 = vadd.f32 %v9849_v38, %v9836_v51  ;;  %v14387_v16 = vor.u32 %v18409_v50, %v14386_v0  ;;  %v18403_v51 = vld [vmem:[%s19566_s7 + $0x124c] sm:$0xf0]  ;;  %v14338_v50 = vld [vmem:[%s19566_s7 + $0x1208] sm:$0xf] }
 0x27e   : > { %10109 = vmatpush.bf16.msra.mxu1 %v14627_v23  ;;  %v14962_v23 = vld [vmem:[%s19566_s7 + $0x16e8] sm:$0xf]  ;;  %v14363_v0 = vor.u32 %v18403_v51, %v14362_v19  ;;  %v18631_v19 = vld [vmem:[%s19566_s7 + $0x196c] sm:$0xf0]  ;;  %v15466_v51 = vld [vmem:[%s19566_s7 + $0x1ad8] sm:$0xf] }
 0x27f   : > { %10123 = vmatpush.bf16.msra.mxu2 %v14819_v8  ;;  %v18553_v8 = vld [vmem:[%s19566_s7 + $0x16fc] sm:$0xf0]  ;;  %v21121_v10 = vadd.f32 %v9863_v4, %v9850_v28 }
 0x280   : > { %10137 = vmatpush.bf16.msra.mxu3 %v15011_v55  ;;  %v14771_v55 = vor.u32 %v18505_v62, %v14770_v31  ;;  %v14963_v15 = vor.u32 %v18553_v8, %v14962_v23  ;;  %v18445_v31 = vld [vmem:[%s19566_s7 + $0x139c] sm:$0xf0]  ;;  %v14722_v62 = vld [vmem:[%s19566_s7 + $0x1508] sm:$0xf] }
 0x281   : > { %10096 = vmatpush.bf16.msra.mxu0 %v14411_v27  ;;  %v18499_v27 = vld [vmem:[%s19566_s7 + $0x154c] sm:$0xf0]  ;;  %v18493_v4 = vld [vmem:[%s19566_s7 + $0x151c] sm:$0xf0]  ;;  %v14914_v23 = vld [vmem:[%s19566_s7 + $0x1688] sm:$0xf] }
 0x282   : > { %10110 = vmatpush.bf16.msra.mxu1 %v14603_v12  ;;  %v14938_v12 = vld [vmem:[%s19566_s7 + $0x16b8] sm:$0xf]  ;;  %v14747_v38 = vor.u32 %v18499_v27, %v14746_v63  ;;  %v18541_v8 = vld [vmem:[%s19566_s7 + $0x169c] sm:$0xf0]  ;;  %v14723_v63 = vor.u32 %v18493_v4, %v14722_v62  ;;  %v15826_v62 = vld [vmem:[%s19566_s7 + $0x1da8] sm:$0xf]  ;;  %v21157_v4 = vpop.f32.mrf.mxu1 }
 0x283   : > { %10124 = vmatpush.bf16.msra.mxu2 %v14795_v13  ;;  %v18547_v13 = vld [vmem:[%s19566_s7 + $0x16cc] sm:$0xf0]  ;;  %v15850_v27 = vld [vmem:[%s19566_s7 + $0x1dd8] sm:$0xf]  ;;  %23602 = vst [vmem:[#allocation65_spill] sm:$0xff] %v21157_v4 }
 0x284   : > { %10138 = vmatpush.bf16.msra.mxu3 %v14987_v35  ;;  %v14555_v35 = vor.u32 %v18451_v43, %v14554_v58  ;;  %v14939_v28 = vor.u32 %v18547_v13, %v14938_v12  ;;  %v15658_v58 = vld [vmem:[%s19566_s7 + $0x1c58] sm:$0xf]  ;;  %v18727_v43 = vld [vmem:[%s19566_s7 + $0x1c6c] sm:$0xf0]  ;;  %v14915_v13 = vor.u32 %v18541_v8, %v14914_v23  ;;  %v15251_v23 = vor.u32 %v18625_v9, %v15250_v53  ;;  %v16210_v4 = vld [vmem:[%s19566_s7 + $0x20a8] sm:$0xf] }
 0x285   : > { %10097 = vmatpush.bf16.msra.mxu0 %v14387_v16  ;;  %v15274_v16 = vld [vmem:[%s19566_s7 + $0x1958] sm:$0xf]  ;;  %v18775_v12 = vld [vmem:[%s19566_s7 + $0x1dec] sm:$0xf0]  ;;  %v15443_v8 = vor.u32 %v18673_v7, %v15442_v1 }
 0x286   : > { %10111 = vmatpush.bf16.msra.mxu1 %v14579_v6  ;;  %v14339_v6 = vor.u32 %v18397_v3, %v14338_v50  ;;  %v15659_v3 = vor.u32 %v18727_v43, %v15658_v58  ;;  %v18667_v58 = vld [vmem:[%s19566_s7 + $0x1a8c] sm:$0xf0]  ;;  %v15610_v43 = vld [vmem:[%s19566_s7 + $0x1bf8] sm:$0xf] }
 0x287   : > { %10125 = vmatpush.bf16.msra.mxu2 %v14771_v55  ;;  %v18679_v55 = vld [vmem:[%s19566_s7 + $0x1aec] sm:$0xf0]  ;;  %v15802_v7 = vld [vmem:[%s19566_s7 + $0x1d78] sm:$0xf] }
 0x288   : > { %10139 = vmatpush.bf16.msra.mxu3 %v14963_v15  ;;  %v14531_v15 = vor.u32 %v18445_v31, %v14530_v17  ;;  %v15467_v50 = vor.u32 %v18679_v55, %v15466_v51  ;;  %v18721_v17 = vld [vmem:[%s19566_s7 + $0x1c3c] sm:$0xf0]  ;;  %v21153_v31 = vpop.f32.mrf.mxu0  ;;  %v18619_v51 = vld [vmem:[%s19566_s7 + $0x190c] sm:$0xf0] }
 0x289   : > { %10098 = vmatpush.bf16.msra.mxu0 %v14363_v0  ;;  %v15275_v0 = vor.u32 %v18631_v19, %v15274_v16  ;;  %23601 = vst [vmem:[#allocation64_spill] sm:$0xff] %v21153_v31  ;;  %v15226_v19 = vld [vmem:[%s19566_s7 + $0x18f8] sm:$0xf]  ;;  %v18763_v1 = vld [vmem:[%s19566_s7 + $0x1d8c] sm:$0xf0] }
 0x28a   : > { %10112 = vmatpush.bf16.msra.mxu1 %v14555_v35  ;;  %v15851_v35 = vor.u32 %v18775_v12, %v15850_v27  ;;  %v15227_v9 = vor.u32 %v18619_v51, %v15226_v19  ;;  %v15202_v27 = vld [vmem:[%s19566_s7 + $0x18c8] sm:$0xf]  ;;  %v18613_v12 = vld [vmem:[%s19566_s7 + $0x18dc] sm:$0xf0] }
 0x28b   : > { %10126 = vmatpush.bf16.msra.mxu2 %v14747_v38  ;;  %v15634_v38 = vld [vmem:[%s19566_s7 + $0x1c28] sm:$0xf]  ;;  %v18865_v31 = vld [vmem:[%s19566_s7 + $0x20bc] sm:$0xf0] }
 0x28c   : > { %10140 = vmatpush.bf16.msra.mxu3 %v14939_v28  ;;  %v18769_v28 = vld [vmem:[%s19566_s7 + $0x1dbc] sm:$0xf0]  ;;  %v15635_v16 = vor.u32 %v18721_v17, %v15634_v38  ;;  %v21179_v17 = vpop.f32.mrf.mxu3 }
 0x28d   : > { %10099 = vmatpush.bf16.msra.mxu0 %v14339_v6  ;;  %v15418_v6 = vld [vmem:[%s19566_s7 + $0x1a78] sm:$0xf]  ;;  %v15827_v55 = vor.u32 %v18769_v28, %v15826_v62  ;;  %v18709_v38 = vld [vmem:[%s19566_s7 + $0x1bdc] sm:$0xf0]  ;;  %23604 = vst [vmem:[#allocation67_spill] sm:$0xff] %v21179_v17 }
 0x28e   : > { %10113 = vmatpush.bf16.msra.mxu1 %v14531_v15  ;;  %v18715_v15 = vld [vmem:[%s19566_s7 + $0x1c0c] sm:$0xf0]  ;;  %v15419_v53 = vor.u32 %v18667_v58, %v15418_v6  ;;  %v15778_v28 = vld [vmem:[%s19566_s7 + $0x1d48] sm:$0xf]  ;;  %v9891_v19 = vpop.f32.mrf.mxu1 }
 0x28f   : > { %10127 = vmatpush.bf16.msra.mxu2 %v14723_v63  ;;  %v15611_v63 = vor.u32 %v18715_v15, %v15610_v43  ;;  %v18607_v58 = vld [vmem:[%s19566_s7 + $0x18ac] sm:$0xf0]  ;;  %v15370_v43 = vld [vmem:[%s19566_s7 + $0x1a18] sm:$0xf]  ;;  %v16018_v17 = vld [vmem:[%s19566_s7 + $0x1f28] sm:$0xf] }
 0x290   : > { %10141 = vmatpush.bf16.msra.mxu3 %v14915_v13  ;;  %10100 = vmatmul.bf16.vlgmr.msra.gmra.mxu0 %v19919_v33  ;;  %v15394_v13 = vld [vmem:[%s19566_s7 + $0x1a48] sm:$0xf]  ;;  %v9877_v62 = vpop.f32.mrf.mxu0 }
 0x291   : > { %10148 = vmatpush.bf16.msrb.mxu0 %v15275_v0  ;;  %10114 = vmatmul.bf16.vlgmr.msra.gmra.mxu1 %v19926_v42  ;;  %v21174_v0 = vpop.f32.mrf.mxu2 }
 0x292   : > { %10162 = vmatpush.bf16.msrb.mxu1 %v15467_v50  ;;  %10128 = vmatmul.bf16.vlgmr.msra.gmra.mxu2 %v19924_v39  ;;  %23603 = vst [vmem:[#allocation66_spill] sm:$0xff] %v21174_v0  ;;  %v15803_v50 = vor.u32 %v18763_v1, %v15802_v7  ;;  %v18655_v1 = vld [vmem:[%s19566_s7 + $0x1a2c] sm:$0xf0]  ;;  %v18817_v0 = vld [vmem:[%s19566_s7 + $0x1f3c] sm:$0xf0] }
 0x293   : > { %10176 = vmatpush.bf16.msrb.mxu2 %v15659_v3  ;;  %10142 = vmatmul.bf16.vlgmr.msra.gmra.mxu3 %v19930_v47  ;;  %v18661_v3 = vld [vmem:[%s19566_s7 + $0x1a5c] sm:$0xf0] }
 0x294   : > { %10190 = vmatpush.bf16.msrb.mxu3 %v15851_v35  ;;  %v15586_v35 = vld [vmem:[%s19566_s7 + $0x1bc8] sm:$0xf]  ;;  %v15395_v51 = vor.u32 %v18661_v3, %v15394_v13  ;;  %v18601_v3 = vld [vmem:[%s19566_s7 + $0x187c] sm:$0xf0] }
 0x295   : > { %10149 = vmatpush.bf16.msrb.mxu0 %v15251_v23  ;;  %v18757_v23 = vld [vmem:[%s19566_s7 + $0x1d5c] sm:$0xf0]  ;;  %v15587_v6 = vor.u32 %v18709_v38, %v15586_v35  ;;  %v15346_v35 = vld [vmem:[%s19566_s7 + $0x19e8] sm:$0xf] }
 0x296   : > { %10163 = vmatpush.bf16.msrb.mxu1 %v15443_v8  ;;  %v9878_v8 = vadd.f32 %v9877_v62, %v21121_v10  ;;  %v15779_v15 = vor.u32 %v18757_v23, %v15778_v28  ;;  %v18703_v10 = vld [vmem:[%s19566_s7 + $0x1bac] sm:$0xf0]  ;;  %v18649_v28 = vld [vmem:[%s19566_s7 + $0x19fc] sm:$0xf0]  ;;  %v15538_v23 = vld [vmem:[%s19566_s7 + $0x1b68] sm:$0xf] }
 0x297   : > { %10177 = vmatpush.bf16.msrb.mxu2 %v15635_v16  ;;  %v15203_v16 = vor.u32 %v18613_v12, %v15202_v27  ;;  %v15754_v27 = vld [vmem:[%s19566_s7 + $0x1d18] sm:$0xf]  ;;  %v15371_v12 = vor.u32 %v18655_v1, %v15370_v43  ;;  %v15347_v43 = vor.u32 %v18649_v28, %v15346_v35  ;;  %v18589_v35 = vld [vmem:[%s19566_s7 + $0x181c] sm:$0xf0]  ;;  %v15298_v28 = vld [vmem:[%s19566_s7 + $0x1988] sm:$0xf] }
 0x298   : > { %10191 = vmatpush.bf16.msrb.mxu3 %v15827_v55  ;;  %v15178_v55 = vld [vmem:[%s19566_s7 + $0x1898] sm:$0xf]  ;;  %v9892_v7 = vadd.f32 %v9891_v19, %v9878_v8  ;;  %v18697_v8 = vld [vmem:[%s19566_s7 + $0x1b7c] sm:$0xf0]  ;;  %v9919_v19 = vpop.f32.mrf.mxu3 }
 0x299   : > { %10150 = vmatpush.bf16.msrb.mxu0 %v15227_v9  ;;  %v15562_v9 = vld [vmem:[%s19566_s7 + $0x1b98] sm:$0xf]  ;;  %v9905_v62 = vpop.f32.mrf.mxu2 }
 0x29a   : > { %10164 = vmatpush.bf16.msrb.mxu1 %v15419_v53  ;;  %v18751_v53 = vld [vmem:[%s19566_s7 + $0x1d2c] sm:$0xf0]  ;;  %v15563_v13 = vor.u32 %v18703_v10, %v15562_v9  ;;  %v15130_v1 = vld [vmem:[%s19566_s7 + $0x1838] sm:$0xf] }
 0x29b   : > { %10178 = vmatpush.bf16.msrb.mxu2 %v15611_v63  ;;  %v15179_v63 = vor.u32 %v18607_v58, %v15178_v55  ;;  %v15755_v38 = vor.u32 %v18751_v53, %v15754_v27  ;;  %v15322_v9 = vld [vmem:[%s19566_s7 + $0x19b8] sm:$0xf]  ;;  %v18643_v27 = vld [vmem:[%s19566_s7 + $0x19cc] sm:$0xf0] }
 0x29c   : > { %10192 = vmatpush.bf16.msrb.mxu3 %v15803_v50  ;;  %v15154_v50 = vld [vmem:[%s19566_s7 + $0x1868] sm:$0xf]  ;;  %v15514_v53 = vld [vmem:[%s19566_s7 + $0x1b38] sm:$0xf] }
 0x29d   : > { %10151 = vmatpush.bf16.msrb.mxu0 %v15203_v16  ;;  %v9906_v16 = vadd.f32 %v9905_v62, %v9892_v7  ;;  %v15155_v55 = vor.u32 %v18601_v3, %v15154_v50  ;;  %v18595_v7 = vld [vmem:[%s19566_s7 + $0x184c] sm:$0xf0]  ;;  %v15106_v3 = vld [vmem:[%s19566_s7 + $0x1808] sm:$0xf] }
 0x29e   : > { %10165 = vmatpush.bf16.msrb.mxu1 %v15395_v51  ;;  %v15730_v51 = vld [vmem:[%s19566_s7 + $0x1ce8] sm:$0xf]  ;;  %v15131_v50 = vor.u32 %v18595_v7, %v15130_v1  ;;  %v18823_v1 = vld [vmem:[%s19566_s7 + $0x1f6c] sm:$0xf0]  ;;  %v16234_v7 = vld [vmem:[%s19566_s7 + $0x20d8] sm:$0xf] }
 0x29f   : > { %10179 = vmatpush.bf16.msrb.mxu2 %v15587_v6  ;;  %v18745_v6 = vld [vmem:[%s19566_s7 + $0x1cfc] sm:$0xf0]  ;;  %v21200_v58 = vadd.f32 %v9919_v19, %v9906_v16 }
 0x2a0   : > { %10193 = vmatpush.bf16.msrb.mxu3 %v15779_v15  ;;  %v15539_v15 = vor.u32 %v18697_v8, %v15538_v23  ;;  %v15731_v10 = vor.u32 %v18745_v6, %v15730_v51  ;;  %v18637_v23 = vld [vmem:[%s19566_s7 + $0x199c] sm:$0xf0]  ;;  %v15490_v8 = vld [vmem:[%s19566_s7 + $0x1b08] sm:$0xf] }
 0x2a1   : > { %10152 = vmatpush.bf16.msrb.mxu0 %v15179_v63  ;;  %v18691_v63 = vld [vmem:[%s19566_s7 + $0x1b4c] sm:$0xf0]  ;;  %v18685_v19 = vld [vmem:[%s19566_s7 + $0x1b1c] sm:$0xf0]  ;;  %v15682_v51 = vld [vmem:[%s19566_s7 + $0x1c88] sm:$0xf] }
 0x2a2   : > { %10166 = vmatpush.bf16.msrb.mxu1 %v15371_v12  ;;  %v15706_v12 = vld [vmem:[%s19566_s7 + $0x1cb8] sm:$0xf]  ;;  %v15515_v62 = vor.u32 %v18691_v63, %v15514_v53  ;;  %v18733_v6 = vld [vmem:[%s19566_s7 + $0x1c9c] sm:$0xf0]  ;;  %v15491_v53 = vor.u32 %v18685_v19, %v15490_v8  ;;  %v21236_v19 = vpop.f32.mrf.mxu1 }
 0x2a3   : > { %10180 = vmatpush.bf16.msrb.mxu2 %v15563_v13  ;;  %v18739_v13 = vld [vmem:[%s19566_s7 + $0x1ccc] sm:$0xf0]  ;;  %v16618_v63 = vld [vmem:[%s19566_s7 + $0x23d8] sm:$0xf]  ;;  %v18961_v8 = vld [vmem:[%s19566_s7 + $0x23bc] sm:$0xf0] }
 0x2a4   : > { %10194 = vmatpush.bf16.msrb.mxu3 %v15755_v38  ;;  %v15323_v38 = vor.u32 %v18643_v27, %v15322_v9  ;;  %v15707_v16 = vor.u32 %v18739_v13, %v15706_v12  ;;  %v16426_v9 = vld [vmem:[%s19566_s7 + $0x2258] sm:$0xf]  ;;  %v18919_v27 = vld [vmem:[%s19566_s7 + $0x226c] sm:$0xf0]  ;;  %v15683_v13 = vor.u32 %v18733_v6, %v15682_v51  ;;  %23606 = vst [vmem:[#allocation69_spill] sm:$0xff] %v21236_v19 }
 0x2a5   : > { %10153 = vmatpush.bf16.msrb.mxu0 %v15155_v55  ;;  %v16042_v55 = vld [vmem:[%s19566_s7 + $0x1f58] sm:$0xf]  ;;  %v18967_v12 = vld [vmem:[%s19566_s7 + $0x23ec] sm:$0xf0]  ;;  %v16019_v51 = vor.u32 %v18817_v0, %v16018_v17  ;;  %v16211_v6 = vor.u32 %v18865_v31, %v16210_v4  ;;  %v16786_v19 = vld [vmem:[%s19566_s7 + $0x2528] sm:$0xf] }
 0x2a6   : > { %10167 = vmatpush.bf16.msrb.mxu1 %v15347_v43  ;;  %v15107_v43 = vor.u32 %v18589_v35, %v15106_v3  ;;  %v16427_v35 = vor.u32 %v18919_v27, %v16426_v9  ;;  %v18859_v9 = vld [vmem:[%s19566_s7 + $0x208c] sm:$0xf0]  ;;  %v16378_v27 = vld [vmem:[%s19566_s7 + $0x21f8] sm:$0xf] }
 0x2a7   : > { %10181 = vmatpush.bf16.msrb.mxu2 %v15539_v15  ;;  %v18871_v15 = vld [vmem:[%s19566_s7 + $0x20ec] sm:$0xf0]  ;;  %v16570_v31 = vld [vmem:[%s19566_s7 + $0x2378] sm:$0xf] }
 0x2a8   : > { %10195 = vmatpush.bf16.msrb.mxu3 %v15731_v10  ;;  %v15299_v10 = vor.u32 %v18637_v23, %v15298_v28  ;;  %v16235_v3 = vor.u32 %v18871_v15, %v16234_v7  ;;  %v18913_v28 = vld [vmem:[%s19566_s7 + $0x223c] sm:$0xf0]  ;;  %v16594_v23 = vld [vmem:[%s19566_s7 + $0x23a8] sm:$0xf]  ;;  %v18811_v7 = vld [vmem:[%s19566_s7 + $0x1f0c] sm:$0xf0] }
 0x2a9   : > { %10154 = vmatpush.bf16.msrb.mxu0 %v15131_v50  ;;  %v16043_v50 = vor.u32 %v18823_v1, %v16042_v55  ;;  %v15994_v1 = vld [vmem:[%s19566_s7 + $0x1ef8] sm:$0xf]  ;;  %v16595_v15 = vor.u32 %v18961_v8, %v16594_v23  ;;  %v18955_v4 = vld [vmem:[%s19566_s7 + $0x238c] sm:$0xf0]  ;;  %v16546_v23 = vld [vmem:[%s19566_s7 + $0x2348] sm:$0xf] }
 0x2aa   : > { %10168 = vmatpush.bf16.msrb.mxu1 %v15323_v38  ;;  %v16619_v38 = vor.u32 %v18967_v12, %v16618_v63  ;;  %v15995_v0 = vor.u32 %v18811_v7, %v15994_v1  ;;  %v15970_v63 = vld [vmem:[%s19566_s7 + $0x1ec8] sm:$0xf]  ;;  %v18805_v12 = vld [vmem:[%s19566_s7 + $0x1edc] sm:$0xf0] }
 0x2ab   : > { %10182 = vmatpush.bf16.msrb.mxu2 %v15515_v62  ;;  %v16402_v62 = vld [vmem:[%s19566_s7 + $0x2228] sm:$0xf]  ;;  %v18949_v8 = vld [vmem:[%s19566_s7 + $0x235c] sm:$0xf0] }
 0x2ac   : > { %10196 = vmatpush.bf16.msrb.mxu3 %v15707_v16  ;;  %v21234_v16 = vpop.f32.mrf.mxu0  ;;  %v16403_v55 = vor.u32 %v18913_v28, %v16402_v62  ;;  %v18901_v62 = vld [vmem:[%s19566_s7 + $0x21dc] sm:$0xf0]  ;;  %v21258_v28 = vpop.f32.mrf.mxu3 }
 0x2ad   : > { %10155 = vmatpush.bf16.msrb.mxu0 %v15107_v43  ;;  %23605 = vst [vmem:[#allocation68_spill] sm:$0xff] %v21234_v16  ;;  %v16186_v43 = vld [vmem:[%s19566_s7 + $0x2078] sm:$0xf]  ;;  %v19009_v16 = vld [vmem:[%s19566_s7 + $0x253c] sm:$0xf0] }
 0x2ae   : > { %10169 = vmatpush.bf16.msrb.mxu1 %v15299_v10  ;;  %v18907_v10 = vld [vmem:[%s19566_s7 + $0x220c] sm:$0xf0]  ;;  %v16187_v17 = vor.u32 %v18859_v9, %v16186_v43  ;;  %23608 = vst [vmem:[#allocation71_spill] sm:$0xff] %v21258_v28  ;;  %v15946_v43 = vld [vmem:[%s19566_s7 + $0x1e98] sm:$0xf] }
 0x2af   : > { %10183 = vmatpush.bf16.msrb.mxu2 %v15491_v53  ;;  %v16379_v53 = vor.u32 %v18907_v10, %v16378_v27  ;;  %v16138_v9 = vld [vmem:[%s19566_s7 + $0x2018] sm:$0xf]  ;;  %v16547_v10 = vor.u32 %v18949_v8, %v16546_v23  ;;  %v18841_v23 = vld [vmem:[%s19566_s7 + $0x1ffc] sm:$0xf0]  ;;  %v16306_v8 = vld [vmem:[%s19566_s7 + $0x2168] sm:$0xf] }
 0x2b0   : > { %10197 = vmatpush.bf16.msrb.mxu3 %v15683_v13  ;;  %10156 = vmatmul.bf16.vlgmr.msrb.gmra.mxu0 %v20003_v52  ;;  %v16162_v13 = vld [vmem:[%s19566_s7 + $0x2048] sm:$0xf] }
 0x2b1   : > { %10204 = vmatpush.bf16.msra.mxu0 %v16043_v50  ;;  %10170 = vmatmul.bf16.vlgmr.msrb.gmra.mxu1 %v20010_v57  ;;  %v21253_v50 = vpop.f32.mrf.mxu2  ;;  %v16498_v28 = vld [vmem:[%s19566_s7 + $0x22e8] sm:$0xf] }
 0x2b2   : > { %10218 = vmatpush.bf16.msra.mxu1 %v16235_v3  ;;  %10184 = vmatmul.bf16.vlgmr.msrb.gmra.mxu2 %v20008_v56  ;;  %23607 = vst [vmem:[#allocation70_spill] sm:$0xff] %v21253_v50  ;;  %v16571_v3 = vor.u32 %v18955_v4, %v16570_v31  ;;  %v18847_v31 = vld [vmem:[%s19566_s7 + $0x202c] sm:$0xf0]  ;;  %v16330_v4 = vld [vmem:[%s19566_s7 + $0x2198] sm:$0xf] }
 0x2b3   : > { %10232 = vmatpush.bf16.msra.mxu2 %v16427_v35  ;;  %10198 = vmatmul.bf16.vlgmr.msrb.gmra.mxu3 %v20014_v61  ;;  %v18853_v35 = vld [vmem:[%s19566_s7 + $0x205c] sm:$0xf0] }
 0x2b4   : > { %10246 = vmatpush.bf16.msra.mxu3 %v16619_v38  ;;  %v16354_v38 = vld [vmem:[%s19566_s7 + $0x21c8] sm:$0xf]  ;;  %v16163_v1 = vor.u32 %v18853_v35, %v16162_v13 }
 0x2b5   : > { %10205 = vmatpush.bf16.msra.mxu0 %v16019_v51  ;;  %v15971_v51 = vor.u32 %v18805_v12, %v15970_v63  ;;  %v16355_v7 = vor.u32 %v18901_v62, %v16354_v38  ;;  %v16522_v63 = vld [vmem:[%s19566_s7 + $0x2318] sm:$0xf]  ;;  %v16139_v12 = vor.u32 %v18847_v31, %v16138_v9  ;;  %v15922_v35 = vld [vmem:[%s19566_s7 + $0x1e68] sm:$0xf]  ;;  %v18793_v38 = vld [vmem:[%s19566_s7 + $0x1e7c] sm:$0xf0] }
 0x2b6   : > { %10219 = vmatpush.bf16.msra.mxu1 %v16211_v6  ;;  %v9933_v6 = vpop.f32.mrf.mxu0  ;;  %v18787_v31 = vld [vmem:[%s19566_s7 + $0x1e4c] sm:$0xf0] }
 0x2b7   : > { %10233 = vmatpush.bf16.msra.mxu2 %v16403_v55  ;;  %v9947_v55 = vpop.f32.mrf.mxu1 }
 0x2b8   : > { %10247 = vmatpush.bf16.msra.mxu3 %v16595_v15  ;;  %v18799_v15 = vld [vmem:[%s19566_s7 + $0x1eac] sm:$0xf0]  ;;  %v9948_v27 = vadd.f32 %v9947_v55, %v9933_v6  ;;  %v18889_v6 = vld [vmem:[%s19566_s7 + $0x217c] sm:$0xf0] }
 0x2b9   : > { %10206 = vmatpush.bf16.msra.mxu0 %v15995_v0  ;;  %v18895_v0 = vld [vmem:[%s19566_s7 + $0x21ac] sm:$0xf0]  ;;  %v9961_v55 = vpop.f32.mrf.mxu2  ;;  %v16307_v9 = vor.u32 %v18889_v6, %v16306_v8  ;;  %v18829_v8 = vld [vmem:[%s19566_s7 + $0x1f9c] sm:$0xf0]  ;;  %v16258_v6 = vld [vmem:[%s19566_s7 + $0x2108] sm:$0xf] }
 0x2ba   : > { %10220 = vmatpush.bf16.msra.mxu1 %v16187_v17  ;;  %v18943_v17 = vld [vmem:[%s19566_s7 + $0x232c] sm:$0xf0]  ;;  %v16331_v13 = vor.u32 %v18895_v0, %v16330_v4  ;;  %v16090_v4 = vld [vmem:[%s19566_s7 + $0x1fb8] sm:$0xf] }
 0x2bb   : > { %10234 = vmatpush.bf16.msra.mxu2 %v16379_v53  ;;  %v15947_v53 = vor.u32 %v18799_v15, %v15946_v43  ;;  %v16523_v62 = vor.u32 %v18943_v17, %v16522_v63  ;;  %v9975_v43 = vpop.f32.mrf.mxu3  ;;  %v18835_v63 = vld [vmem:[%s19566_s7 + $0x1fcc] sm:$0xf0]  ;;  %v16282_v17 = vld [vmem:[%s19566_s7 + $0x2138] sm:$0xf] }
 0x2bc   : > { %10248 = vmatpush.bf16.msra.mxu3 %v16571_v3  ;;  %v16114_v3 = vld [vmem:[%s19566_s7 + $0x1fe8] sm:$0xf] }
 0x2bd   : > { %10207 = vmatpush.bf16.msra.mxu0 %v15971_v51  ;;  %v18937_v51 = vld [vmem:[%s19566_s7 + $0x22fc] sm:$0xf0]  ;;  %v16115_v15 = vor.u32 %v18841_v23, %v16114_v3  ;;  %v16066_v23 = vld [vmem:[%s19566_s7 + $0x1f88] sm:$0xf] }
 0x2be   : > { %10221 = vmatpush.bf16.msra.mxu1 %v16163_v1  ;;  %v9962_v1 = vadd.f32 %v9961_v55, %v9948_v27  ;;  %v16499_v27 = vor.u32 %v18937_v51, %v16498_v28  ;;  %v18781_v3 = vld [vmem:[%s19566_s7 + $0x1e1c] sm:$0xf0]  ;;  %v16091_v28 = vor.u32 %v18835_v63, %v16090_v4  ;;  %v17194_v4 = vld [vmem:[%s19566_s7 + $0x2858] sm:$0xf]  ;;  %v19111_v63 = vld [vmem:[%s19566_s7 + $0x286c] sm:$0xf0]  ;;  %v21304_v50 = vpop.f32.mrf.mxu0 }
 0x2bf   : > { %10235 = vmatpush.bf16.msra.mxu2 %v16355_v7  ;;  %v15923_v7 = vor.u32 %v18793_v38, %v15922_v35  ;;  %v15874_v38 = vld [vmem:[%s19566_s7 + $0x1e08] sm:$0xf]  ;;  %v18877_v51 = vld [vmem:[%s19566_s7 + $0x211c] sm:$0xf0]  ;;  %23609 = vst [vmem:[#allocation72_spill] sm:$0xff] %v21304_v50 }
 0x2c0   : > { %10249 = vmatpush.bf16.msra.mxu3 %v16547_v10  ;;  %v15898_v10 = vld [vmem:[%s19566_s7 + $0x1e38] sm:$0xf]  ;;  %v21281_v0 = vadd.f32 %v9975_v43, %v9962_v1  ;;  %v16450_v1 = vld [vmem:[%s19566_s7 + $0x2288] sm:$0xf] }
 0x2c1   : > { %10208 = vmatpush.bf16.msra.mxu0 %v15947_v53  ;;  %v18883_v53 = vld [vmem:[%s19566_s7 + $0x214c] sm:$0xf0]  ;;  %v15899_v35 = vor.u32 %v18787_v31, %v15898_v10  ;;  %v16810_v43 = vld [vmem:[%s19566_s7 + $0x2558] sm:$0xf]  ;;  %v17746_v50 = vld [vmem:[%s19566_s7 + $0x2ca8] sm:$0xf] }
 0x2c2   : > { %10222 = vmatpush.bf16.msra.mxu1 %v16139_v12  ;;  %v16474_v12 = vld [vmem:[%s19566_s7 + $0x22b8] sm:$0xf]  ;;  %v19015_v10 = vld [vmem:[%s19566_s7 + $0x256c] sm:$0xf0] }
 0x2c3   : > { %10236 = vmatpush.bf16.msra.mxu2 %v16331_v13  ;;  %v18931_v13 = vld [vmem:[%s19566_s7 + $0x22cc] sm:$0xf0]  ;;  %v17002_v31 = vld [vmem:[%s19566_s7 + $0x26d8] sm:$0xf] }
 0x2c4   : > { %10250 = vmatpush.bf16.msra.mxu3 %v16523_v62  ;;  %v16283_v62 = vor.u32 %v18883_v53, %v16282_v17  ;;  %v16475_v55 = vor.u32 %v18931_v13, %v16474_v12  ;;  %v16259_v17 = vor.u32 %v18877_v51, %v16258_v6  ;;  %v17386_v53 = vld [vmem:[%s19566_s7 + $0x29d8] sm:$0xf]  ;;  %v19159_v12 = vld [vmem:[%s19566_s7 + $0x29ec] sm:$0xf0]  ;;  %v19105_v6 = vld [vmem:[%s19566_s7 + $0x283c] sm:$0xf0] }
 0x2c5   : > { %10209 = vmatpush.bf16.msra.mxu0 %v15923_v7  ;;  %v18925_v7 = vld [vmem:[%s19566_s7 + $0x229c] sm:$0xf0] }
 0x2c6   : > { %10223 = vmatpush.bf16.msra.mxu1 %v16115_v15  ;;  %v15875_v15 = vor.u32 %v18781_v3, %v15874_v38  ;;  %v16451_v13 = vor.u32 %v18925_v7, %v16450_v1  ;;  %v17195_v3 = vor.u32 %v19111_v63, %v17194_v4  ;;  %v19153_v51 = vld [vmem:[%s19566_s7 + $0x29bc] sm:$0xf0]  ;;  %v21314_v1 = vpop.f32.mrf.mxu1  ;;  %v16787_v7 = vor.u32 %v19009_v16, %v16786_v19  ;;  %v19051_v63 = vld [vmem:[%s19566_s7 + $0x268c] sm:$0xf0]  ;;  %v17338_v16 = vld [vmem:[%s19566_s7 + $0x2978] sm:$0xf] }
 0x2c7   : > { %10237 = vmatpush.bf16.msra.mxu2 %v16307_v9  ;;  %v19063_v9 = vld [vmem:[%s19566_s7 + $0x26ec] sm:$0xf0]  ;;  %23610 = vst [vmem:[#allocation73_spill] sm:$0xff] %v21314_v1  ;;  %v19201_v1 = vld [vmem:[%s19566_s7 + $0x2b3c] sm:$0xf0] }
 0x2c8   : > { %10251 = vmatpush.bf16.msra.mxu3 %v16499_v27  ;;  %v16067_v27 = vor.u32 %v18829_v8, %v16066_v23  ;;  %v17003_v38 = vor.u32 %v19063_v9, %v17002_v31  ;;  %v19057_v23 = vld [vmem:[%s19566_s7 + $0x26bc] sm:$0xf0]  ;;  %v17170_v8 = vld [vmem:[%s19566_s7 + $0x2828] sm:$0xf]  ;;  %v16762_v31 = vld [vmem:[%s19566_s7 + $0x24f8] sm:$0xf] }
 0x2c9   : > { %10210 = vmatpush.bf16.msra.mxu0 %v15899_v35  ;;  %v16811_v35 = vor.u32 %v19015_v10, %v16810_v43  ;;  %v17171_v10 = vor.u32 %v19105_v6, %v17170_v8  ;;  %v16954_v9 = vld [vmem:[%s19566_s7 + $0x2678] sm:$0xf]  ;;  %v19147_v19 = vld [vmem:[%s19566_s7 + $0x298c] sm:$0xf0]  ;;  %v19045_v8 = vld [vmem:[%s19566_s7 + $0x265c] sm:$0xf0] }
 0x2ca   : > { %10224 = vmatpush.bf16.msra.mxu1 %v16091_v28  ;;  %v16978_v28 = vld [vmem:[%s19566_s7 + $0x26a8] sm:$0xf] }
 0x2cb   : > { %10238 = vmatpush.bf16.msra.mxu2 %v16283_v62  ;;  %v17387_v62 = vor.u32 %v19159_v12, %v17386_v53  ;;  %v16979_v43 = vor.u32 %v19057_v23, %v16978_v28  ;;  %v21328_v12 = vpop.f32.mrf.mxu2  ;;  %v16930_v28 = vld [vmem:[%s19566_s7 + $0x2648] sm:$0xf]  ;;  %v21333_v23 = vpop.f32.mrf.mxu3 }
 0x2cc   : > { %10252 = vmatpush.bf16.msra.mxu3 %v16475_v55  ;;  %v17362_v55 = vld [vmem:[%s19566_s7 + $0x29a8] sm:$0xf]  ;;  %23611 = vst [vmem:[#allocation74_spill] sm:$0xff] %v21328_v12 }
 0x2cd   : > { %10211 = vmatpush.bf16.msra.mxu0 %v15875_v15  ;;  %v19003_v15 = vld [vmem:[%s19566_s7 + $0x250c] sm:$0xf0]  ;;  %v17363_v4 = vor.u32 %v19153_v51, %v17362_v55  ;;  %23612 = vst [vmem:[#allocation75_spill] sm:$0xff] %v21333_v23  ;;  %v17122_v6 = vld [vmem:[%s19566_s7 + $0x27c8] sm:$0xf]  ;;  %v9989_v51 = vpop.f32.mrf.mxu0 }
 0x2ce   : > { %10225 = vmatpush.bf16.msra.mxu1 %v16067_v27  ;;  %v17146_v27 = vld [vmem:[%s19566_s7 + $0x27f8] sm:$0xf]  ;;  %v16763_v53 = vor.u32 %v19003_v15, %v16762_v31  ;;  %v19093_v55 = vld [vmem:[%s19566_s7 + $0x27dc] sm:$0xf0]  ;;  %v16931_v15 = vor.u32 %v19045_v8, %v16930_v28  ;;  %v17554_v12 = vld [vmem:[%s19566_s7 + $0x2b28] sm:$0xf] }
 0x2cf   : > { %10239 = vmatpush.bf16.msra.mxu2 %v16259_v17  ;;  %v19099_v17 = vld [vmem:[%s19566_s7 + $0x280c] sm:$0xf0]  ;;  %v17098_v23 = vld [vmem:[%s19566_s7 + $0x2798] sm:$0xf]  ;;  %v18985_v8 = vld [vmem:[%s19566_s7 + $0x247c] sm:$0xf0] }
 0x2d0   : > { %10253 = vmatpush.bf16.msra.mxu3 %v16451_v13  ;;  %10212 = vmatmul.bf16.vlgmr.msra.gmra.mxu0 %v20091_v20  ;;  %v16955_v13 = vor.u32 %v19051_v63, %v16954_v9  ;;  %v17123_v9 = vor.u32 %v19093_v55, %v17122_v6  ;;  %v16714_v63 = vld [vmem:[%s19566_s7 + $0x2498] sm:$0xf]  ;;  %v16882_v6 = vld [vmem:[%s19566_s7 + $0x25e8] sm:$0xf] }
 0x2d1   : > { %10260 = vmatpush.bf16.msrb.mxu0 %v16811_v35  ;;  %10226 = vmatmul.bf16.vlgmr.msra.gmra.mxu1 %v20098_v26  ;;  %v17147_v35 = vor.u32 %v19099_v17, %v17146_v27  ;;  %v18991_v27 = vld [vmem:[%s19566_s7 + $0x24ac] sm:$0xf0]  ;;  %v16906_v17 = vld [vmem:[%s19566_s7 + $0x2618] sm:$0xf] }
 0x2d2   : > { %10274 = vmatpush.bf16.msrb.mxu1 %v17003_v38  ;;  %10240 = vmatmul.bf16.vlgmr.msra.gmra.mxu2 %v20096_v24  ;;  %v16738_v38 = vld [vmem:[%s19566_s7 + $0x24c8] sm:$0xf] }
 0x2d3   : > { %10288 = vmatpush.bf16.msrb.mxu2 %v17195_v3  ;;  %10254 = vmatmul.bf16.vlgmr.msra.gmra.mxu3 %v20104_v30  ;;  %v18997_v3 = vld [vmem:[%s19566_s7 + $0x24dc] sm:$0xf0] }
 0x2d4   : > { %10302 = vmatpush.bf16.msrb.mxu3 %v17387_v62  ;;  %v17339_v62 = vor.u32 %v19147_v19, %v17338_v16  ;;  %v16739_v31 = vor.u32 %v18997_v3, %v16738_v38  ;;  %v17290_v38 = vld [vmem:[%s19566_s7 + $0x2918] sm:$0xf] }
 0x2d5   : > { %10261 = vmatpush.bf16.msrb.mxu0 %v16787_v7  ;;  %v17314_v7 = vld [vmem:[%s19566_s7 + $0x2948] sm:$0xf] }
 0x2d6   : > { %10275 = vmatpush.bf16.msrb.mxu1 %v16979_v43  ;;  %v19141_v43 = vld [vmem:[%s19566_s7 + $0x295c] sm:$0xf0] }
 0x2d7   : > { %10289 = vmatpush.bf16.msrb.mxu2 %v17171_v10  ;;  %v9990_v10 = vadd.f32 %v9989_v51, %v21281_v0  ;;  %v17315_v16 = vor.u32 %v19141_v43, %v17314_v7  ;;  %v19087_v0 = vld [vmem:[%s19566_s7 + $0x27ac] sm:$0xf0]  ;;  %v10017_v51 = vpop.f32.mrf.mxu2  ;;  %v19033_v7 = vld [vmem:[%s19566_s7 + $0x25fc] sm:$0xf0]  ;;  %v17074_v43 = vld [vmem:[%s19566_s7 + $0x2768] sm:$0xf] }
 0x2d8   : > { %10303 = vmatpush.bf16.msrb.mxu3 %v17363_v4  ;;  %v10003_v4 = vpop.f32.mrf.mxu1  ;;  %v17099_v28 = vor.u32 %v19087_v0, %v17098_v23  ;;  %v10031_v23 = vpop.f32.mrf.mxu3 }
 0x2d9   : > { %10262 = vmatpush.bf16.msrb.mxu0 %v16763_v53  ;;  %v10004_v19 = vadd.f32 %v10003_v4, %v9990_v10  ;;  %v19039_v53 = vld [vmem:[%s19566_s7 + $0x262c] sm:$0xf0]  ;;  %v19081_v10 = vld [vmem:[%s19566_s7 + $0x277c] sm:$0xf0]  ;;  %v17266_v4 = vld [vmem:[%s19566_s7 + $0x28e8] sm:$0xf] }
 0x2da   : > { %10276 = vmatpush.bf16.msrb.mxu1 %v16955_v13  ;;  %v19135_v13 = vld [vmem:[%s19566_s7 + $0x292c] sm:$0xf0]  ;;  %v16907_v3 = vor.u32 %v19039_v53, %v16906_v17  ;;  %v17075_v17 = vor.u32 %v19081_v10, %v17074_v43  ;;  %v16858_v53 = vld [vmem:[%s19566_s7 + $0x25b8] sm:$0xf]  ;;  %v19021_v43 = vld [vmem:[%s19566_s7 + $0x259c] sm:$0xf0] }
 0x2db   : > { %10290 = vmatpush.bf16.msrb.mxu2 %v17147_v35  ;;  %v16715_v35 = vor.u32 %v18991_v27, %v16714_v63  ;;  %v17291_v55 = vor.u32 %v19135_v13, %v17290_v38  ;;  %v16883_v27 = vor.u32 %v19033_v7, %v16882_v6  ;;  %v19027_v38 = vld [vmem:[%s19566_s7 + $0x25cc] sm:$0xf0]  ;;  %v17050_v13 = vld [vmem:[%s19566_s7 + $0x2738] sm:$0xf]  ;;  %v18973_v6 = vld [vmem:[%s19566_s7 + $0x241c] sm:$0xf0] }
 0x2dc   : > { %10304 = vmatpush.bf16.msrb.mxu3 %v17339_v62  ;;  %v16690_v62 = vld [vmem:[%s19566_s7 + $0x2468] sm:$0xf] }
 0x2dd   : > { %10263 = vmatpush.bf16.msrb.mxu0 %v16739_v31  ;;  %v10018_v31 = vadd.f32 %v10017_v51, %v10004_v19  ;;  %v18979_v19 = vld [vmem:[%s19566_s7 + $0x244c] sm:$0xf0]  ;;  %v16834_v7 = vld [vmem:[%s19566_s7 + $0x2588] sm:$0xf] }
 0x2de   : > { %10277 = vmatpush.bf16.msrb.mxu1 %v16931_v15  ;;  %v19129_v15 = vld [vmem:[%s19566_s7 + $0x28fc] sm:$0xf0]  ;;  %v17026_v10 = vld [vmem:[%s19566_s7 + $0x2708] sm:$0xf] }
 0x2df   : > { %10291 = vmatpush.bf16.msrb.mxu2 %v17123_v9  ;;  %v16691_v9 = vor.u32 %v18985_v8, %v16690_v62  ;;  %v21357_v63 = vadd.f32 %v10031_v23, %v10018_v31  ;;  %v17267_v0 = vor.u32 %v19129_v15, %v17266_v4  ;;  %v16642_v8 = vld [vmem:[%s19566_s7 + $0x2408] sm:$0xf]  ;;  %v19069_v4 = vld [vmem:[%s19566_s7 + $0x271c] sm:$0xf0] }
 0x2e0   : > { %10305 = vmatpush.bf16.msrb.mxu3 %v17315_v16  ;;  %v16666_v16 = vld [vmem:[%s19566_s7 + $0x2438] sm:$0xf]  ;;  %v17218_v15 = vld [vmem:[%s19566_s7 + $0x2888] sm:$0xf]  ;;  %v19117_v23 = vld [vmem:[%s19566_s7 + $0x289c] sm:$0xf0] }
 0x2e1   : > { %10264 = vmatpush.bf16.msrb.mxu0 %v16715_v35  ;;  %v19075_v35 = vld [vmem:[%s19566_s7 + $0x274c] sm:$0xf0]  ;;  %v16667_v62 = vor.u32 %v18979_v19, %v16666_v16  ;;  %v17770_v19 = vld [vmem:[%s19566_s7 + $0x2cd8] sm:$0xf] }
 0x2e2   : > { %10278 = vmatpush.bf16.msrb.mxu1 %v16907_v3  ;;  %v17242_v3 = vld [vmem:[%s19566_s7 + $0x28b8] sm:$0xf]  ;;  %v17051_v51 = vor.u32 %v19075_v35, %v17050_v13  ;;  %v19207_v16 = vld [vmem:[%s19566_s7 + $0x2b6c] sm:$0xf0]  ;;  %v17027_v13 = vor.u32 %v19069_v4, %v17026_v10  ;;  %v17908_v35 = vld [vmem:[%s19566_s7 + $0x2dc] sm:$0xf]  ;;  %v21393_v4 = vpop.f32.mrf.mxu1 }
 0x2e3   : > { %10292 = vmatpush.bf16.msrb.mxu2 %v17099_v28  ;;  %v19123_v28 = vld [vmem:[%s19566_s7 + $0x28cc] sm:$0xf0]  ;;  %v17902_v10 = vld [vmem:[%s19566_s7 + $0x2ac] sm:$0xf]  ;;  %23614 = vst [vmem:[#allocation77_spill] sm:$0xff] %v21393_v4 }
 0x2e4   : > { %10306 = vmatpush.bf16.msrb.mxu3 %v17291_v55  ;;  %v16859_v55 = vor.u32 %v19027_v38, %v16858_v53  ;;  %v17243_v31 = vor.u32 %v19123_v28, %v17242_v3  ;;  %v17860_v53 = vld [vmem:[%s19566_s7 + $0x15c] sm:$0xf]  ;;  %v12204_v38 = vld [vmem:[%s19566_s7 + $0x170] sm:$0xf0]  ;;  %v17219_v28 = vor.u32 %v19117_v23, %v17218_v15  ;;  %v17555_v15 = vor.u32 %v19201_v1, %v17554_v12  ;;  %v17998_v4 = vld [vmem:[%s19566_s7 + $0x5ac] sm:$0xf] }
 0x2e5   : > { %10265 = vmatpush.bf16.msrb.mxu0 %v16691_v9  ;;  %v17578_v9 = vld [vmem:[%s19566_s7 + $0x2b58] sm:$0xf]  ;;  %v12396_v3 = vld [vmem:[%s19566_s7 + $0x2f0] sm:$0xf0]  ;;  %v17747_v23 = vor.u32 %v19249_v5, %v17746_v50  ;;  %v17896_v5 = vld [vmem:[%s19566_s7 + $0x27c] sm:$0xf] }
 0x2e6   : > { %10279 = vmatpush.bf16.msrb.mxu1 %v16883_v27  ;;  %v16643_v27 = vor.u32 %v18973_v6, %v16642_v8  ;;  %v12207_v6 = vor.u32 %v17860_v53, %v12204_v38  ;;  %v19243_v53 = vld [vmem:[%s19566_s7 + $0x2c8c] sm:$0xf0]  ;;  %v17848_v38 = vld [vmem:[%s19566_s7 + $0xfc] sm:$0xf]  ;;  %v12348_v50 = vld [vmem:[%s19566_s7 + $0x290] sm:$0xf0] }
 0x2e7   : > { %10293 = vmatpush.bf16.msrb.mxu2 %v17075_v17  ;;  %v19255_v17 = vld [vmem:[%s19566_s7 + $0x2cec] sm:$0xf0] }
 0x2e8   : > { %10307 = vmatpush.bf16.msrb.mxu3 %v17267_v0  ;;  %v16835_v0 = vor.u32 %v19021_v43, %v16834_v7  ;;  %v17771_v8 = vor.u32 %v19255_v17, %v17770_v19  ;;  %v12180_v7 = vld [vmem:[%s19566_s7 + $0x140] sm:$0xf0]  ;;  %v21389_v43 = vpop.f32.mrf.mxu0  ;;  %v19195_v19 = vld [vmem:[%s19566_s7 + $0x2b0c] sm:$0xf0] }
 0x2e9   : > { %10266 = vmatpush.bf16.msrb.mxu0 %v16667_v62  ;;  %v17579_v62 = vor.u32 %v19207_v16, %v17578_v9  ;;  %23613 = vst [vmem:[#allocation76_spill] sm:$0xff] %v21389_v43  ;;  %v17530_v16 = vld [vmem:[%s19566_s7 + $0x2af8] sm:$0xf]  ;;  %v12756_v43 = vld [vmem:[%s19566_s7 + $0x5c0] sm:$0xf0] }
 0x2ea   : > { %10280 = vmatpush.bf16.msrb.mxu1 %v16859_v55  ;;  %v12399_v55 = vor.u32 %v17908_v35, %v12396_v3  ;;  %v17531_v1 = vor.u32 %v19195_v19, %v17530_v16  ;;  %v17506_v35 = vld [vmem:[%s19566_s7 + $0x2ac8] sm:$0xf]  ;;  %v19189_v3 = vld [vmem:[%s19566_s7 + $0x2adc] sm:$0xf0] }
 0x2eb   : > { %10294 = vmatpush.bf16.msrb.mxu2 %v17051_v51  ;;  %v17854_v51 = vld [vmem:[%s19566_s7 + $0x12c] sm:$0xf] }
 0x2ec   : > { %10308 = vmatpush.bf16.msrb.mxu3 %v17243_v31  ;;  %v12372_v31 = vld [vmem:[%s19566_s7 + $0x2c0] sm:$0xf0]  ;;  %v12183_v9 = vor.u32 %v17854_v51, %v12180_v7  ;;  %v21415_v7 = vpop.f32.mrf.mxu3 }
 0x2ed   : > { %10267 = vmatpush.bf16.msrb.mxu0 %v16643_v27  ;;  %v17722_v27 = vld [vmem:[%s19566_s7 + $0x2c78] sm:$0xf]  ;;  %v12375_v17 = vor.u32 %v17902_v10, %v12372_v31  ;;  %v12132_v51 = vld [vmem:[%s19566_s7 + $0xe0] sm:$0xf0]  ;;  %23616 = vst [vmem:[#allocation79_spill] sm:$0xff] %v21415_v7 }
 0x2ee   : > { %10281 = vmatpush.bf16.msrb.mxu1 %v16835_v0  ;;  %v12156_v0 = vld [vmem:[%s19566_s7 + $0x110] sm:$0xf0]  ;;  %v17723_v12 = vor.u32 %v19243_v53, %v17722_v27  ;;  %v17890_v31 = vld [vmem:[%s19566_s7 + $0x24c] sm:$0xf]  ;;  %v10059_v16 = vpop.f32.mrf.mxu1  ;;  %v19183_v53 = vld [vmem:[%s19566_s7 + $0x2aac] sm:$0xf0] }
 0x2ef   : > { %10295 = vmatpush.bf16.msrb.mxu2 %v17027_v13  ;;  %v12159_v13 = vor.u32 %v17848_v38, %v12156_v0  ;;  %v17674_v38 = vld [vmem:[%s19566_s7 + $0x2c18] sm:$0xf]  ;;  %v17950_v7 = vld [vmem:[%s19566_s7 + $0x42c] sm:$0xf] }
 0x2f0   : > { %10309 = vmatpush.bf16.msrb.mxu3 %v17219_v28  ;;  %10268 = vmatmul.bf16.vlgmr.msrb.gmra.mxu0 %v20184_v34  ;;  %v17698_v28 = vld [vmem:[%s19566_s7 + $0x2c48] sm:$0xf]  ;;  %v10045_v10 = vpop.f32.mrf.mxu0 }
 0x2f1   : > { %10316 = vmatpush.bf16.msra.mxu0 %v17579_v62  ;;  %10282 = vmatmul.bf16.vlgmr.msrb.gmra.mxu1 %v20193_v49  ;;  %v21410_v62 = vpop.f32.mrf.mxu2 }
 0x2f2   : > { %10330 = vmatpush.bf16.msra.mxu1 %v17771_v8  ;;  %10296 = vmatmul.bf16.vlgmr.msrb.gmra.mxu2 %v20191_v46  ;;  %23615 = vst [vmem:[#allocation78_spill] sm:$0xff] %v21410_v62  ;;  %v12351_v8 = vor.u32 %v17896_v5, %v12348_v50  ;;  %v19231_v50 = vld [vmem:[%s19566_s7 + $0x2c2c] sm:$0xf0]  ;;  %v12564_v62 = vld [vmem:[%s19566_s7 + $0x440] sm:$0xf0] }
 0x2f3   : > { %10344 = vmatpush.bf16.msra.mxu2 %v12207_v6  ;;  %10310 = vmatmul.bf16.vlgmr.msrb.gmra.mxu3 %v20199_v54  ;;  %v19237_v6 = vld [vmem:[%s19566_s7 + $0x2c5c] sm:$0xf0] }
 0x2f4   : > { %10358 = vmatpush.bf16.msra.mxu3 %v12399_v55  ;;  %v17842_v55 = vld [vmem:[%s19566_s7 + $0xcc] sm:$0xf]  ;;  %v17699_v19 = vor.u32 %v19237_v6, %v17698_v28  ;;  %v19177_v6 = vld [vmem:[%s19566_s7 + $0x2a7c] sm:$0xf0] }
 0x2f5   : > { %10317 = vmatpush.bf16.msra.mxu0 %v17555_v15  ;;  %v12324_v15 = vld [vmem:[%s19566_s7 + $0x260] sm:$0xf0]  ;;  %v12135_v27 = vor.u32 %v17842_v55, %v12132_v51  ;;  %v17650_v55 = vld [vmem:[%s19566_s7 + $0x2be8] sm:$0xf] }
 0x2f6   : > { %10331 = vmatpush.bf16.msra.mxu1 %v17747_v23  ;;  %v10046_v23 = vadd.f32 %v10045_v10, %v21357_v63  ;;  %v12327_v0 = vor.u32 %v17890_v31, %v12324_v15  ;;  %v12108_v63 = vld [vmem:[%s19566_s7 + $0xb0] sm:$0xf0]  ;;  %v19225_v31 = vld [vmem:[%s19566_s7 + $0x2bfc] sm:$0xf0]  ;;  %v17830_v15 = vld [vmem:[%s19566_s7 + $0x6c] sm:$0xf] }
 0x2f7   : > { %10345 = vmatpush.bf16.msra.mxu2 %v12183_v9  ;;  %v17507_v9 = vor.u32 %v19189_v3, %v17506_v35  ;;  %v17884_v35 = vld [vmem:[%s19566_s7 + $0x21c] sm:$0xf]  ;;  %v17675_v3 = vor.u32 %v19231_v50, %v17674_v38  ;;  %v17651_v38 = vor.u32 %v19225_v31, %v17650_v55  ;;  %v17434_v50 = vld [vmem:[%s19566_s7 + $0x2a38] sm:$0xf]  ;;  %v19165_v55 = vld [vmem:[%s19566_s7 + $0x2a1c] sm:$0xf0] }
 0x2f8   : > { %10359 = vmatpush.bf16.msra.mxu3 %v12375_v17  ;;  %v17482_v17 = vld [vmem:[%s19566_s7 + $0x2a98] sm:$0xf]  ;;  %v10060_v5 = vadd.f32 %v10059_v16, %v10046_v23  ;;  %v12084_v23 = vld [vmem:[%s19566_s7 + $0x80] sm:$0xf0]  ;;  %v10087_v16 = vpop.f32.mrf.mxu3  ;;  %v17602_v31 = vld [vmem:[%s19566_s7 + $0x2b88] sm:$0xf] }
 0x2f9   : > { %10318 = vmatpush.bf16.msra.mxu0 %v17531_v1  ;;  %v17836_v1 = vld [vmem:[%s19566_s7 + $0x9c] sm:$0xf]  ;;  %v10073_v10 = vpop.f32.mrf.mxu2 }
 0x2fa   : > { %10332 = vmatpush.bf16.msra.mxu1 %v17723_v12  ;;  %v12300_v12 = vld [vmem:[%s19566_s7 + $0x230] sm:$0xf0]  ;;  %v12111_v28 = vor.u32 %v17836_v1, %v12108_v63  ;;  %v17626_v1 = vld [vmem:[%s19566_s7 + $0x2bb8] sm:$0xf] }
 0x2fb   : > { %10346 = vmatpush.bf16.msra.mxu2 %v12159_v13  ;;  %v17483_v13 = vor.u32 %v19183_v53, %v17482_v17  ;;  %v12303_v51 = vor.u32 %v17884_v35, %v12300_v12  ;;  %v19219_v35 = vld [vmem:[%s19566_s7 + $0x2bcc] sm:$0xf0]  ;;  %v17824_v12 = vld [vmem:[%s19566_s7 + $0x3c] sm:$0xf] }
 0x2fc   : > { %10360 = vmatpush.bf16.msra.mxu3 %v12351_v8  ;;  %v17458_v8 = vld [vmem:[%s19566_s7 + $0x2a68] sm:$0xf] }
 0x2fd   : > { %10319 = vmatpush.bf16.msra.mxu0 %v17507_v9  ;;  %v10074_v9 = vadd.f32 %v10073_v10, %v10060_v5  ;;  %v17459_v17 = vor.u32 %v19177_v6, %v17458_v8  ;;  %v19171_v5 = vld [vmem:[%s19566_s7 + $0x2a4c] sm:$0xf0]  ;;  %v17410_v6 = vld [vmem:[%s19566_s7 + $0x2a08] sm:$0xf] }
 0x2fe   : > { %10333 = vmatpush.bf16.msra.mxu1 %v17699_v19  ;;  %v17878_v19 = vld [vmem:[%s19566_s7 + $0x1ec] sm:$0xf]  ;;  %v17435_v8 = vor.u32 %v19171_v5, %v17434_v50  ;;  %v12588_v50 = vld [vmem:[%s19566_s7 + $0x470] sm:$0xf0]  ;;  %v18004_v5 = vld [vmem:[%s19566_s7 + $0x5dc] sm:$0xf] }
 0x2ff   : > { %10347 = vmatpush.bf16.msra.mxu2 %v12135_v27  ;;  %v12276_v27 = vld [vmem:[%s19566_s7 + $0x200] sm:$0xf0]  ;;  %v21436_v53 = vadd.f32 %v10087_v16, %v10074_v9 }
 0x300   : > { %10361 = vmatpush.bf16.msra.mxu3 %v12327_v0  ;;  %v12087_v0 = vor.u32 %v17830_v15, %v12084_v23  ;;  %v12279_v63 = vor.u32 %v17878_v19, %v12276_v27  ;;  %v19213_v15 = vld [vmem:[%s19566_s7 + $0x2b9c] sm:$0xf0]  ;;  %v17818_v23 = vld [vmem:[%s19566_s7 + $0xc] sm:$0xf]  ;;  %v12036_v16 = vld [vmem:[%s19566_s7 + $0x20] sm:$0xf0] }
 0x301   : > { %10320 = vmatpush.bf16.msra.mxu0 %v17483_v13  ;;  %v12060_v13 = vld [vmem:[%s19566_s7 + $0x50] sm:$0xf0]  ;;  %v17866_v19 = vld [vmem:[%s19566_s7 + $0x18c] sm:$0xf]  ;;  %v12228_v27 = vld [vmem:[%s19566_s7 + $0x1a0] sm:$0xf0] }
 0x302   : > { %10334 = vmatpush.bf16.msra.mxu1 %v17675_v3  ;;  %v17872_v3 = vld [vmem:[%s19566_s7 + $0x1bc] sm:$0xf]  ;;  %v12063_v10 = vor.u32 %v17824_v12, %v12060_v13  ;;  %v12039_v12 = vor.u32 %v17818_v23, %v12036_v16  ;;  %v18094_v23 = vld [vmem:[%s19566_s7 + $0x8ac] sm:$0xf]  ;;  %v21472_v16 = vpop.f32.mrf.mxu1 }
 0x303   : > { %10348 = vmatpush.bf16.msra.mxu2 %v12111_v28  ;;  %v12252_v28 = vld [vmem:[%s19566_s7 + $0x1d0] sm:$0xf0]  ;;  %v18100_v13 = vld [vmem:[%s19566_s7 + $0x8dc] sm:$0xf]  ;;  %23618 = vst [vmem:[#allocation81_spill] sm:$0xff] %v21472_v16 }
 0x304   : > { %10362 = vmatpush.bf16.msra.mxu3 %v12303_v51  ;;  %v17627_v51 = vor.u32 %v19219_v35, %v17626_v1  ;;  %v12255_v9 = vor.u32 %v17872_v3, %v12252_v28  ;;  %v18052_v1 = vld [vmem:[%s19566_s7 + $0x75c] sm:$0xf]  ;;  %v12972_v35 = vld [vmem:[%s19566_s7 + $0x770] sm:$0xf0]  ;;  %v12231_v28 = vor.u32 %v17866_v19, %v12228_v27  ;;  %v12567_v19 = vor.u32 %v17950_v7, %v12564_v62  ;;  %v18190_v16 = vld [vmem:[%s19566_s7 + $0xbac] sm:$0xf] }
 0x305   : > { %10321 = vmatpush.bf16.msra.mxu0 %v17459_v17  ;;  %v17956_v17 = vld [vmem:[%s19566_s7 + $0x45c] sm:$0xf]  ;;  %v13164_v3 = vld [vmem:[%s19566_s7 + $0x8f0] sm:$0xf0]  ;;  %v12759_v27 = vor.u32 %v17998_v4, %v12756_v43 }
 0x306   : > { %10335 = vmatpush.bf16.msra.mxu1 %v17651_v38  ;;  %v17411_v38 = vor.u32 %v19165_v55, %v17410_v6  ;;  %v12975_v55 = vor.u32 %v18052_v1, %v12972_v35  ;;  %v12732_v1 = vld [vmem:[%s19566_s7 + $0x590] sm:$0xf0]  ;;  %v18040_v35 = vld [vmem:[%s19566_s7 + $0x6fc] sm:$0xf] }
 0x307   : > { %10349 = vmatpush.bf16.msra.mxu2 %v12087_v0  ;;  %v12780_v0 = vld [vmem:[%s19566_s7 + $0x5f0] sm:$0xf0]  ;;  %v18088_v62 = vld [vmem:[%s19566_s7 + $0x87c] sm:$0xf] }
 0x308   : > { %10363 = vmatpush.bf16.msra.mxu3 %v12279_v63  ;;  %v17603_v63 = vor.u32 %v19213_v15, %v17602_v31  ;;  %v12783_v6 = vor.u32 %v18004_v5, %v12780_v0  ;;  %v12948_v31 = vld [vmem:[%s19566_s7 + $0x740] sm:$0xf0]  ;;  %v21468_v15 = vpop.f32.mrf.mxu0  ;;  %v12540_v5 = vld [vmem:[%s19566_s7 + $0x410] sm:$0xf0] }
 0x309   : > { %10322 = vmatpush.bf16.msra.mxu0 %v17435_v8  ;;  %v12591_v8 = vor.u32 %v17956_v17, %v12588_v50  ;;  %23617 = vst [vmem:[#allocation80_spill] sm:$0xff] %v21468_v15  ;;  %v17944_v50 = vld [vmem:[%s19566_s7 + $0x3fc] sm:$0xf]  ;;  %v13116_v7 = vld [vmem:[%s19566_s7 + $0x890] sm:$0xf0] }
 0x30a   : > { %10336 = vmatpush.bf16.msra.mxu1 %v17627_v51  ;;  %v13167_v51 = vor.u32 %v18100_v13, %v13164_v3  ;;  %v12543_v43 = vor.u32 %v17944_v50, %v12540_v5  ;;  %v17938_v13 = vld [vmem:[%s19566_s7 + $0x3cc] sm:$0xf]  ;;  %v12516_v3 = vld [vmem:[%s19566_s7 + $0x3e0] sm:$0xf0] }
 0x30b   : > { %10350 = vmatpush.bf16.msra.mxu2 %v12063_v10  ;;  %v18046_v10 = vld [vmem:[%s19566_s7 + $0x72c] sm:$0xf]  ;;  %v13524_v15 = vld [vmem:[%s19566_s7 + $0xbc0] sm:$0xf0] }
 0x30c   : > { %10364 = vmatpush.bf16.msra.mxu3 %v12255_v9  ;;  %v13140_v9 = vld [vmem:[%s19566_s7 + $0x8c0] sm:$0xf0]  ;;  %v12951_v17 = vor.u32 %v18046_v10, %v12948_v31  ;;  %v21494_v31 = vpop.f32.mrf.mxu3 }
 0x30d   : > { %10323 = vmatpush.bf16.msra.mxu0 %v17411_v38  ;;  %v17992_v38 = vld [vmem:[%s19566_s7 + $0x57c] sm:$0xf]  ;;  %v13143_v0 = vor.u32 %v18094_v23, %v13140_v9  ;;  %v12900_v10 = vld [vmem:[%s19566_s7 + $0x6e0] sm:$0xf0]  ;;  %23620 = vst [vmem:[#allocation83_spill] sm:$0xff] %v21494_v31 }
 0x30e   : > { %10337 = vmatpush.bf16.msra.mxu1 %v17603_v63  ;;  %v12924_v63 = vld [vmem:[%s19566_s7 + $0x710] sm:$0xf0]  ;;  %v12735_v4 = vor.u32 %v17992_v38, %v12732_v1  ;;  %v18082_v9 = vld [vmem:[%s19566_s7 + $0x84c] sm:$0xf]  ;;  %v10115_v50 = vpop.f32.mrf.mxu1 }
 0x30f   : > { %10351 = vmatpush.bf16.msra.mxu2 %v12039_v12  ;;  %v12927_v12 = vor.u32 %v18040_v35, %v12924_v63  ;;  %v12492_v1 = vld [vmem:[%s19566_s7 + $0x3b0] sm:$0xf0]  ;;  %v17980_v35 = vld [vmem:[%s19566_s7 + $0x51c] sm:$0xf]  ;;  %v18142_v31 = vld [vmem:[%s19566_s7 + $0xa2c] sm:$0xf] }
 0x310   : > { %10365 = vmatpush.bf16.msra.mxu3 %v12231_v28  ;;  %10324 = vmatmul.bf16.vlgmr.msra.gmra.mxu0 %v20275_v22  ;;  %v17986_v28 = vld [vmem:[%s19566_s7 + $0x54c] sm:$0xf]  ;;  %v10101_v23 = vpop.f32.mrf.mxu0 }
 0x311   : > { %10372 = vmatpush.bf16.msrb.mxu0 %v12591_v8  ;;  %10338 = vmatmul.bf16.vlgmr.msra.gmra.mxu1 %v20282_v25  ;;  %v21489_v8 = vpop.f32.mrf.mxu2 }
 0x312   : > { %10386 = vmatpush.bf16.msrb.mxu1 %v12783_v6  ;;  %10352 = vmatmul.bf16.vlgmr.msra.gmra.mxu2 %v19669_v59  ;;  %23619 = vst [vmem:[#allocation82_spill] sm:$0xff] %v21489_v8  ;;  %v13119_v6 = vor.u32 %v18088_v62, %v13116_v7  ;;  %v12684_v7 = vld [vmem:[%s19566_s7 + $0x530] sm:$0xf0]  ;;  %v13332_v8 = vld [vmem:[%s19566_s7 + $0xa40] sm:$0xf0] }
 0x313   : > { %10400 = vmatpush.bf16.msrb.mxu2 %v12975_v55  ;;  %10366 = vmatmul.bf16.vlgmr.msra.gmra.mxu3 %v19685_v11  ;;  %v12708_v55 = vld [vmem:[%s19566_s7 + $0x560] sm:$0xf0] }
 0x314   : > { %10414 = vmatpush.bf16.msrb.mxu3 %v13167_v51  ;;  %v18034_v51 = vld [vmem:[%s19566_s7 + $0x6cc] sm:$0xf]  ;;  %v12711_v5 = vor.u32 %v17986_v28, %v12708_v55  ;;  %v12468_v55 = vld [vmem:[%s19566_s7 + $0x380] sm:$0xf0] }
 0x315   : > { %10373 = vmatpush.bf16.msrb.mxu0 %v12567_v19  ;;  %v13092_v19 = vld [vmem:[%s19566_s7 + $0x860] sm:$0xf0]  ;;  %v12903_v38 = vor.u32 %v18034_v51, %v12900_v10  ;;  %v17974_v51 = vld [vmem:[%s19566_s7 + $0x4ec] sm:$0xf] }
 0x316   : > { %10387 = vmatpush.bf16.msrb.mxu1 %v12759_v27  ;;  %v10102_v27 = vadd.f32 %v10101_v23, %v21436_v53  ;;  %v13095_v63 = vor.u32 %v18082_v9, %v13092_v19  ;;  %v12876_v53 = vld [vmem:[%s19566_s7 + $0x6b0] sm:$0xf0]  ;;  %v12660_v9 = vld [vmem:[%s19566_s7 + $0x500] sm:$0xf0]  ;;  %v18022_v19 = vld [vmem:[%s19566_s7 + $0x66c] sm:$0xf] }
 0x317   : > { %10401 = vmatpush.bf16.msrb.mxu2 %v12951_v17  ;;  %v12519_v17 = vor.u32 %v17938_v13, %v12516_v3  ;;  %v18076_v13 = vld [vmem:[%s19566_s7 + $0x81c] sm:$0xf]  ;;  %v12687_v3 = vor.u32 %v17980_v35, %v12684_v7  ;;  %v12663_v35 = vor.u32 %v17974_v51, %v12660_v9  ;;  %v12420_v51 = vld [vmem:[%s19566_s7 + $0x320] sm:$0xf0]  ;;  %v17962_v9 = vld [vmem:[%s19566_s7 + $0x48c] sm:$0xf] }
 0x318   : > { %10415 = vmatpush.bf16.msrb.mxu3 %v13143_v0  ;;  %v17932_v0 = vld [vmem:[%s19566_s7 + $0x39c] sm:$0xf]  ;;  %v10116_v62 = vadd.f32 %v10115_v50, %v10102_v27  ;;  %v12852_v27 = vld [vmem:[%s19566_s7 + $0x680] sm:$0xf0]  ;;  %v10143_v50 = vpop.f32.mrf.mxu3 }
 0x319   : > { %10374 = vmatpush.bf16.msrb.mxu0 %v12543_v43  ;;  %v18028_v43 = vld [vmem:[%s19566_s7 + $0x69c] sm:$0xf]  ;;  %v10129_v23 = vpop.f32.mrf.mxu2 }
 0x31a   : > { %10388 = vmatpush.bf16.msrb.mxu1 %v12735_v4  ;;  %v13068_v4 = vld [vmem:[%s19566_s7 + $0x830] sm:$0xf0]  ;;  %v12879_v28 = vor.u32 %v18028_v43, %v12876_v53  ;;  %v17920_v7 = vld [vmem:[%s19566_s7 + $0x33c] sm:$0xf] }
 0x31b   : > { %10402 = vmatpush.bf16.msrb.mxu2 %v12927_v12  ;;  %v12495_v12 = vor.u32 %v17932_v0, %v12492_v1  ;;  %v13071_v10 = vor.u32 %v18076_v13, %v13068_v4  ;;  %v17968_v43 = vld [vmem:[%s19566_s7 + $0x4bc] sm:$0xf]  ;;  %v12636_v13 = vld [vmem:[%s19566_s7 + $0x4d0] sm:$0xf0] }
 0x31c   : > { %10416 = vmatpush.bf16.msrb.mxu3 %v13119_v6  ;;  %v17926_v6 = vld [vmem:[%s19566_s7 + $0x36c] sm:$0xf]  ;;  %v18016_v4 = vld [vmem:[%s19566_s7 + $0x63c] sm:$0xf] }
 0x31d   : > { %10375 = vmatpush.bf16.msrb.mxu0 %v12519_v17  ;;  %v10130_v17 = vadd.f32 %v10129_v23, %v10116_v62  ;;  %v12471_v0 = vor.u32 %v17926_v6, %v12468_v55  ;;  %v12444_v62 = vld [vmem:[%s19566_s7 + $0x350] sm:$0xf0]  ;;  %v17914_v55 = vld [vmem:[%s19566_s7 + $0x30c] sm:$0xf] }
 0x31e   : > { %10389 = vmatpush.bf16.msrb.mxu1 %v12711_v5  ;;  %v18070_v5 = vld [vmem:[%s19566_s7 + $0x7ec] sm:$0xf]  ;;  %v12447_v6 = vor.u32 %v17920_v7, %v12444_v62  ;;  %v13356_v7 = vld [vmem:[%s19566_s7 + $0xa70] sm:$0xf0]  ;;  %v18196_v62 = vld [vmem:[%s19566_s7 + $0xbdc] sm:$0xf] }
 0x31f   : > { %10403 = vmatpush.bf16.msrb.mxu2 %v12903_v38  ;;  %v13044_v38 = vld [vmem:[%s19566_s7 + $0x800] sm:$0xf0]  ;;  %v21515_v1 = vadd.f32 %v10143_v50, %v10130_v17 }
 0x320   : > { %10417 = vmatpush.bf16.msrb.mxu3 %v13095_v63  ;;  %v12855_v63 = vor.u32 %v18022_v19, %v12852_v27  ;;  %v13047_v53 = vor.u32 %v18070_v5, %v13044_v38  ;;  %v12612_v19 = vld [vmem:[%s19566_s7 + $0x4a0] sm:$0xf0]  ;;  %v18010_v27 = vld [vmem:[%s19566_s7 + $0x60c] sm:$0xf] }
 0x321   : > { %10376 = vmatpush.bf16.msrb.mxu0 %v12495_v12  ;;  %v12828_v12 = vld [vmem:[%s19566_s7 + $0x650] sm:$0xf0]  ;;  %v12804_v50 = vld [vmem:[%s19566_s7 + $0x620] sm:$0xf0]  ;;  %v18058_v5 = vld [vmem:[%s19566_s7 + $0x78c] sm:$0xf] }
 0x322   : > { %10390 = vmatpush.bf16.msrb.mxu1 %v12687_v3  ;;  %v18064_v3 = vld [vmem:[%s19566_s7 + $0x7bc] sm:$0xf]  ;;  %v12831_v23 = vor.u32 %v18016_v4, %v12828_v12  ;;  %v12996_v38 = vld [vmem:[%s19566_s7 + $0x7a0] sm:$0xf0]  ;;  %v12807_v4 = vor.u32 %v18010_v27, %v12804_v50  ;;  %v18286_v27 = vld [vmem:[%s19566_s7 + $0xeac] sm:$0xf]  ;;  %v21551_v50 = vpop.f32.mrf.mxu1 }
 0x323   : > { %10404 = vmatpush.bf16.msrb.mxu2 %v12879_v28  ;;  %v13020_v28 = vld [vmem:[%s19566_s7 + $0x7d0] sm:$0xf0]  ;;  %v18292_v12 = vld [vmem:[%s19566_s7 + $0xedc] sm:$0xf]  ;;  %23622 = vst [vmem:[#allocation85_spill] sm:$0xff] %v21551_v50 }
 0x324   : > { %10418 = vmatpush.bf16.msrb.mxu3 %v13071_v10  ;;  %v12639_v10 = vor.u32 %v17968_v43, %v12636_v13  ;;  %v13023_v17 = vor.u32 %v18064_v3, %v13020_v28  ;;  %v18244_v43 = vld [vmem:[%s19566_s7 + $0xd5c] sm:$0xf]  ;;  %v13740_v13 = vld [vmem:[%s19566_s7 + $0xd70] sm:$0xf0]  ;;  %v12999_v28 = vor.u32 %v18058_v5, %v12996_v38  ;;  %v13335_v5 = vor.u32 %v18142_v31, %v13332_v8  ;;  %v18382_v50 = vld [vmem:[%s19566_s7 + $0x11ac] sm:$0xf] }
 0x325   : > { %10377 = vmatpush.bf16.msrb.mxu0 %v12471_v0  ;;  %v18148_v0 = vld [vmem:[%s19566_s7 + $0xa5c] sm:$0xf]  ;;  %v13932_v3 = vld [vmem:[%s19566_s7 + $0xef0] sm:$0xf0]  ;;  %v13527_v38 = vor.u32 %v18190_v16, %v13524_v15 }
 0x326   : > { %10391 = vmatpush.bf16.msrb.mxu1 %v12663_v35  ;;  %v12423_v35 = vor.u32 %v17914_v55, %v12420_v51  ;;  %v13743_v51 = vor.u32 %v18244_v43, %v13740_v13  ;;  %v13500_v43 = vld [vmem:[%s19566_s7 + $0xb90] sm:$0xf0]  ;;  %v18232_v13 = vld [vmem:[%s19566_s7 + $0xcfc] sm:$0xf] }
 0x327   : > { %10405 = vmatpush.bf16.msrb.mxu2 %v12855_v63  ;;  %v13548_v63 = vld [vmem:[%s19566_s7 + $0xbf0] sm:$0xf0]  ;;  %v18280_v15 = vld [vmem:[%s19566_s7 + $0xe7c] sm:$0xf] }
 0x328   : > { %10419 = vmatpush.bf16.msrb.mxu3 %v13047_v53  ;;  %v12615_v53 = vor.u32 %v17962_v9, %v12612_v19  ;;  %v13551_v55 = vor.u32 %v18196_v62, %v13548_v63  ;;  %v13716_v9 = vld [vmem:[%s19566_s7 + $0xd40] sm:$0xf0]  ;;  %v21547_v19 = vpop.f32.mrf.mxu0  ;;  %v13308_v62 = vld [vmem:[%s19566_s7 + $0xa10] sm:$0xf0] }
 0x329   : > { %10378 = vmatpush.bf16.msrb.mxu0 %v12447_v6  ;;  %v13359_v6 = vor.u32 %v18148_v0, %v13356_v7  ;;  %23621 = vst [vmem:[#allocation84_spill] sm:$0xff] %v21547_v19  ;;  %v18136_v7 = vld [vmem:[%s19566_s7 + $0x9fc] sm:$0xf]  ;;  %v13884_v16 = vld [vmem:[%s19566_s7 + $0xe90] sm:$0xf0] }
 0x32a   : > { %10392 = vmatpush.bf16.msrb.mxu1 %v12639_v10  ;;  %v13935_v10 = vor.u32 %v18292_v12, %v13932_v3  ;;  %v13311_v8 = vor.u32 %v18136_v7, %v13308_v62  ;;  %v18130_v12 = vld [vmem:[%s19566_s7 + $0x9cc] sm:$0xf]  ;;  %v13284_v3 = vld [vmem:[%s19566_s7 + $0x9e0] sm:$0xf0] }
 0x32b   : > { %10406 = vmatpush.bf16.msrb.mxu2 %v12831_v23  ;;  %v18238_v23 = vld [vmem:[%s19566_s7 + $0xd2c] sm:$0xf]  ;;  %v14292_v19 = vld [vmem:[%s19566_s7 + $0x11c0] sm:$0xf0] }
 0x32c   : > { %10420 = vmatpush.bf16.msrb.mxu3 %v13023_v17  ;;  %v13908_v17 = vld [vmem:[%s19566_s7 + $0xec0] sm:$0xf0]  ;;  %v13719_v0 = vor.u32 %v18238_v23, %v13716_v9  ;;  %v21573_v9 = vpop.f32.mrf.mxu3 }
 0x32d   : > { %10379 = vmatpush.bf16.msrb.mxu0 %v12423_v35  ;;  %v18184_v35 = vld [vmem:[%s19566_s7 + $0xb7c] sm:$0xf]  ;;  %v13911_v63 = vor.u32 %v18286_v27, %v13908_v17  ;;  %v13668_v23 = vld [vmem:[%s19566_s7 + $0xce0] sm:$0xf0]  ;;  %23624 = vst [vmem:[#allocation87_spill] sm:$0xff] %v21573_v9 }
 0x32e   : > { %10393 = vmatpush.bf16.msrb.mxu1 %v12615_v53  ;;  %v13692_v53 = vld [vmem:[%s19566_s7 + $0xd10] sm:$0xf0]  ;;  %v13503_v31 = vor.u32 %v18184_v35, %v13500_v43  ;;  %v18274_v17 = vld [vmem:[%s19566_s7 + $0xe4c] sm:$0xf]  ;;  %v10171_v7 = vpop.f32.mrf.mxu1 }
 0x32f   : > { %10407 = vmatpush.bf16.msrb.mxu2 %v12807_v4  ;;  %v13695_v4 = vor.u32 %v18232_v13, %v13692_v53  ;;  %v13260_v43 = vld [vmem:[%s19566_s7 + $0x9b0] sm:$0xf0]  ;;  %v18172_v13 = vld [vmem:[%s19566_s7 + $0xb1c] sm:$0xf]  ;;  %v18334_v9 = vld [vmem:[%s19566_s7 + $0x102c] sm:$0xf] }
 0x330   : > { %10421 = vmatpush.bf16.msrb.mxu3 %v12999_v28  ;;  %10380 = vmatmul.bf16.vlgmr.msrb.gmra.mxu0 %v19675_v2  ;;  %v18178_v28 = vld [vmem:[%s19566_s7 + $0xb4c] sm:$0xf]  ;;  %v10157_v27 = vpop.f32.mrf.mxu0 }
 0x331   : > { %10428 = vmatpush.bf16.msra.mxu0 %v13359_v6  ;;  %10394 = vmatmul.bf16.vlgmr.msrb.gmra.mxu1 %v19691_v18  ;;  %v21568_v6 = vpop.f32.mrf.mxu2 }
 0x332   : > { %10442 = vmatpush.bf16.msra.mxu1 %v13551_v55  ;;  %10408 = vmatmul.bf16.vlgmr.msrb.gmra.mxu2 %v19751_v40  ;;  %23623 = vst [vmem:[#allocation86_spill] sm:$0xff] %v21568_v6  ;;  %v13887_v55 = vor.u32 %v18280_v15, %v13884_v16  ;;  %v13452_v16 = vld [vmem:[%s19566_s7 + $0xb30] sm:$0xf0]  ;;  %v14100_v6 = vld [vmem:[%s19566_s7 + $0x1040] sm:$0xf0] }
 0x333   : > { %10456 = vmatpush.bf16.msra.mxu2 %v13743_v51  ;;  %10422 = vmatmul.bf16.vlgmr.msrb.gmra.mxu3 %v19758_v45  ;;  %v13476_v51 = vld [vmem:[%s19566_s7 + $0xb60] sm:$0xf0] }
 0x334   : > { %10470 = vmatpush.bf16.msra.mxu3 %v13935_v10  ;;  %v18226_v10 = vld [vmem:[%s19566_s7 + $0xccc] sm:$0xf]  ;;  %v13479_v62 = vor.u32 %v18178_v28, %v13476_v51  ;;  %v13236_v51 = vld [vmem:[%s19566_s7 + $0x980] sm:$0xf0] }
 0x335   : > { %10429 = vmatpush.bf16.msra.mxu0 %v13335_v5  ;;  %v13860_v5 = vld [vmem:[%s19566_s7 + $0xe60] sm:$0xf0]  ;;  %v13671_v35 = vor.u32 %v18226_v10, %v13668_v23  ;;  %v18166_v10 = vld [vmem:[%s19566_s7 + $0xaec] sm:$0xf] }
 0x336   : > { %10443 = vmatpush.bf16.msra.mxu1 %v13527_v38  ;;  %v10158_v38 = vadd.f32 %v10157_v27, %v21515_v1  ;;  %v13863_v53 = vor.u32 %v18274_v17, %v13860_v5  ;;  %v13644_v1 = vld [vmem:[%s19566_s7 + $0xcb0] sm:$0xf0]  ;;  %v13428_v17 = vld [vmem:[%s19566_s7 + $0xb00] sm:$0xf0]  ;;  %v18214_v5 = vld [vmem:[%s19566_s7 + $0xc6c] sm:$0xf] }
 0x337   : > { %10457 = vmatpush.bf16.msra.mxu2 %v13719_v0  ;;  %v13287_v0 = vor.u32 %v18130_v12, %v13284_v3  ;;  %v18268_v12 = vld [vmem:[%s19566_s7 + $0xe1c] sm:$0xf]  ;;  %v13455_v3 = vor.u32 %v18172_v13, %v13452_v16  ;;  %v13431_v13 = vor.u32 %v18166_v10, %v13428_v17  ;;  %v13188_v10 = vld [vmem:[%s19566_s7 + $0x920] sm:$0xf0]  ;;  %v18154_v17 = vld [vmem:[%s19566_s7 + $0xa8c] sm:$0xf] }
 0x338   : > { %10471 = vmatpush.bf16.msra.mxu3 %v13911_v63  ;;  %v18124_v63 = vld [vmem:[%s19566_s7 + $0x99c] sm:$0xf]  ;;  %v10172_v15 = vadd.f32 %v10171_v7, %v10158_v38  ;;  %v13620_v38 = vld [vmem:[%s19566_s7 + $0xc80] sm:$0xf0]  ;;  %v10199_v7 = vpop.f32.mrf.mxu3 }
 0x339   : > { %10430 = vmatpush.bf16.msra.mxu0 %v13311_v8  ;;  %v18220_v8 = vld [vmem:[%s19566_s7 + $0xc9c] sm:$0xf]  ;;  %v10185_v27 = vpop.f32.mrf.mxu2 }
 0x33a   : > { %10444 = vmatpush.bf16.msra.mxu1 %v13503_v31  ;;  %v13836_v31 = vld [vmem:[%s19566_s7 + $0xe30] sm:$0xf0]  ;;  %v13647_v28 = vor.u32 %v18220_v8, %v13644_v1  ;;  %v18112_v16 = vld [vmem:[%s19566_s7 + $0x93c] sm:$0xf] }
 0x33b   : > { %10458 = vmatpush.bf16.msra.mxu2 %v13695_v4  ;;  %v13263_v4 = vor.u32 %v18124_v63, %v13260_v43  ;;  %v13839_v23 = vor.u32 %v18268_v12, %v13836_v31  ;;  %v18160_v8 = vld [vmem:[%s19566_s7 + $0xabc] sm:$0xf]  ;;  %v13404_v12 = vld [vmem:[%s19566_s7 + $0xad0] sm:$0xf0] }
 0x33c   : > { %10472 = vmatpush.bf16.msra.mxu3 %v13887_v55  ;;  %v18118_v55 = vld [vmem:[%s19566_s7 + $0x96c] sm:$0xf]  ;;  %v18208_v31 = vld [vmem:[%s19566_s7 + $0xc3c] sm:$0xf] }
 0x33d   : > { %10431 = vmatpush.bf16.msra.mxu0 %v13287_v0  ;;  %v10186_v0 = vadd.f32 %v10185_v27, %v10172_v15  ;;  %v13239_v63 = vor.u32 %v18118_v55, %v13236_v51  ;;  %v13212_v15 = vld [vmem:[%s19566_s7 + $0x950] sm:$0xf0]  ;;  %v18106_v51 = vld [vmem:[%s19566_s7 + $0x90c] sm:$0xf] }
 0x33e   : > { %10445 = vmatpush.bf16.msra.mxu1 %v13479_v62  ;;  %v18262_v62 = vld [vmem:[%s19566_s7 + $0xdec] sm:$0xf]  ;;  %v13215_v55 = vor.u32 %v18112_v16, %v13212_v15  ;;  %v14124_v16 = vld [vmem:[%s19566_s7 + $0x1070] sm:$0xf0]  ;;  %v18388_v15 = vld [vmem:[%s19566_s7 + $0x11dc] sm:$0xf] }
 0x33f   : > { %10459 = vmatpush.bf16.msra.mxu2 %v13671_v35  ;;  %v13812_v35 = vld [vmem:[%s19566_s7 + $0xe00] sm:$0xf0]  ;;  %v21594_v43 = vadd.f32 %v10199_v7, %v10186_v0 }
 0x340   : > { %10473 = vmatpush.bf16.msra.mxu3 %v13863_v53  ;;  %v13623_v53 = vor.u32 %v18214_v5, %v13620_v38  ;;  %v13815_v1 = vor.u32 %v18262_v62, %v13812_v35  ;;  %v13380_v5 = vld [vmem:[%s19566_s7 + $0xaa0] sm:$0xf0]  ;;  %v18202_v38 = vld [vmem:[%s19566_s7 + $0xc0c] sm:$0xf] }
 0x341   : > { %10432 = vmatpush.bf16.msra.mxu0 %v13263_v4  ;;  %v13596_v4 = vld [vmem:[%s19566_s7 + $0xc50] sm:$0xf0]  ;;  %v13572_v7 = vld [vmem:[%s19566_s7 + $0xc20] sm:$0xf0]  ;;  %v18250_v62 = vld [vmem:[%s19566_s7 + $0xd8c] sm:$0xf] }
 0x342   : > { %10446 = vmatpush.bf16.msra.mxu1 %v13455_v3  ;;  %v18256_v3 = vld [vmem:[%s19566_s7 + $0xdbc] sm:$0xf]  ;;  %v13599_v27 = vor.u32 %v18208_v31, %v13596_v4  ;;  %v13764_v35 = vld [vmem:[%s19566_s7 + $0xda0] sm:$0xf0]  ;;  %v13575_v31 = vor.u32 %v18202_v38, %v13572_v7  ;;  %v18478_v38 = vld [vmem:[%s19566_s7 + $0x14ac] sm:$0xf]  ;;  %v21630_v7 = vpop.f32.mrf.mxu1 }
 0x343   : > { %10460 = vmatpush.bf16.msra.mxu2 %v13647_v28  ;;  %v13788_v28 = vld [vmem:[%s19566_s7 + $0xdd0] sm:$0xf0]  ;;  %v18484_v4 = vld [vmem:[%s19566_s7 + $0x14dc] sm:$0xf]  ;;  %23626 = vst [vmem:[#allocation89_spill] sm:$0xff] %v21630_v7 }
 0x344   : > { %10474 = vmatpush.bf16.msra.mxu3 %v13839_v23  ;;  %v13407_v23 = vor.u32 %v18160_v8, %v13404_v12  ;;  %v13791_v0 = vor.u32 %v18256_v3, %v13788_v28  ;;  %v18436_v8 = vld [vmem:[%s19566_s7 + $0x135c] sm:$0xf]  ;;  %v14508_v12 = vld [vmem:[%s19566_s7 + $0x1370] sm:$0xf0]  ;;  %v13767_v28 = vor.u32 %v18250_v62, %v13764_v35  ;;  %v14103_v62 = vor.u32 %v18334_v9, %v14100_v6  ;;  %v18574_v7 = vld [vmem:[%s19566_s7 + $0x17ac] sm:$0xf] }
 0x345   : > { %10433 = vmatpush.bf16.msra.mxu0 %v13239_v63  ;;  %v18340_v63 = vld [vmem:[%s19566_s7 + $0x105c] sm:$0xf]  ;;  %v14700_v3 = vld [vmem:[%s19566_s7 + $0x14f0] sm:$0xf0]  ;;  %v14295_v35 = vor.u32 %v18382_v50, %v14292_v19 }
 0x346   : > { %10447 = vmatpush.bf16.msra.mxu1 %v13431_v13  ;;  %v13191_v13 = vor.u32 %v18106_v51, %v13188_v10  ;;  %v14511_v10 = vor.u32 %v18436_v8, %v14508_v12  ;;  %v14268_v8 = vld [vmem:[%s19566_s7 + $0x1190] sm:$0xf0]  ;;  %v18424_v12 = vld [vmem:[%s19566_s7 + $0x12fc] sm:$0xf] }
 0x347   : > { %10461 = vmatpush.bf16.msra.mxu2 %v13623_v53  ;;  %v14316_v53 = vld [vmem:[%s19566_s7 + $0x11f0] sm:$0xf0]  ;;  %v18472_v19 = vld [vmem:[%s19566_s7 + $0x147c] sm:$0xf] }
 0x348   : > { %10475 = vmatpush.bf16.msra.mxu3 %v13815_v1  ;;  %v13383_v1 = vor.u32 %v18154_v17, %v13380_v5  ;;  %v14319_v51 = vor.u32 %v18388_v15, %v14316_v53  ;;  %v14484_v17 = vld [vmem:[%s19566_s7 + $0x1340] sm:$0xf0]  ;;  %v21626_v5 = vpop.f32.mrf.mxu0  ;;  %v14076_v15 = vld [vmem:[%s19566_s7 + $0x1010] sm:$0xf0] }
 0x349   : > { %10434 = vmatpush.bf16.msra.mxu0 %v13215_v55  ;;  %v14127_v55 = vor.u32 %v18340_v63, %v14124_v16  ;;  %23625 = vst [vmem:[#allocation88_spill] sm:$0xff] %v21626_v5  ;;  %v18328_v16 = vld [vmem:[%s19566_s7 + $0xffc] sm:$0xf]  ;;  %v14652_v50 = vld [vmem:[%s19566_s7 + $0x1490] sm:$0xf0] }
 0x34a   : > { %10448 = vmatpush.bf16.msra.mxu1 %v13407_v23  ;;  %v14703_v23 = vor.u32 %v18484_v4, %v14700_v3  ;;  %v14079_v6 = vor.u32 %v18328_v16, %v14076_v15  ;;  %v18322_v4 = vld [vmem:[%s19566_s7 + $0xfcc] sm:$0xf]  ;;  %v14052_v3 = vld [vmem:[%s19566_s7 + $0xfe0] sm:$0xf0] }
 0x34b   : > { %10462 = vmatpush.bf16.msra.mxu2 %v13599_v27  ;;  %v18430_v27 = vld [vmem:[%s19566_s7 + $0x132c] sm:$0xf]  ;;  %v15060_v5 = vld [vmem:[%s19566_s7 + $0x17c0] sm:$0xf0] }
 0x34c   : > { %10476 = vmatpush.bf16.msra.mxu3 %v13791_v0  ;;  %v14676_v0 = vld [vmem:[%s19566_s7 + $0x14c0] sm:$0xf0]  ;;  %v14487_v63 = vor.u32 %v18430_v27, %v14484_v17  ;;  %v21652_v17 = vpop.f32.mrf.mxu3 }
 0x34d   : > { %10435 = vmatpush.bf16.msra.mxu0 %v13191_v13  ;;  %v18376_v13 = vld [vmem:[%s19566_s7 + $0x117c] sm:$0xf]  ;;  %v14679_v53 = vor.u32 %v18478_v38, %v14676_v0  ;;  %v14436_v27 = vld [vmem:[%s19566_s7 + $0x12e0] sm:$0xf0]  ;;  %23628 = vst [vmem:[#allocation91_spill] sm:$0xff] %v21652_v17 }
 0x34e   : > { %10449 = vmatpush.bf16.msra.mxu1 %v13383_v1  ;;  %v14460_v1 = vld [vmem:[%s19566_s7 + $0x1310] sm:$0xf0]  ;;  %v14271_v9 = vor.u32 %v18376_v13, %v14268_v8  ;;  %v18466_v0 = vld [vmem:[%s19566_s7 + $0x144c] sm:$0xf]  ;;  %v10227_v16 = vpop.f32.mrf.mxu1 }
 0x34f   : > { %10463 = vmatpush.bf16.msra.mxu2 %v13575_v31  ;;  %v14463_v31 = vor.u32 %v18424_v12, %v14460_v1  ;;  %v14028_v8 = vld [vmem:[%s19566_s7 + $0xfb0] sm:$0xf0]  ;;  %v18364_v12 = vld [vmem:[%s19566_s7 + $0x111c] sm:$0xf]  ;;  %v18526_v17 = vld [vmem:[%s19566_s7 + $0x162c] sm:$0xf] }
 0x350   : > { %10477 = vmatpush.bf16.msra.mxu3 %v13767_v28  ;;  %10436 = vmatmul.bf16.vlgmr.msra.gmra.mxu0 %v19756_v44  ;;  %v18370_v28 = vld [vmem:[%s19566_s7 + $0x114c] sm:$0xf]  ;;  %v10213_v38 = vpop.f32.mrf.mxu0 }
 0x351   : > { %10484 = vmatpush.bf16.msrb.mxu0 %v14127_v55  ;;  %10450 = vmatmul.bf16.vlgmr.msra.gmra.mxu1 %v19762_v48  ;;  %v21647_v55 = vpop.f32.mrf.mxu2 }
 0x352   : > { %10498 = vmatpush.bf16.msrb.mxu1 %v14319_v51  ;;  %10464 = vmatmul.bf16.vlgmr.msra.gmra.mxu2 %v19835_v32  ;;  %23627 = vst [vmem:[#allocation90_spill] sm:$0xff] %v21647_v55  ;;  %v14655_v51 = vor.u32 %v18472_v19, %v14652_v50  ;;  %v14220_v50 = vld [vmem:[%s19566_s7 + $0x1130] sm:$0xf0]  ;;  %v14868_v55 = vld [vmem:[%s19566_s7 + $0x1640] sm:$0xf0] }
 0x353   : > { %10512 = vmatpush.bf16.msrb.mxu2 %v14511_v10  ;;  %10478 = vmatmul.bf16.vlgmr.msra.gmra.mxu3 %v19842_v37  ;;  %v14244_v10 = vld [vmem:[%s19566_s7 + $0x1160] sm:$0xf0] }
 0x354   : > { %10526 = vmatpush.bf16.msrb.mxu3 %v14703_v23  ;;  %v18418_v23 = vld [vmem:[%s19566_s7 + $0x12cc] sm:$0xf]  ;;  %v14247_v15 = vor.u32 %v18370_v28, %v14244_v10  ;;  %v14004_v10 = vld [vmem:[%s19566_s7 + $0xf80] sm:$0xf0] }
 0x355   : > { %10485 = vmatpush.bf16.msrb.mxu0 %v14103_v62  ;;  %v14628_v62 = vld [vmem:[%s19566_s7 + $0x1460] sm:$0xf0]  ;;  %v14439_v13 = vor.u32 %v18418_v23, %v14436_v27  ;;  %v18358_v23 = vld [vmem:[%s19566_s7 + $0x10ec] sm:$0xf] }
 0x356   : > { %10499 = vmatpush.bf16.msrb.mxu1 %v14295_v35  ;;  %v10214_v35 = vadd.f32 %v10213_v38, %v21594_v43  ;;  %v14631_v1 = vor.u32 %v18466_v0, %v14628_v62  ;;  %v14412_v43 = vld [vmem:[%s19566_s7 + $0x12b0] sm:$0xf0]  ;;  %v14196_v0 = vld [vmem:[%s19566_s7 + $0x1100] sm:$0xf0]  ;;  %v18406_v62 = vld [vmem:[%s19566_s7 + $0x126c] sm:$0xf] }
 0x357   : > { %10513 = vmatpush.bf16.msrb.mxu2 %v14487_v63  ;;  %v14055_v63 = vor.u32 %v18322_v4, %v14052_v3  ;;  %v18460_v4 = vld [vmem:[%s19566_s7 + $0x141c] sm:$0xf]  ;;  %v14223_v3 = vor.u32 %v18364_v12, %v14220_v50  ;;  %v14199_v12 = vor.u32 %v18358_v23, %v14196_v0  ;;  %v13956_v23 = vld [vmem:[%s19566_s7 + $0xf20] sm:$0xf0]  ;;  %v18346_v0 = vld [vmem:[%s19566_s7 + $0x108c] sm:$0xf] }
 0x358   : > { %10527 = vmatpush.bf16.msrb.mxu3 %v14679_v53  ;;  %v18316_v53 = vld [vmem:[%s19566_s7 + $0xf9c] sm:$0xf]  ;;  %v10228_v19 = vadd.f32 %v10227_v16, %v10214_v35  ;;  %v14388_v35 = vld [vmem:[%s19566_s7 + $0x1280] sm:$0xf0]  ;;  %v10255_v16 = vpop.f32.mrf.mxu3 }
 0x359   : > { %10486 = vmatpush.bf16.msrb.mxu0 %v14079_v6  ;;  %v18412_v6 = vld [vmem:[%s19566_s7 + $0x129c] sm:$0xf]  ;;  %v10241_v38 = vpop.f32.mrf.mxu2 }
 0x35a   : > { %10500 = vmatpush.bf16.msrb.mxu1 %v14271_v9  ;;  %v14604_v9 = vld [vmem:[%s19566_s7 + $0x1430] sm:$0xf0]  ;;  %v14415_v28 = vor.u32 %v18412_v6, %v14412_v43  ;;  %v18304_v50 = vld [vmem:[%s19566_s7 + $0xf3c] sm:$0xf] }
 0x35b   : > { %10514 = vmatpush.bf16.msrb.mxu2 %v14463_v31  ;;  %v14031_v31 = vor.u32 %v18316_v53, %v14028_v8  ;;  %v14607_v27 = vor.u32 %v18460_v4, %v14604_v9  ;;  %v18352_v6 = vld [vmem:[%s19566_s7 + $0x10bc] sm:$0xf]  ;;  %v14172_v4 = vld [vmem:[%s19566_s7 + $0x10d0] sm:$0xf0] }
 0x35c   : > { %10528 = vmatpush.bf16.msrb.mxu3 %v14655_v51  ;;  %v18310_v51 = vld [vmem:[%s19566_s7 + $0xf6c] sm:$0xf]  ;;  %v18400_v9 = vld [vmem:[%s19566_s7 + $0x123c] sm:$0xf] }
 0x35d   : > { %10487 = vmatpush.bf16.msrb.mxu0 %v14055_v63  ;;  %v10242_v63 = vadd.f32 %v10241_v38, %v10228_v19  ;;  %v14007_v53 = vor.u32 %v18310_v51, %v14004_v10  ;;  %v13980_v19 = vld [vmem:[%s19566_s7 + $0xf50] sm:$0xf0]  ;;  %v18298_v10 = vld [vmem:[%s19566_s7 + $0xf0c] sm:$0xf] }
 0x35e   : > { %10501 = vmatpush.bf16.msrb.mxu1 %v14247_v15  ;;  %v18454_v15 = vld [vmem:[%s19566_s7 + $0x13ec] sm:$0xf]  ;;  %v13983_v51 = vor.u32 %v18304_v50, %v13980_v19  ;;  %v14892_v50 = vld [vmem:[%s19566_s7 + $0x1670] sm:$0xf0]  ;;  %v18580_v19 = vld [vmem:[%s19566_s7 + $0x17dc] sm:$0xf] }
 0x35f   : > { %10515 = vmatpush.bf16.msrb.mxu2 %v14439_v13  ;;  %v14580_v13 = vld [vmem:[%s19566_s7 + $0x1400] sm:$0xf0]  ;;  %v21673_v8 = vadd.f32 %v10255_v16, %v10242_v63 }
 0x360   : > { %10529 = vmatpush.bf16.msrb.mxu3 %v14631_v1  ;;  %v14391_v1 = vor.u32 %v18406_v62, %v14388_v35  ;;  %v14583_v43 = vor.u32 %v18454_v15, %v14580_v13  ;;  %v14148_v62 = vld [vmem:[%s19566_s7 + $0x10a0] sm:$0xf0]  ;;  %v18394_v35 = vld [vmem:[%s19566_s7 + $0x120c] sm:$0xf] }
 0x361   : > { %10488 = vmatpush.bf16.msrb.mxu0 %v14031_v31  ;;  %v14364_v31 = vld [vmem:[%s19566_s7 + $0x1250] sm:$0xf0]  ;;  %v14340_v16 = vld [vmem:[%s19566_s7 + $0x1220] sm:$0xf0]  ;;  %v18442_v15 = vld [vmem:[%s19566_s7 + $0x138c] sm:$0xf] }
 0x362   : > { %10502 = vmatpush.bf16.msrb.mxu1 %v14223_v3  ;;  %v18448_v3 = vld [vmem:[%s19566_s7 + $0x13bc] sm:$0xf]  ;;  %v14367_v38 = vor.u32 %v18400_v9, %v14364_v31  ;;  %v14532_v13 = vld [vmem:[%s19566_s7 + $0x13a0] sm:$0xf0]  ;;  %v14343_v9 = vor.u32 %v18394_v35, %v14340_v16  ;;  %v18670_v35 = vld [vmem:[%s19566_s7 + $0x1aac] sm:$0xf]  ;;  %v21709_v16 = vpop.f32.mrf.mxu1 }
 0x363   : > { %10516 = vmatpush.bf16.msrb.mxu2 %v14415_v28  ;;  %v14556_v28 = vld [vmem:[%s19566_s7 + $0x13d0] sm:$0xf0]  ;;  %v18676_v31 = vld [vmem:[%s19566_s7 + $0x1adc] sm:$0xf]  ;;  %23630 = vst [vmem:[#allocation93_spill] sm:$0xff] %v21709_v16 }
 0x364   : > { %10530 = vmatpush.bf16.msrb.mxu3 %v14607_v27  ;;  %v14175_v27 = vor.u32 %v18352_v6, %v14172_v4  ;;  %v14559_v63 = vor.u32 %v18448_v3, %v14556_v28  ;;  %v18628_v6 = vld [vmem:[%s19566_s7 + $0x195c] sm:$0xf]  ;;  %v15276_v4 = vld [vmem:[%s19566_s7 + $0x1970] sm:$0xf0]  ;;  %v14535_v28 = vor.u32 %v18442_v15, %v14532_v13  ;;  %v14871_v15 = vor.u32 %v18526_v17, %v14868_v55  ;;  %v18766_v16 = vld [vmem:[%s19566_s7 + $0x1dac] sm:$0xf] }
 0x365   : > { %10489 = vmatpush.bf16.msrb.mxu0 %v14007_v53  ;;  %v18532_v53 = vld [vmem:[%s19566_s7 + $0x165c] sm:$0xf]  ;;  %v15468_v3 = vld [vmem:[%s19566_s7 + $0x1af0] sm:$0xf0]  ;;  %v15063_v13 = vor.u32 %v18574_v7, %v15060_v5 }
 0x366   : > { %10503 = vmatpush.bf16.msrb.mxu1 %v14199_v12  ;;  %v13959_v12 = vor.u32 %v18298_v10, %v13956_v23  ;;  %v15279_v23 = vor.u32 %v18628_v6, %v15276_v4  ;;  %v15036_v6 = vld [vmem:[%s19566_s7 + $0x1790] sm:$0xf0]  ;;  %v18616_v4 = vld [vmem:[%s19566_s7 + $0x18fc] sm:$0xf] }
 0x367   : > { %10517 = vmatpush.bf16.msrb.mxu2 %v14391_v1  ;;  %v15084_v1 = vld [vmem:[%s19566_s7 + $0x17f0] sm:$0xf0]  ;;  %v18664_v5 = vld [vmem:[%s19566_s7 + $0x1a7c] sm:$0xf] }
 0x368   : > { %10531 = vmatpush.bf16.msrb.mxu3 %v14583_v43  ;;  %v14151_v43 = vor.u32 %v18346_v0, %v14148_v62  ;;  %v15087_v10 = vor.u32 %v18580_v19, %v15084_v1  ;;  %v15252_v0 = vld [vmem:[%s19566_s7 + $0x1940] sm:$0xf0]  ;;  %v21705_v62 = vpop.f32.mrf.mxu0  ;;  %v14844_v19 = vld [vmem:[%s19566_s7 + $0x1610] sm:$0xf0] }
 0x369   : > { %10490 = vmatpush.bf16.msrb.mxu0 %v13983_v51  ;;  %v14895_v51 = vor.u32 %v18532_v53, %v14892_v50  ;;  %23629 = vst [vmem:[#allocation92_spill] sm:$0xff] %v21705_v62  ;;  %v18520_v50 = vld [vmem:[%s19566_s7 + $0x15fc] sm:$0xf]  ;;  %v15420_v7 = vld [vmem:[%s19566_s7 + $0x1a90] sm:$0xf0] }
 0x36a   : > { %10504 = vmatpush.bf16.msrb.mxu1 %v14175_v27  ;;  %v15471_v27 = vor.u32 %v18676_v31, %v15468_v3  ;;  %v14847_v55 = vor.u32 %v18520_v50, %v14844_v19  ;;  %v18514_v31 = vld [vmem:[%s19566_s7 + $0x15cc] sm:$0xf]  ;;  %v14820_v3 = vld [vmem:[%s19566_s7 + $0x15e0] sm:$0xf0] }
 0x36b   : > { %10518 = vmatpush.bf16.msrb.mxu2 %v14367_v38  ;;  %v18622_v38 = vld [vmem:[%s19566_s7 + $0x192c] sm:$0xf]  ;;  %v15828_v62 = vld [vmem:[%s19566_s7 + $0x1dc0] sm:$0xf0] }
 0x36c   : > { %10532 = vmatpush.bf16.msrb.mxu3 %v14559_v63  ;;  %v15444_v63 = vld [vmem:[%s19566_s7 + $0x1ac0] sm:$0xf0]  ;;  %v15255_v53 = vor.u32 %v18622_v38, %v15252_v0  ;;  %v21731_v0 = vpop.f32.mrf.mxu3 }
 0x36d   : > { %10491 = vmatpush.bf16.msrb.mxu0 %v13959_v12  ;;  %v18568_v12 = vld [vmem:[%s19566_s7 + $0x177c] sm:$0xf]  ;;  %v15447_v1 = vor.u32 %v18670_v35, %v15444_v63  ;;  %v15204_v38 = vld [vmem:[%s19566_s7 + $0x18e0] sm:$0xf0]  ;;  %23632 = vst [vmem:[#allocation95_spill] sm:$0xff] %v21731_v0 }
 0x36e   : > { %10505 = vmatpush.bf16.msrb.mxu1 %v14151_v43  ;;  %v15228_v43 = vld [vmem:[%s19566_s7 + $0x1910] sm:$0xf0]  ;;  %v15039_v17 = vor.u32 %v18568_v12, %v15036_v6  ;;  %v18658_v63 = vld [vmem:[%s19566_s7 + $0x1a4c] sm:$0xf]  ;;  %v10283_v50 = vpop.f32.mrf.mxu1 }
 0x36f   : > { %10519 = vmatpush.bf16.msrb.mxu2 %v14343_v9  ;;  %v15231_v9 = vor.u32 %v18616_v4, %v15228_v43  ;;  %v14796_v6 = vld [vmem:[%s19566_s7 + $0x15b0] sm:$0xf0]  ;;  %v18556_v4 = vld [vmem:[%s19566_s7 + $0x171c] sm:$0xf]  ;;  %v18718_v0 = vld [vmem:[%s19566_s7 + $0x1c2c] sm:$0xf] }
 0x370   : > { %10533 = vmatpush.bf16.msrb.mxu3 %v14535_v28  ;;  %10492 = vmatmul.bf16.vlgmr.msrb.gmra.mxu0 %v19840_v36  ;;  %v18562_v28 = vld [vmem:[%s19566_s7 + $0x174c] sm:$0xf]  ;;  %v10269_v35 = vpop.f32.mrf.mxu0 }
 0x371   : > { %10540 = vmatpush.bf16.msra.mxu0 %v14895_v51  ;;  %10506 = vmatmul.bf16.vlgmr.msrb.gmra.mxu1 %v19846_v41  ;;  %v21726_v51 = vpop.f32.mrf.mxu2 }
 0x372   : > { %10554 = vmatpush.bf16.msra.mxu1 %v15087_v10  ;;  %10520 = vmatmul.bf16.vlgmr.msrb.gmra.mxu2 %v19919_v33  ;;  %23631 = vst [vmem:[#allocation94_spill] sm:$0xff] %v21726_v51  ;;  %v15423_v10 = vor.u32 %v18664_v5, %v15420_v7  ;;  %v14988_v7 = vld [vmem:[%s19566_s7 + $0x1730] sm:$0xf0]  ;;  %v15636_v51 = vld [vmem:[%s19566_s7 + $0x1c40] sm:$0xf0] }
 0x373   : > { %10568 = vmatpush.bf16.msra.mxu2 %v15279_v23  ;;  %10534 = vmatmul.bf16.vlgmr.msrb.gmra.mxu3 %v19926_v42  ;;  %v15012_v23 = vld [vmem:[%s19566_s7 + $0x1760] sm:$0xf0] }
 0x374   : > { %10582 = vmatpush.bf16.msra.mxu3 %v15471_v27  ;;  %v18610_v27 = vld [vmem:[%s19566_s7 + $0x18cc] sm:$0xf]  ;;  %v15015_v19 = vor.u32 %v18562_v28, %v15012_v23  ;;  %v14772_v23 = vld [vmem:[%s19566_s7 + $0x1580] sm:$0xf0] }
 0x375   : > { %10541 = vmatpush.bf16.msra.mxu0 %v14871_v15  ;;  %v15396_v15 = vld [vmem:[%s19566_s7 + $0x1a60] sm:$0xf0]  ;;  %v15207_v12 = vor.u32 %v18610_v27, %v15204_v38  ;;  %v18550_v27 = vld [vmem:[%s19566_s7 + $0x16ec] sm:$0xf] }
 0x376   : > { %10555 = vmatpush.bf16.msra.mxu1 %v15063_v13  ;;  %v10270_v13 = vadd.f32 %v10269_v35, %v21673_v8  ;;  %v15399_v43 = vor.u32 %v18658_v63, %v15396_v15  ;;  %v15180_v8 = vld [vmem:[%s19566_s7 + $0x18b0] sm:$0xf0]  ;;  %v14964_v63 = vld [vmem:[%s19566_s7 + $0x1700] sm:$0xf0]  ;;  %v18598_v15 = vld [vmem:[%s19566_s7 + $0x186c] sm:$0xf] }
 0x377   : > { %10569 = vmatpush.bf16.msra.mxu2 %v15255_v53  ;;  %v14823_v53 = vor.u32 %v18514_v31, %v14820_v3  ;;  %v18652_v31 = vld [vmem:[%s19566_s7 + $0x1a1c] sm:$0xf]  ;;  %v14991_v3 = vor.u32 %v18556_v4, %v14988_v7  ;;  %v14967_v4 = vor.u32 %v18550_v27, %v14964_v63  ;;  %v14724_v27 = vld [vmem:[%s19566_s7 + $0x1520] sm:$0xf0]  ;;  %v18538_v63 = vld [vmem:[%s19566_s7 + $0x168c] sm:$0xf] }
 0x378   : > { %10583 = vmatpush.bf16.msra.mxu3 %v15447_v1  ;;  %v18508_v1 = vld [vmem:[%s19566_s7 + $0x159c] sm:$0xf]  ;;  %v10284_v5 = vadd.f32 %v10283_v50, %v10270_v13  ;;  %v15156_v13 = vld [vmem:[%s19566_s7 + $0x1880] sm:$0xf0]  ;;  %v10311_v50 = vpop.f32.mrf.mxu3 }
 0x379   : > { %10542 = vmatpush.bf16.msra.mxu0 %v14847_v55  ;;  %v18604_v55 = vld [vmem:[%s19566_s7 + $0x189c] sm:$0xf]  ;;  %v10297_v35 = vpop.f32.mrf.mxu2 }
 0x37a   : > { %10556 = vmatpush.bf16.msra.mxu1 %v15039_v17  ;;  %v15372_v17 = vld [vmem:[%s19566_s7 + $0x1a30] sm:$0xf0]  ;;  %v15183_v28 = vor.u32 %v18604_v55, %v15180_v8  ;;  %v18496_v7 = vld [vmem:[%s19566_s7 + $0x153c] sm:$0xf] }
 0x37b   : > { %10570 = vmatpush.bf16.msra.mxu2 %v15231_v9  ;;  %v14799_v9 = vor.u32 %v18508_v1, %v14796_v6  ;;  %v15375_v38 = vor.u32 %v18652_v31, %v15372_v17  ;;  %v18544_v55 = vld [vmem:[%s19566_s7 + $0x16bc] sm:$0xf]  ;;  %v14940_v31 = vld [vmem:[%s19566_s7 + $0x16d0] sm:$0xf0] }
 0x37c   : > { %10584 = vmatpush.bf16.msra.mxu3 %v15423_v10  ;;  %v18502_v10 = vld [vmem:[%s19566_s7 + $0x156c] sm:$0xf]  ;;  %v18592_v17 = vld [vmem:[%s19566_s7 + $0x183c] sm:$0xf] }
 0x37d   : > { %10543 = vmatpush.bf16.msra.mxu0 %v14823_v53  ;;  %v10298_v53 = vadd.f32 %v10297_v35, %v10284_v5  ;;  %v14775_v1 = vor.u32 %v18502_v10, %v14772_v23  ;;  %v14748_v5 = vld [vmem:[%s19566_s7 + $0x1550] sm:$0xf0]  ;;  %v18490_v23 = vld [vmem:[%s19566_s7 + $0x150c] sm:$0xf] }
 0x37e   : > { %10557 = vmatpush.bf16.msra.mxu1 %v15015_v19  ;;  %v18646_v19 = vld [vmem:[%s19566_s7 + $0x19ec] sm:$0xf]  ;;  %v14751_v10 = vor.u32 %v18496_v7, %v14748_v5  ;;  %v15660_v7 = vld [vmem:[%s19566_s7 + $0x1c70] sm:$0xf0]  ;;  %v18772_v5 = vld [vmem:[%s19566_s7 + $0x1ddc] sm:$0xf] }
 0x37f   : > { %10571 = vmatpush.bf16.msra.mxu2 %v15207_v12  ;;  %v15348_v12 = vld [vmem:[%s19566_s7 + $0x1a00] sm:$0xf0]  ;;  %v21752_v6 = vadd.f32 %v10311_v50, %v10298_v53 }
 0x380   : > { %10585 = vmatpush.bf16.msra.mxu3 %v15399_v43  ;;  %v15159_v43 = vor.u32 %v18598_v15, %v15156_v13  ;;  %v15351_v8 = vor.u32 %v18646_v19, %v15348_v12  ;;  %v14916_v15 = vld [vmem:[%s19566_s7 + $0x16a0] sm:$0xf0]  ;;  %v18586_v13 = vld [vmem:[%s19566_s7 + $0x180c] sm:$0xf] }
 0x381   : > { %10544 = vmatpush.bf16.msra.mxu0 %v14799_v9  ;;  %v15132_v9 = vld [vmem:[%s19566_s7 + $0x1850] sm:$0xf0]  ;;  %v15108_v50 = vld [vmem:[%s19566_s7 + $0x1820] sm:$0xf0]  ;;  %v18634_v19 = vld [vmem:[%s19566_s7 + $0x198c] sm:$0xf] }
 0x382   : > { %10558 = vmatpush.bf16.msra.mxu1 %v14991_v3  ;;  %v18640_v3 = vld [vmem:[%s19566_s7 + $0x19bc] sm:$0xf]  ;;  %v15135_v35 = vor.u32 %v18592_v17, %v15132_v9  ;;  %v15300_v12 = vld [vmem:[%s19566_s7 + $0x19a0] sm:$0xf0]  ;;  %v15111_v17 = vor.u32 %v18586_v13, %v15108_v50  ;;  %v18862_v13 = vld [vmem:[%s19566_s7 + $0x20ac] sm:$0xf]  ;;  %v21788_v50 = vpop.f32.mrf.mxu1 }
 0x383   : > { %10572 = vmatpush.bf16.msra.mxu2 %v15183_v28  ;;  %v15324_v28 = vld [vmem:[%s19566_s7 + $0x19d0] sm:$0xf0]  ;;  %v18868_v9 = vld [vmem:[%s19566_s7 + $0x20dc] sm:$0xf]  ;;  %23634 = vst [vmem:[#allocation97_spill] sm:$0xff] %v21788_v50 }
 0x384   : > { %10586 = vmatpush.bf16.msra.mxu3 %v15375_v38  ;;  %v14943_v38 = vor.u32 %v18544_v55, %v14940_v31  ;;  %v15327_v53 = vor.u32 %v18640_v3, %v15324_v28  ;;  %v18820_v55 = vld [vmem:[%s19566_s7 + $0x1f5c] sm:$0xf]  ;;  %v16044_v31 = vld [vmem:[%s19566_s7 + $0x1f70] sm:$0xf0]  ;;  %v15303_v28 = vor.u32 %v18634_v19, %v15300_v12  ;;  %v15639_v19 = vor.u32 %v18718_v0, %v15636_v51  ;;  %v18958_v50 = vld [vmem:[%s19566_s7 + $0x23ac] sm:$0xf] }
 0x385   : > { %10545 = vmatpush.bf16.msra.mxu0 %v14775_v1  ;;  %v18724_v1 = vld [vmem:[%s19566_s7 + $0x1c5c] sm:$0xf]  ;;  %v16236_v3 = vld [vmem:[%s19566_s7 + $0x20f0] sm:$0xf0]  ;;  %v15831_v12 = vor.u32 %v18766_v16, %v15828_v62 }
 0x386   : > { %10559 = vmatpush.bf16.msra.mxu1 %v14967_v4  ;;  %v14727_v4 = vor.u32 %v18490_v23, %v14724_v27  ;;  %v16047_v27 = vor.u32 %v18820_v55, %v16044_v31  ;;  %v15804_v55 = vld [vmem:[%s19566_s7 + $0x1d90] sm:$0xf0]  ;;  %v18808_v31 = vld [vmem:[%s19566_s7 + $0x1efc] sm:$0xf] }
 0x387   : > { %10573 = vmatpush.bf16.msra.mxu2 %v15159_v43  ;;  %v15852_v43 = vld [vmem:[%s19566_s7 + $0x1df0] sm:$0xf0]  ;;  %v18856_v62 = vld [vmem:[%s19566_s7 + $0x207c] sm:$0xf] }
 0x388   : > { %10587 = vmatpush.bf16.msra.mxu3 %v15351_v8  ;;  %v14919_v8 = vor.u32 %v18538_v63, %v14916_v15  ;;  %v15855_v23 = vor.u32 %v18772_v5, %v15852_v43  ;;  %v16020_v63 = vld [vmem:[%s19566_s7 + $0x1f40] sm:$0xf0]  ;;  %v21784_v15 = vpop.f32.mrf.mxu0  ;;  %v15612_v5 = vld [vmem:[%s19566_s7 + $0x1c10] sm:$0xf0] }
 0x389   : > { %10546 = vmatpush.bf16.msra.mxu0 %v14751_v10  ;;  %v15663_v10 = vor.u32 %v18724_v1, %v15660_v7  ;;  %23633 = vst [vmem:[#allocation96_spill] sm:$0xff] %v21784_v15  ;;  %v18712_v7 = vld [vmem:[%s19566_s7 + $0x1bfc] sm:$0xf]  ;;  %v16188_v16 = vld [vmem:[%s19566_s7 + $0x2090] sm:$0xf0] }
 0x38a   : > { %10560 = vmatpush.bf16.msra.mxu1 %v14943_v38  ;;  %v16239_v38 = vor.u32 %v18868_v9, %v16236_v3  ;;  %v15615_v51 = vor.u32 %v18712_v7, %v15612_v5  ;;  %v18706_v9 = vld [vmem:[%s19566_s7 + $0x1bcc] sm:$0xf]  ;;  %v15588_v3 = vld [vmem:[%s19566_s7 + $0x1be0] sm:$0xf0] }
 0x38b   : > { %10574 = vmatpush.bf16.msra.mxu2 %v15135_v35  ;;  %v18814_v35 = vld [vmem:[%s19566_s7 + $0x1f2c] sm:$0xf]  ;;  %v16596_v15 = vld [vmem:[%s19566_s7 + $0x23c0] sm:$0xf0] }
 0x38c   : > { %10588 = vmatpush.bf16.msra.mxu3 %v15327_v53  ;;  %v16212_v53 = vld [vmem:[%s19566_s7 + $0x20c0] sm:$0xf0]  ;;  %v16023_v1 = vor.u32 %v18814_v35, %v16020_v63  ;;  %v21810_v63 = vpop.f32.mrf.mxu3 }
 0x38d   : > { %10547 = vmatpush.bf16.msra.mxu0 %v14727_v4  ;;  %v18760_v4 = vld [vmem:[%s19566_s7 + $0x1d7c] sm:$0xf]  ;;  %v16215_v43 = vor.u32 %v18862_v13, %v16212_v53  ;;  %v15972_v35 = vld [vmem:[%s19566_s7 + $0x1ee0] sm:$0xf0]  ;;  %23636 = vst [vmem:[#allocation99_spill] sm:$0xff] %v21810_v63 }
 0x38e   : > { %10561 = vmatpush.bf16.msra.mxu1 %v14919_v8  ;;  %v15996_v8 = vld [vmem:[%s19566_s7 + $0x1f10] sm:$0xf0]  ;;  %v15807_v0 = vor.u32 %v18760_v4, %v15804_v55  ;;  %v18850_v53 = vld [vmem:[%s19566_s7 + $0x204c] sm:$0xf]  ;;  %v10339_v7 = vpop.f32.mrf.mxu1 }
 0x38f   : > { %10575 = vmatpush.bf16.msra.mxu2 %v15111_v17  ;;  %v15999_v17 = vor.u32 %v18808_v31, %v15996_v8  ;;  %v15564_v55 = vld [vmem:[%s19566_s7 + $0x1bb0] sm:$0xf0]  ;;  %v18748_v31 = vld [vmem:[%s19566_s7 + $0x1d1c] sm:$0xf]  ;;  %v18910_v63 = vld [vmem:[%s19566_s7 + $0x222c] sm:$0xf] }
 0x390   : > { %10589 = vmatpush.bf16.msra.mxu3 %v15303_v28  ;;  %10548 = vmatmul.bf16.vlgmr.msra.gmra.mxu0 %v19924_v39  ;;  %v18754_v28 = vld [vmem:[%s19566_s7 + $0x1d4c] sm:$0xf]  ;;  %v10325_v13 = vpop.f32.mrf.mxu0 }
 0x391   : > { %10596 = vmatpush.bf16.msrb.mxu0 %v15663_v10  ;;  %10562 = vmatmul.bf16.vlgmr.msra.gmra.mxu1 %v19930_v47  ;;  %v21805_v10 = vpop.f32.mrf.mxu2 }
 0x392   : > { %10610 = vmatpush.bf16.msrb.mxu1 %v15855_v23  ;;  %10576 = vmatmul.bf16.vlgmr.msra.gmra.mxu2 %v20003_v52  ;;  %23635 = vst [vmem:[#allocation98_spill] sm:$0xff] %v21805_v10  ;;  %v16191_v23 = vor.u32 %v18856_v62, %v16188_v16  ;;  %v15756_v16 = vld [vmem:[%s19566_s7 + $0x1d30] sm:$0xf0]  ;;  %v16404_v10 = vld [vmem:[%s19566_s7 + $0x2240] sm:$0xf0] }
 0x393   : > { %10624 = vmatpush.bf16.msrb.mxu2 %v16047_v27  ;;  %10590 = vmatmul.bf16.vlgmr.msra.gmra.mxu3 %v20010_v57  ;;  %v15780_v27 = vld [vmem:[%s19566_s7 + $0x1d60] sm:$0xf0] }
 0x394   : > { %10638 = vmatpush.bf16.msrb.mxu3 %v16239_v38  ;;  %v18802_v38 = vld [vmem:[%s19566_s7 + $0x1ecc] sm:$0xf]  ;;  %v15783_v5 = vor.u32 %v18754_v28, %v15780_v27  ;;  %v15540_v27 = vld [vmem:[%s19566_s7 + $0x1b80] sm:$0xf0] }
 0x395   : > { %10597 = vmatpush.bf16.msrb.mxu0 %v15639_v19  ;;  %v16164_v19 = vld [vmem:[%s19566_s7 + $0x2060] sm:$0xf0]  ;;  %v15975_v4 = vor.u32 %v18802_v38, %v15972_v35  ;;  %v18742_v38 = vld [vmem:[%s19566_s7 + $0x1cec] sm:$0xf] }
 0x396   : > { %10611 = vmatpush.bf16.msrb.mxu1 %v15831_v12  ;;  %v10326_v12 = vadd.f32 %v10325_v13, %v21752_v6  ;;  %v16167_v8 = vor.u32 %v18850_v53, %v16164_v19  ;;  %v18796_v6 = vld [vmem:[%s19566_s7 + $0x1e9c] sm:$0xf]  ;;  %v15732_v13 = vld [vmem:[%s19566_s7 + $0x1d00] sm:$0xf0]  ;;  %v18790_v53 = vld [vmem:[%s19566_s7 + $0x1e6c] sm:$0xf] }
 0x397   : > { %10625 = vmatpush.bf16.msrb.mxu2 %v16023_v1  ;;  %v15591_v1 = vor.u32 %v18706_v9, %v15588_v3  ;;  %v15759_v3 = vor.u32 %v18748_v31, %v15756_v16  ;;  %v15924_v19 = vld [vmem:[%s19566_s7 + $0x1e80] sm:$0xf0]  ;;  %v15516_v16 = vld [vmem:[%s19566_s7 + $0x1b50] sm:$0xf0] }
 0x398   : > { %10639 = vmatpush.bf16.msrb.mxu3 %v16215_v43  ;;  %v18700_v43 = vld [vmem:[%s19566_s7 + $0x1b9c] sm:$0xf]  ;;  %v21818_v62 = vadd.f32 %v10339_v7, %v10326_v12  ;;  %v18838_v12 = vld [vmem:[%s19566_s7 + $0x1fec] sm:$0xf]  ;;  %v16116_v7 = vld [vmem:[%s19566_s7 + $0x2000] sm:$0xf0]  ;;  %v15927_v31 = vor.u32 %v18790_v53, %v15924_v19 }
 0x399   : > { %10598 = vmatpush.bf16.msrb.mxu0 %v15615_v51  ;;  %v15948_v51 = vld [vmem:[%s19566_s7 + $0x1eb0] sm:$0xf0]  ;;  %v15567_v9 = vor.u32 %v18700_v43, %v15564_v55  ;;  %v15735_v55 = vor.u32 %v18742_v38, %v15732_v13  ;;  %v15492_v38 = vld [vmem:[%s19566_s7 + $0x1b20] sm:$0xf0]  ;;  %v18730_v53 = vld [vmem:[%s19566_s7 + $0x1c8c] sm:$0xf] }
 0x39a   : > { %10612 = vmatpush.bf16.msrb.mxu1 %v15807_v0  ;;  %23637 = vst [vmem:[#allocation100_spill] sm:$0xff] %v21818_v62  ;;  %v18844_v0 = vld [vmem:[%s19566_s7 + $0x201c] sm:$0xf]  ;;  %v15951_v28 = vor.u32 %v18796_v6, %v15948_v51  ;;  %v16119_v51 = vor.u32 %v18838_v12, %v16116_v7  ;;  %v15684_v19 = vld [vmem:[%s19566_s7 + $0x1ca0] sm:$0xf0] }
 0x39b   : > { %10626 = vmatpush.bf16.msrb.mxu2 %v15999_v17  ;;  %v16140_v17 = vld [vmem:[%s19566_s7 + $0x2030] sm:$0xf0]  ;;  %v18736_v6 = vld [vmem:[%s19566_s7 + $0x1cbc] sm:$0xf]  ;;  %v18778_v12 = vld [vmem:[%s19566_s7 + $0x1e0c] sm:$0xf] }
 0x39c   : > { %10640 = vmatpush.bf16.msrb.mxu3 %v16191_v23  ;;  %v18694_v23 = vld [vmem:[%s19566_s7 + $0x1b6c] sm:$0xf]  ;;  %v16143_v35 = vor.u32 %v18844_v0, %v16140_v17  ;;  %v15708_v0 = vld [vmem:[%s19566_s7 + $0x1cd0] sm:$0xf0]  ;;  %v18784_v17 = vld [vmem:[%s19566_s7 + $0x1e3c] sm:$0xf] }
 0x39d   : > { %10599 = vmatpush.bf16.msrb.mxu0 %v15591_v1  ;;  %v10353_v1 = vpop.f32.mrf.mxu2  ;;  %v18964_v62 = vld [vmem:[%s19566_s7 + $0x23dc] sm:$0xf] }
 0x39e   : > { %10613 = vmatpush.bf16.msrb.mxu1 %v15783_v5  ;;  %v10367_v5 = vpop.f32.mrf.mxu3 }
 0x39f   : > { %10627 = vmatpush.bf16.msrb.mxu2 %v15975_v4  ;;  %v15543_v4 = vor.u32 %v18694_v23, %v15540_v27  ;;  %v21833_v43 = vadd.f32 %v10367_v5, %v10353_v1  ;;  %v18832_v23 = vld [vmem:[%s19566_s7 + $0x1fbc] sm:$0xf]  ;;  %v18682_v27 = vld [vmem:[%s19566_s7 + $0x1b0c] sm:$0xf]  ;;  %v15876_v1 = vld [vmem:[%s19566_s7 + $0x1e20] sm:$0xf0] }
 0x3a0   : > { %10641 = vmatpush.bf16.msrb.mxu3 %v16167_v8  ;;  %v18688_v8 = vld [vmem:[%s19566_s7 + $0x1b3c] sm:$0xf]  ;;  %v18826_v5 = vld [vmem:[%s19566_s7 + $0x1f8c] sm:$0xf] }
 0x3a1   : > { %10600 = vmatpush.bf16.msrb.mxu0 %v15567_v9  ;;  %v15900_v9 = vld [vmem:[%s19566_s7 + $0x1e50] sm:$0xf0] }
 0x3a2   : > { %10614 = vmatpush.bf16.msrb.mxu1 %v15759_v3  ;;  %v16092_v3 = vld [vmem:[%s19566_s7 + $0x1fd0] sm:$0xf0]  ;;  %v15903_v13 = vor.u32 %v18784_v17, %v15900_v9  ;;  %v15879_v17 = vor.u32 %v18778_v12, %v15876_v1  ;;  %v19060_v9 = vld [vmem:[%s19566_s7 + $0x26dc] sm:$0xf]  ;;  %v19054_v12 = vld [vmem:[%s19566_s7 + $0x26ac] sm:$0xf]  ;;  %v21869_v1 = vpop.f32.mrf.mxu1 }
 0x3a3   : > { %10628 = vmatpush.bf16.msrb.mxu2 %v15951_v28  ;;  %v15519_v28 = vor.u32 %v18688_v8, %v15516_v16  ;;  %v16095_v7 = vor.u32 %v18832_v23, %v16092_v3  ;;  %v18916_v8 = vld [vmem:[%s19566_s7 + $0x225c] sm:$0xf]  ;;  %v16428_v16 = vld [vmem:[%s19566_s7 + $0x2270] sm:$0xf0]  ;;  %23639 = vst [vmem:[#allocation102_spill] sm:$0xff] %v21869_v1 }
 0x3a4   : > { %10642 = vmatpush.bf16.msrb.mxu3 %v16143_v35  ;;  %v15711_v35 = vor.u32 %v18736_v6, %v15708_v0  ;;  %v19012_v6 = vld [vmem:[%s19566_s7 + $0x255c] sm:$0xf]  ;;  %v16812_v0 = vld [vmem:[%s19566_s7 + $0x2570] sm:$0xf0]  ;;  %v19102_v1 = vld [vmem:[%s19566_s7 + $0x282c] sm:$0xf] }
 0x3a5   : > { %10601 = vmatpush.bf16.msrb.mxu0 %v15543_v4  ;;  %v16068_v4 = vld [vmem:[%s19566_s7 + $0x1fa0] sm:$0xf0]  ;;  %v17004_v23 = vld [vmem:[%s19566_s7 + $0x26f0] sm:$0xf0] }
 0x3a6   : > { %10615 = vmatpush.bf16.msrb.mxu1 %v15735_v55  ;;  %v15495_v55 = vor.u32 %v18682_v27, %v15492_v38  ;;  %v16071_v3 = vor.u32 %v18826_v5, %v16068_v4  ;;  %v16815_v38 = vor.u32 %v19012_v6, %v16812_v0  ;;  %v16599_v5 = vor.u32 %v18958_v50, %v16596_v15  ;;  %v16572_v6 = vld [vmem:[%s19566_s7 + $0x2390] sm:$0xf0]  ;;  %v19000_v0 = vld [vmem:[%s19566_s7 + $0x24fc] sm:$0xf] }
 0x3a7   : > { %10629 = vmatpush.bf16.msrb.mxu2 %v15927_v31  ;;  %v16620_v31 = vld [vmem:[%s19566_s7 + $0x23f0] sm:$0xf0] }
 0x3a8   : > { %10643 = vmatpush.bf16.msrb.mxu3 %v16119_v51  ;;  %v15687_v51 = vor.u32 %v18730_v53, %v15684_v19  ;;  %v16623_v27 = vor.u32 %v18964_v62, %v16620_v31  ;;  %v16788_v53 = vld [vmem:[%s19566_s7 + $0x2540] sm:$0xf0]  ;;  %v21865_v19 = vpop.f32.mrf.mxu0  ;;  %v16407_v62 = vor.u32 %v18910_v63, %v16404_v10  ;;  %v16764_v10 = vld [vmem:[%s19566_s7 + $0x2510] sm:$0xf0]  ;;  %v19048_v63 = vld [vmem:[%s19566_s7 + $0x267c] sm:$0xf] }
 0x3a9   : > { %10602 = vmatpush.bf16.msrb.mxu0 %v15519_v28  ;;  %v16431_v28 = vor.u32 %v18916_v8, %v16428_v16  ;;  %23638 = vst [vmem:[#allocation101_spill] sm:$0xff] %v21865_v19  ;;  %v18904_v8 = vld [vmem:[%s19566_s7 + $0x21fc] sm:$0xf]  ;;  %v16380_v16 = vld [vmem:[%s19566_s7 + $0x2210] sm:$0xf0] }
 0x3aa   : > { %10616 = vmatpush.bf16.msrb.mxu1 %v15711_v35  ;;  %v17007_v35 = vor.u32 %v19060_v9, %v17004_v23  ;;  %v16956_v15 = vld [vmem:[%s19566_s7 + $0x2690] sm:$0xf0]  ;;  %v16383_v50 = vor.u32 %v18904_v8, %v16380_v16  ;;  %v16767_v9 = vor.u32 %v19000_v0, %v16764_v10  ;;  %v18898_v23 = vld [vmem:[%s19566_s7 + $0x21cc] sm:$0xf]  ;;  %v18940_v0 = vld [vmem:[%s19566_s7 + $0x231c] sm:$0xf] }
 0x3ab   : > { %10630 = vmatpush.bf16.msrb.mxu2 %v15903_v13  ;;  %v19006_v13 = vld [vmem:[%s19566_s7 + $0x252c] sm:$0xf]  ;;  %v17172_v19 = vld [vmem:[%s19566_s7 + $0x2840] sm:$0xf0] }
 0x3ac   : > { %10644 = vmatpush.bf16.msrb.mxu3 %v16095_v7  ;;  %v16980_v7 = vld [vmem:[%s19566_s7 + $0x26c0] sm:$0xf0]  ;;  %v16791_v4 = vor.u32 %v19006_v13, %v16788_v53  ;;  %v18994_v13 = vld [vmem:[%s19566_s7 + $0x24cc] sm:$0xf] }
 0x3ad   : > { %10603 = vmatpush.bf16.msrb.mxu0 %v15495_v55  ;;  %v18952_v55 = vld [vmem:[%s19566_s7 + $0x237c] sm:$0xf]  ;;  %v16983_v31 = vor.u32 %v19054_v12, %v16980_v7  ;;  %v16740_v53 = vld [vmem:[%s19566_s7 + $0x24e0] sm:$0xf0]  ;;  %v19042_v7 = vld [vmem:[%s19566_s7 + $0x264c] sm:$0xf] }
 0x3ae   : > { %10617 = vmatpush.bf16.msrb.mxu1 %v15687_v51  ;;  %v21883_v51 = vpop.f32.mrf.mxu2  ;;  %v16743_v16 = vor.u32 %v18994_v13, %v16740_v53  ;;  %v18934_v13 = vld [vmem:[%s19566_s7 + $0x22ec] sm:$0xf] }
 0x3af   : > { %10631 = vmatpush.bf16.msrb.mxu2 %v15879_v17  ;;  %v16575_v17 = vor.u32 %v18952_v55, %v16572_v6  ;;  %v10395_v55 = vpop.f32.mrf.mxu1  ;;  %v16332_v6 = vld [vmem:[%s19566_s7 + $0x21b0] sm:$0xf0] }
 0x3b0   : > { %10645 = vmatpush.bf16.msrb.mxu3 %v16071_v3  ;;  %10604 = vmatmul.bf16.vlgmr.msrb.gmra.mxu0 %v20008_v56  ;;  %v16356_v3 = vld [vmem:[%s19566_s7 + $0x21e0] sm:$0xf0]  ;;  %v10381_v12 = vpop.f32.mrf.mxu0 }
 0x3b1   : > { %10652 = vmatpush.bf16.msra.mxu0 %v16431_v28  ;;  %10618 = vmatmul.bf16.vlgmr.msrb.gmra.mxu1 %v20014_v61  ;;  %v18946_v28 = vld [vmem:[%s19566_s7 + $0x234c] sm:$0xf] }
 0x3b2   : > { %10666 = vmatpush.bf16.msra.mxu1 %v16623_v27  ;;  %10632 = vmatmul.bf16.vlgmr.msrb.gmra.mxu2 %v20091_v20  ;;  %v16959_v27 = vor.u32 %v19048_v63, %v16956_v15  ;;  %v16524_v15 = vld [vmem:[%s19566_s7 + $0x2330] sm:$0xf0] }
 0x3b3   : > { %10680 = vmatpush.bf16.msra.mxu2 %v16815_v38  ;;  %10646 = vmatmul.bf16.vlgmr.msrb.gmra.mxu3 %v20098_v26  ;;  %v21888_v38 = vpop.f32.mrf.mxu3 }
 0x3b4   : > { %10694 = vmatpush.bf16.msra.mxu3 %v17007_v35  ;;  %23640 = vst [vmem:[#allocation103_spill] sm:$0xff] %v21888_v38  ;;  %v16548_v35 = vld [vmem:[%s19566_s7 + $0x2360] sm:$0xf0] }
 0x3b5   : > { %10653 = vmatpush.bf16.msra.mxu0 %v16407_v62  ;;  %v16932_v62 = vld [vmem:[%s19566_s7 + $0x2660] sm:$0xf0]  ;;  %v16551_v8 = vor.u32 %v18946_v28, %v16548_v35 }
 0x3b6   : > { %10667 = vmatpush.bf16.msra.mxu1 %v16599_v5  ;;  %v10382_v5 = vadd.f32 %v10381_v12, %v21833_v43  ;;  %v16935_v10 = vor.u32 %v19042_v7, %v16932_v62  ;;  %v16716_v43 = vld [vmem:[%s19566_s7 + $0x24b0] sm:$0xf0]  ;;  %v16308_v35 = vld [vmem:[%s19566_s7 + $0x2180] sm:$0xf0]  ;;  %v10409_v12 = vpop.f32.mrf.mxu2  ;;  %v18982_v62 = vld [vmem:[%s19566_s7 + $0x246c] sm:$0xf] }
 0x3b7   : > { %10681 = vmatpush.bf16.msra.mxu2 %v16791_v4  ;;  %v16359_v4 = vor.u32 %v18898_v23, %v16356_v3  ;;  %v19036_v23 = vld [vmem:[%s19566_s7 + $0x261c] sm:$0xf]  ;;  %v16527_v3 = vor.u32 %v18940_v0, %v16524_v15  ;;  %v16500_v7 = vld [vmem:[%s19566_s7 + $0x2300] sm:$0xf0] }
 0x3b8   : > { %10695 = vmatpush.bf16.msra.mxu3 %v16983_v31  ;;  %v18892_v31 = vld [vmem:[%s19566_s7 + $0x219c] sm:$0xf]  ;;  %v10396_v63 = vadd.f32 %v10395_v55, %v10382_v5  ;;  %v16692_v5 = vld [vmem:[%s19566_s7 + $0x2480] sm:$0xf0]  ;;  %v19030_v55 = vld [vmem:[%s19566_s7 + $0x25ec] sm:$0xf]  ;;  %v16503_v0 = vor.u32 %v18934_v13, %v16500_v7 }
 0x3b9   : > { %10654 = vmatpush.bf16.msra.mxu0 %v16383_v50  ;;  %v18988_v50 = vld [vmem:[%s19566_s7 + $0x249c] sm:$0xf]  ;;  %v16260_v13 = vld [vmem:[%s19566_s7 + $0x2120] sm:$0xf0]  ;;  %v18922_v7 = vld [vmem:[%s19566_s7 + $0x228c] sm:$0xf] }
 0x3ba   : > { %10668 = vmatpush.bf16.msra.mxu1 %v16575_v17  ;;  %v16908_v17 = vld [vmem:[%s19566_s7 + $0x2630] sm:$0xf0]  ;;  %v16719_v28 = vor.u32 %v18988_v50, %v16716_v43  ;;  %v18880_v15 = vld [vmem:[%s19566_s7 + $0x213c] sm:$0xf]  ;;  %v17364_v38 = vld [vmem:[%s19566_s7 + $0x29c0] sm:$0xf0] }
 0x3bb   : > { %10682 = vmatpush.bf16.msra.mxu2 %v16767_v9  ;;  %v16335_v9 = vor.u32 %v18892_v31, %v16332_v6  ;;  %v16911_v53 = vor.u32 %v19036_v23, %v16908_v17  ;;  %v18928_v50 = vld [vmem:[%s19566_s7 + $0x22bc] sm:$0xf]  ;;  %v16476_v23 = vld [vmem:[%s19566_s7 + $0x22d0] sm:$0xf0] }
 0x3bc   : > { %10696 = vmatpush.bf16.msra.mxu3 %v16959_v27  ;;  %v18886_v27 = vld [vmem:[%s19566_s7 + $0x216c] sm:$0xf]  ;;  %v18976_v17 = vld [vmem:[%s19566_s7 + $0x243c] sm:$0xf] }
 0x3bd   : > { %10655 = vmatpush.bf16.msra.mxu0 %v16359_v4  ;;  %v10410_v4 = vadd.f32 %v10409_v12, %v10396_v63  ;;  %v16311_v31 = vor.u32 %v18886_v27, %v16308_v35  ;;  %v16284_v63 = vld [vmem:[%s19566_s7 + $0x2150] sm:$0xf0]  ;;  %v18874_v35 = vld [vmem:[%s19566_s7 + $0x210c] sm:$0xf] }
 0x3be   : > { %10669 = vmatpush.bf16.msra.mxu1 %v16551_v8  ;;  %v16884_v8 = vld [vmem:[%s19566_s7 + $0x2600] sm:$0xf0]  ;;  %v16287_v27 = vor.u32 %v18880_v15, %v16284_v63  ;;  %v17196_v15 = vld [vmem:[%s19566_s7 + $0x2870] sm:$0xf0]  ;;  %v19156_v63 = vld [vmem:[%s19566_s7 + $0x29dc] sm:$0xf] }
 0x3bf   : > { %10683 = vmatpush.bf16.msra.mxu2 %v16743_v16  ;;  %v10423_v16 = vpop.f32.mrf.mxu3  ;;  %v16887_v43 = vor.u32 %v19030_v55, %v16884_v8  ;;  %v16644_v55 = vld [vmem:[%s19566_s7 + $0x2420] sm:$0xf0]  ;;  %v19018_v8 = vld [vmem:[%s19566_s7 + $0x258c] sm:$0xf] }
 0x3c0   : > { %10697 = vmatpush.bf16.msra.mxu3 %v16935_v10  ;;  %v21912_v6 = vadd.f32 %v10423_v16, %v10410_v4  ;;  %v16695_v10 = vor.u32 %v18982_v62, %v16692_v5  ;;  %v16452_v62 = vld [vmem:[%s19566_s7 + $0x22a0] sm:$0xf0]  ;;  %v18970_v5 = vld [vmem:[%s19566_s7 + $0x240c] sm:$0xf] }
 0x3c1   : > { %10656 = vmatpush.bf16.msra.mxu0 %v16335_v9  ;;  %v16668_v9 = vld [vmem:[%s19566_s7 + $0x2450] sm:$0xf0]  ;;  %v16836_v16 = vld [vmem:[%s19566_s7 + $0x25a0] sm:$0xf0] }
 0x3c2   : > { %10670 = vmatpush.bf16.msra.mxu1 %v16527_v3  ;;  %v19024_v3 = vld [vmem:[%s19566_s7 + $0x25bc] sm:$0xf]  ;;  %v16671_v12 = vor.u32 %v18976_v17, %v16668_v9  ;;  %v16647_v17 = vor.u32 %v18970_v5, %v16644_v55  ;;  %v19246_v5 = vld [vmem:[%s19566_s7 + $0x2cac] sm:$0xf]  ;;  %v21948_v55 = vpop.f32.mrf.mxu1 }
 0x3c3   : > { %10684 = vmatpush.bf16.msra.mxu2 %v16719_v28  ;;  %v16860_v28 = vld [vmem:[%s19566_s7 + $0x25d0] sm:$0xf0]  ;;  %v19252_v9 = vld [vmem:[%s19566_s7 + $0x2cdc] sm:$0xf]  ;;  %23642 = vst [vmem:[#allocation105_spill] sm:$0xff] %v21948_v55 }
 0x3c4   : > { %10698 = vmatpush.bf16.msra.mxu3 %v16911_v53  ;;  %v16479_v53 = vor.u32 %v18928_v50, %v16476_v23  ;;  %v16863_v4 = vor.u32 %v19024_v3, %v16860_v28  ;;  %v19204_v50 = vld [vmem:[%s19566_s7 + $0x2b5c] sm:$0xf]  ;;  %v17580_v23 = vld [vmem:[%s19566_s7 + $0x2b70] sm:$0xf0]  ;;  %v16839_v28 = vor.u32 %v19018_v8, %v16836_v16  ;;  %v17175_v8 = vor.u32 %v19102_v1, %v17172_v19  ;;  %v12378_v55 = vld [vmem:[%s19566_s7 + $0x2b0] sm:$0xf] }
 0x3c5   : > { %10657 = vmatpush.bf16.msra.mxu0 %v16311_v31  ;;  %v19108_v31 = vld [vmem:[%s19566_s7 + $0x285c] sm:$0xf]  ;;  %v17772_v3 = vld [vmem:[%s19566_s7 + $0x2cf0] sm:$0xf0]  ;;  %v17367_v16 = vor.u32 %v19150_v60, %v17364_v38 }
 0x3c6   : > { %10671 = vmatpush.bf16.msra.mxu1 %v16503_v0  ;;  %v16263_v0 = vor.u32 %v18874_v35, %v16260_v13  ;;  %v17583_v13 = vor.u32 %v19204_v50, %v17580_v23  ;;  %v17340_v50 = vld [vmem:[%s19566_s7 + $0x2990] sm:$0xf0]  ;;  %v19192_v23 = vld [vmem:[%s19566_s7 + $0x2afc] sm:$0xf] }
 0x3c7   : > { %10685 = vmatpush.bf16.msra.mxu2 %v16695_v10  ;;  %v17388_v10 = vld [vmem:[%s19566_s7 + $0x29f0] sm:$0xf0]  ;;  %v19240_v60 = vld [vmem:[%s19566_s7 + $0x2c7c] sm:$0xf] }
 0x3c8   : > { %10699 = vmatpush.bf16.msra.mxu3 %v16887_v43  ;;  %v16455_v43 = vor.u32 %v18922_v7, %v16452_v62  ;;  %v17391_v35 = vor.u32 %v19156_v63, %v17388_v10  ;;  %v17556_v7 = vld [vmem:[%s19566_s7 + $0x2b40] sm:$0xf0]  ;;  %v21944_v62 = vpop.f32.mrf.mxu0  ;;  %v17148_v63 = vld [vmem:[%s19566_s7 + $0x2810] sm:$0xf0] }
 0x3c9   : > { %10658 = vmatpush.bf16.msra.mxu0 %v16287_v27  ;;  %v17199_v27 = vor.u32 %v19108_v31, %v17196_v15  ;;  %23641 = vst [vmem:[#allocation104_spill] sm:$0xff] %v21944_v62  ;;  %v19096_v15 = vld [vmem:[%s19566_s7 + $0x27fc] sm:$0xf]  ;;  %v17724_v19 = vld [vmem:[%s19566_s7 + $0x2c90] sm:$0xf0] }
 0x3ca   : > { %10672 = vmatpush.bf16.msra.mxu1 %v16479_v53  ;;  %v17775_v53 = vor.u32 %v19252_v9, %v17772_v3  ;;  %v17151_v1 = vor.u32 %v19096_v15, %v17148_v63  ;;  %v19090_v9 = vld [vmem:[%s19566_s7 + $0x27cc] sm:$0xf]  ;;  %v17124_v3 = vld [vmem:[%s19566_s7 + $0x27e0] sm:$0xf0]  ;;  %v17906_v62 = vld [vmem:[%s19566_s7 + $0x2c4] sm:$0xf0] }
 0x3cb   : > { %10686 = vmatpush.bf16.msra.mxu2 %v16671_v12  ;;  %v19198_v12 = vld [vmem:[%s19566_s7 + $0x2b2c] sm:$0xf] }
 0x3cc   : > { %10700 = vmatpush.bf16.msra.mxu3 %v16863_v4  ;;  %v17748_v4 = vld [vmem:[%s19566_s7 + $0x2cc0] sm:$0xf0]  ;;  %v17559_v31 = vor.u32 %v19198_v12, %v17556_v7  ;;  %v21970_v7 = vpop.f32.mrf.mxu3 }
 0x3cd   : > { %10659 = vmatpush.bf16.msra.mxu0 %v16263_v0  ;;  %v19144_v0 = vld [vmem:[%s19566_s7 + $0x297c] sm:$0xf]  ;;  %v17751_v10 = vor.u32 %v19246_v5, %v17748_v4  ;;  %v17508_v12 = vld [vmem:[%s19566_s7 + $0x2ae0] sm:$0xf0]  ;;  %23644 = vst [vmem:[#allocation107_spill] sm:$0xff] %v21970_v7 }
 0x3ce   : > { %10673 = vmatpush.bf16.msra.mxu1 %v16455_v43  ;;  %v17532_v43 = vld [vmem:[%s19566_s7 + $0x2b10] sm:$0xf0]  ;;  %v17343_v38 = vor.u32 %v19144_v0, %v17340_v50  ;;  %v19234_v4 = vld [vmem:[%s19566_s7 + $0x2c4c] sm:$0xf]  ;;  %v10451_v15 = vpop.f32.mrf.mxu1  ;;  %v12186_v7 = vld [vmem:[%s19566_s7 + $0x130] sm:$0xf] }
 0x3cf   : > { %10687 = vmatpush.bf16.msra.mxu2 %v16647_v17  ;;  %v17535_v17 = vor.u32 %v19192_v23, %v17532_v43  ;;  %v17100_v50 = vld [vmem:[%s19566_s7 + $0x27b0] sm:$0xf0]  ;;  %v19132_v23 = vld [vmem:[%s19566_s7 + $0x291c] sm:$0xf] }
 0x3d0   : > { %10701 = vmatpush.bf16.msra.mxu3 %v16839_v28  ;;  %10660 = vmatmul.bf16.vlgmr.msra.gmra.mxu0 %v20096_v24  ;;  %v19138_v28 = vld [vmem:[%s19566_s7 + $0x294c] sm:$0xf]  ;;  %v10437_v5 = vpop.f32.mrf.mxu0 }
 0x3d1   : > { %10708 = vmatpush.bf16.msrb.mxu0 %v17199_v27  ;;  %10674 = vmatmul.bf16.vlgmr.msra.gmra.mxu1 %v20104_v30  ;;  %v21965_v27 = vpop.f32.mrf.mxu2 }
 0x3d2   : > { %10722 = vmatpush.bf16.msrb.mxu1 %v17391_v35  ;;  %10688 = vmatmul.bf16.vlgmr.msra.gmra.mxu2 %v20184_v34  ;;  %23643 = vst [vmem:[#allocation106_spill] sm:$0xff] %v21965_v27  ;;  %v17727_v35 = vor.u32 %v19240_v60, %v17724_v19  ;;  %v17292_v19 = vld [vmem:[%s19566_s7 + $0x2930] sm:$0xf0]  ;;  %v17858_v27 = vld [vmem:[%s19566_s7 + $0x144] sm:$0xf0] }
 0x3d3   : > { %10736 = vmatpush.bf16.msrb.mxu2 %v17583_v13  ;;  %10702 = vmatmul.bf16.vlgmr.msra.gmra.mxu3 %v20193_v49  ;;  %v17316_v13 = vld [vmem:[%s19566_s7 + $0x2960] sm:$0xf0] }
 0x3d4   : > { %10750 = vmatpush.bf16.msrb.mxu3 %v17775_v53  ;;  %v19186_v53 = vld [vmem:[%s19566_s7 + $0x2acc] sm:$0xf]  ;;  %v17319_v63 = vor.u32 %v19138_v28, %v17316_v13  ;;  %v17076_v13 = vld [vmem:[%s19566_s7 + $0x2780] sm:$0xf0] }
 0x3d5   : > { %10709 = vmatpush.bf16.msrb.mxu0 %v17175_v8  ;;  %v17700_v8 = vld [vmem:[%s19566_s7 + $0x2c60] sm:$0xf0]  ;;  %v17511_v0 = vor.u32 %v19186_v53, %v17508_v12  ;;  %v19126_v53 = vld [vmem:[%s19566_s7 + $0x28ec] sm:$0xf] }
 0x3d6   : > { %10723 = vmatpush.bf16.msrb.mxu1 %v17367_v16  ;;  %v10438_v16 = vadd.f32 %v10437_v5, %v21912_v6  ;;  %v17703_v43 = vor.u32 %v19234_v4, %v17700_v8  ;;  %v17484_v6 = vld [vmem:[%s19566_s7 + $0x2ab0] sm:$0xf0]  ;;  %v17268_v4 = vld [vmem:[%s19566_s7 + $0x2900] sm:$0xf0]  ;;  %v19174_v8 = vld [vmem:[%s19566_s7 + $0x2a6c] sm:$0xf] }
 0x3d7   : > { %10737 = vmatpush.bf16.msrb.mxu2 %v17559_v31  ;;  %v17127_v31 = vor.u32 %v19090_v9, %v17124_v3  ;;  %v19228_v9 = vld [vmem:[%s19566_s7 + $0x2c1c] sm:$0xf]  ;;  %v17295_v3 = vor.u32 %v19132_v23, %v17292_v19  ;;  %v17271_v23 = vor.u32 %v19126_v53, %v17268_v4  ;;  %v17028_v53 = vld [vmem:[%s19566_s7 + $0x2720] sm:$0xf0]  ;;  %v19114_v4 = vld [vmem:[%s19566_s7 + $0x288c] sm:$0xf] }
 0x3d8   : > { %10751 = vmatpush.bf16.msrb.mxu3 %v17751_v10  ;;  %v19084_v10 = vld [vmem:[%s19566_s7 + $0x279c] sm:$0xf]  ;;  %v10452_v60 = vadd.f32 %v10451_v15, %v10438_v16  ;;  %v17460_v16 = vld [vmem:[%s19566_s7 + $0x2a80] sm:$0xf0]  ;;  %v10479_v15 = vpop.f32.mrf.mxu3 }
 0x3d9   : > { %10710 = vmatpush.bf16.msrb.mxu0 %v17151_v1  ;;  %v19180_v1 = vld [vmem:[%s19566_s7 + $0x2a9c] sm:$0xf]  ;;  %v10465_v5 = vpop.f32.mrf.mxu2 }
 0x3da   : > { %10724 = vmatpush.bf16.msrb.mxu1 %v17343_v38  ;;  %v17676_v38 = vld [vmem:[%s19566_s7 + $0x2c30] sm:$0xf0]  ;;  %v17487_v28 = vor.u32 %v19180_v1, %v17484_v6  ;;  %v19072_v19 = vld [vmem:[%s19566_s7 + $0x273c] sm:$0xf] }
 0x3db   : > { %10738 = vmatpush.bf16.msrb.mxu2 %v17535_v17  ;;  %v17103_v17 = vor.u32 %v19084_v10, %v17100_v50  ;;  %v17679_v12 = vor.u32 %v19228_v9, %v17676_v38  ;;  %v19120_v1 = vld [vmem:[%s19566_s7 + $0x28bc] sm:$0xf]  ;;  %v17244_v9 = vld [vmem:[%s19566_s7 + $0x28d0] sm:$0xf0] }
 0x3dc   : > { %10752 = vmatpush.bf16.msrb.mxu3 %v17727_v35  ;;  %v19078_v35 = vld [vmem:[%s19566_s7 + $0x276c] sm:$0xf]  ;;  %v19168_v38 = vld [vmem:[%s19566_s7 + $0x2a3c] sm:$0xf] }
 0x3dd   : > { %10711 = vmatpush.bf16.msrb.mxu0 %v17127_v31  ;;  %v10466_v31 = vadd.f32 %v10465_v5, %v10452_v60  ;;  %v17079_v10 = vor.u32 %v19078_v35, %v17076_v13  ;;  %v17052_v60 = vld [vmem:[%s19566_s7 + $0x2750] sm:$0xf0]  ;;  %v19066_v13 = vld [vmem:[%s19566_s7 + $0x270c] sm:$0xf] }
 0x3de   : > { %10725 = vmatpush.bf16.msrb.mxu1 %v17319_v63  ;;  %v19222_v63 = vld [vmem:[%s19566_s7 + $0x2bec] sm:$0xf]  ;;  %v17055_v35 = vor.u32 %v19072_v19, %v17052_v60  ;;  %v17864_v19 = vld [vmem:[%s19566_s7 + $0x174] sm:$0xf0]  ;;  %v12402_v60 = vld [vmem:[%s19566_s7 + $0x2e0] sm:$0xf] }
 0x3df   : > { %10739 = vmatpush.bf16.msrb.mxu2 %v17511_v0  ;;  %v17652_v0 = vld [vmem:[%s19566_s7 + $0x2c00] sm:$0xf0]  ;;  %v21991_v50 = vadd.f32 %v10479_v15, %v10466_v31 }
 0x3e0   : > { %10753 = vmatpush.bf16.msrb.mxu3 %v17703_v43  ;;  %v17463_v43 = vor.u32 %v19174_v8, %v17460_v16  ;;  %v17655_v6 = vor.u32 %v19222_v63, %v17652_v0  ;;  %v17220_v8 = vld [vmem:[%s19566_s7 + $0x28a0] sm:$0xf0]  ;;  %v19162_v16 = vld [vmem:[%s19566_s7 + $0x2a0c] sm:$0xf] }
 0x3e1   : > { %10712 = vmatpush.bf16.msrb.mxu0 %v17103_v17  ;;  %v17436_v17 = vld [vmem:[%s19566_s7 + $0x2a50] sm:$0xf0]  ;;  %v17412_v15 = vld [vmem:[%s19566_s7 + $0x2a20] sm:$0xf0]  ;;  %v19210_v63 = vld [vmem:[%s19566_s7 + $0x2b8c] sm:$0xf] }
 0x3e2   : > { %10726 = vmatpush.bf16.msrb.mxu1 %v17295_v3  ;;  %v19216_v3 = vld [vmem:[%s19566_s7 + $0x2bbc] sm:$0xf]  ;;  %v17439_v5 = vor.u32 %v19168_v38, %v17436_v17  ;;  %v17604_v0 = vld [vmem:[%s19566_s7 + $0x2ba0] sm:$0xf0]  ;;  %v17415_v38 = vor.u32 %v19162_v16, %v17412_v15  ;;  %v12786_v17 = vld [vmem:[%s19566_s7 + $0x5e0] sm:$0xf]  ;;  %v22027_v15 = vpop.f32.mrf.mxu1 }
 0x3e3   : > { %10740 = vmatpush.bf16.msrb.mxu2 %v17487_v28  ;;  %v17628_v28 = vld [vmem:[%s19566_s7 + $0x2bd0] sm:$0xf0]  ;;  %v12762_v16 = vld [vmem:[%s19566_s7 + $0x5b0] sm:$0xf]  ;;  %23646 = vst [vmem:[#allocation109_spill] sm:$0xff] %v22027_v15 }
 0x3e4   : > { %10754 = vmatpush.bf16.msrb.mxu3 %v17679_v12  ;;  %v17247_v12 = vor.u32 %v19120_v1, %v17244_v9  ;;  %v17631_v31 = vor.u32 %v19216_v3, %v17628_v28  ;;  %v12594_v1 = vld [vmem:[%s19566_s7 + $0x460] sm:$0xf]  ;;  %v17960_v9 = vld [vmem:[%s19566_s7 + $0x474] sm:$0xf0]  ;;  %v17607_v28 = vor.u32 %v19210_v63, %v17604_v0  ;;  %v12187_v63 = vor.u32 %v17858_v27, %v12186_v7  ;;  %v13146_v15 = vld [vmem:[%s19566_s7 + $0x8b0] sm:$0xf] }
 0x3e5   : > { %10713 = vmatpush.bf16.msrb.mxu0 %v17079_v10  ;;  %v12210_v10 = vld [vmem:[%s19566_s7 + $0x160] sm:$0xf]  ;;  %v18008_v3 = vld [vmem:[%s19566_s7 + $0x5f4] sm:$0xf0]  ;;  %v12379_v0 = vor.u32 %v17906_v62, %v12378_v55 }
 0x3e6   : > { %10727 = vmatpush.bf16.msrb.mxu1 %v17271_v23  ;;  %v17031_v23 = vor.u32 %v19066_v13, %v17028_v53  ;;  %v12595_v53 = vor.u32 %v17960_v9, %v12594_v1  ;;  %v17900_v1 = vld [vmem:[%s19566_s7 + $0x294] sm:$0xf0]  ;;  %v12546_v9 = vld [vmem:[%s19566_s7 + $0x400] sm:$0xf] }
 0x3e7   : > { %10741 = vmatpush.bf16.msrb.mxu2 %v17463_v43  ;;  %v17912_v43 = vld [vmem:[%s19566_s7 + $0x2f4] sm:$0xf0]  ;;  %v12738_v62 = vld [vmem:[%s19566_s7 + $0x580] sm:$0xf] }
 0x3e8   : > { %10755 = vmatpush.bf16.msrb.mxu3 %v17655_v6  ;;  %v17223_v6 = vor.u32 %v19114_v4, %v17220_v8  ;;  %v12403_v13 = vor.u32 %v17912_v43, %v12402_v60  ;;  %v17954_v4 = vld [vmem:[%s19566_s7 + $0x444] sm:$0xf0]  ;;  %v22023_v8 = vpop.f32.mrf.mxu0  ;;  %v17852_v60 = vld [vmem:[%s19566_s7 + $0x114] sm:$0xf0] }
 0x3e9   : > { %10714 = vmatpush.bf16.msrb.mxu0 %v17055_v35  ;;  %v12211_v35 = vor.u32 %v17864_v19, %v12210_v10  ;;  %23645 = vst [vmem:[#allocation108_spill] sm:$0xff] %v22023_v8  ;;  %v12162_v19 = vld [vmem:[%s19566_s7 + $0x100] sm:$0xf]  ;;  %v17996_v55 = vld [vmem:[%s19566_s7 + $0x594] sm:$0xf0] }
 0x3ea   : > { %10728 = vmatpush.bf16.msrb.mxu1 %v17247_v12  ;;  %v12787_v12 = vor.u32 %v18008_v3, %v12786_v17  ;;  %v12163_v27 = vor.u32 %v17852_v60, %v12162_v19  ;;  %v12138_v17 = vld [vmem:[%s19566_s7 + $0xd0] sm:$0xf]  ;;  %v17846_v3 = vld [vmem:[%s19566_s7 + $0xe4] sm:$0xf0] }
 0x3eb   : > { %10742 = vmatpush.bf16.msrb.mxu2 %v17439_v5  ;;  %v12570_v5 = vld [vmem:[%s19566_s7 + $0x430] sm:$0xf]  ;;  %v18098_v8 = vld [vmem:[%s19566_s7 + $0x8c4] sm:$0xf0] }
 0x3ec   : > { %10756 = vmatpush.bf16.msrb.mxu3 %v17631_v31  ;;  %v18002_v31 = vld [vmem:[%s19566_s7 + $0x5c4] sm:$0xf0]  ;;  %v12571_v10 = vor.u32 %v17954_v4, %v12570_v5  ;;  %v22049_v4 = vpop.f32.mrf.mxu3 }
 0x3ed   : > { %10715 = vmatpush.bf16.msrb.mxu0 %v17031_v23  ;;  %v12354_v23 = vld [vmem:[%s19566_s7 + $0x280] sm:$0xf]  ;;  %v12763_v43 = vor.u32 %v18002_v31, %v12762_v16  ;;  %v17942_v5 = vld [vmem:[%s19566_s7 + $0x3e4] sm:$0xf0]  ;;  %23648 = vst [vmem:[#allocation111_spill] sm:$0xff] %v22049_v4 }
 0x3ee   : > { %10729 = vmatpush.bf16.msrb.mxu1 %v17223_v6  ;;  %v17948_v6 = vld [vmem:[%s19566_s7 + $0x414] sm:$0xf0]  ;;  %v12355_v7 = vor.u32 %v17900_v1, %v12354_v23  ;;  %v12714_v31 = vld [vmem:[%s19566_s7 + $0x550] sm:$0xf]  ;;  %v10507_v19 = vpop.f32.mrf.mxu1 }
 0x3ef   : > { %10743 = vmatpush.bf16.msrb.mxu2 %v17415_v38  ;;  %v12547_v38 = vor.u32 %v17948_v6, %v12546_v9  ;;  %v17840_v1 = vld [vmem:[%s19566_s7 + $0xb4] sm:$0xf0]  ;;  %v12306_v9 = vld [vmem:[%s19566_s7 + $0x220] sm:$0xf]  ;;  %v12954_v4 = vld [vmem:[%s19566_s7 + $0x730] sm:$0xf] }
 0x3f0   : > { %10757 = vmatpush.bf16.msrb.mxu3 %v17607_v28  ;;  %10716 = vmatmul.bf16.vlgmr.msrb.gmra.mxu0 %v20191_v46  ;;  %v12330_v28 = vld [vmem:[%s19566_s7 + $0x250] sm:$0xf]  ;;  %v10493_v16 = vpop.f32.mrf.mxu0 }
 0x3f1   : > { %10764 = vmatpush.bf16.msra.mxu0 %v12211_v35  ;;  %10730 = vmatmul.bf16.vlgmr.msrb.gmra.mxu1 %v20199_v54  ;;  %v22044_v35 = vpop.f32.mrf.mxu2 }
 0x3f2   : > { %10778 = vmatpush.bf16.msra.mxu1 %v12403_v13  ;;  %10744 = vmatmul.bf16.vlgmr.msrb.gmra.mxu2 %v20275_v22  ;;  %23647 = vst [vmem:[#allocation110_spill] sm:$0xff] %v22044_v35  ;;  %v12739_v13 = vor.u32 %v17996_v55, %v12738_v62  ;;  %v17888_v55 = vld [vmem:[%s19566_s7 + $0x234] sm:$0xf0]  ;;  %v18050_v35 = vld [vmem:[%s19566_s7 + $0x744] sm:$0xf0] }
 0x3f3   : > { %10792 = vmatpush.bf16.msra.mxu2 %v12595_v53  ;;  %10758 = vmatmul.bf16.vlgmr.msrb.gmra.mxu3 %v20282_v25  ;;  %v17894_v53 = vld [vmem:[%s19566_s7 + $0x264] sm:$0xf0] }
 0x3f4   : > { %10806 = vmatpush.bf16.msra.mxu3 %v12787_v12  ;;  %v12522_v12 = vld [vmem:[%s19566_s7 + $0x3d0] sm:$0xf]  ;;  %v12331_v60 = vor.u32 %v17894_v53, %v12330_v28  ;;  %v17834_v53 = vld [vmem:[%s19566_s7 + $0x84] sm:$0xf0] }
 0x3f5   : > { %10765 = vmatpush.bf16.msra.mxu0 %v12187_v63  ;;  %v17990_v63 = vld [vmem:[%s19566_s7 + $0x564] sm:$0xf0]  ;;  %v12523_v23 = vor.u32 %v17942_v5, %v12522_v12  ;;  %v12282_v12 = vld [vmem:[%s19566_s7 + $0x1f0] sm:$0xf] }
 0x3f6   : > { %10779 = vmatpush.bf16.msra.mxu1 %v12379_v0  ;;  %v10494_v0 = vadd.f32 %v10493_v16, %v21991_v50  ;;  %v12715_v6 = vor.u32 %v17990_v63, %v12714_v31  ;;  %v17936_v50 = vld [vmem:[%s19566_s7 + $0x3b4] sm:$0xf0]  ;;  %v17882_v31 = vld [vmem:[%s19566_s7 + $0x204] sm:$0xf0]  ;;  %v12474_v63 = vld [vmem:[%s19566_s7 + $0x370] sm:$0xf] }
 0x3f7   : > { %10793 = vmatpush.bf16.msra.mxu2 %v12571_v10  ;;  %v12139_v10 = vor.u32 %v17846_v3, %v12138_v17  ;;  %v12690_v17 = vld [vmem:[%s19566_s7 + $0x520] sm:$0xf]  ;;  %v12307_v3 = vor.u32 %v17888_v55, %v12306_v9  ;;  %v12283_v9 = vor.u32 %v17882_v31, %v12282_v12  ;;  %v17822_v12 = vld [vmem:[%s19566_s7 + $0x24] sm:$0xf0]  ;;  %v12234_v31 = vld [vmem:[%s19566_s7 + $0x190] sm:$0xf] }
 0x3f8   : > { %10807 = vmatpush.bf16.msra.mxu3 %v12763_v43  ;;  %v12114_v43 = vld [vmem:[%s19566_s7 + $0xa0] sm:$0xf]  ;;  %v10508_v62 = vadd.f32 %v10507_v19, %v10494_v0  ;;  %v17930_v0 = vld [vmem:[%s19566_s7 + $0x384] sm:$0xf0]  ;;  %v10535_v19 = vpop.f32.mrf.mxu3 }
 0x3f9   : > { %10766 = vmatpush.bf16.msra.mxu0 %v12163_v27  ;;  %v12498_v27 = vld [vmem:[%s19566_s7 + $0x3a0] sm:$0xf]  ;;  %v10521_v16 = vpop.f32.mrf.mxu2 }
 0x3fa   : > { %10780 = vmatpush.bf16.msra.mxu1 %v12355_v7  ;;  %v17984_v7 = vld [vmem:[%s19566_s7 + $0x534] sm:$0xf0]  ;;  %v12499_v28 = vor.u32 %v17936_v50, %v12498_v27  ;;  %v12066_v55 = vld [vmem:[%s19566_s7 + $0x40] sm:$0xf] }
 0x3fb   : > { %10794 = vmatpush.bf16.msra.mxu2 %v12547_v38  ;;  %v12115_v38 = vor.u32 %v17840_v1, %v12114_v43  ;;  %v12691_v5 = vor.u32 %v17984_v7, %v12690_v17  ;;  %v12258_v27 = vld [vmem:[%s19566_s7 + $0x1c0] sm:$0xf]  ;;  %v17876_v17 = vld [vmem:[%s19566_s7 + $0x1d4] sm:$0xf0] }
 0x3fc   : > { %10808 = vmatpush.bf16.msra.mxu3 %v12739_v13  ;;  %v12090_v13 = vld [vmem:[%s19566_s7 + $0x70] sm:$0xf]  ;;  %v12450_v7 = vld [vmem:[%s19566_s7 + $0x340] sm:$0xf] }
 0x3fd   : > { %10767 = vmatpush.bf16.msra.mxu0 %v12139_v10  ;;  %v10522_v10 = vadd.f32 %v10521_v16, %v10508_v62  ;;  %v12091_v43 = vor.u32 %v17834_v53, %v12090_v13  ;;  %v17828_v62 = vld [vmem:[%s19566_s7 + $0x54] sm:$0xf0]  ;;  %v12042_v53 = vld [vmem:[%s19566_s7 + $0x10] sm:$0xf] }
 0x3fe   : > { %10781 = vmatpush.bf16.msra.mxu1 %v12331_v60  ;;  %v12666_v60 = vld [vmem:[%s19566_s7 + $0x4f0] sm:$0xf]  ;;  %v12067_v13 = vor.u32 %v17828_v62, %v12066_v55  ;;  %v18056_v55 = vld [vmem:[%s19566_s7 + $0x774] sm:$0xf0]  ;;  %v13170_v62 = vld [vmem:[%s19566_s7 + $0x8e0] sm:$0xf] }
 0x3ff   : > { %10795 = vmatpush.bf16.msra.mxu2 %v12523_v23  ;;  %v17978_v23 = vld [vmem:[%s19566_s7 + $0x504] sm:$0xf0]  ;;  %v22070_v1 = vadd.f32 %v10535_v19, %v10522_v10 }
 0x400   : > { %10809 = vmatpush.bf16.msra.mxu3 %v12715_v6  ;;  %v12475_v6 = vor.u32 %v17930_v0, %v12474_v63  ;;  %v12667_v50 = vor.u32 %v17978_v23, %v12666_v60  ;;  %v17870_v63 = vld [vmem:[%s19566_s7 + $0x1a4] sm:$0xf0]  ;;  %v12426_v0 = vld [vmem:[%s19566_s7 + $0x310] sm:$0xf] }
 0x401   : > { %10768 = vmatpush.bf16.msra.mxu0 %v12115_v38  ;;  %v17924_v38 = vld [vmem:[%s19566_s7 + $0x354] sm:$0xf0]  ;;  %v17918_v19 = vld [vmem:[%s19566_s7 + $0x324] sm:$0xf0]  ;;  %v12618_v60 = vld [vmem:[%s19566_s7 + $0x490] sm:$0xf] }
 0x402   : > { %10782 = vmatpush.bf16.msra.mxu1 %v12307_v3  ;;  %v12642_v3 = vld [vmem:[%s19566_s7 + $0x4c0] sm:$0xf]  ;;  %v12451_v16 = vor.u32 %v17924_v38, %v12450_v7  ;;  %v17966_v23 = vld [vmem:[%s19566_s7 + $0x4a4] sm:$0xf0]  ;;  %v12427_v7 = vor.u32 %v17918_v19, %v12426_v0  ;;  %v13530_v0 = vld [vmem:[%s19566_s7 + $0xbb0] sm:$0xf]  ;;  %v22106_v19 = vpop.f32.mrf.mxu1 }
 0x403   : > { %10796 = vmatpush.bf16.msra.mxu2 %v12499_v28  ;;  %v17972_v28 = vld [vmem:[%s19566_s7 + $0x4d4] sm:$0xf0]  ;;  %v13554_v38 = vld [vmem:[%s19566_s7 + $0xbe0] sm:$0xf]  ;;  %23650 = vst [vmem:[#allocation113_spill] sm:$0xff] %v22106_v19 }
 0x404   : > { %10810 = vmatpush.bf16.msra.mxu3 %v12691_v5  ;;  %v12259_v5 = vor.u32 %v17876_v17, %v12258_v27  ;;  %v12643_v10 = vor.u32 %v17972_v28, %v12642_v3  ;;  %v13362_v27 = vld [vmem:[%s19566_s7 + $0xa60] sm:$0xf]  ;;  %v18152_v17 = vld [vmem:[%s19566_s7 + $0xa74] sm:$0xf0]  ;;  %v12619_v28 = vor.u32 %v17966_v23, %v12618_v60  ;;  %v12955_v60 = vor.u32 %v18050_v35, %v12954_v4  ;;  %v12906_v4 = vld [vmem:[%s19566_s7 + $0x6d0] sm:$0xf] }
 0x405   : > { %10769 = vmatpush.bf16.msra.mxu0 %v12091_v43  ;;  %v12978_v43 = vld [vmem:[%s19566_s7 + $0x760] sm:$0xf]  ;;  %v18200_v3 = vld [vmem:[%s19566_s7 + $0xbf4] sm:$0xf0]  ;;  %v13147_v23 = vor.u32 %v18098_v8, %v13146_v15  ;;  %v13914_v19 = vld [vmem:[%s19566_s7 + $0xeb0] sm:$0xf] }
 0x406   : > { %10783 = vmatpush.bf16.msra.mxu1 %v12283_v9  ;;  %v12043_v9 = vor.u32 %v17822_v12, %v12042_v53  ;;  %v13363_v12 = vor.u32 %v18152_v17, %v13362_v27  ;;  %v18092_v27 = vld [vmem:[%s19566_s7 + $0x894] sm:$0xf0]  ;;  %v13314_v17 = vld [vmem:[%s19566_s7 + $0xa00] sm:$0xf] }
 0x407   : > { %10797 = vmatpush.bf16.msra.mxu2 %v12475_v6  ;;  %v18104_v6 = vld [vmem:[%s19566_s7 + $0x8f4] sm:$0xf0] }
 0x408   : > { %10811 = vmatpush.bf16.msra.mxu3 %v12667_v50  ;;  %v12235_v50 = vor.u32 %v17870_v63, %v12234_v31  ;;  %v13171_v53 = vor.u32 %v18104_v6, %v13170_v62  ;;  %v18146_v31 = vld [vmem:[%s19566_s7 + $0xa44] sm:$0xf0]  ;;  %v22102_v63 = vpop.f32.mrf.mxu0  ;;  %v18044_v62 = vld [vmem:[%s19566_s7 + $0x714] sm:$0xf0] }
 0x409   : > { %10770 = vmatpush.bf16.msra.mxu0 %v12067_v13  ;;  %v12979_v13 = vor.u32 %v18056_v55, %v12978_v43  ;;  %23649 = vst [vmem:[#allocation112_spill] sm:$0xff] %v22102_v63  ;;  %v12930_v55 = vld [vmem:[%s19566_s7 + $0x700] sm:$0xf]  ;;  %v18290_v63 = vld [vmem:[%s19566_s7 + $0xec4] sm:$0xf0] }
 0x40a   : > { %10784 = vmatpush.bf16.msra.mxu1 %v12259_v5  ;;  %v13555_v5 = vor.u32 %v18200_v3, %v13554_v38  ;;  %v18188_v38 = vld [vmem:[%s19566_s7 + $0xb94] sm:$0xf0]  ;;  %v12931_v8 = vor.u32 %v18044_v62, %v12930_v55  ;;  %v18038_v3 = vld [vmem:[%s19566_s7 + $0x6e4] sm:$0xf0] }
 0x40b   : > { %10798 = vmatpush.bf16.msra.mxu2 %v12451_v16  ;;  %v13338_v16 = vld [vmem:[%s19566_s7 + $0xa30] sm:$0xf] }
 0x40c   : > { %10812 = vmatpush.bf16.msra.mxu3 %v12643_v10  ;;  %v18194_v10 = vld [vmem:[%s19566_s7 + $0xbc4] sm:$0xf0]  ;;  %v13339_v43 = vor.u32 %v18146_v31, %v13338_v16  ;;  %v22128_v31 = vpop.f32.mrf.mxu3 }
 0x40d   : > { %10771 = vmatpush.bf16.msra.mxu0 %v12043_v9  ;;  %v13122_v9 = vld [vmem:[%s19566_s7 + $0x880] sm:$0xf]  ;;  %v13531_v6 = vor.u32 %v18194_v10, %v13530_v0  ;;  %v18134_v16 = vld [vmem:[%s19566_s7 + $0x9e4] sm:$0xf0]  ;;  %23652 = vst [vmem:[#allocation115_spill] sm:$0xff] %v22128_v31 }
 0x40e   : > { %10785 = vmatpush.bf16.msra.mxu1 %v12235_v50  ;;  %v18140_v50 = vld [vmem:[%s19566_s7 + $0xa14] sm:$0xf0]  ;;  %v13123_v15 = vor.u32 %v18092_v27, %v13122_v9  ;;  %v13482_v10 = vld [vmem:[%s19566_s7 + $0xb50] sm:$0xf]  ;;  %v10563_v55 = vpop.f32.mrf.mxu1 }
 0x40f   : > { %10799 = vmatpush.bf16.msra.mxu2 %v12427_v7  ;;  %v13506_v7 = vld [vmem:[%s19566_s7 + $0xb80] sm:$0xf]  ;;  %v13315_v35 = vor.u32 %v18140_v50, %v13314_v17  ;;  %v18032_v27 = vld [vmem:[%s19566_s7 + $0x6b4] sm:$0xf0]  ;;  %v13722_v31 = vld [vmem:[%s19566_s7 + $0xd30] sm:$0xf] }
 0x410   : > { %10813 = vmatpush.bf16.msra.mxu3 %v12619_v28  ;;  %10772 = vmatmul.bf16.vlgmr.msra.gmra.mxu0 %v19669_v59  ;;  %v13098_v28 = vld [vmem:[%s19566_s7 + $0x850] sm:$0xf]  ;;  %v10549_v0 = vpop.f32.mrf.mxu0  ;;  %v13074_v17 = vld [vmem:[%s19566_s7 + $0x820] sm:$0xf] }
 0x411   : > { %10820 = vmatpush.bf16.msrb.mxu0 %v12979_v13  ;;  %10786 = vmatmul.bf16.vlgmr.msra.gmra.mxu1 %v19685_v11  ;;  %v22123_v13 = vpop.f32.mrf.mxu2 }
 0x412   : > { %10834 = vmatpush.bf16.msrb.mxu1 %v13171_v53  ;;  %10800 = vmatmul.bf16.vlgmr.msra.gmra.mxu2 %v19675_v2  ;;  %23651 = vst [vmem:[#allocation114_spill] sm:$0xff] %v22123_v13  ;;  %v13507_v53 = vor.u32 %v18188_v38, %v13506_v7  ;;  %v18080_v38 = vld [vmem:[%s19566_s7 + $0x834] sm:$0xf0]  ;;  %v18242_v13 = vld [vmem:[%s19566_s7 + $0xd44] sm:$0xf0] }
 0x413   : > { %10848 = vmatpush.bf16.msrb.mxu2 %v13363_v12  ;;  %10814 = vmatmul.bf16.vlgmr.msra.gmra.mxu3 %v19691_v18  ;;  %v18086_v12 = vld [vmem:[%s19566_s7 + $0x864] sm:$0xf0] }
 0x414   : > { %10862 = vmatpush.bf16.msrb.mxu3 %v13555_v5  ;;  %v13290_v5 = vld [vmem:[%s19566_s7 + $0x9d0] sm:$0xf]  ;;  %v13099_v62 = vor.u32 %v18086_v12, %v13098_v28  ;;  %v18026_v12 = vld [vmem:[%s19566_s7 + $0x684] sm:$0xf0] }
 0x415   : > { %10821 = vmatpush.bf16.msrb.mxu0 %v12955_v60  ;;  %v18182_v60 = vld [vmem:[%s19566_s7 + $0xb64] sm:$0xf0]  ;;  %v13291_v9 = vor.u32 %v18134_v16, %v13290_v5  ;;  %v13050_v5 = vld [vmem:[%s19566_s7 + $0x7f0] sm:$0xf] }
 0x416   : > { %10835 = vmatpush.bf16.msrb.mxu1 %v13147_v23  ;;  %v10550_v23 = vadd.f32 %v10549_v0, %v22070_v1  ;;  %v13483_v50 = vor.u32 %v18182_v60, %v13482_v10  ;;  %v18128_v1 = vld [vmem:[%s19566_s7 + $0x9b4] sm:$0xf0]  ;;  %v18074_v10 = vld [vmem:[%s19566_s7 + $0x804] sm:$0xf0]  ;;  %v13242_v60 = vld [vmem:[%s19566_s7 + $0x970] sm:$0xf] }
 0x417   : > { %10849 = vmatpush.bf16.msrb.mxu2 %v13339_v43  ;;  %v12907_v43 = vor.u32 %v18038_v3, %v12906_v4  ;;  %v13458_v4 = vld [vmem:[%s19566_s7 + $0xb20] sm:$0xf]  ;;  %v13075_v3 = vor.u32 %v18080_v38, %v13074_v17  ;;  %v13051_v17 = vor.u32 %v18074_v10, %v13050_v5  ;;  %v18014_v5 = vld [vmem:[%s19566_s7 + $0x624] sm:$0xf0]  ;;  %v13002_v10 = vld [vmem:[%s19566_s7 + $0x790] sm:$0xf] }
 0x418   : > { %10863 = vmatpush.bf16.msrb.mxu3 %v13531_v6  ;;  %v12882_v6 = vld [vmem:[%s19566_s7 + $0x6a0] sm:$0xf]  ;;  %v10564_v7 = vadd.f32 %v10563_v55, %v10550_v23  ;;  %v18122_v23 = vld [vmem:[%s19566_s7 + $0x984] sm:$0xf0]  ;;  %v10591_v55 = vpop.f32.mrf.mxu3 }
 0x419   : > { %10822 = vmatpush.bf16.msrb.mxu0 %v12931_v8  ;;  %v13266_v8 = vld [vmem:[%s19566_s7 + $0x9a0] sm:$0xf]  ;;  %v10577_v0 = vpop.f32.mrf.mxu2 }
 0x41a   : > { %10836 = vmatpush.bf16.msrb.mxu1 %v13123_v15  ;;  %v18176_v15 = vld [vmem:[%s19566_s7 + $0xb34] sm:$0xf0]  ;;  %v13267_v28 = vor.u32 %v18128_v1, %v13266_v8  ;;  %v12834_v38 = vld [vmem:[%s19566_s7 + $0x640] sm:$0xf] }
 0x41b   : > { %10850 = vmatpush.bf16.msrb.mxu2 %v13315_v35  ;;  %v12883_v35 = vor.u32 %v18032_v27, %v12882_v6  ;;  %v13459_v16 = vor.u32 %v18176_v15, %v13458_v4  ;;  %v13026_v8 = vld [vmem:[%s19566_s7 + $0x7c0] sm:$0xf]  ;;  %v18068_v4 = vld [vmem:[%s19566_s7 + $0x7d4] sm:$0xf0] }
 0x41c   : > { %10864 = vmatpush.bf16.msrb.mxu3 %v13507_v53  ;;  %v12858_v53 = vld [vmem:[%s19566_s7 + $0x670] sm:$0xf]  ;;  %v13218_v15 = vld [vmem:[%s19566_s7 + $0x940] sm:$0xf] }
 0x41d   : > { %10823 = vmatpush.bf16.msrb.mxu0 %v12907_v43  ;;  %v10578_v43 = vadd.f32 %v10577_v0, %v10564_v7  ;;  %v12859_v6 = vor.u32 %v18026_v12, %v12858_v53  ;;  %v18020_v7 = vld [vmem:[%s19566_s7 + $0x654] sm:$0xf0]  ;;  %v12810_v12 = vld [vmem:[%s19566_s7 + $0x610] sm:$0xf] }
 0x41e   : > { %10837 = vmatpush.bf16.msrb.mxu1 %v13099_v62  ;;  %v13434_v62 = vld [vmem:[%s19566_s7 + $0xaf0] sm:$0xf]  ;;  %v12835_v53 = vor.u32 %v18020_v7, %v12834_v38  ;;  %v18248_v38 = vld [vmem:[%s19566_s7 + $0xd74] sm:$0xf0]  ;;  %v13938_v7 = vld [vmem:[%s19566_s7 + $0xee0] sm:$0xf] }
 0x41f   : > { %10851 = vmatpush.bf16.msrb.mxu2 %v13291_v9  ;;  %v18170_v9 = vld [vmem:[%s19566_s7 + $0xb04] sm:$0xf0]  ;;  %v22149_v27 = vadd.f32 %v10591_v55, %v10578_v43 }
 0x420   : > { %10865 = vmatpush.bf16.msrb.mxu3 %v13483_v50  ;;  %v13243_v50 = vor.u32 %v18122_v23, %v13242_v60  ;;  %v13435_v1 = vor.u32 %v18170_v9, %v13434_v62  ;;  %v18062_v60 = vld [vmem:[%s19566_s7 + $0x7a4] sm:$0xf0]  ;;  %v13194_v23 = vld [vmem:[%s19566_s7 + $0x910] sm:$0xf] }
 0x421   : > { %10824 = vmatpush.bf16.msrb.mxu0 %v12883_v35  ;;  %v18116_v35 = vld [vmem:[%s19566_s7 + $0x954] sm:$0xf0]  ;;  %v18110_v55 = vld [vmem:[%s19566_s7 + $0x924] sm:$0xf0]  ;;  %v13386_v62 = vld [vmem:[%s19566_s7 + $0xa90] sm:$0xf] }
 0x422   : > { %10838 = vmatpush.bf16.msrb.mxu1 %v13075_v3  ;;  %v13410_v3 = vld [vmem:[%s19566_s7 + $0xac0] sm:$0xf]  ;;  %v13219_v0 = vor.u32 %v18116_v35, %v13218_v15  ;;  %v18158_v9 = vld [vmem:[%s19566_s7 + $0xaa4] sm:$0xf0]  ;;  %v13195_v15 = vor.u32 %v18110_v55, %v13194_v23  ;;  %v14298_v23 = vld [vmem:[%s19566_s7 + $0x11b0] sm:$0xf]  ;;  %v22185_v55 = vpop.f32.mrf.mxu1 }
 0x423   : > { %10852 = vmatpush.bf16.msrb.mxu2 %v13267_v28  ;;  %v18164_v28 = vld [vmem:[%s19566_s7 + $0xad4] sm:$0xf0]  ;;  %v14322_v35 = vld [vmem:[%s19566_s7 + $0x11e0] sm:$0xf]  ;;  %23654 = vst [vmem:[#allocation117_spill] sm:$0xff] %v22185_v55 }
 0x424   : > { %10866 = vmatpush.bf16.msrb.mxu3 %v13459_v16  ;;  %v13027_v16 = vor.u32 %v18068_v4, %v13026_v8  ;;  %v13411_v43 = vor.u32 %v18164_v28, %v13410_v3  ;;  %v14130_v8 = vld [vmem:[%s19566_s7 + $0x1060] sm:$0xf]  ;;  %v18344_v4 = vld [vmem:[%s19566_s7 + $0x1074] sm:$0xf0]  ;;  %v13387_v28 = vor.u32 %v18158_v9, %v13386_v62  ;;  %v13723_v62 = vor.u32 %v18242_v13, %v13722_v31  ;;  %v14682_v55 = vld [vmem:[%s19566_s7 + $0x14b0] sm:$0xf] }
 0x425   : > { %10825 = vmatpush.bf16.msrb.mxu0 %v12859_v6  ;;  %v13746_v6 = vld [vmem:[%s19566_s7 + $0xd60] sm:$0xf]  ;;  %v18392_v3 = vld [vmem:[%s19566_s7 + $0x11f4] sm:$0xf0]  ;;  %v13915_v9 = vor.u32 %v18290_v63, %v13914_v19 }
 0x426   : > { %10839 = vmatpush.bf16.msrb.mxu1 %v13051_v17  ;;  %v12811_v17 = vor.u32 %v18014_v5, %v12810_v12  ;;  %v14131_v5 = vor.u32 %v18344_v4, %v14130_v8  ;;  %v18284_v8 = vld [vmem:[%s19566_s7 + $0xe94] sm:$0xf0]  ;;  %v14082_v4 = vld [vmem:[%s19566_s7 + $0x1000] sm:$0xf] }
 0x427   : > { %10853 = vmatpush.bf16.msrb.mxu2 %v13243_v50  ;;  %v18296_v50 = vld [vmem:[%s19566_s7 + $0xef4] sm:$0xf0]  ;;  %v14274_v63 = vld [vmem:[%s19566_s7 + $0x1180] sm:$0xf] }
 0x428   : > { %10867 = vmatpush.bf16.msrb.mxu3 %v13435_v1  ;;  %v13003_v1 = vor.u32 %v18062_v60, %v13002_v10  ;;  %v13939_v12 = vor.u32 %v18296_v50, %v13938_v7  ;;  %v18338_v10 = vld [vmem:[%s19566_s7 + $0x1044] sm:$0xf0]  ;;  %v22181_v60 = vpop.f32.mrf.mxu0  ;;  %v18236_v7 = vld [vmem:[%s19566_s7 + $0xd14] sm:$0xf0] }
 0x429   : > { %10826 = vmatpush.bf16.msrb.mxu0 %v12835_v53  ;;  %v13747_v53 = vor.u32 %v18248_v38, %v13746_v6  ;;  %23653 = vst [vmem:[#allocation116_spill] sm:$0xff] %v22181_v60  ;;  %v13698_v38 = vld [vmem:[%s19566_s7 + $0xd00] sm:$0xf]  ;;  %v18380_v19 = vld [vmem:[%s19566_s7 + $0x1194] sm:$0xf0] }
 0x42a   : > { %10840 = vmatpush.bf16.msrb.mxu1 %v13027_v16  ;;  %v14323_v16 = vor.u32 %v18392_v3, %v14322_v35  ;;  %v13699_v13 = vor.u32 %v18236_v7, %v13698_v38  ;;  %v13674_v35 = vld [vmem:[%s19566_s7 + $0xcd0] sm:$0xf]  ;;  %v18230_v3 = vld [vmem:[%s19566_s7 + $0xce4] sm:$0xf0] }
 0x42b   : > { %10854 = vmatpush.bf16.msrb.mxu2 %v13219_v0  ;;  %v14106_v0 = vld [vmem:[%s19566_s7 + $0x1030] sm:$0xf]  ;;  %v18482_v60 = vld [vmem:[%s19566_s7 + $0x14c4] sm:$0xf0] }
 0x42c   : > { %10868 = vmatpush.bf16.msrb.mxu3 %v13411_v43  ;;  %v18386_v43 = vld [vmem:[%s19566_s7 + $0x11c4] sm:$0xf0]  ;;  %v14107_v6 = vor.u32 %v18338_v10, %v14106_v0  ;;  %v22207_v10 = vpop.f32.mrf.mxu3 }
 0x42d   : > { %10827 = vmatpush.bf16.msrb.mxu0 %v12811_v17  ;;  %v13890_v17 = vld [vmem:[%s19566_s7 + $0xe80] sm:$0xf]  ;;  %v14299_v50 = vor.u32 %v18386_v43, %v14298_v23  ;;  %v18326_v0 = vld [vmem:[%s19566_s7 + $0xfe4] sm:$0xf0]  ;;  %23656 = vst [vmem:[#allocation119_spill] sm:$0xff] %v22207_v10 }
 0x42e   : > { %10841 = vmatpush.bf16.msrb.mxu1 %v13003_v1  ;;  %v18332_v1 = vld [vmem:[%s19566_s7 + $0x1014] sm:$0xf0]  ;;  %v13891_v31 = vor.u32 %v18284_v8, %v13890_v17  ;;  %v14250_v43 = vld [vmem:[%s19566_s7 + $0x1150] sm:$0xf]  ;;  %v10619_v38 = vpop.f32.mrf.mxu1 }
 0x42f   : > { %10855 = vmatpush.bf16.msrb.mxu2 %v13195_v15  ;;  %v14083_v15 = vor.u32 %v18332_v1, %v14082_v4  ;;  %v18224_v8 = vld [vmem:[%s19566_s7 + $0xcb4] sm:$0xf0]  ;;  %v13842_v4 = vld [vmem:[%s19566_s7 + $0xe20] sm:$0xf]  ;;  %v14490_v10 = vld [vmem:[%s19566_s7 + $0x1330] sm:$0xf] }
 0x430   : > { %10869 = vmatpush.bf16.msrb.mxu3 %v13387_v28  ;;  %10828 = vmatmul.bf16.vlgmr.msrb.gmra.mxu0 %v19751_v40  ;;  %v13866_v28 = vld [vmem:[%s19566_s7 + $0xe50] sm:$0xf]  ;;  %v10605_v23 = vpop.f32.mrf.mxu0 }
 0x431   : > { %10876 = vmatpush.bf16.msra.mxu0 %v13747_v53  ;;  %10842 = vmatmul.bf16.vlgmr.msrb.gmra.mxu1 %v19758_v45  ;;  %v22202_v53 = vpop.f32.mrf.mxu2 }
 0x432   : > { %10890 = vmatpush.bf16.msra.mxu1 %v13939_v12  ;;  %10856 = vmatmul.bf16.vlgmr.msrb.gmra.mxu2 %v19756_v44  ;;  %23655 = vst [vmem:[#allocation118_spill] sm:$0xff] %v22202_v53  ;;  %v14275_v12 = vor.u32 %v18380_v19, %v14274_v63  ;;  %v18272_v19 = vld [vmem:[%s19566_s7 + $0xe34] sm:$0xf0]  ;;  %v18434_v53 = vld [vmem:[%s19566_s7 + $0x1344] sm:$0xf0] }
 0x433   : > { %10904 = vmatpush.bf16.msra.mxu2 %v14131_v5  ;;  %10870 = vmatmul.bf16.vlgmr.msrb.gmra.mxu3 %v19762_v48  ;;  %v18278_v5 = vld [vmem:[%s19566_s7 + $0xe64] sm:$0xf0] }
 0x434   : > { %10918 = vmatpush.bf16.msra.mxu3 %v14323_v16  ;;  %v14058_v16 = vld [vmem:[%s19566_s7 + $0xfd0] sm:$0xf]  ;;  %v13867_v7 = vor.u32 %v18278_v5, %v13866_v28  ;;  %v18218_v5 = vld [vmem:[%s19566_s7 + $0xc84] sm:$0xf0] }
 0x435   : > { %10877 = vmatpush.bf16.msra.mxu0 %v13723_v62  ;;  %v18374_v62 = vld [vmem:[%s19566_s7 + $0x1164] sm:$0xf0]  ;;  %v14059_v17 = vor.u32 %v18326_v0, %v14058_v16  ;;  %v13818_v16 = vld [vmem:[%s19566_s7 + $0xdf0] sm:$0xf] }
 0x436   : > { %10891 = vmatpush.bf16.msra.mxu1 %v13915_v9  ;;  %v10606_v9 = vadd.f32 %v10605_v23, %v22149_v27  ;;  %v14251_v1 = vor.u32 %v18374_v62, %v14250_v43  ;;  %v18320_v27 = vld [vmem:[%s19566_s7 + $0xfb4] sm:$0xf0]  ;;  %v18266_v43 = vld [vmem:[%s19566_s7 + $0xe04] sm:$0xf0]  ;;  %v14010_v62 = vld [vmem:[%s19566_s7 + $0xf70] sm:$0xf] }
 0x437   : > { %10905 = vmatpush.bf16.msra.mxu2 %v14107_v6  ;;  %v13675_v6 = vor.u32 %v18230_v3, %v13674_v35  ;;  %v14226_v35 = vld [vmem:[%s19566_s7 + $0x1120] sm:$0xf]  ;;  %v13843_v3 = vor.u32 %v18272_v19, %v13842_v4  ;;  %v13819_v4 = vor.u32 %v18266_v43, %v13818_v16  ;;  %v18206_v16 = vld [vmem:[%s19566_s7 + $0xc24] sm:$0xf0]  ;;  %v13770_v43 = vld [vmem:[%s19566_s7 + $0xd90] sm:$0xf] }
 0x438   : > { %10919 = vmatpush.bf16.msra.mxu3 %v14299_v50  ;;  %v13650_v50 = vld [vmem:[%s19566_s7 + $0xca0] sm:$0xf]  ;;  %v10620_v63 = vadd.f32 %v10619_v38, %v10606_v9  ;;  %v18314_v9 = vld [vmem:[%s19566_s7 + $0xf84] sm:$0xf0]  ;;  %v10647_v38 = vpop.f32.mrf.mxu3 }
 0x439   : > { %10878 = vmatpush.bf16.msra.mxu0 %v13699_v13  ;;  %v14034_v13 = vld [vmem:[%s19566_s7 + $0xfa0] sm:$0xf]  ;;  %v10633_v23 = vpop.f32.mrf.mxu2 }
 0x43a   : > { %10892 = vmatpush.bf16.msra.mxu1 %v13891_v31  ;;  %v18368_v31 = vld [vmem:[%s19566_s7 + $0x1134] sm:$0xf0]  ;;  %v14035_v28 = vor.u32 %v18320_v27, %v14034_v13  ;;  %v13602_v19 = vld [vmem:[%s19566_s7 + $0xc40] sm:$0xf] }
 0x43b   : > { %10906 = vmatpush.bf16.msra.mxu2 %v14083_v15  ;;  %v13651_v15 = vor.u32 %v18224_v8, %v13650_v50  ;;  %v14227_v0 = vor.u32 %v18368_v31, %v14226_v35  ;;  %v13794_v13 = vld [vmem:[%s19566_s7 + $0xdc0] sm:$0xf]  ;;  %v18260_v35 = vld [vmem:[%s19566_s7 + $0xdd4] sm:$0xf0] }
 0x43c   : > { %10920 = vmatpush.bf16.msra.mxu3 %v14275_v12  ;;  %v13626_v12 = vld [vmem:[%s19566_s7 + $0xc70] sm:$0xf]  ;;  %v13986_v31 = vld [vmem:[%s19566_s7 + $0xf40] sm:$0xf] }
 0x43d   : > { %10879 = vmatpush.bf16.msra.mxu0 %v13675_v6  ;;  %v10634_v6 = vadd.f32 %v10633_v23, %v10620_v63  ;;  %v13627_v50 = vor.u32 %v18218_v5, %v13626_v12  ;;  %v18212_v63 = vld [vmem:[%s19566_s7 + $0xc54] sm:$0xf0]  ;;  %v13578_v5 = vld [vmem:[%s19566_s7 + $0xc10] sm:$0xf] }
 0x43e   : > { %10893 = vmatpush.bf16.msra.mxu1 %v13867_v7  ;;  %v14202_v7 = vld [vmem:[%s19566_s7 + $0x10f0] sm:$0xf]  ;;  %v13603_v12 = vor.u32 %v18212_v63, %v13602_v19  ;;  %v18440_v19 = vld [vmem:[%s19566_s7 + $0x1374] sm:$0xf0]  ;;  %v14706_v63 = vld [vmem:[%s19566_s7 + $0x14e0] sm:$0xf] }
 0x43f   : > { %10907 = vmatpush.bf16.msra.mxu2 %v14059_v17  ;;  %v18362_v17 = vld [vmem:[%s19566_s7 + $0x1104] sm:$0xf0]  ;;  %v22228_v8 = vadd.f32 %v10647_v38, %v10634_v6 }
 0x440   : > { %10921 = vmatpush.bf16.msra.mxu3 %v14251_v1  ;;  %v14011_v1 = vor.u32 %v18314_v9, %v14010_v62  ;;  %v14203_v27 = vor.u32 %v18362_v17, %v14202_v7  ;;  %v18254_v62 = vld [vmem:[%s19566_s7 + $0xda4] sm:$0xf0]  ;;  %v13962_v9 = vld [vmem:[%s19566_s7 + $0xf10] sm:$0xf] }
 0x441   : > { %10880 = vmatpush.bf16.msra.mxu0 %v13651_v15  ;;  %v18308_v15 = vld [vmem:[%s19566_s7 + $0xf54] sm:$0xf0]  ;;  %v18302_v38 = vld [vmem:[%s19566_s7 + $0xf24] sm:$0xf0]  ;;  %v14154_v7 = vld [vmem:[%s19566_s7 + $0x1090] sm:$0xf] }
 0x442   : > { %10894 = vmatpush.bf16.msra.mxu1 %v13843_v3  ;;  %v14178_v3 = vld [vmem:[%s19566_s7 + $0x10c0] sm:$0xf]  ;;  %v13987_v23 = vor.u32 %v18308_v15, %v13986_v31  ;;  %v18350_v17 = vld [vmem:[%s19566_s7 + $0x10a4] sm:$0xf0]  ;;  %v13963_v31 = vor.u32 %v18302_v38, %v13962_v9  ;;  %v15066_v9 = vld [vmem:[%s19566_s7 + $0x17b0] sm:$0xf]  ;;  %v22264_v38 = vpop.f32.mrf.mxu1 }
 0x443   : > { %10908 = vmatpush.bf16.msra.mxu2 %v14035_v28  ;;  %v18356_v28 = vld [vmem:[%s19566_s7 + $0x10d4] sm:$0xf0]  ;;  %v15090_v15 = vld [vmem:[%s19566_s7 + $0x17e0] sm:$0xf]  ;;  %23658 = vst [vmem:[#allocation121_spill] sm:$0xff] %v22264_v38 }
 0x444   : > { %10922 = vmatpush.bf16.msra.mxu3 %v14227_v0  ;;  %v13795_v0 = vor.u32 %v18260_v35, %v13794_v13  ;;  %v14179_v6 = vor.u32 %v18356_v28, %v14178_v3  ;;  %v14898_v13 = vld [vmem:[%s19566_s7 + $0x1660] sm:$0xf]  ;;  %v18536_v35 = vld [vmem:[%s19566_s7 + $0x1674] sm:$0xf0]  ;;  %v14155_v28 = vor.u32 %v18350_v17, %v14154_v7  ;;  %v14491_v7 = vor.u32 %v18434_v53, %v14490_v10  ;;  %v15450_v38 = vld [vmem:[%s19566_s7 + $0x1ab0] sm:$0xf] }
 0x445   : > { %10881 = vmatpush.bf16.msra.mxu0 %v13627_v50  ;;  %v14514_v50 = vld [vmem:[%s19566_s7 + $0x1360] sm:$0xf]  ;;  %v18584_v3 = vld [vmem:[%s19566_s7 + $0x17f4] sm:$0xf0]  ;;  %v14683_v17 = vor.u32 %v18482_v60, %v14682_v55 }
 0x446   : > { %10895 = vmatpush.bf16.msra.mxu1 %v13819_v4  ;;  %v13579_v4 = vor.u32 %v18206_v16, %v13578_v5  ;;  %v14899_v16 = vor.u32 %v18536_v35, %v14898_v13  ;;  %v18476_v13 = vld [vmem:[%s19566_s7 + $0x1494] sm:$0xf0]  ;;  %v14850_v35 = vld [vmem:[%s19566_s7 + $0x1600] sm:$0xf] }
 0x447   : > { %10909 = vmatpush.bf16.msra.mxu2 %v14011_v1  ;;  %v18488_v1 = vld [vmem:[%s19566_s7 + $0x14f4] sm:$0xf0]  ;;  %v15042_v60 = vld [vmem:[%s19566_s7 + $0x1780] sm:$0xf] }
 0x448   : > { %10923 = vmatpush.bf16.msra.mxu3 %v14203_v27  ;;  %v13771_v27 = vor.u32 %v18254_v62, %v13770_v43  ;;  %v14707_v5 = vor.u32 %v18488_v1, %v14706_v63  ;;  %v18530_v43 = vld [vmem:[%s19566_s7 + $0x1644] sm:$0xf0]  ;;  %v22260_v62 = vpop.f32.mrf.mxu0  ;;  %v18428_v63 = vld [vmem:[%s19566_s7 + $0x1314] sm:$0xf0] }
 0x449   : > { %10882 = vmatpush.bf16.msra.mxu0 %v13603_v12  ;;  %v14515_v12 = vor.u32 %v18440_v19, %v14514_v50  ;;  %23657 = vst [vmem:[#allocation120_spill] sm:$0xff] %v22260_v62  ;;  %v14466_v19 = vld [vmem:[%s19566_s7 + $0x1300] sm:$0xf]  ;;  %v18572_v55 = vld [vmem:[%s19566_s7 + $0x1794] sm:$0xf0] }
 0x44a   : > { %10896 = vmatpush.bf16.msra.mxu1 %v13795_v0  ;;  %v15091_v0 = vor.u32 %v18584_v3, %v15090_v15  ;;  %v14467_v53 = vor.u32 %v18428_v63, %v14466_v19  ;;  %v14442_v15 = vld [vmem:[%s19566_s7 + $0x12d0] sm:$0xf]  ;;  %v18422_v3 = vld [vmem:[%s19566_s7 + $0x12e4] sm:$0xf0] }
 0x44b   : > { %10910 = vmatpush.bf16.msra.mxu2 %v13987_v23  ;;  %v14874_v23 = vld [vmem:[%s19566_s7 + $0x1630] sm:$0xf]  ;;  %v18674_v62 = vld [vmem:[%s19566_s7 + $0x1ac4] sm:$0xf0] }
 0x44c   : > { %10924 = vmatpush.bf16.msra.mxu3 %v14179_v6  ;;  %v18578_v6 = vld [vmem:[%s19566_s7 + $0x17c4] sm:$0xf0]  ;;  %v14875_v50 = vor.u32 %v18530_v43, %v14874_v23  ;;  %v22286_v43 = vpop.f32.mrf.mxu3 }
 0x44d   : > { %10883 = vmatpush.bf16.msra.mxu0 %v13579_v4  ;;  %v14658_v4 = vld [vmem:[%s19566_s7 + $0x1480] sm:$0xf]  ;;  %v15067_v1 = vor.u32 %v18578_v6, %v15066_v9  ;;  %v18518_v23 = vld [vmem:[%s19566_s7 + $0x15e4] sm:$0xf0]  ;;  %23660 = vst [vmem:[#allocation123_spill] sm:$0xff] %v22286_v43 }
 0x44e   : > { %10897 = vmatpush.bf16.msra.mxu1 %v13771_v27  ;;  %v18524_v27 = vld [vmem:[%s19566_s7 + $0x1614] sm:$0xf0]  ;;  %v14659_v10 = vor.u32 %v18476_v13, %v14658_v4  ;;  %v15018_v6 = vld [vmem:[%s19566_s7 + $0x1750] sm:$0xf]  ;;  %v10675_v19 = vpop.f32.mrf.mxu1 }
 0x44f   : > { %10911 = vmatpush.bf16.msra.mxu2 %v13963_v31  ;;  %v14851_v31 = vor.u32 %v18524_v27, %v14850_v35  ;;  %v18416_v13 = vld [vmem:[%s19566_s7 + $0x12b4] sm:$0xf0]  ;;  %v14610_v35 = vld [vmem:[%s19566_s7 + $0x1420] sm:$0xf]  ;;  %v15258_v43 = vld [vmem:[%s19566_s7 + $0x1930] sm:$0xf] }
 0x450   : > { %10925 = vmatpush.bf16.msra.mxu3 %v14155_v28  ;;  %10884 = vmatmul.bf16.vlgmr.msra.gmra.mxu0 %v19835_v32  ;;  %v14634_v28 = vld [vmem:[%s19566_s7 + $0x1450] sm:$0xf]  ;;  %v10661_v9 = vpop.f32.mrf.mxu0 }
 0x451   : > { %10932 = vmatpush.bf16.msrb.mxu0 %v14515_v12  ;;  %10898 = vmatmul.bf16.vlgmr.msra.gmra.mxu1 %v19842_v37  ;;  %v22281_v12 = vpop.f32.mrf.mxu2 }
 0x452   : > { %10946 = vmatpush.bf16.msrb.mxu1 %v14707_v5  ;;  %10912 = vmatmul.bf16.vlgmr.msra.gmra.mxu2 %v19840_v36  ;;  %23659 = vst [vmem:[#allocation122_spill] sm:$0xff] %v22281_v12  ;;  %v15043_v5 = vor.u32 %v18572_v55, %v15042_v60  ;;  %v18464_v55 = vld [vmem:[%s19566_s7 + $0x1434] sm:$0xf0]  ;;  %v18626_v12 = vld [vmem:[%s19566_s7 + $0x1944] sm:$0xf0] }
 0x453   : > { %10960 = vmatpush.bf16.msrb.mxu2 %v14899_v16  ;;  %10926 = vmatmul.bf16.vlgmr.msra.gmra.mxu3 %v19846_v41  ;;  %v18470_v16 = vld [vmem:[%s19566_s7 + $0x1464] sm:$0xf0] }
 0x454   : > { %10974 = vmatpush.bf16.msrb.mxu3 %v15091_v0  ;;  %v14826_v0 = vld [vmem:[%s19566_s7 + $0x15d0] sm:$0xf]  ;;  %v14635_v63 = vor.u32 %v18470_v16, %v14634_v28  ;;  %v18410_v16 = vld [vmem:[%s19566_s7 + $0x1284] sm:$0xf0] }
 0x455   : > { %10933 = vmatpush.bf16.msrb.mxu0 %v14491_v7  ;;  %v18566_v7 = vld [vmem:[%s19566_s7 + $0x1764] sm:$0xf0]  ;;  %v14827_v4 = vor.u32 %v18518_v23, %v14826_v0  ;;  %v14586_v0 = vld [vmem:[%s19566_s7 + $0x13f0] sm:$0xf] }
 0x456   : > { %10947 = vmatpush.bf16.msrb.mxu1 %v14683_v17  ;;  %v10662_v17 = vadd.f32 %v10661_v9, %v22228_v8  ;;  %v15019_v27 = vor.u32 %v18566_v7, %v15018_v6  ;;  %v18512_v8 = vld [vmem:[%s19566_s7 + $0x15b4] sm:$0xf0]  ;;  %v18458_v6 = vld [vmem:[%s19566_s7 + $0x1404] sm:$0xf0]  ;;  %v14778_v7 = vld [vmem:[%s19566_s7 + $0x1570] sm:$0xf] }
 0x457   : > { %10961 = vmatpush.bf16.msrb.mxu2 %v14875_v50  ;;  %v14443_v50 = vor.u32 %v18422_v3, %v14442_v15  ;;  %v14994_v15 = vld [vmem:[%s19566_s7 + $0x1720] sm:$0xf]  ;;  %v14611_v3 = vor.u32 %v18464_v55, %v14610_v35  ;;  %v14587_v35 = vor.u32 %v18458_v6, %v14586_v0  ;;  %v18398_v0 = vld [vmem:[%s19566_s7 + $0x1224] sm:$0xf0]  ;;  %v14538_v6 = vld [vmem:[%s19566_s7 + $0x1390] sm:$0xf] }
 0x458   : > { %10975 = vmatpush.bf16.msrb.mxu3 %v15067_v1  ;;  %v14418_v1 = vld [vmem:[%s19566_s7 + $0x12a0] sm:$0xf]  ;;  %v10676_v60 = vadd.f32 %v10675_v19, %v10662_v17  ;;  %v18506_v17 = vld [vmem:[%s19566_s7 + $0x1584] sm:$0xf0]  ;;  %v10703_v19 = vpop.f32.mrf.mxu3 }
 0x459   : > { %10934 = vmatpush.bf16.msrb.mxu0 %v14467_v53  ;;  %v14802_v53 = vld [vmem:[%s19566_s7 + $0x15a0] sm:$0xf]  ;;  %v10689_v9 = vpop.f32.mrf.mxu2 }
 0x45a   : > { %10948 = vmatpush.bf16.msrb.mxu1 %v14659_v10  ;;  %v18560_v10 = vld [vmem:[%s19566_s7 + $0x1734] sm:$0xf0]  ;;  %v14803_v28 = vor.u32 %v18512_v8, %v14802_v53  ;;  %v14370_v55 = vld [vmem:[%s19566_s7 + $0x1240] sm:$0xf] }
 0x45b   : > { %10962 = vmatpush.bf16.msrb.mxu2 %v14851_v31  ;;  %v14419_v31 = vor.u32 %v18416_v13, %v14418_v1  ;;  %v14995_v23 = vor.u32 %v18560_v10, %v14994_v15  ;;  %v14562_v53 = vld [vmem:[%s19566_s7 + $0x13c0] sm:$0xf]  ;;  %v18452_v15 = vld [vmem:[%s19566_s7 + $0x13d4] sm:$0xf0] }
 0x45c   : > { %10976 = vmatpush.bf16.msrb.mxu3 %v15043_v5  ;;  %v14394_v5 = vld [vmem:[%s19566_s7 + $0x1270] sm:$0xf]  ;;  %v14754_v10 = vld [vmem:[%s19566_s7 + $0x1540] sm:$0xf] }
 0x45d   : > { %10935 = vmatpush.bf16.msrb.mxu0 %v14443_v50  ;;  %v10690_v50 = vadd.f32 %v10689_v9, %v10676_v60  ;;  %v14395_v1 = vor.u32 %v18410_v16, %v14394_v5  ;;  %v18404_v60 = vld [vmem:[%s19566_s7 + $0x1254] sm:$0xf0]  ;;  %v14346_v16 = vld [vmem:[%s19566_s7 + $0x1210] sm:$0xf] }
 0x45e   : > { %10949 = vmatpush.bf16.msrb.mxu1 %v14635_v63  ;;  %v14970_v63 = vld [vmem:[%s19566_s7 + $0x16f0] sm:$0xf]  ;;  %v14371_v5 = vor.u32 %v18404_v60, %v14370_v55  ;;  %v18632_v55 = vld [vmem:[%s19566_s7 + $0x1974] sm:$0xf0]  ;;  %v15474_v60 = vld [vmem:[%s19566_s7 + $0x1ae0] sm:$0xf] }
 0x45f   : > { %10963 = vmatpush.bf16.msrb.mxu2 %v14827_v4  ;;  %v18554_v4 = vld [vmem:[%s19566_s7 + $0x1704] sm:$0xf0]  ;;  %v22307_v13 = vadd.f32 %v10703_v19, %v10690_v50 }
 0x460   : > { %10977 = vmatpush.bf16.msrb.mxu3 %v15019_v27  ;;  %v14779_v27 = vor.u32 %v18506_v17, %v14778_v7  ;;  %v14971_v8 = vor.u32 %v18554_v4, %v14970_v63  ;;  %v18446_v7 = vld [vmem:[%s19566_s7 + $0x13a4] sm:$0xf0]  ;;  %v14730_v17 = vld [vmem:[%s19566_s7 + $0x1510] sm:$0xf] }
 0x461   : > { %10936 = vmatpush.bf16.msrb.mxu0 %v14419_v31  ;;  %v18500_v31 = vld [vmem:[%s19566_s7 + $0x1554] sm:$0xf0]  ;;  %v18494_v19 = vld [vmem:[%s19566_s7 + $0x1524] sm:$0xf0]  ;;  %v14922_v63 = vld [vmem:[%s19566_s7 + $0x1690] sm:$0xf] }
 0x462   : > { %10950 = vmatpush.bf16.msrb.mxu1 %v14611_v3  ;;  %v14946_v3 = vld [vmem:[%s19566_s7 + $0x16c0] sm:$0xf]  ;;  %v14755_v9 = vor.u32 %v18500_v31, %v14754_v10  ;;  %v18542_v4 = vld [vmem:[%s19566_s7 + $0x16a4] sm:$0xf0]  ;;  %v14731_v10 = vor.u32 %v18494_v19, %v14730_v17  ;;  %v15834_v17 = vld [vmem:[%s19566_s7 + $0x1db0] sm:$0xf]  ;;  %v22343_v19 = vpop.f32.mrf.mxu1 }
 0x463   : > { %10964 = vmatpush.bf16.msrb.mxu2 %v14803_v28  ;;  %v18548_v28 = vld [vmem:[%s19566_s7 + $0x16d4] sm:$0xf0]  ;;  %v15858_v31 = vld [vmem:[%s19566_s7 + $0x1de0] sm:$0xf]  ;;  %23662 = vst [vmem:[#allocation125_spill] sm:$0xff] %v22343_v19 }
 0x464   : > { %10978 = vmatpush.bf16.msrb.mxu3 %v14995_v23  ;;  %v14563_v23 = vor.u32 %v18452_v15, %v14562_v53  ;;  %v14947_v50 = vor.u32 %v18548_v28, %v14946_v3  ;;  %v15666_v53 = vld [vmem:[%s19566_s7 + $0x1c60] sm:$0xf]  ;;  %v18728_v15 = vld [vmem:[%s19566_s7 + $0x1c74] sm:$0xf0]  ;;  %v14923_v28 = vor.u32 %v18542_v4, %v14922_v63  ;;  %v15259_v63 = vor.u32 %v18626_v12, %v15258_v43  ;;  %v12812_v19 = vld [vmem:[%s19566_s7 + $0x628] sm:$0xf0] }
 0x465   : > { %10937 = vmatpush.bf16.msrb.mxu0 %v14395_v1  ;;  %v15282_v1 = vld [vmem:[%s19566_s7 + $0x1960] sm:$0xf]  ;;  %v18776_v3 = vld [vmem:[%s19566_s7 + $0x1df4] sm:$0xf0]  ;;  %v15451_v4 = vor.u32 %v18674_v62, %v15450_v38 }
 0x466   : > { %10951 = vmatpush.bf16.msrb.mxu1 %v14587_v35  ;;  %v14347_v35 = vor.u32 %v18398_v0, %v14346_v16  ;;  %v15667_v0 = vor.u32 %v18728_v15, %v15666_v53  ;;  %v18668_v53 = vld [vmem:[%s19566_s7 + $0x1a94] sm:$0xf0]  ;;  %v15618_v15 = vld [vmem:[%s19566_s7 + $0x1c00] sm:$0xf] }
 0x467   : > { %10965 = vmatpush.bf16.msrb.mxu2 %v14779_v27  ;;  %v18680_v27 = vld [vmem:[%s19566_s7 + $0x1af4] sm:$0xf0]  ;;  %v15810_v62 = vld [vmem:[%s19566_s7 + $0x1d80] sm:$0xf] }
 0x468   : > { %10979 = vmatpush.bf16.msrb.mxu3 %v14971_v8  ;;  %v14539_v8 = vor.u32 %v18446_v7, %v14538_v6  ;;  %v15475_v16 = vor.u32 %v18680_v27, %v15474_v60  ;;  %v18722_v6 = vld [vmem:[%s19566_s7 + $0x1c44] sm:$0xf0]  ;;  %v22339_v7 = vpop.f32.mrf.mxu0  ;;  %v18620_v60 = vld [vmem:[%s19566_s7 + $0x1914] sm:$0xf0] }
 0x469   : > { %10938 = vmatpush.bf16.msrb.mxu0 %v14371_v5  ;;  %v15283_v5 = vor.u32 %v18632_v55, %v15282_v1  ;;  %23661 = vst [vmem:[#allocation124_spill] sm:$0xff] %v22339_v7  ;;  %v15234_v55 = vld [vmem:[%s19566_s7 + $0x1900] sm:$0xf]  ;;  %v18764_v38 = vld [vmem:[%s19566_s7 + $0x1d94] sm:$0xf0] }
 0x46a   : > { %10952 = vmatpush.bf16.msrb.mxu1 %v14563_v23  ;;  %v15859_v23 = vor.u32 %v18776_v3, %v15858_v31  ;;  %v15235_v12 = vor.u32 %v18620_v60, %v15234_v55  ;;  %v15210_v31 = vld [vmem:[%s19566_s7 + $0x18d0] sm:$0xf]  ;;  %v18614_v3 = vld [vmem:[%s19566_s7 + $0x18e4] sm:$0xf0]  ;;  %v13340_v7 = vld [vmem:[%s19566_s7 + $0xa48] sm:$0xf0] }
 0x46b   : > { %10966 = vmatpush.bf16.msrb.mxu2 %v14755_v9  ;;  %v15642_v9 = vld [vmem:[%s19566_s7 + $0x1c30] sm:$0xf] }
 0x46c   : > { %10980 = vmatpush.bf16.msrb.mxu3 %v14947_v50  ;;  %v18770_v50 = vld [vmem:[%s19566_s7 + $0x1dc4] sm:$0xf0]  ;;  %v15643_v1 = vor.u32 %v18722_v6, %v15642_v9  ;;  %v22365_v6 = vpop.f32.mrf.mxu3 }
 0x46d   : > { %10939 = vmatpush.bf16.msrb.mxu0 %v14347_v35  ;;  %v15426_v35 = vld [vmem:[%s19566_s7 + $0x1a80] sm:$0xf]  ;;  %v15835_v27 = vor.u32 %v18770_v50, %v15834_v17  ;;  %v18710_v9 = vld [vmem:[%s19566_s7 + $0x1be4] sm:$0xf0]  ;;  %23664 = vst [vmem:[#allocation127_spill] sm:$0xff] %v22365_v6 }
 0x46e   : > { %10953 = vmatpush.bf16.msrb.mxu1 %v14539_v8  ;;  %v18716_v8 = vld [vmem:[%s19566_s7 + $0x1c14] sm:$0xf0]  ;;  %v15427_v43 = vor.u32 %v18668_v53, %v15426_v35  ;;  %v15786_v50 = vld [vmem:[%s19566_s7 + $0x1d50] sm:$0xf]  ;;  %v10731_v55 = vpop.f32.mrf.mxu1 }
 0x46f   : > { %10967 = vmatpush.bf16.msrb.mxu2 %v14731_v10  ;;  %v15619_v10 = vor.u32 %v18716_v8, %v15618_v15  ;;  %v18608_v53 = vld [vmem:[%s19566_s7 + $0x18b4] sm:$0xf0]  ;;  %v15378_v15 = vld [vmem:[%s19566_s7 + $0x1a20] sm:$0xf]  ;;  %v16218_v6 = vld [vmem:[%s19566_s7 + $0x20b0] sm:$0xf] }
 0x470   : > { %10981 = vmatpush.bf16.msrb.mxu3 %v14923_v28  ;;  %10940 = vmatmul.bf16.vlgmr.msrb.gmra.mxu0 %v19919_v33  ;;  %v15402_v28 = vld [vmem:[%s19566_s7 + $0x1a50] sm:$0xf]  ;;  %v10717_v17 = vpop.f32.mrf.mxu0 }
 0x471   : > { %10988 = vmatpush.bf16.msra.mxu0 %v15283_v5  ;;  %10954 = vmatmul.bf16.vlgmr.msrb.gmra.mxu1 %v19926_v42  ;;  %v22360_v5 = vpop.f32.mrf.mxu2 }
 0x472   : > { %11002 = vmatpush.bf16.msra.mxu1 %v15475_v16  ;;  %10968 = vmatmul.bf16.vlgmr.msrb.gmra.mxu2 %v19924_v39  ;;  %23663 = vst [vmem:[#allocation126_spill] sm:$0xff] %v22360_v5  ;;  %v15811_v16 = vor.u32 %v18764_v38, %v15810_v62  ;;  %v18656_v38 = vld [vmem:[%s19566_s7 + $0x1a34] sm:$0xf0]  ;;  %v12764_v5 = vld [vmem:[%s19566_s7 + $0x5c8] sm:$0xf0] }
 0x473   : > { %11016 = vmatpush.bf16.msra.mxu2 %v15667_v0  ;;  %10982 = vmatmul.bf16.vlgmr.msrb.gmra.mxu3 %v19930_v47  ;;  %v18662_v0 = vld [vmem:[%s19566_s7 + $0x1a64] sm:$0xf0] }
 0x474   : > { %11030 = vmatpush.bf16.msra.mxu3 %v15859_v23  ;;  %v15594_v23 = vld [vmem:[%s19566_s7 + $0x1bd0] sm:$0xf]  ;;  %v15403_v60 = vor.u32 %v18662_v0, %v15402_v28  ;;  %v18602_v0 = vld [vmem:[%s19566_s7 + $0x1884] sm:$0xf0] }
 0x475   : > { %10989 = vmatpush.bf16.msra.mxu0 %v15259_v63  ;;  %v18758_v63 = vld [vmem:[%s19566_s7 + $0x1d64] sm:$0xf0]  ;;  %v15595_v35 = vor.u32 %v18710_v9, %v15594_v23  ;;  %v15354_v23 = vld [vmem:[%s19566_s7 + $0x19f0] sm:$0xf] }
 0x476   : > { %11003 = vmatpush.bf16.msra.mxu1 %v15451_v4  ;;  %v10718_v4 = vadd.f32 %v10717_v17, %v22307_v13  ;;  %v15787_v8 = vor.u32 %v18758_v63, %v15786_v50  ;;  %v18704_v13 = vld [vmem:[%s19566_s7 + $0x1bb4] sm:$0xf0]  ;;  %v18650_v50 = vld [vmem:[%s19566_s7 + $0x1a04] sm:$0xf0]  ;;  %v15546_v63 = vld [vmem:[%s19566_s7 + $0x1b70] sm:$0xf] }
 0x477   : > { %11017 = vmatpush.bf16.msra.mxu2 %v15643_v1  ;;  %v15211_v1 = vor.u32 %v18614_v3, %v15210_v31  ;;  %v15762_v31 = vld [vmem:[%s19566_s7 + $0x1d20] sm:$0xf]  ;;  %v15379_v3 = vor.u32 %v18656_v38, %v15378_v15  ;;  %v15355_v15 = vor.u32 %v18650_v50, %v15354_v23 }
 0x478   : > { %11031 = vmatpush.bf16.msra.mxu3 %v15835_v27  ;;  %v15186_v27 = vld [vmem:[%s19566_s7 + $0x18a0] sm:$0xf]  ;;  %v10732_v62 = vadd.f32 %v10731_v55, %v10718_v4  ;;  %v18698_v4 = vld [vmem:[%s19566_s7 + $0x1b84] sm:$0xf0]  ;;  %v10759_v55 = vpop.f32.mrf.mxu3 }
 0x479   : > { %10990 = vmatpush.bf16.msra.mxu0 %v15235_v12  ;;  %v15570_v12 = vld [vmem:[%s19566_s7 + $0x1ba0] sm:$0xf]  ;;  %v10745_v17 = vpop.f32.mrf.mxu2 }
 0x47a   : > { %11004 = vmatpush.bf16.msra.mxu1 %v15427_v43  ;;  %v18752_v43 = vld [vmem:[%s19566_s7 + $0x1d34] sm:$0xf0]  ;;  %v15571_v28 = vor.u32 %v18704_v13, %v15570_v12  ;;  %v15138_v38 = vld [vmem:[%s19566_s7 + $0x1840] sm:$0xf] }
 0x47b   : > { %11018 = vmatpush.bf16.msra.mxu2 %v15619_v10  ;;  %v15187_v10 = vor.u32 %v18608_v53, %v15186_v27  ;;  %v15763_v9 = vor.u32 %v18752_v43, %v15762_v31  ;;  %v18596_v12 = vld [vmem:[%s19566_s7 + $0x1854] sm:$0xf0]  ;;  %v15522_v43 = vld [vmem:[%s19566_s7 + $0x1b40] sm:$0xf] }
 0x47c   : > { %11032 = vmatpush.bf16.msra.mxu3 %v15811_v16  ;;  %v15162_v16 = vld [vmem:[%s19566_s7 + $0x1870] sm:$0xf]  ;;  %v18644_v31 = vld [vmem:[%s19566_s7 + $0x19d4] sm:$0xf0]  ;;  %v15139_v23 = vor.u32 %v18596_v12, %v15138_v38  ;;  %v16050_v38 = vld [vmem:[%s19566_s7 + $0x1f60] sm:$0xf] }
 0x47d   : > { %10991 = vmatpush.bf16.msra.mxu0 %v15211_v1  ;;  %v10746_v1 = vadd.f32 %v10745_v17, %v10732_v62  ;;  %v15163_v27 = vor.u32 %v18602_v0, %v15162_v16  ;;  %v15330_v62 = vld [vmem:[%s19566_s7 + $0x19c0] sm:$0xf]  ;;  %v18740_v0 = vld [vmem:[%s19566_s7 + $0x1cd4] sm:$0xf0]  ;;  %v18590_v17 = vld [vmem:[%s19566_s7 + $0x1824] sm:$0xf0] }
 0x47e   : > { %11005 = vmatpush.bf16.msra.mxu1 %v15403_v60  ;;  %v15738_v60 = vld [vmem:[%s19566_s7 + $0x1cf0] sm:$0xf]  ;;  %v15714_v16 = vld [vmem:[%s19566_s7 + $0x1cc0] sm:$0xf]  ;;  %v18824_v12 = vld [vmem:[%s19566_s7 + $0x1f74] sm:$0xf0] }
 0x47f   : > { %11019 = vmatpush.bf16.msra.mxu2 %v15595_v35  ;;  %v18746_v35 = vld [vmem:[%s19566_s7 + $0x1d04] sm:$0xf0]  ;;  %v10760_v53 = vadd.f32 %v10759_v55, %v10746_v1  ;;  %v15498_v55 = vld [vmem:[%s19566_s7 + $0x1b10] sm:$0xf] }
 0x480   : > { %11033 = vmatpush.bf16.msra.mxu3 %v15787_v8  ;;  %v15547_v8 = vor.u32 %v18698_v4, %v15546_v63  ;;  %v15739_v13 = vor.u32 %v18746_v35, %v15738_v60  ;;  %v15331_v63 = vor.u32 %v18644_v31, %v15330_v62  ;;  %v15306_v4 = vld [vmem:[%s19566_s7 + $0x1990] sm:$0xf]  ;;  %v18638_v1 = vld [vmem:[%s19566_s7 + $0x19a4] sm:$0xf0]  ;;  %v15715_v60 = vor.u32 %v18740_v0, %v15714_v16  ;;  %v16434_v62 = vld [vmem:[%s19566_s7 + $0x2260] sm:$0xf] }
 0x481   : > { %10992 = vmatpush.bf16.msra.mxu0 %v15187_v10  ;;  %v18692_v10 = vld [vmem:[%s19566_s7 + $0x1b54] sm:$0xf0]  ;;  %v18686_v35 = vld [vmem:[%s19566_s7 + $0x1b24] sm:$0xf0]  ;;  %v16051_v0 = vor.u32 %v18824_v12, %v16050_v38  ;;  %v16002_v38 = vld [vmem:[%s19566_s7 + $0x1f00] sm:$0xf] }
 0x482   : > { %11006 = vmatpush.bf16.msra.mxu1 %v15379_v3  ;;  %v11604_v3 = vmul.f32 %v20632_v21, %v20632_v21  ;;  %v15523_v21 = vor.u32 %v18692_v10, %v15522_v43  ;;  %v18920_v31 = vld [vmem:[%s19566_s7 + $0x2274] sm:$0xf0]  ;;  %v15499_v43 = vor.u32 %v18686_v35, %v15498_v55  ;;  %v16626_v10 = vld [vmem:[%s19566_s7 + $0x23e0] sm:$0xf]  ;;  %v16602_v55 = vld [vmem:[%s19566_s7 + $0x23b0] sm:$0xf] }
 0x483   : > { %11020 = vmatpush.bf16.msra.mxu2 %v15571_v28  ;;  %v11610_v28 = vmul.f32 %v10760_v53, %v10760_v53  ;;  %v18734_v53 = vld [vmem:[%s19566_s7 + $0x1ca4] sm:$0xf0]  ;;  %v18812_v12 = vld [vmem:[%s19566_s7 + $0x1f14] sm:$0xf0] }
 0x484   : > { %11034 = vmatpush.bf16.msra.mxu3 %v15763_v9  ;;  %v15114_v9 = vld [vmem:[%s19566_s7 + $0x1810] sm:$0xf] }
 0x485   : > { %10993 = vmatpush.bf16.msra.mxu0 %v15163_v27  ;;  %v22398_v50 = vadd.f32 %v11610_v28, %v11604_v3  ;;  %v15690_v27 = vld [vmem:[%s19566_s7 + $0x1c90] sm:$0xf]  ;;  %v16242_v3 = vld [vmem:[%s19566_s7 + $0x20e0] sm:$0xf]  ;;  %v18968_v28 = vld [vmem:[%s19566_s7 + $0x23f4] sm:$0xf0] }
 0x486   : > { %11007 = vmatpush.bf16.msra.mxu1 %v15355_v15  ;;  %v15115_v15 = vor.u32 %v18590_v17, %v15114_v9  ;;  %v15691_v16 = vor.u32 %v18734_v53, %v15690_v27  ;;  %v16435_v9 = vor.u32 %v18920_v31, %v16434_v62  ;;  %v16026_v17 = vld [vmem:[%s19566_s7 + $0x1f30] sm:$0xf]  ;;  %v16386_v62 = vld [vmem:[%s19566_s7 + $0x2200] sm:$0xf]  ;;  %v18908_v31 = vld [vmem:[%s19566_s7 + $0x2214] sm:$0xf0] }
 0x487   : > { %23665 = vst [vmem:[#allocation128_spill] sm:$0xff] %v22398_v50  ;;  %11021 = vmatpush.bf16.msra.mxu2 %v15547_v8  ;;  %v18872_v8 = vld [vmem:[%s19566_s7 + $0x20f4] sm:$0xf0]  ;;  %v18818_v50 = vld [vmem:[%s19566_s7 + $0x1f44] sm:$0xf0] }
 0x488   : > { %11035 = vmatpush.bf16.msra.mxu3 %v15739_v13  ;;  %v15307_v13 = vor.u32 %v18638_v1, %v15306_v4  ;;  %v16410_v4 = vld [vmem:[%s19566_s7 + $0x2230] sm:$0xf]  ;;  %v18914_v1 = vld [vmem:[%s19566_s7 + $0x2244] sm:$0xf0]  ;;  %v16027_v35 = vor.u32 %v18818_v50, %v16026_v17  ;;  %v18956_v50 = vld [vmem:[%s19566_s7 + $0x2394] sm:$0xf0] }
 0x489   : > { %10994 = vmatpush.bf16.msra.mxu0 %v15139_v23  ;;  %v16243_v23 = vor.u32 %v18872_v8, %v16242_v3  ;;  %v16411_v53 = vor.u32 %v18914_v1, %v16410_v4  ;;  %v16194_v3 = vld [vmem:[%s19566_s7 + $0x2080] sm:$0xf]  ;;  %v18860_v8 = vld [vmem:[%s19566_s7 + $0x2094] sm:$0xf0]  ;;  %v16362_v17 = vld [vmem:[%s19566_s7 + $0x21d0] sm:$0xf] }
 0x48a   : > { %11008 = vmatpush.bf16.msra.mxu1 %v15331_v63  ;;  %v16627_v63 = vor.u32 %v18968_v28, %v16626_v10  ;;  %v16387_v10 = vor.u32 %v18908_v31, %v16386_v62  ;;  %v15978_v28 = vld [vmem:[%s19566_s7 + $0x1ed0] sm:$0xf]  ;;  %v18950_v4 = vld [vmem:[%s19566_s7 + $0x2364] sm:$0xf0]  ;;  %v18944_v62 = vld [vmem:[%s19566_s7 + $0x2334] sm:$0xf0] }
 0x48b   : > { %11022 = vmatpush.bf16.msra.mxu2 %v15523_v21  ;;  %v18866_v21 = vld [vmem:[%s19566_s7 + $0x20c4] sm:$0xf0] }
 0x48c   : > { %11036 = vmatpush.bf16.msra.mxu3 %v15715_v60  ;;  %v18962_v60 = vld [vmem:[%s19566_s7 + $0x23c4] sm:$0xf0]  ;;  %v16219_v27 = vor.u32 %v18866_v21, %v16218_v6  ;;  %v16578_v6 = vld [vmem:[%s19566_s7 + $0x2380] sm:$0xf]  ;;  %v16554_v21 = vld [vmem:[%s19566_s7 + $0x2350] sm:$0xf] }
 0x48d   : > { %10995 = vmatpush.bf16.msra.mxu0 %v15115_v15  ;;  %v16603_v15 = vor.u32 %v18962_v60, %v16602_v55 }
 0x48e   : > { %11009 = vmatpush.bf16.msra.mxu1 %v15307_v13  ;;  %v16003_v13 = vor.u32 %v18812_v12, %v16002_v38  ;;  %v16555_v38 = vor.u32 %v18950_v4, %v16554_v21  ;;  %v18848_v12 = vld [vmem:[%s19566_s7 + $0x2034] sm:$0xf0] }
 0x48f   : > { %11023 = vmatpush.bf16.msra.mxu2 %v15499_v43  ;;  %v16195_v43 = vor.u32 %v18860_v8, %v16194_v3  ;;  %v16338_v3 = vld [vmem:[%s19566_s7 + $0x21a0] sm:$0xf] }
 0x490   : > { %11037 = vmatpush.bf16.msra.mxu3 %v15691_v16  ;;  %10996 = vmatmul.bf16.vlgmr.msra.gmra.mxu0 %v20003_v52  ;;  %v18806_v16 = vld [vmem:[%s19566_s7 + $0x1ee4] sm:$0xf0]  ;;  %v16530_v8 = vld [vmem:[%s19566_s7 + $0x2320] sm:$0xf] }
 0x491   : > { %11044 = vmatpush.bf16.msrb.mxu0 %v16051_v0  ;;  %11010 = vmatmul.bf16.vlgmr.msra.gmra.mxu1 %v20010_v57  ;;  %v16170_v0 = vld [vmem:[%s19566_s7 + $0x2050] sm:$0xf]  ;;  %v15979_v1 = vor.u32 %v18806_v16, %v15978_v28  ;;  %v16531_v28 = vor.u32 %v18944_v62, %v16530_v8  ;;  %v18842_v16 = vld [vmem:[%s19566_s7 + $0x2004] sm:$0xf0] }
 0x492   : > { %11058 = vmatpush.bf16.msrb.mxu1 %v16243_v23  ;;  %11024 = vmatmul.bf16.vlgmr.msra.gmra.mxu2 %v20008_v56  ;;  %v16579_v23 = vor.u32 %v18956_v50, %v16578_v6  ;;  %v15882_v8 = vld [vmem:[%s19566_s7 + $0x1e10] sm:$0xf]  ;;  %v18782_v62 = vld [vmem:[%s19566_s7 + $0x1e24] sm:$0xf0] }
 0x493   : > { %11072 = vmatpush.bf16.msrb.mxu2 %v16435_v9  ;;  %11038 = vmatmul.bf16.vlgmr.msra.gmra.mxu3 %v20014_v61  ;;  %v18854_v9 = vld [vmem:[%s19566_s7 + $0x2064] sm:$0xf0] }
 0x494   : > { %11086 = vmatpush.bf16.msrb.mxu3 %v16627_v63  ;;  %v18902_v63 = vld [vmem:[%s19566_s7 + $0x21e4] sm:$0xf0]  ;;  %v16171_v55 = vor.u32 %v18854_v9, %v16170_v0  ;;  %v16314_v0 = vld [vmem:[%s19566_s7 + $0x2170] sm:$0xf] }
 0x495   : > { %11045 = vmatpush.bf16.msrb.mxu0 %v16027_v35  ;;  %v16363_v60 = vor.u32 %v18902_v63, %v16362_v17  ;;  %v15954_v35 = vld [vmem:[%s19566_s7 + $0x1ea0] sm:$0xf]  ;;  %v16506_v9 = vld [vmem:[%s19566_s7 + $0x22f0] sm:$0xf]  ;;  %v18938_v17 = vld [vmem:[%s19566_s7 + $0x2304] sm:$0xf0] }
 0x496   : > { %11059 = vmatpush.bf16.msrb.mxu1 %v16219_v27  ;;  %v18800_v27 = vld [vmem:[%s19566_s7 + $0x1eb4] sm:$0xf0] }
 0x497   : > { %11073 = vmatpush.bf16.msrb.mxu2 %v16411_v53  ;;  %v16146_v53 = vld [vmem:[%s19566_s7 + $0x2020] sm:$0xf]  ;;  %v15955_v31 = vor.u32 %v18800_v27, %v15954_v35  ;;  %v16507_v35 = vor.u32 %v18938_v17, %v16506_v9  ;;  %v18836_v27 = vld [vmem:[%s19566_s7 + $0x1fd4] sm:$0xf0] }
 0x498   : > { %11087 = vmatpush.bf16.msrb.mxu3 %v16603_v15  ;;  %v18896_v15 = vld [vmem:[%s19566_s7 + $0x21b4] sm:$0xf0]  ;;  %v16147_v6 = vor.u32 %v18848_v12, %v16146_v53  ;;  %v16290_v53 = vld [vmem:[%s19566_s7 + $0x2140] sm:$0xf] }
 0x499   : > { %11046 = vmatpush.bf16.msrb.mxu0 %v16003_v13  ;;  %v16339_v50 = vor.u32 %v18896_v15, %v16338_v3  ;;  %v15930_v13 = vld [vmem:[%s19566_s7 + $0x1e70] sm:$0xf]  ;;  %v16482_v12 = vld [vmem:[%s19566_s7 + $0x22c0] sm:$0xf]  ;;  %v18932_v3 = vld [vmem:[%s19566_s7 + $0x22d4] sm:$0xf0] }
 0x49a   : > { %11060 = vmatpush.bf16.msrb.mxu1 %v16195_v43  ;;  %v18794_v43 = vld [vmem:[%s19566_s7 + $0x1e84] sm:$0xf0]  ;;  %v19016_v9 = vld [vmem:[%s19566_s7 + $0x2574] sm:$0xf0]  ;;  %v17010_v17 = vld [vmem:[%s19566_s7 + $0x26e0] sm:$0xf] }
 0x49b   : > { %11074 = vmatpush.bf16.msrb.mxu2 %v16387_v10  ;;  %v16122_v10 = vld [vmem:[%s19566_s7 + $0x1ff0] sm:$0xf]  ;;  %v15931_v63 = vor.u32 %v18794_v43, %v15930_v13  ;;  %v18830_v13 = vld [vmem:[%s19566_s7 + $0x1fa4] sm:$0xf0] }
 0x49c   : > { %11088 = vmatpush.bf16.msrb.mxu3 %v16579_v23  ;;  %v18890_v23 = vld [vmem:[%s19566_s7 + $0x2184] sm:$0xf0]  ;;  %v16123_v21 = vor.u32 %v18842_v16, %v16122_v10  ;;  %v16266_v43 = vld [vmem:[%s19566_s7 + $0x2110] sm:$0xf]  ;;  %v16483_v10 = vor.u32 %v18932_v3, %v16482_v12 }
 0x49d   : > { %11047 = vmatpush.bf16.msrb.mxu0 %v15979_v1  ;;  %v16315_v4 = vor.u32 %v18890_v23, %v16314_v0  ;;  %v15906_v1 = vld [vmem:[%s19566_s7 + $0x1e40] sm:$0xf]  ;;  %v16458_v16 = vld [vmem:[%s19566_s7 + $0x2290] sm:$0xf]  ;;  %v18926_v0 = vld [vmem:[%s19566_s7 + $0x22a4] sm:$0xf0] }
 0x49e   : > { %11061 = vmatpush.bf16.msrb.mxu1 %v16171_v55  ;;  %v18788_v55 = vld [vmem:[%s19566_s7 + $0x1e54] sm:$0xf0]  ;;  %v16818_v23 = vld [vmem:[%s19566_s7 + $0x2560] sm:$0xf] }
 0x49f   : > { %11075 = vmatpush.bf16.msrb.mxu2 %v16363_v60  ;;  %v16098_v60 = vld [vmem:[%s19566_s7 + $0x1fc0] sm:$0xf]  ;;  %v15907_v15 = vor.u32 %v18788_v55, %v15906_v1  ;;  %v19112_v1 = vld [vmem:[%s19566_s7 + $0x2874] sm:$0xf0] }
 0x4a0   : > { %11089 = vmatpush.bf16.msrb.mxu3 %v16555_v38  ;;  %v18884_v38 = vld [vmem:[%s19566_s7 + $0x2154] sm:$0xf0] }
 0x4a1   : > { %11048 = vmatpush.bf16.msrb.mxu0 %v15955_v31  ;;  %v16099_v31 = vor.u32 %v18836_v27, %v16098_v60  ;;  %v19160_v27 = vld [vmem:[%s19566_s7 + $0x29f4] sm:$0xf0] }
 0x4a2   : > { %11062 = vmatpush.bf16.msrb.mxu1 %v16147_v6  ;;  %v16291_v6 = vor.u32 %v18884_v38, %v16290_v53  ;;  %v16459_v53 = vor.u32 %v18926_v0, %v16458_v16  ;;  %v16819_v38 = vor.u32 %v19016_v9, %v16818_v23  ;;  %v16770_v23 = vld [vmem:[%s19566_s7 + $0x2500] sm:$0xf]  ;;  %v19004_v9 = vld [vmem:[%s19566_s7 + $0x2514] sm:$0xf0] }
 0x4a3   : > { %11076 = vmatpush.bf16.msrb.mxu2 %v16339_v50  ;;  %v16074_v50 = vld [vmem:[%s19566_s7 + $0x1f90] sm:$0xf] }
 0x4a4   : > { %11090 = vmatpush.bf16.msrb.mxu3 %v16531_v28  ;;  %v18878_v28 = vld [vmem:[%s19566_s7 + $0x2124] sm:$0xf0]  ;;  %v16075_v55 = vor.u32 %v18830_v13, %v16074_v50  ;;  %v17178_v50 = vld [vmem:[%s19566_s7 + $0x2830] sm:$0xf] }
 0x4a5   : > { %11049 = vmatpush.bf16.msrb.mxu0 %v15931_v63  ;;  %v15883_v63 = vor.u32 %v18782_v62, %v15882_v8  ;;  %v16267_v60 = vor.u32 %v18878_v28, %v16266_v43  ;;  %v19010_v8 = vld [vmem:[%s19566_s7 + $0x2544] sm:$0xf0]  ;;  %v16986_v62 = vld [vmem:[%s19566_s7 + $0x26b0] sm:$0xf] }
 0x4a6   : > { %11063 = vmatpush.bf16.msrb.mxu1 %v16123_v21  ;;  %v19064_v21 = vld [vmem:[%s19566_s7 + $0x26f4] sm:$0xf0]  ;;  %v19106_v13 = vld [vmem:[%s19566_s7 + $0x2844] sm:$0xf0]  ;;  %v17370_v43 = vld [vmem:[%s19566_s7 + $0x29b0] sm:$0xf] }
 0x4a7   : > { %11077 = vmatpush.bf16.msrb.mxu2 %v16315_v4  ;;  %v17202_v4 = vld [vmem:[%s19566_s7 + $0x2860] sm:$0xf]  ;;  %v17011_v12 = vor.u32 %v19064_v21, %v17010_v17  ;;  %v17179_v0 = vor.u32 %v19106_v13, %v17178_v50  ;;  %v19052_v21 = vld [vmem:[%s19566_s7 + $0x2694] sm:$0xf0]  ;;  %v19142_v50 = vld [vmem:[%s19566_s7 + $0x2964] sm:$0xf0] }
 0x4a8   : > { %11091 = vmatpush.bf16.msrb.mxu3 %v16507_v35  ;;  %v17394_v35 = vld [vmem:[%s19566_s7 + $0x29e0] sm:$0xf]  ;;  %v17203_v3 = vor.u32 %v19112_v1, %v17202_v4  ;;  %v19100_v1 = vld [vmem:[%s19566_s7 + $0x2814] sm:$0xf0] }
 0x4a9   : > { %11050 = vmatpush.bf16.msrb.mxu0 %v15907_v15  ;;  %v16794_v15 = vld [vmem:[%s19566_s7 + $0x2530] sm:$0xf]  ;;  %v16962_v17 = vld [vmem:[%s19566_s7 + $0x2680] sm:$0xf] }
 0x4aa   : > { %11064 = vmatpush.bf16.msrb.mxu1 %v16099_v31  ;;  %v17395_v31 = vor.u32 %v19160_v27, %v17394_v35  ;;  %v16795_v28 = vor.u32 %v19010_v8, %v16794_v15  ;;  %v17154_v4 = vld [vmem:[%s19566_s7 + $0x2800] sm:$0xf]  ;;  %v16771_v35 = vor.u32 %v19004_v9, %v16770_v23  ;;  %v16963_v27 = vor.u32 %v19052_v21, %v16962_v17  ;;  %v19046_v8 = vld [vmem:[%s19566_s7 + $0x2664] sm:$0xf0]  ;;  %v19040_v9 = vld [vmem:[%s19566_s7 + $0x2634] sm:$0xf0] }
 0x4ab   : > { %11078 = vmatpush.bf16.msrb.mxu2 %v16291_v6  ;;  %v19058_v6 = vld [vmem:[%s19566_s7 + $0x26c4] sm:$0xf0]  ;;  %v17106_v17 = vld [vmem:[%s19566_s7 + $0x27a0] sm:$0xf] }
 0x4ac   : > { %11092 = vmatpush.bf16.msrb.mxu3 %v16483_v10  ;;  %v19154_v10 = vld [vmem:[%s19566_s7 + $0x29c4] sm:$0xf0]  ;;  %v16987_v16 = vor.u32 %v19058_v6, %v16986_v62  ;;  %v17130_v62 = vld [vmem:[%s19566_s7 + $0x27d0] sm:$0xf]  ;;  %v17298_v21 = vld [vmem:[%s19566_s7 + $0x2920] sm:$0xf] }
 0x4ad   : > { %11051 = vmatpush.bf16.msrb.mxu0 %v15883_v63  ;;  %v17371_v63 = vor.u32 %v19154_v10, %v17370_v43  ;;  %v17322_v6 = vld [vmem:[%s19566_s7 + $0x2950] sm:$0xf] }
 0x4ae   : > { %11065 = vmatpush.bf16.msrb.mxu1 %v16075_v55  ;;  %v17346_v55 = vld [vmem:[%s19566_s7 + $0x2980] sm:$0xf]  ;;  %v17323_v23 = vor.u32 %v19142_v50, %v17322_v6 }
 0x4af   : > { %11079 = vmatpush.bf16.msrb.mxu2 %v16267_v60  ;;  %v19148_v60 = vld [vmem:[%s19566_s7 + $0x2994] sm:$0xf0] }
 0x4b0   : > { %11093 = vmatpush.bf16.msrb.mxu3 %v16459_v53  ;;  %11052 = vmatmul.bf16.vlgmr.msrb.gmra.mxu0 %v20091_v20  ;;  %v17155_v53 = vor.u32 %v19100_v1, %v17154_v4  ;;  %v17347_v15 = vor.u32 %v19148_v60, %v17346_v55  ;;  %v19136_v4 = vld [vmem:[%s19566_s7 + $0x2934] sm:$0xf0] }
 0x4b1   : > { %11100 = vmatpush.bf16.msra.mxu0 %v16819_v38  ;;  %11066 = vmatmul.bf16.vlgmr.msrb.gmra.mxu1 %v20098_v26  ;;  %v16746_v38 = vld [vmem:[%s19566_s7 + $0x24d0] sm:$0xf] }
 0x4b2   : > { %11114 = vmatpush.bf16.msra.mxu1 %v17011_v12  ;;  %11080 = vmatmul.bf16.vlgmr.msrb.gmra.mxu2 %v20096_v24  ;;  %v18998_v12 = vld [vmem:[%s19566_s7 + $0x24e4] sm:$0xf0]  ;;  %v14708_v24 = vld [vmem:[%s19566_s7 + $0x14f8] sm:$0xf0] }
 0x4b3   : > { %11128 = vmatpush.bf16.msra.mxu2 %v17203_v3  ;;  %11094 = vmatmul.bf16.vlgmr.msrb.gmra.mxu3 %v20104_v30  ;;  %v16938_v3 = vld [vmem:[%s19566_s7 + $0x2650] sm:$0xf]  ;;  %v16747_v13 = vor.u32 %v18998_v12, %v16746_v38  ;;  %v17299_v38 = vor.u32 %v19136_v4, %v17298_v21  ;;  %v19034_v12 = vld [vmem:[%s19566_s7 + $0x2604] sm:$0xf0]  ;;  %v13532_v30 = vld [vmem:[%s19566_s7 + $0xbc8] sm:$0xf0] }
 0x4b4   : > { %11142 = vmatpush.bf16.msra.mxu3 %v17395_v31  ;;  %v19094_v31 = vld [vmem:[%s19566_s7 + $0x27e4] sm:$0xf0]  ;;  %v16939_v43 = vor.u32 %v19046_v8, %v16938_v3  ;;  %v17082_v3 = vld [vmem:[%s19566_s7 + $0x2770] sm:$0xf] }
 0x4b5   : > { %11101 = vmatpush.bf16.msra.mxu0 %v16795_v28  ;;  %v17131_v10 = vor.u32 %v19094_v31, %v17130_v62  ;;  %v16722_v28 = vld [vmem:[%s19566_s7 + $0x24a0] sm:$0xf]  ;;  %v17274_v8 = vld [vmem:[%s19566_s7 + $0x28f0] sm:$0xf]  ;;  %v19130_v62 = vld [vmem:[%s19566_s7 + $0x2904] sm:$0xf0] }
 0x4b6   : > { %11115 = vmatpush.bf16.msra.mxu1 %v16987_v16  ;;  %v18992_v16 = vld [vmem:[%s19566_s7 + $0x24b4] sm:$0xf0]  ;;  %v16650_v21 = vld [vmem:[%s19566_s7 + $0x2410] sm:$0xf]  ;;  %v18974_v4 = vld [vmem:[%s19566_s7 + $0x2424] sm:$0xf0] }
 0x4b7   : > { %11129 = vmatpush.bf16.msra.mxu2 %v17179_v0  ;;  %v16914_v0 = vld [vmem:[%s19566_s7 + $0x2620] sm:$0xf]  ;;  %v16723_v1 = vor.u32 %v18992_v16, %v16722_v28  ;;  %v17275_v28 = vor.u32 %v19130_v62, %v17274_v8  ;;  %v19028_v16 = vld [vmem:[%s19566_s7 + $0x25d4] sm:$0xf0] }
 0x4b8   : > { %11143 = vmatpush.bf16.msra.mxu3 %v17371_v63  ;;  %v19088_v63 = vld [vmem:[%s19566_s7 + $0x27b4] sm:$0xf0]  ;;  %v16915_v55 = vor.u32 %v19040_v9, %v16914_v0  ;;  %v17058_v0 = vld [vmem:[%s19566_s7 + $0x2740] sm:$0xf] }
 0x4b9   : > { %11102 = vmatpush.bf16.msra.mxu0 %v16771_v35  ;;  %v17107_v60 = vor.u32 %v19088_v63, %v17106_v17  ;;  %v16698_v35 = vld [vmem:[%s19566_s7 + $0x2470] sm:$0xf]  ;;  %v17250_v9 = vld [vmem:[%s19566_s7 + $0x28c0] sm:$0xf]  ;;  %v19124_v17 = vld [vmem:[%s19566_s7 + $0x28d4] sm:$0xf0] }
 0x4ba   : > { %11116 = vmatpush.bf16.msra.mxu1 %v16963_v27  ;;  %v18986_v27 = vld [vmem:[%s19566_s7 + $0x2484] sm:$0xf0]  ;;  %v19208_v8 = vld [vmem:[%s19566_s7 + $0x2b74] sm:$0xf0]  ;;  %v17778_v62 = vld [vmem:[%s19566_s7 + $0x2ce0] sm:$0xf] }
 0x4bb   : > { %11130 = vmatpush.bf16.msra.mxu2 %v17155_v53  ;;  %v16890_v53 = vld [vmem:[%s19566_s7 + $0x25f0] sm:$0xf]  ;;  %v16699_v31 = vor.u32 %v18986_v27, %v16698_v35  ;;  %v19022_v35 = vld [vmem:[%s19566_s7 + $0x25a4] sm:$0xf0] }
 0x4bc   : > { %11144 = vmatpush.bf16.msra.mxu3 %v17347_v15  ;;  %v19082_v15 = vld [vmem:[%s19566_s7 + $0x2784] sm:$0xf0]  ;;  %v16891_v6 = vor.u32 %v19034_v12, %v16890_v53  ;;  %v17034_v27 = vld [vmem:[%s19566_s7 + $0x2710] sm:$0xf]  ;;  %v17251_v53 = vor.u32 %v19124_v17, %v17250_v9 }
 0x4bd   : > { %11103 = vmatpush.bf16.msra.mxu0 %v16747_v13  ;;  %v17083_v50 = vor.u32 %v19082_v15, %v17082_v3  ;;  %v16674_v13 = vld [vmem:[%s19566_s7 + $0x2440] sm:$0xf]  ;;  %v17226_v12 = vld [vmem:[%s19566_s7 + $0x2890] sm:$0xf]  ;;  %v19118_v3 = vld [vmem:[%s19566_s7 + $0x28a4] sm:$0xf0] }
 0x4be   : > { %11117 = vmatpush.bf16.msra.mxu1 %v16939_v43  ;;  %v18980_v43 = vld [vmem:[%s19566_s7 + $0x2454] sm:$0xf0]  ;;  %v17586_v15 = vld [vmem:[%s19566_s7 + $0x2b60] sm:$0xf] }
 0x4bf   : > { %11131 = vmatpush.bf16.msra.mxu2 %v17131_v10  ;;  %v16866_v10 = vld [vmem:[%s19566_s7 + $0x25c0] sm:$0xf]  ;;  %v16675_v63 = vor.u32 %v18980_v43, %v16674_v13  ;;  %v12212_v13 = vld [vmem:[%s19566_s7 + $0x178] sm:$0xf0] }
 0x4c0   : > { %11145 = vmatpush.bf16.msra.mxu3 %v17323_v23  ;;  %v19076_v23 = vld [vmem:[%s19566_s7 + $0x2754] sm:$0xf0] }
 0x4c1   : > { %11104 = vmatpush.bf16.msra.mxu0 %v16723_v1  ;;  %v16867_v1 = vor.u32 %v19028_v16, %v16866_v10  ;;  %v12404_v16 = vld [vmem:[%s19566_s7 + $0x2f8] sm:$0xf0] }
 0x4c2   : > { %11118 = vmatpush.bf16.msra.mxu1 %v16915_v55  ;;  %v17059_v55 = vor.u32 %v19076_v23, %v17058_v0  ;;  %v17227_v0 = vor.u32 %v19118_v3, %v17226_v12  ;;  %v17587_v23 = vor.u32 %v19208_v8, %v17586_v15  ;;  %v17538_v15 = vld [vmem:[%s19566_s7 + $0x2b00] sm:$0xf]  ;;  %v19196_v8 = vld [vmem:[%s19566_s7 + $0x2b14] sm:$0xf0] }
 0x4c3   : > { %11132 = vmatpush.bf16.msra.mxu2 %v17107_v60  ;;  %v16842_v60 = vld [vmem:[%s19566_s7 + $0x2590] sm:$0xf] }
 0x4c4   : > { %11146 = vmatpush.bf16.msra.mxu3 %v17299_v38  ;;  %v19070_v38 = vld [vmem:[%s19566_s7 + $0x2724] sm:$0xf0]  ;;  %v16843_v43 = vor.u32 %v19022_v35, %v16842_v60  ;;  %v17855_v60 = vld [vmem:[%s19566_s7 + $0x134] sm:$0xf]  ;;  %v12188_v35 = vld [vmem:[%s19566_s7 + $0x148] sm:$0xf0] }
 0x4c5   : > { %11105 = vmatpush.bf16.msra.mxu0 %v16699_v31  ;;  %v16651_v31 = vor.u32 %v18974_v4, %v16650_v21  ;;  %v17035_v10 = vor.u32 %v19070_v38, %v17034_v27  ;;  %v19202_v21 = vld [vmem:[%s19566_s7 + $0x2b44] sm:$0xf0]  ;;  %v17754_v4 = vld [vmem:[%s19566_s7 + $0x2cb0] sm:$0xf]  ;;  %v17903_v27 = vld [vmem:[%s19566_s7 + $0x2b4] sm:$0xf]  ;;  %v12191_v3 = vor.u32 %v17855_v60, %v12188_v35 }
 0x4c6   : > { %11119 = vmatpush.bf16.msra.mxu1 %v16891_v6  ;;  %v19256_v6 = vld [vmem:[%s19566_s7 + $0x2cf4] sm:$0xf0]  ;;  %v12332_v60 = vld [vmem:[%s19566_s7 + $0x268] sm:$0xf0] }
 0x4c7   : > { %11133 = vmatpush.bf16.msra.mxu2 %v17083_v50  ;;  %v17861_v50 = vld [vmem:[%s19566_s7 + $0x164] sm:$0xf]  ;;  %v17779_v9 = vor.u32 %v19256_v6, %v17778_v62  ;;  %v17730_v62 = vld [vmem:[%s19566_s7 + $0x2c80] sm:$0xf]  ;;  %v19244_v6 = vld [vmem:[%s19566_s7 + $0x2c94] sm:$0xf0] }
 0x4c8   : > { %11147 = vmatpush.bf16.msra.mxu3 %v17275_v28  ;;  %v17909_v28 = vld [vmem:[%s19566_s7 + $0x2e4] sm:$0xf]  ;;  %v12215_v17 = vor.u32 %v17861_v50, %v12212_v13  ;;  %v12164_v13 = vld [vmem:[%s19566_s7 + $0x118] sm:$0xf0] }
 0x4c9   : > { %11106 = vmatpush.bf16.msra.mxu0 %v16675_v63  ;;  %v17562_v63 = vld [vmem:[%s19566_s7 + $0x2b30] sm:$0xf]  ;;  %v17849_v50 = vld [vmem:[%s19566_s7 + $0x104] sm:$0xf] }
 0x4ca   : > { %11120 = vmatpush.bf16.msra.mxu1 %v16867_v1  ;;  %v12407_v1 = vor.u32 %v17909_v28, %v12404_v16  ;;  %v17563_v38 = vor.u32 %v19202_v21, %v17562_v63  ;;  %v17539_v28 = vor.u32 %v19196_v8, %v17538_v15  ;;  %v17731_v16 = vor.u32 %v19244_v6, %v17730_v62  ;;  %v19238_v21 = vld [vmem:[%s19566_s7 + $0x2c64] sm:$0xf0]  ;;  %v19232_v8 = vld [vmem:[%s19566_s7 + $0x2c34] sm:$0xf0]  ;;  %v17837_v62 = vld [vmem:[%s19566_s7 + $0xa4] sm:$0xf] }
 0x4cb   : > { %11134 = vmatpush.bf16.msra.mxu2 %v17059_v55  ;;  %v19250_v55 = vld [vmem:[%s19566_s7 + $0x2cc4] sm:$0xf0]  ;;  %v17885_v6 = vld [vmem:[%s19566_s7 + $0x224] sm:$0xf] }
 0x4cc   : > { %11148 = vmatpush.bf16.msra.mxu3 %v17251_v53  ;;  %v12380_v53 = vld [vmem:[%s19566_s7 + $0x2c8] sm:$0xf0]  ;;  %v17755_v12 = vor.u32 %v19250_v55, %v17754_v4  ;;  %v17843_v4 = vld [vmem:[%s19566_s7 + $0xd4] sm:$0xf] }
 0x4cd   : > { %11107 = vmatpush.bf16.msra.mxu0 %v16651_v31  ;;  %v12383_v31 = vor.u32 %v17903_v27, %v12380_v53  ;;  %v17891_v55 = vld [vmem:[%s19566_s7 + $0x254] sm:$0xf] }
 0x4ce   : > { %11121 = vmatpush.bf16.msra.mxu1 %v16843_v43  ;;  %v17897_v43 = vld [vmem:[%s19566_s7 + $0x284] sm:$0xf]  ;;  %v12335_v15 = vor.u32 %v17891_v55, %v12332_v60 }
 0x4cf   : > { %11135 = vmatpush.bf16.msra.mxu2 %v17035_v10  ;;  %v12356_v10 = vld [vmem:[%s19566_s7 + $0x298] sm:$0xf0] }
 0x4d0   : > { %11149 = vmatpush.bf16.msra.mxu3 %v17227_v0  ;;  %11108 = vmatmul.bf16.vlgmr.msra.gmra.mxu0 %v20184_v34  ;;  %v12167_v0 = vor.u32 %v17849_v50, %v12164_v13  ;;  %v12359_v63 = vor.u32 %v17897_v43, %v12356_v10  ;;  %v12308_v50 = vld [vmem:[%s19566_s7 + $0x238] sm:$0xf0]  ;;  %v18389_v34 = vld [vmem:[%s19566_s7 + $0x11e4] sm:$0xf] }
 0x4d1   : > { %11156 = vmatpush.bf16.msrb.mxu0 %v17587_v23  ;;  %11122 = vmatmul.bf16.vlgmr.msra.gmra.mxu1 %v20193_v49  ;;  %v17514_v23 = vld [vmem:[%s19566_s7 + $0x2ad0] sm:$0xf]  ;;  %v18191_v49 = vld [vmem:[%s19566_s7 + $0xbb4] sm:$0xf] }
 0x4d2   : > { %11170 = vmatpush.bf16.msrb.mxu1 %v17779_v9  ;;  %11136 = vmatmul.bf16.vlgmr.msra.gmra.mxu2 %v20191_v46  ;;  %v19190_v9 = vld [vmem:[%s19566_s7 + $0x2ae4] sm:$0xf0]  ;;  %v18143_v46 = vld [vmem:[%s19566_s7 + $0xa34] sm:$0xf] }
 0x4d3   : > { %11184 = vmatpush.bf16.msrb.mxu2 %v12215_v17  ;;  %11150 = vmatmul.bf16.vlgmr.msra.gmra.mxu3 %v20199_v54  ;;  %v17706_v17 = vld [vmem:[%s19566_s7 + $0x2c50] sm:$0xf]  ;;  %v17515_v35 = vor.u32 %v19190_v9, %v17514_v23  ;;  %v12311_v23 = vor.u32 %v17885_v6, %v12308_v50  ;;  %v19226_v9 = vld [vmem:[%s19566_s7 + $0x2c04] sm:$0xf0] }
 0x4d4   : > { %11198 = vmatpush.bf16.msrb.mxu3 %v12407_v1  ;;  %v12140_v1 = vld [vmem:[%s19566_s7 + $0xe8] sm:$0xf0]  ;;  %v17707_v27 = vor.u32 %v19238_v21, %v17706_v17  ;;  %v17831_v17 = vld [vmem:[%s19566_s7 + $0x74] sm:$0xf]  ;;  %v17418_v6 = vld [vmem:[%s19566_s7 + $0x2a10] sm:$0xf] }
 0x4d5   : > { %11157 = vmatpush.bf16.msrb.mxu0 %v17563_v38  ;;  %v12143_v53 = vor.u32 %v17843_v4, %v12140_v1  ;;  %v17490_v38 = vld [vmem:[%s19566_s7 + $0x2aa0] sm:$0xf]  ;;  %v17879_v21 = vld [vmem:[%s19566_s7 + $0x1f4] sm:$0xf]  ;;  %v12284_v4 = vld [vmem:[%s19566_s7 + $0x208] sm:$0xf0] }
 0x4d6   : > { %11171 = vmatpush.bf16.msrb.mxu1 %v17755_v12  ;;  %v19184_v12 = vld [vmem:[%s19566_s7 + $0x2ab4] sm:$0xf0]  ;;  %v19166_v50 = vld [vmem:[%s19566_s7 + $0x2a24] sm:$0xf0] }
 0x4d7   : > { %11185 = vmatpush.bf16.msrb.mxu2 %v12191_v3  ;;  %v17682_v3 = vld [vmem:[%s19566_s7 + $0x2c20] sm:$0xf]  ;;  %v17491_v13 = vor.u32 %v19184_v12, %v17490_v38  ;;  %v12287_v38 = vor.u32 %v17879_v21, %v12284_v4  ;;  %v19220_v12 = vld [vmem:[%s19566_s7 + $0x2bd4] sm:$0xf0]  ;;  %v12236_v21 = vld [vmem:[%s19566_s7 + $0x1a8] sm:$0xf0] }
 0x4d8   : > { %11199 = vmatpush.bf16.msrb.mxu3 %v12383_v31  ;;  %v12116_v31 = vld [vmem:[%s19566_s7 + $0xb8] sm:$0xf0]  ;;  %v17683_v43 = vor.u32 %v19232_v8, %v17682_v3  ;;  %v17825_v3 = vld [vmem:[%s19566_s7 + $0x44] sm:$0xf] }
 0x4d9   : > { %11158 = vmatpush.bf16.msrb.mxu0 %v17539_v28  ;;  %v12119_v10 = vor.u32 %v17837_v62, %v12116_v31  ;;  %v17466_v28 = vld [vmem:[%s19566_s7 + $0x2a70] sm:$0xf]  ;;  %v17873_v8 = vld [vmem:[%s19566_s7 + $0x1c4] sm:$0xf]  ;;  %v12260_v62 = vld [vmem:[%s19566_s7 + $0x1d8] sm:$0xf0] }
 0x4da   : > { %11172 = vmatpush.bf16.msrb.mxu1 %v17731_v16  ;;  %v19178_v16 = vld [vmem:[%s19566_s7 + $0x2a84] sm:$0xf0]  ;;  %v17957_v4 = vld [vmem:[%s19566_s7 + $0x464] sm:$0xf] }
 0x4db   : > { %11186 = vmatpush.bf16.msrb.mxu2 %v12167_v0  ;;  %v17658_v0 = vld [vmem:[%s19566_s7 + $0x2bf0] sm:$0xf]  ;;  %v17467_v1 = vor.u32 %v19178_v16, %v17466_v28  ;;  %v19214_v16 = vld [vmem:[%s19566_s7 + $0x2ba4] sm:$0xf0] }
 0x4dc   : > { %11200 = vmatpush.bf16.msrb.mxu3 %v12359_v63  ;;  %v12092_v63 = vld [vmem:[%s19566_s7 + $0x88] sm:$0xf0]  ;;  %v17659_v55 = vor.u32 %v19226_v9, %v17658_v0  ;;  %v17610_v28 = vld [vmem:[%s19566_s7 + $0x2b90] sm:$0xf]  ;;  %v17819_v0 = vld [vmem:[%s19566_s7 + $0x14] sm:$0xf]  ;;  %v12263_v9 = vor.u32 %v17873_v8, %v12260_v62 }
 0x4dd   : > { %11159 = vmatpush.bf16.msrb.mxu0 %v17515_v35  ;;  %v12095_v60 = vor.u32 %v17831_v17, %v12092_v63  ;;  %v17442_v35 = vld [vmem:[%s19566_s7 + $0x2a40] sm:$0xf]  ;;  %v12044_v17 = vld [vmem:[%s19566_s7 + $0x28] sm:$0xf0]  ;;  %v17867_v63 = vld [vmem:[%s19566_s7 + $0x194] sm:$0xf] }
 0x4de   : > { %11173 = vmatpush.bf16.msrb.mxu1 %v17707_v27  ;;  %v19172_v27 = vld [vmem:[%s19566_s7 + $0x2a54] sm:$0xf0]  ;;  %v12239_v8 = vor.u32 %v17867_v63, %v12236_v21  ;;  %v22634_v21 = vpop.f32.mrf.mxu2 }
 0x4df   : > { %11187 = vmatpush.bf16.msrb.mxu2 %v12143_v53  ;;  %v17634_v53 = vld [vmem:[%s19566_s7 + $0x2bc0] sm:$0xf]  ;;  %v17443_v31 = vor.u32 %v19172_v27, %v17442_v35  ;;  %v12788_v35 = vld [vmem:[%s19566_s7 + $0x5f8] sm:$0xf0]  ;;  %v18053_v27 = vld [vmem:[%s19566_s7 + $0x764] sm:$0xf] }
 0x4e0   : > { %11201 = vmatpush.bf16.msrb.mxu3 %v12335_v15  ;;  %v12068_v15 = vld [vmem:[%s19566_s7 + $0x58] sm:$0xf0]  ;;  %23668 = vst [vmem:[#allocation131_spill] sm:$0xff] %v22634_v21 }
 0x4e1   : > { %11160 = vmatpush.bf16.msrb.mxu0 %v17491_v13  ;;  %v22604_v13 = vpop.f32.mrf.mxu0 }
 0x4e2   : > { %11174 = vmatpush.bf16.msrb.mxu1 %v17683_v43  ;;  %23666 = vst [vmem:[#allocation129_spill] sm:$0xff] %v22604_v13  ;;  %v17635_v43 = vor.u32 %v19220_v12, %v17634_v53  ;;  %v12980_v53 = vld [vmem:[%s19566_s7 + $0x778] sm:$0xf0]  ;;  %v12047_v12 = vor.u32 %v17819_v0, %v12044_v17  ;;  %v17999_v13 = vld [vmem:[%s19566_s7 + $0x5b4] sm:$0xf] }
 0x4e3   : > { %11188 = vmatpush.bf16.msrb.mxu2 %v12119_v10  ;;  %v12071_v10 = vor.u32 %v17825_v3, %v12068_v15  ;;  %v18101_v3 = vld [vmem:[%s19566_s7 + $0x8e4] sm:$0xf]  ;;  %v13172_v15 = vld [vmem:[%s19566_s7 + $0x8f8] sm:$0xf0]  ;;  %v18095_v0 = vld [vmem:[%s19566_s7 + $0x8b4] sm:$0xf] }
 0x4e4   : > { %11202 = vmatpush.bf16.msrb.mxu3 %v12311_v23  ;;  %v22609_v23 = vpop.f32.mrf.mxu1 }
 0x4e5   : > { %11161 = vmatpush.bf16.msrb.mxu0 %v17467_v1  ;;  %23667 = vst [vmem:[#allocation130_spill] sm:$0xff] %v22609_v23  ;;  %v12596_v1 = vld [vmem:[%s19566_s7 + $0x478] sm:$0xf0]  ;;  %v12572_v23 = vld [vmem:[%s19566_s7 + $0x448] sm:$0xf0] }
 0x4e6   : > { %11175 = vmatpush.bf16.msrb.mxu1 %v17659_v55  ;;  %v18005_v55 = vld [vmem:[%s19566_s7 + $0x5e4] sm:$0xf]  ;;  %v12599_v62 = vor.u32 %v17957_v4, %v12596_v1  ;;  %v12767_v4 = vor.u32 %v17999_v13, %v12764_v5  ;;  %v22648_v13 = vpop.f32.mrf.mxu3 }
 0x4e7   : > { %11189 = vmatpush.bf16.msrb.mxu2 %v12095_v60  ;;  %v17419_v60 = vor.u32 %v19166_v50, %v17418_v6  ;;  %v12983_v6 = vor.u32 %v18053_v27, %v12980_v53  ;;  %v17951_v50 = vld [vmem:[%s19566_s7 + $0x434] sm:$0xf]  ;;  %v12740_v53 = vld [vmem:[%s19566_s7 + $0x598] sm:$0xf0]  ;;  %23669 = vst [vmem:[#allocation132_spill] sm:$0xff] %v22648_v13 }
 0x4e8   : > { %11203 = vmatpush.bf16.msrb.mxu3 %v12287_v38  ;;  %v17611_v38 = vor.u32 %v19214_v16, %v17610_v28  ;;  %v12956_v28 = vld [vmem:[%s19566_s7 + $0x748] sm:$0xf0]  ;;  %v12575_v63 = vor.u32 %v17951_v50, %v12572_v23  ;;  %v12932_v23 = vld [vmem:[%s19566_s7 + $0x718] sm:$0xf0]  ;;  %v18011_v13 = vld [vmem:[%s19566_s7 + $0x614] sm:$0xf] }
 0x4e9   : > { %11162 = vmatpush.bf16.msrb.mxu0 %v17443_v31  ;;  %v12791_v31 = vor.u32 %v18005_v55, %v12788_v35  ;;  %v22628_v16 = vpop.f32.mrf.mxu0  ;;  %v17945_v55 = vld [vmem:[%s19566_s7 + $0x404] sm:$0xf]  ;;  %v12716_v50 = vld [vmem:[%s19566_s7 + $0x568] sm:$0xf0] }
 0x4ea   : > { %11176 = vmatpush.bf16.msrb.mxu1 %v17635_v43  ;;  %v13175_v43 = vor.u32 %v18101_v3, %v13172_v15  ;;  %v17993_v35 = vld [vmem:[%s19566_s7 + $0x584] sm:$0xf]  ;;  %v13124_v3 = vld [vmem:[%s19566_s7 + $0x898] sm:$0xf0] }
 0x4eb   : > { %11190 = vmatpush.bf16.msrb.mxu2 %v12071_v10  ;;  %v18047_v10 = vld [vmem:[%s19566_s7 + $0x734] sm:$0xf]  ;;  %v12743_v15 = vor.u32 %v17993_v35, %v12740_v53  ;;  %v17981_v35 = vld [vmem:[%s19566_s7 + $0x524] sm:$0xf] }
 0x4ec   : > { %11204 = vmatpush.bf16.msrb.mxu3 %v12263_v9  ;;  %v13148_v9 = vld [vmem:[%s19566_s7 + $0x8c8] sm:$0xf0]  ;;  %v22632_v17 = vpop.f32.mrf.mxu1  ;;  %v12959_v1 = vor.u32 %v18047_v10, %v12956_v28  ;;  %v18083_v28 = vld [vmem:[%s19566_s7 + $0x854] sm:$0xf] }
 0x4ed   : > { %11163 = vmatpush.bf16.msrb.mxu0 %v17419_v60  ;;  %v12548_v60 = vld [vmem:[%s19566_s7 + $0x418] sm:$0xf0]  ;;  %v13151_v27 = vor.u32 %v18095_v0, %v13148_v9  ;;  %v12908_v10 = vld [vmem:[%s19566_s7 + $0x6e8] sm:$0xf0]  ;;  %v22658_v9 = vpop.f32.mrf.mxu2 }
 0x4ee   : > { %11177 = vmatpush.bf16.msrb.mxu1 %v17611_v38  ;;  %v18041_v38 = vld [vmem:[%s19566_s7 + $0x704] sm:$0xf]  ;;  %v12551_v5 = vor.u32 %v17945_v55, %v12548_v60  ;;  %v12500_v60 = vld [vmem:[%s19566_s7 + $0x3b8] sm:$0xf0] }
 0x4ef   : > { %11191 = vmatpush.bf16.msrb.mxu2 %v12047_v12  ;;  %v18089_v12 = vld [vmem:[%s19566_s7 + $0x884] sm:$0xf] }
 0x4f0   : > { %11205 = vmatpush.bf16.msrb.mxu3 %v12239_v8  ;;  %11164 = vmatmul.bf16.vlgmr.msrb.gmra.mxu0 %v20275_v22  ;;  %v12935_v8 = vor.u32 %v18041_v38, %v12932_v23  ;;  %v17933_v55 = vld [vmem:[%s19566_s7 + $0x3a4] sm:$0xf]  ;;  %v12692_v38 = vld [vmem:[%s19566_s7 + $0x538] sm:$0xf0] }
 0x4f1   : > { %11212 = vmatpush.bf16.msra.mxu0 %v12599_v62  ;;  %11178 = vmatmul.bf16.vlgmr.msrb.gmra.mxu1 %v20282_v25  ;;  %v17939_v62 = vld [vmem:[%s19566_s7 + $0x3d4] sm:$0xf]  ;;  %v18029_v23 = vld [vmem:[%s19566_s7 + $0x6a4] sm:$0xf]  ;;  %v13940_v22 = vld [vmem:[%s19566_s7 + $0xef8] sm:$0xf0] }
 0x4f2   : > { %11226 = vmatpush.bf16.msra.mxu1 %v12791_v31  ;;  %11192 = vmatmul.bf16.vlgmr.msrb.gmra.mxu2 %v19669_v59  ;;  %v12524_v31 = vld [vmem:[%s19566_s7 + $0x3e8] sm:$0xf0]  ;;  %v13127_v59 = vor.u32 %v18089_v12, %v13124_v3  ;;  %v12884_v12 = vld [vmem:[%s19566_s7 + $0x6b8] sm:$0xf0]  ;;  %v18077_v3 = vld [vmem:[%s19566_s7 + $0x824] sm:$0xf] }
 0x4f3   : > { %11240 = vmatpush.bf16.msra.mxu2 %v12983_v6  ;;  %11206 = vmatmul.bf16.vlgmr.msrb.gmra.mxu3 %v19685_v11  ;;  %v17987_v6 = vld [vmem:[%s19566_s7 + $0x554] sm:$0xf]  ;;  %v13100_v11 = vld [vmem:[%s19566_s7 + $0x868] sm:$0xf0]  ;;  %v12527_v0 = vor.u32 %v17939_v62, %v12524_v31  ;;  %v12695_v62 = vor.u32 %v17981_v35, %v12692_v38  ;;  %v12887_v31 = vor.u32 %v18029_v23, %v12884_v12  ;;  %v17921_v35 = vld [vmem:[%s19566_s7 + $0x344] sm:$0xf] }
 0x4f4   : > { %11254 = vmatpush.bf16.msra.mxu3 %v13175_v43  ;;  %v18035_v43 = vld [vmem:[%s19566_s7 + $0x6d4] sm:$0xf]  ;;  %v13103_v53 = vor.u32 %v18083_v28, %v13100_v11  ;;  %v12860_v11 = vld [vmem:[%s19566_s7 + $0x688] sm:$0xf0]  ;;  %v17969_v38 = vld [vmem:[%s19566_s7 + $0x4c4] sm:$0xf] }
 0x4f5   : > { %11213 = vmatpush.bf16.msra.mxu0 %v12575_v63  ;;  %v22660_v63 = vpop.f32.mrf.mxu0  ;;  %v18023_v28 = vld [vmem:[%s19566_s7 + $0x674] sm:$0xf]  ;;  %v12644_v12 = vld [vmem:[%s19566_s7 + $0x4d8] sm:$0xf0]  ;;  %v18149_v25 = vld [vmem:[%s19566_s7 + $0xa64] sm:$0xf] }
 0x4f6   : > { %11227 = vmatpush.bf16.msra.mxu1 %v12767_v4  ;;  %v12719_v4 = vor.u32 %v17987_v6, %v12716_v50  ;;  %v17927_v6 = vld [vmem:[%s19566_s7 + $0x374] sm:$0xf] }
 0x4f7   : > { %11241 = vmatpush.bf16.msra.mxu2 %v12959_v1  ;;  %v12911_v1 = vor.u32 %v18035_v43, %v12908_v10  ;;  %v17975_v50 = vld [vmem:[%s19566_s7 + $0x4f4] sm:$0xf]  ;;  %v12668_v10 = vld [vmem:[%s19566_s7 + $0x508] sm:$0xf0] }
 0x4f8   : > { %11255 = vmatpush.bf16.msra.mxu3 %v13151_v27  ;;  %v22665_v27 = vpop.f32.mrf.mxu1 }
 0x4f9   : > { %11214 = vmatpush.bf16.msra.mxu0 %v12551_v5  ;;  %v13076_v5 = vld [vmem:[%s19566_s7 + $0x838] sm:$0xf0] }
 0x4fa   : > { %11228 = vmatpush.bf16.msra.mxu1 %v12743_v15  ;;  %v12503_v15 = vor.u32 %v17933_v55, %v12500_v60  ;;  %v13079_v43 = vor.u32 %v18077_v3, %v13076_v5  ;;  %v13052_v55 = vld [vmem:[%s19566_s7 + $0x808] sm:$0xf0]  ;;  %v12863_v60 = vor.u32 %v18023_v28, %v12860_v11  ;;  %v18017_v3 = vld [vmem:[%s19566_s7 + $0x644] sm:$0xf]  ;;  %v12836_v5 = vld [vmem:[%s19566_s7 + $0x658] sm:$0xf0]  ;;  %v12647_v28 = vor.u32 %v17969_v38, %v12644_v12 }
 0x4fb   : > { %11242 = vmatpush.bf16.msra.mxu2 %v12935_v8  ;;  %v22672_v8 = vpop.f32.mrf.mxu3  ;;  %v12839_v11 = vor.u32 %v18017_v3, %v12836_v5  ;;  %v13556_v12 = vld [vmem:[%s19566_s7 + $0xbf8] sm:$0xf0]  ;;  %v18245_v3 = vld [vmem:[%s19566_s7 + $0xd64] sm:$0xf] }
 0x4fc   : > { %11256 = vmatpush.bf16.msra.mxu3 %v13127_v59  ;;  %v12476_v59 = vld [vmem:[%s19566_s7 + $0x388] sm:$0xf0]  ;;  %v13748_v5 = vld [vmem:[%s19566_s7 + $0xd78] sm:$0xf0] }
 0x4fd   : > { %11215 = vmatpush.bf16.msra.mxu0 %v12527_v0  ;;  %v18071_v0 = vld [vmem:[%s19566_s7 + $0x7f4] sm:$0xf] }
 0x4fe   : > { %11229 = vmatpush.bf16.msra.mxu1 %v12719_v4  ;;  %v12479_v4 = vor.u32 %v17927_v6, %v12476_v59  ;;  %v13055_v23 = vor.u32 %v18071_v0, %v13052_v55  ;;  %v22690_v6 = vpop.f32.mrf.mxu0  ;;  %v17963_v0 = vld [vmem:[%s19566_s7 + $0x494] sm:$0xf]  ;;  %v12620_v55 = vld [vmem:[%s19566_s7 + $0x4a8] sm:$0xf0] }
 0x4ff   : > { %11243 = vmatpush.bf16.msra.mxu2 %v12911_v1  ;;  %v12671_v1 = vor.u32 %v17975_v50, %v12668_v10  ;;  %v12428_v10 = vld [vmem:[%s19566_s7 + $0x328] sm:$0xf0] }
 0x500   : > { %11257 = vmatpush.bf16.msra.mxu3 %v13103_v53  ;;  %v12452_v53 = vld [vmem:[%s19566_s7 + $0x358] sm:$0xf0]  ;;  %v22694_v59 = vpop.f32.mrf.mxu1 }
 0x501   : > { %11216 = vmatpush.bf16.msra.mxu0 %v12503_v15  ;;  %v22688_v15 = vpop.f32.mrf.mxu2  ;;  %v12455_v50 = vor.u32 %v17921_v35, %v12452_v53  ;;  %v13004_v35 = vld [vmem:[%s19566_s7 + $0x7a8] sm:$0xf0] }
 0x502   : > { %11230 = vmatpush.bf16.msra.mxu1 %v12695_v62  ;;  %v18065_v62 = vld [vmem:[%s19566_s7 + $0x7c4] sm:$0xf] }
 0x503   : > { %11244 = vmatpush.bf16.msra.mxu2 %v12887_v31  ;;  %v13028_v31 = vld [vmem:[%s19566_s7 + $0x7d8] sm:$0xf0]  ;;  %v22704_v53 = vpop.f32.mrf.mxu3 }
 0x504   : > { %11258 = vmatpush.bf16.msra.mxu3 %v13079_v43  ;;  %v17915_v43 = vld [vmem:[%s19566_s7 + $0x314] sm:$0xf]  ;;  %v13031_v21 = vor.u32 %v18065_v62, %v13028_v31  ;;  %v12815_v62 = vor.u32 %v18011_v13, %v12812_v19  ;;  %v18293_v31 = vld [vmem:[%s19566_s7 + $0xee4] sm:$0xf]  ;;  %v13916_v13 = vld [vmem:[%s19566_s7 + $0xec8] sm:$0xf0] }
 0x505   : > { %11217 = vmatpush.bf16.msra.mxu0 %v12479_v4  ;;  %v18059_v4 = vld [vmem:[%s19566_s7 + $0x794] sm:$0xf]  ;;  %v12431_v38 = vor.u32 %v17915_v43, %v12428_v10  ;;  %v13751_v10 = vor.u32 %v18245_v3, %v13748_v5  ;;  %v13508_v3 = vld [vmem:[%s19566_s7 + $0xb98] sm:$0xf0]  ;;  %v18233_v5 = vld [vmem:[%s19566_s7 + $0xd04] sm:$0xf] }
 0x506   : > { %11231 = vmatpush.bf16.msra.mxu1 %v12671_v1  ;;  %v13364_v1 = vld [vmem:[%s19566_s7 + $0xa78] sm:$0xf0]  ;;  %v13007_v54 = vor.u32 %v18059_v4, %v13004_v35  ;;  %v13535_v4 = vor.u32 %v18191_v49, %v13532_v30  ;;  %v18281_v30 = vld [vmem:[%s19566_s7 + $0xe84] sm:$0xf] }
 0x507   : > { %11245 = vmatpush.bf16.msra.mxu2 %v12863_v60  ;;  %v18197_v60 = vld [vmem:[%s19566_s7 + $0xbe4] sm:$0xf]  ;;  %v13892_v49 = vld [vmem:[%s19566_s7 + $0xe98] sm:$0xf0] }
 0x508   : > { %11259 = vmatpush.bf16.msra.mxu3 %v13055_v23  ;;  %v12623_v23 = vor.u32 %v17963_v0, %v12620_v55  ;;  %v13559_v43 = vor.u32 %v18197_v60, %v13556_v12  ;;  %v13724_v0 = vld [vmem:[%s19566_s7 + $0xd48] sm:$0xf0]  ;;  %v22726_v55 = vpop.f32.mrf.mxu1  ;;  %v13316_v60 = vld [vmem:[%s19566_s7 + $0xa18] sm:$0xf0] }
 0x509   : > { %11218 = vmatpush.bf16.msra.mxu0 %v12455_v50  ;;  %v13367_v50 = vor.u32 %v18149_v25, %v13364_v1  ;;  %v22720_v19 = vpop.f32.mrf.mxu2  ;;  %v18287_v25 = vld [vmem:[%s19566_s7 + $0xeb4] sm:$0xf]  ;;  %v18137_v1 = vld [vmem:[%s19566_s7 + $0xa04] sm:$0xf] }
 0x50a   : > { %11232 = vmatpush.bf16.msra.mxu1 %v12647_v28  ;;  %v13943_v28 = vor.u32 %v18293_v31, %v13940_v22  ;;  %v13343_v22 = vor.u32 %v18143_v46, %v13340_v7  ;;  %v13919_v12 = vor.u32 %v18287_v25, %v13916_v13  ;;  %v13292_v31 = vld [vmem:[%s19566_s7 + $0x9e8] sm:$0xf0] }
 0x50b   : > { %11246 = vmatpush.bf16.msra.mxu2 %v12839_v11  ;;  %v18239_v11 = vld [vmem:[%s19566_s7 + $0xd34] sm:$0xf]  ;;  %v22735_v46 = vpop.f32.mrf.mxu3 }
 0x50c   : > { %11260 = vmatpush.bf16.msra.mxu3 %v13031_v21  ;;  %v22722_v21 = vpop.f32.mrf.mxu0  ;;  %v13727_v35 = vor.u32 %v18239_v11, %v13724_v0  ;;  %v13868_v11 = vld [vmem:[%s19566_s7 + $0xe68] sm:$0xf0] }
 0x50d   : > { %11219 = vmatpush.bf16.msra.mxu0 %v12431_v38  ;;  %v18185_v38 = vld [vmem:[%s19566_s7 + $0xb84] sm:$0xf] }
 0x50e   : > { %11233 = vmatpush.bf16.msra.mxu1 %v12623_v23  ;;  %v13511_v7 = vor.u32 %v18185_v38, %v13508_v3  ;;  %v18221_v3 = vld [vmem:[%s19566_s7 + $0xca4] sm:$0xf] }
 0x50f   : > { %11247 = vmatpush.bf16.msra.mxu2 %v12815_v62  ;;  %v18131_v62 = vld [vmem:[%s19566_s7 + $0x9d4] sm:$0xf] }
 0x510   : > { %11261 = vmatpush.bf16.msra.mxu3 %v13007_v54  ;;  %11220 = vmatmul.bf16.vlgmr.msra.gmra.mxu0 %v19675_v2  ;;  %v13700_v54 = vld [vmem:[%s19566_s7 + $0xd18] sm:$0xf0]  ;;  %v13319_v2 = vor.u32 %v18137_v1, %v13316_v60  ;;  %v22752_v0 = vpop.f32.mrf.mxu1  ;;  %v13295_v25 = vor.u32 %v18131_v62, %v13292_v31  ;;  %v18173_v60 = vld [vmem:[%s19566_s7 + $0xb24] sm:$0xf]  ;;  %v18119_v31 = vld [vmem:[%s19566_s7 + $0x974] sm:$0xf] }
 0x511   : > { %11268 = vmatpush.bf16.msrb.mxu0 %v13367_v50  ;;  %11234 = vmatmul.bf16.vlgmr.msra.gmra.mxu1 %v19691_v18  ;;  %v13703_v23 = vor.u32 %v18233_v5, %v13700_v54  ;;  %v13895_v18 = vor.u32 %v18281_v30, %v13892_v49  ;;  %v13484_v50 = vld [vmem:[%s19566_s7 + $0xb68] sm:$0xf0]  ;;  %v22754_v13 = vpop.f32.mrf.mxu2  ;;  %v13268_v1 = vld [vmem:[%s19566_s7 + $0x9b8] sm:$0xf0]  ;;  %v18269_v54 = vld [vmem:[%s19566_s7 + $0xe24] sm:$0xf]  ;;  %v10788_v49 = vadd.f32 %v22632_v17, %v22628_v16 }
 0x512   : > { %11282 = vmatpush.bf16.msrb.mxu1 %v13559_v43  ;;  %11248 = vmatmul.bf16.vlgmr.msra.gmra.mxu2 %v19751_v40  ;;  %v18179_v40 = vld [vmem:[%s19566_s7 + $0xb54] sm:$0xf]  ;;  %v13652_v5 = vld [vmem:[%s19566_s7 + $0xcb8] sm:$0xf0]  ;;  %v13628_v17 = vld [vmem:[%s19566_s7 + $0xc88] sm:$0xf0] }
 0x513   : > { %11296 = vmatpush.bf16.msrb.mxu2 %v13751_v10  ;;  %11262 = vmatmul.bf16.vlgmr.msra.gmra.mxu3 %v19758_v45  ;;  %v18227_v43 = vld [vmem:[%s19566_s7 + $0xcd4] sm:$0xf]  ;;  %v13676_v10 = vld [vmem:[%s19566_s7 + $0xce8] sm:$0xf0]  ;;  %v13844_v30 = vld [vmem:[%s19566_s7 + $0xe38] sm:$0xf0]  ;;  %v13655_v62 = vor.u32 %v18221_v3, %v13652_v5 }
 0x514   : > { %11310 = vmatpush.bf16.msrb.mxu3 %v13943_v28  ;;  %v22748_v45 = vpop.f32.mrf.mxu0  ;;  %v18275_v28 = vld [vmem:[%s19566_s7 + $0xe54] sm:$0xf]  ;;  %v13412_v5 = vld [vmem:[%s19566_s7 + $0xad8] sm:$0xf0] }
 0x515   : > { %11269 = vmatpush.bf16.msrb.mxu0 %v13343_v22  ;;  %v13487_v22 = vor.u32 %v18179_v40, %v13484_v50  ;;  %v13871_v38 = vor.u32 %v18275_v28, %v13868_v11  ;;  %v13244_v40 = vld [vmem:[%s19566_s7 + $0x988] sm:$0xf0]  ;;  %v13847_v50 = vor.u32 %v18269_v54, %v13844_v30  ;;  %v18215_v16 = vld [vmem:[%s19566_s7 + $0xc74] sm:$0xf]  ;;  %v10802_v11 = vadd.f32 %v22658_v9, %v10788_v49  ;;  %v18209_v54 = vld [vmem:[%s19566_s7 + $0xc44] sm:$0xf] }
 0x516   : > { %11283 = vmatpush.bf16.msrb.mxu1 %v13535_v4  ;;  %v13679_v4 = vor.u32 %v18227_v43, %v13676_v10  ;;  %v13436_v43 = vld [vmem:[%s19566_s7 + $0xb08] sm:$0xf0]  ;;  %v18263_v10 = vld [vmem:[%s19566_s7 + $0xdf4] sm:$0xf]  ;;  %v13604_v30 = vld [vmem:[%s19566_s7 + $0xc58] sm:$0xf0] }
 0x517   : > { %11297 = vmatpush.bf16.msrb.mxu2 %v13727_v35  ;;  %v18125_v35 = vld [vmem:[%s19566_s7 + $0x9a4] sm:$0xf]  ;;  %v13820_v28 = vld [vmem:[%s19566_s7 + $0xe08] sm:$0xf0] }
 0x518   : > { %11311 = vmatpush.bf16.msrb.mxu3 %v13919_v12  ;;  %v13460_v12 = vld [vmem:[%s19566_s7 + $0xb38] sm:$0xf0]  ;;  %v22784_v9 = vpop.f32.mrf.mxu1  ;;  %v13823_v3 = vor.u32 %v18263_v10, %v13820_v28  ;;  %v18257_v49 = vld [vmem:[%s19566_s7 + $0xdc4] sm:$0xf]  ;;  %v13580_v28 = vld [vmem:[%s19566_s7 + $0xc28] sm:$0xf0] }
 0x519   : > { %11270 = vmatpush.bf16.msrb.mxu0 %v13319_v2  ;;  %v13271_v2 = vor.u32 %v18125_v35, %v13268_v1  ;;  %v13631_v1 = vor.u32 %v18215_v16, %v13628_v17  ;;  %23671 = vst [vmem:[#allocation134_spill] sm:$0xff] %v22784_v9  ;;  %v18155_v16 = vld [vmem:[%s19566_s7 + $0xa94] sm:$0xf] }
 0x51a   : > { %11284 = vmatpush.bf16.msrb.mxu1 %v13511_v7  ;;  %v22766_v7 = vpop.f32.mrf.mxu3  ;;  %v18203_v17 = vld [vmem:[%s19566_s7 + $0xc14] sm:$0xf] }
 0x51b   : > { %11298 = vmatpush.bf16.msrb.mxu2 %v13703_v23  ;;  %v13463_v23 = vor.u32 %v18173_v60, %v13460_v12  ;;  %v18113_v60 = vld [vmem:[%s19566_s7 + $0x944] sm:$0xf] }
 0x51c   : > { %11312 = vmatpush.bf16.msrb.mxu3 %v13895_v18  ;;  %v18167_v18 = vld [vmem:[%s19566_s7 + $0xaf4] sm:$0xf]  ;;  %v18161_v12 = vld [vmem:[%s19566_s7 + $0xac4] sm:$0xf] }
 0x51d   : > { %11271 = vmatpush.bf16.msrb.mxu0 %v13295_v25  ;;  %v13247_v25 = vor.u32 %v18119_v31, %v13244_v40  ;;  %v13439_v35 = vor.u32 %v18167_v18, %v13436_v43  ;;  %v18107_v31 = vld [vmem:[%s19566_s7 + $0x914] sm:$0xf]  ;;  %v13196_v40 = vld [vmem:[%s19566_s7 + $0x928] sm:$0xf0]  ;;  %v13607_v43 = vor.u32 %v18209_v54, %v13604_v30  ;;  %v14516_v54 = vld [vmem:[%s19566_s7 + $0x1378] sm:$0xf0] }
 0x51e   : > { %11285 = vmatpush.bf16.msrb.mxu1 %v13487_v22  ;;  %v22777_v22 = vpop.f32.mrf.mxu2 }
 0x51f   : > { %11299 = vmatpush.bf16.msrb.mxu2 %v13679_v4  ;;  %v22779_v4 = vpop.f32.mrf.mxu0 }
 0x520   : > { %11313 = vmatpush.bf16.msrb.mxu3 %v13871_v38  ;;  %23670 = vst [vmem:[#allocation133_spill] sm:$0xff] %v22779_v4  ;;  %v13220_v38 = vld [vmem:[%s19566_s7 + $0x958] sm:$0xf0]  ;;  %v18431_v4 = vld [vmem:[%s19566_s7 + $0x1334] sm:$0xf] }
 0x521   : > { %11272 = vmatpush.bf16.msrb.mxu0 %v13271_v2  ;;  %v13796_v2 = vld [vmem:[%s19566_s7 + $0xdd8] sm:$0xf0] }
 0x522   : > { %11286 = vmatpush.bf16.msrb.mxu1 %v13463_v23  ;;  %v10816_v23 = vadd.f32 %v22672_v8, %v10802_v11  ;;  %v22794_v18 = vpop.f32.mrf.mxu3  ;;  %v13388_v8 = vld [vmem:[%s19566_s7 + $0xaa8] sm:$0xf0]  ;;  %v13799_v10 = vor.u32 %v18257_v49, %v13796_v2  ;;  %v18251_v11 = vld [vmem:[%s19566_s7 + $0xd94] sm:$0xf]  ;;  %v13583_v49 = vor.u32 %v18203_v17, %v13580_v28  ;;  %v18485_v2 = vld [vmem:[%s19566_s7 + $0x14e4] sm:$0xf] }
 0x523   : > { %11300 = vmatpush.bf16.msrb.mxu2 %v13655_v62  ;;  %v13223_v62 = vor.u32 %v18113_v60, %v13220_v38  ;;  %v18341_v60 = vld [vmem:[%s19566_s7 + $0x1064] sm:$0xf]  ;;  %v14132_v38 = vld [vmem:[%s19566_s7 + $0x1078] sm:$0xf0]  ;;  %v14711_v17 = vor.u32 %v18485_v2, %v14708_v24  ;;  %v14300_v28 = vld [vmem:[%s19566_s7 + $0x11c8] sm:$0xf0] }
 0x524   : > { %11314 = vmatpush.bf16.msrb.mxu3 %v13847_v50  ;;  %v13415_v50 = vor.u32 %v18161_v12, %v13412_v5  ;;  %v14324_v12 = vld [vmem:[%s19566_s7 + $0x11f8] sm:$0xf0]  ;;  %v18437_v5 = vld [vmem:[%s19566_s7 + $0x1364] sm:$0xf] }
 0x525   : > { %11273 = vmatpush.bf16.msrb.mxu0 %v13247_v25  ;;  %v13772_v25 = vld [vmem:[%s19566_s7 + $0xda8] sm:$0xf0]  ;;  %v14519_v9 = vor.u32 %v18437_v5, %v14516_v54  ;;  %v14276_v54 = vld [vmem:[%s19566_s7 + $0x1198] sm:$0xf0] }
 0x526   : > { %11287 = vmatpush.bf16.msrb.mxu1 %v13439_v35  ;;  %v10830_v35 = vadd.f32 %v22690_v6, %v10816_v23  ;;  %v22813_v6 = vpop.f32.mrf.mxu1  ;;  %v13775_v23 = vor.u32 %v18251_v11, %v13772_v25  ;;  %v18479_v11 = vld [vmem:[%s19566_s7 + $0x14b4] sm:$0xf]  ;;  %v14684_v25 = vld [vmem:[%s19566_s7 + $0x14c8] sm:$0xf0] }
 0x527   : > { %11301 = vmatpush.bf16.msrb.mxu2 %v13631_v1  ;;  %v13199_v1 = vor.u32 %v18107_v31, %v13196_v40  ;;  %v22809_v30 = vpop.f32.mrf.mxu0  ;;  %v22815_v31 = vpop.f32.mrf.mxu2  ;;  %v14327_v40 = vor.u32 %v18389_v34, %v14324_v12  ;;  %v14687_v5 = vor.u32 %v18479_v11, %v14684_v25 }
 0x528   : > { %11315 = vmatpush.bf16.msrb.mxu3 %v13823_v3  ;;  %v13391_v3 = vor.u32 %v18155_v16, %v13388_v8  ;;  %v18383_v16 = vld [vmem:[%s19566_s7 + $0x11b4] sm:$0xf]  ;;  %v10844_v8 = vadd.f32 %v22694_v59, %v10830_v35  ;;  %v14084_v35 = vld [vmem:[%s19566_s7 + $0x1018] sm:$0xf0] }
 0x529   : > { %11274 = vmatpush.bf16.msrb.mxu0 %v13223_v62  ;;  %v14135_v62 = vor.u32 %v18341_v60, %v14132_v38  ;;  %v14303_v24 = vor.u32 %v18383_v16, %v14300_v28  ;;  %v18329_v38 = vld [vmem:[%s19566_s7 + $0x1004] sm:$0xf]  ;;  %v14252_v16 = vld [vmem:[%s19566_s7 + $0x1168] sm:$0xf0]  ;;  %v18467_v28 = vld [vmem:[%s19566_s7 + $0x1454] sm:$0xf] }
 0x52a   : > { %11288 = vmatpush.bf16.msrb.mxu1 %v13415_v50  ;;  %v18335_v50 = vld [vmem:[%s19566_s7 + $0x1034] sm:$0xf]  ;;  %v22826_v60 = vpop.f32.mrf.mxu3  ;;  %v10858_v12 = vadd.f32 %v22720_v19, %v10844_v8  ;;  %v14087_v19 = vor.u32 %v18329_v38, %v14084_v35  ;;  %v14036_v38 = vld [vmem:[%s19566_s7 + $0xfb8] sm:$0xf0]  ;;  %v18365_v35 = vld [vmem:[%s19566_s7 + $0x1124] sm:$0xf] }
 0x52b   : > { %11302 = vmatpush.bf16.msrb.mxu2 %v13607_v43  ;;  %v14108_v43 = vld [vmem:[%s19566_s7 + $0x1048] sm:$0xf0]  ;;  %v18419_v8 = vld [vmem:[%s19566_s7 + $0x12d4] sm:$0xf] }
 0x52c   : > { %11316 = vmatpush.bf16.msrb.mxu3 %v13799_v10  ;;  %v14492_v10 = vld [vmem:[%s19566_s7 + $0x1348] sm:$0xf0]  ;;  %v14111_v34 = vor.u32 %v18335_v50, %v14108_v43 }
 0x52d   : > { %11275 = vmatpush.bf16.msrb.mxu0 %v13199_v1  ;;  %v14495_v59 = vor.u32 %v18431_v4, %v14492_v10  ;;  %v18377_v1 = vld [vmem:[%s19566_s7 + $0x1184] sm:$0xf]  ;;  %v14636_v10 = vld [vmem:[%s19566_s7 + $0x1468] sm:$0xf0] }
 0x52e   : > { %11289 = vmatpush.bf16.msrb.mxu1 %v13391_v3  ;;  %v18425_v3 = vld [vmem:[%s19566_s7 + $0x1304] sm:$0xf]  ;;  %v22849_v50 = vpop.f32.mrf.mxu1 }
 0x52f   : > { %11303 = vmatpush.bf16.msrb.mxu2 %v13583_v49  ;;  %v14468_v49 = vld [vmem:[%s19566_s7 + $0x1318] sm:$0xf0]  ;;  %v18473_v4 = vld [vmem:[%s19566_s7 + $0x1484] sm:$0xf]  ;;  %v22843_v2 = vpop.f32.mrf.mxu0 }
 0x530   : > { %11317 = vmatpush.bf16.msrb.mxu3 %v13775_v23  ;;  %11276 = vmatmul.bf16.vlgmr.msrb.gmra.mxu0 %v19756_v44  ;;  %v22841_v44 = vpop.f32.mrf.mxu2  ;;  %v14471_v23 = vor.u32 %v18425_v3, %v14468_v49  ;;  %v14612_v3 = vld [vmem:[%s19566_s7 + $0x1438] sm:$0xf0] }
 0x531   : > { %11324 = vmatpush.bf16.msra.mxu0 %v14135_v62  ;;  %11290 = vmatmul.bf16.vlgmr.msrb.gmra.mxu1 %v19762_v48  ;;  %v18323_v48 = vld [vmem:[%s19566_s7 + $0xfd4] sm:$0xf]  ;;  %v14060_v62 = vld [vmem:[%s19566_s7 + $0xfe8] sm:$0xf0] }
 0x532   : > { %11338 = vmatpush.bf16.msra.mxu1 %v14327_v40  ;;  %11304 = vmatmul.bf16.vlgmr.msrb.gmra.mxu2 %v19835_v32  ;;  %v14279_v32 = vor.u32 %v18377_v1, %v14276_v54  ;;  %v18371_v40 = vld [vmem:[%s19566_s7 + $0x1154] sm:$0xf]  ;;  %v22857_v25 = vpop.f32.mrf.mxu3  ;;  %v14639_v1 = vor.u32 %v18467_v28, %v14636_v10  ;;  %v18461_v54 = vld [vmem:[%s19566_s7 + $0x1424] sm:$0xf]  ;;  %v14588_v10 = vld [vmem:[%s19566_s7 + $0x1408] sm:$0xf0] }
 0x533   : > { %11352 = vmatpush.bf16.msra.mxu2 %v14519_v9  ;;  %v14660_v9 = vld [vmem:[%s19566_s7 + $0x1498] sm:$0xf0]  ;;  %11318 = vmatmul.bf16.vlgmr.msrb.gmra.mxu3 %v19842_v37  ;;  %v10872_v37 = vadd.f32 %v22735_v46, %v10858_v12  ;;  %v14063_v46 = vor.u32 %v18323_v48, %v14060_v62  ;;  %v14012_v48 = vld [vmem:[%s19566_s7 + $0xf88] sm:$0xf0]  ;;  %v18359_v62 = vld [vmem:[%s19566_s7 + $0x10f4] sm:$0xf] }
 0x534   : > { %11366 = vmatpush.bf16.msra.mxu3 %v14711_v17  ;;  %v14663_v43 = vor.u32 %v18473_v4, %v14660_v9  ;;  %v14444_v17 = vld [vmem:[%s19566_s7 + $0x12e8] sm:$0xf0]  ;;  %v14228_v12 = vld [vmem:[%s19566_s7 + $0x1138] sm:$0xf0]  ;;  %v18455_v28 = vld [vmem:[%s19566_s7 + $0x13f4] sm:$0xf] }
 0x535   : > { %11325 = vmatpush.bf16.msra.mxu0 %v14111_v34  ;;  %v10886_v11 = vadd.f32 %v22748_v45, %v10872_v37  ;;  %v14255_v34 = vor.u32 %v18371_v40, %v14252_v16  ;;  %v18413_v45 = vld [vmem:[%s19566_s7 + $0x12a4] sm:$0xf]  ;;  %v18407_v16 = vld [vmem:[%s19566_s7 + $0x1274] sm:$0xf] }
 0x536   : > { %11339 = vmatpush.bf16.msra.mxu1 %v14303_v24  ;;  %v14447_v24 = vor.u32 %v18419_v8, %v14444_v17  ;;  %v22874_v37 = vpop.f32.mrf.mxu1  ;;  %v14396_v8 = vld [vmem:[%s19566_s7 + $0x1288] sm:$0xf0] }
 0x537   : > { %11353 = vmatpush.bf16.msra.mxu2 %v14495_v59  ;;  %v18317_v59 = vld [vmem:[%s19566_s7 + $0xfa4] sm:$0xf]  ;;  %v10900_v49 = vadd.f32 %v22752_v0, %v10886_v11  ;;  %v22868_v9 = vpop.f32.mrf.mxu0  ;;  %v14615_v0 = vor.u32 %v18461_v54, %v14612_v3  ;;  %v14564_v3 = vld [vmem:[%s19566_s7 + $0x13d8] sm:$0xf0] }
 0x538   : > { %11367 = vmatpush.bf16.msra.mxu3 %v14687_v5  ;;  %v14420_v5 = vld [vmem:[%s19566_s7 + $0x12b8] sm:$0xf0]  ;;  %v14039_v4 = vor.u32 %v18317_v59, %v14036_v38  ;;  %v22879_v17 = vpop.f32.mrf.mxu2  ;;  %v18353_v59 = vld [vmem:[%s19566_s7 + $0x10c4] sm:$0xf] }
 0x539   : > { %11326 = vmatpush.bf16.msra.mxu0 %v14087_v19  ;;  %v14231_v19 = vor.u32 %v18365_v35, %v14228_v12  ;;  %v10914_v40 = vadd.f32 %v22777_v22, %v10900_v49  ;;  %v14591_v35 = vor.u32 %v18455_v28, %v14588_v10  ;;  %v18401_v12 = vld [vmem:[%s19566_s7 + $0x1244] sm:$0xf] }
 0x53a   : > { %11340 = vmatpush.bf16.msra.mxu1 %v14279_v32  ;;  %v14423_v32 = vor.u32 %v18413_v45, %v14420_v5  ;;  %v14372_v45 = vld [vmem:[%s19566_s7 + $0x1258] sm:$0xf0]  ;;  %v22890_v5 = vpop.f32.mrf.mxu3  ;;  %v18449_v54 = vld [vmem:[%s19566_s7 + $0x13c4] sm:$0xf] }
 0x53b   : > { %11354 = vmatpush.bf16.msra.mxu2 %v14471_v23  ;;  %v18311_v23 = vld [vmem:[%s19566_s7 + $0xf74] sm:$0xf]  ;;  %v10928_v38 = vadd.f32 %v22794_v18, %v10914_v40  ;;  %v18533_v10 = vld [vmem:[%s19566_s7 + $0x1664] sm:$0xf] }
 0x53c   : > { %11368 = vmatpush.bf16.msra.mxu3 %v14663_v43  ;;  %v14204_v43 = vld [vmem:[%s19566_s7 + $0x1108] sm:$0xf0]  ;;  %v14015_v22 = vor.u32 %v18311_v23, %v14012_v48  ;;  %v18299_v18 = vld [vmem:[%s19566_s7 + $0xf14] sm:$0xf]  ;;  %v14375_v23 = vor.u32 %v18401_v12, %v14372_v45  ;;  %v18677_v45 = vld [vmem:[%s19566_s7 + $0x1ae4] sm:$0xf] }
 0x53d   : > { %11327 = vmatpush.bf16.msra.mxu0 %v14063_v46  ;;  %v14207_v11 = vor.u32 %v18359_v62, %v14204_v43  ;;  %v14399_v46 = vor.u32 %v18407_v16, %v14396_v8  ;;  %v10942_v49 = vadd.f32 %v22809_v30, %v10928_v38  ;;  %v18347_v48 = vld [vmem:[%s19566_s7 + $0x1094] sm:$0xf]  ;;  %v14156_v62 = vld [vmem:[%s19566_s7 + $0x10a8] sm:$0xf0]  ;;  %v14567_v30 = vor.u32 %v18449_v54, %v14564_v3  ;;  %v18629_v38 = vld [vmem:[%s19566_s7 + $0x1964] sm:$0xf] }
 0x53e   : > { %11341 = vmatpush.bf16.msra.mxu1 %v14255_v34  ;;  %v18305_v34 = vld [vmem:[%s19566_s7 + $0xf44] sm:$0xf]  ;;  %v18395_v40 = vld [vmem:[%s19566_s7 + $0x1214] sm:$0xf]  ;;  %v14540_v16 = vld [vmem:[%s19566_s7 + $0x13a8] sm:$0xf0] }
 0x53f   : > { %11355 = vmatpush.bf16.msra.mxu2 %v14447_v24  ;;  %v13988_v24 = vld [vmem:[%s19566_s7 + $0xf58] sm:$0xf0]  ;;  %v18443_v43 = vld [vmem:[%s19566_s7 + $0x1394] sm:$0xf]  ;;  %v22905_v28 = vpop.f32.mrf.mxu0 }
 0x540   : > { %11369 = vmatpush.bf16.msra.mxu3 %v14639_v1  ;;  %v14180_v1 = vld [vmem:[%s19566_s7 + $0x10d8] sm:$0xf0]  ;;  %v22903_v8 = vpop.f32.mrf.mxu2  ;;  %v14543_v3 = vor.u32 %v18443_v43, %v14540_v16 }
 0x541   : > { %11328 = vmatpush.bf16.msra.mxu0 %v14039_v4  ;;  %v13991_v4 = vor.u32 %v18305_v34, %v13988_v24  ;;  %v22911_v34 = vpop.f32.mrf.mxu1  ;;  %v15476_v54 = vld [vmem:[%s19566_s7 + $0x1af8] sm:$0xf0] }
 0x542   : > { %11342 = vmatpush.bf16.msra.mxu1 %v14231_v19  ;;  %v13964_v19 = vld [vmem:[%s19566_s7 + $0xf28] sm:$0xf0]  ;;  %23672 = vst [vmem:[#allocation135_spill] sm:$0xff] %v22911_v34 }
 0x543   : > { %11356 = vmatpush.bf16.msra.mxu2 %v14423_v32  ;;  %v14183_v32 = vor.u32 %v18353_v59, %v14180_v1  ;;  %v13967_v24 = vor.u32 %v18299_v18, %v13964_v19  ;;  %v15092_v59 = vld [vmem:[%s19566_s7 + $0x17f8] sm:$0xf0]  ;;  %v14159_v1 = vor.u32 %v18347_v48, %v14156_v62  ;;  %v18575_v48 = vld [vmem:[%s19566_s7 + $0x17b4] sm:$0xf]  ;;  %v15479_v62 = vor.u32 %v18677_v45, %v15476_v54  ;;  %v15260_v34 = vld [vmem:[%s19566_s7 + $0x1948] sm:$0xf0] }
 0x544   : > { %11370 = vmatpush.bf16.msra.mxu3 %v14615_v0  ;;  %v14348_v0 = vld [vmem:[%s19566_s7 + $0x1228] sm:$0xf0]  ;;  %v15236_v45 = vld [vmem:[%s19566_s7 + $0x1918] sm:$0xf0] }
 0x545   : > { %11329 = vmatpush.bf16.msra.mxu0 %v14015_v22  ;;  %v14900_v22 = vld [vmem:[%s19566_s7 + $0x1678] sm:$0xf0]  ;;  %v14351_v12 = vor.u32 %v18395_v40, %v14348_v0  ;;  %v15068_v40 = vld [vmem:[%s19566_s7 + $0x17c8] sm:$0xf0]  ;;  %v18623_v0 = vld [vmem:[%s19566_s7 + $0x1934] sm:$0xf] }
 0x546   : > { %11343 = vmatpush.bf16.msra.mxu1 %v14207_v11  ;;  %v18581_v11 = vld [vmem:[%s19566_s7 + $0x17e4] sm:$0xf] }
 0x547   : > { %11357 = vmatpush.bf16.msra.mxu2 %v14399_v46  ;;  %v10956_v46 = vadd.f32 %v22813_v6, %v10942_v49  ;;  %v14903_v49 = vor.u32 %v18533_v10, %v14900_v22  ;;  %v15095_v18 = vor.u32 %v18581_v11, %v15092_v59  ;;  %v22930_v10 = vpop.f32.mrf.mxu0  ;;  %v15071_v22 = vor.u32 %v18575_v48, %v15068_v40  ;;  %v18569_v59 = vld [vmem:[%s19566_s7 + $0x1784] sm:$0xf]  ;;  %v15404_v40 = vld [vmem:[%s19566_s7 + $0x1a68] sm:$0xf0] }
 0x548   : > { %11371 = vmatpush.bf16.msra.mxu3 %v14591_v35  ;;  %v15284_v35 = vld [vmem:[%s19566_s7 + $0x1978] sm:$0xf0]  ;;  %v15263_v11 = vor.u32 %v18623_v0, %v15260_v34  ;;  %v22942_v54 = vpop.f32.mrf.mxu2 }
 0x549   : > { %11330 = vmatpush.bf16.msra.mxu0 %v13991_v4  ;;  %v10970_v6 = vadd.f32 %v22841_v44, %v10956_v46  ;;  %v22919_v4 = vpop.f32.mrf.mxu3  ;;  %v15287_v19 = vor.u32 %v18629_v38, %v15284_v35  ;;  %v18671_v44 = vld [vmem:[%s19566_s7 + $0x1ab4] sm:$0xf]  ;;  %v18521_v46 = vld [vmem:[%s19566_s7 + $0x1604] sm:$0xf]  ;;  %v15428_v34 = vld [vmem:[%s19566_s7 + $0x1a98] sm:$0xf0] }
 0x54a   : > { %11344 = vmatpush.bf16.msra.mxu1 %v14183_v32  ;;  %v18527_v32 = vld [vmem:[%s19566_s7 + $0x1634] sm:$0xf] }
 0x54b   : > { %11358 = vmatpush.bf16.msra.mxu2 %v14375_v23  ;;  %v14876_v23 = vld [vmem:[%s19566_s7 + $0x1648] sm:$0xf0]  ;;  %v10984_v43 = vadd.f32 %v22857_v25, %v10970_v6  ;;  %v22936_v25 = vpop.f32.mrf.mxu1 }
 0x54c   : > { %11372 = vmatpush.bf16.msra.mxu3 %v14567_v30  ;;  %v15452_v30 = vld [vmem:[%s19566_s7 + $0x1ac8] sm:$0xf0]  ;;  %v14879_v16 = vor.u32 %v18527_v32, %v14876_v23 }
 0x54d   : > { %11331 = vmatpush.bf16.msra.mxu0 %v13967_v24  ;;  %v14852_v24 = vld [vmem:[%s19566_s7 + $0x1618] sm:$0xf0]  ;;  %v10998_v38 = vadd.f32 %v22868_v9, %v10984_v43  ;;  %v15455_v35 = vor.u32 %v18671_v44, %v15452_v30  ;;  %v18665_v9 = vld [vmem:[%s19566_s7 + $0x1a84] sm:$0xf]  ;;  %v15020_v32 = vld [vmem:[%s19566_s7 + $0x1768] sm:$0xf0] }
 0x54e   : > { %11345 = vmatpush.bf16.msra.mxu1 %v14159_v1  ;;  %v15044_v1 = vld [vmem:[%s19566_s7 + $0x1798] sm:$0xf0]  ;;  %v15212_v23 = vld [vmem:[%s19566_s7 + $0x18e8] sm:$0xf0]  ;;  %v18509_v43 = vld [vmem:[%s19566_s7 + $0x15a4] sm:$0xf] }
 0x54f   : > { %11359 = vmatpush.bf16.msra.mxu2 %v14351_v12  ;;  %v18617_v12 = vld [vmem:[%s19566_s7 + $0x1904] sm:$0xf]  ;;  %v15047_v6 = vor.u32 %v18569_v59, %v15044_v1  ;;  %v15188_v59 = vld [vmem:[%s19566_s7 + $0x18b8] sm:$0xf0] }
 0x550   : > { %11373 = vmatpush.bf16.msra.mxu3 %v14543_v3  ;;  %11332 = vmatmul.bf16.vlgmr.msra.gmra.mxu0 %v19840_v36  ;;  %v14855_v36 = vor.u32 %v18521_v46, %v14852_v24  ;;  %v15239_v3 = vor.u32 %v18617_v12, %v15236_v45  ;;  %v14996_v46 = vld [vmem:[%s19566_s7 + $0x1738] sm:$0xf0]  ;;  %v18605_v24 = vld [vmem:[%s19566_s7 + $0x18a4] sm:$0xf] }
 0x551   : > { %11380 = vmatpush.bf16.msrb.mxu0 %v14903_v49  ;;  %11346 = vmatmul.bf16.vlgmr.msra.gmra.mxu1 %v19846_v41  ;;  %v18515_v49 = vld [vmem:[%s19566_s7 + $0x15d4] sm:$0xf]  ;;  %v11012_v41 = vadd.f32 %v22874_v37, %v10998_v38  ;;  %v22956_v48 = vpop.f32.mrf.mxu3  ;;  %v22967_v38 = vpop.f32.mrf.mxu0  ;;  %v15380_v1 = vld [vmem:[%s19566_s7 + $0x1a38] sm:$0xf0] }
 0x552   : > { %11394 = vmatpush.bf16.msrb.mxu1 %v15095_v18  ;;  %11360 = vmatmul.bf16.vlgmr.msra.gmra.mxu2 %v19919_v33  ;;  %v14828_v18 = vld [vmem:[%s19566_s7 + $0x15e8] sm:$0xf0]  ;;  %v18563_v33 = vld [vmem:[%s19566_s7 + $0x1754] sm:$0xf] }
 0x553   : > { %11408 = vmatpush.bf16.msrb.mxu2 %v15287_v19  ;;  %11374 = vmatmul.bf16.vlgmr.msra.gmra.mxu3 %v19926_v42  ;;  %v15431_v19 = vor.u32 %v18665_v9, %v15428_v34  ;;  %v18611_v42 = vld [vmem:[%s19566_s7 + $0x18d4] sm:$0xf]  ;;  %v11026_v0 = vadd.f32 %v22903_v8, %v11012_v41  ;;  %v14831_v37 = vor.u32 %v18515_v49, %v14828_v18  ;;  %v11081_v8 = vpop.f32.mrf.mxu2  ;;  %v22972_v45 = vpop.f32.mrf.mxu1 }
 0x554   : > { %11422 = vmatpush.bf16.msrb.mxu3 %v15479_v62  ;;  %v18659_v62 = vld [vmem:[%s19566_s7 + $0x1a54] sm:$0xf]  ;;  %v15023_v44 = vor.u32 %v18563_v33, %v15020_v32  ;;  %v15215_v30 = vor.u32 %v18611_v42, %v15212_v23  ;;  %v14972_v33 = vld [vmem:[%s19566_s7 + $0x1708] sm:$0xf0] }
 0x555   : > { %11381 = vmatpush.bf16.msrb.mxu0 %v14879_v16  ;;  %v14804_v16 = vld [vmem:[%s19566_s7 + $0x15b8] sm:$0xf0]  ;;  %v11040_v12 = vadd.f32 %v22919_v4, %v11026_v0  ;;  %v18551_v49 = vld [vmem:[%s19566_s7 + $0x16f4] sm:$0xf]  ;;  %v15356_v23 = vld [vmem:[%s19566_s7 + $0x1a08] sm:$0xf0] }
 0x556   : > { %11395 = vmatpush.bf16.msrb.mxu1 %v15071_v22  ;;  %v18557_v22 = vld [vmem:[%s19566_s7 + $0x1724] sm:$0xf]  ;;  %v14807_v9 = vor.u32 %v18509_v43, %v14804_v16  ;;  %v18599_v41 = vld [vmem:[%s19566_s7 + $0x1874] sm:$0xf]  ;;  %v14948_v16 = vld [vmem:[%s19566_s7 + $0x16d8] sm:$0xf0] }
 0x557   : > { %11409 = vmatpush.bf16.msrb.mxu2 %v15263_v11  ;;  %v15407_v11 = vor.u32 %v18659_v62, %v15404_v40  ;;  %v14999_v34 = vor.u32 %v18557_v22, %v14996_v46  ;;  %v11054_v18 = vadd.f32 %v22930_v10, %v11040_v12  ;;  %v18647_v42 = vld [vmem:[%s19566_s7 + $0x19f4] sm:$0xf]  ;;  %v14975_v10 = vor.u32 %v18551_v49, %v14972_v33  ;;  %v18497_v0 = vld [vmem:[%s19566_s7 + $0x1544] sm:$0xf] }
 0x558   : > { %11423 = vmatpush.bf16.msrb.mxu3 %v15455_v35  ;;  %v18653_v35 = vld [vmem:[%s19566_s7 + $0x1a24] sm:$0xf]  ;;  %v15359_v43 = vor.u32 %v18647_v42, %v15356_v23  ;;  %v18587_v49 = vld [vmem:[%s19566_s7 + $0x1814] sm:$0xf]  ;;  %v15668_v42 = vld [vmem:[%s19566_s7 + $0x1c78] sm:$0xf0] }
 0x559   : > { %11382 = vmatpush.bf16.msrb.mxu0 %v14855_v36  ;;  %v15191_v36 = vor.u32 %v18605_v24, %v15188_v59  ;;  %v15383_v4 = vor.u32 %v18653_v35, %v15380_v1  ;;  %v11095_v32 = vpop.f32.mrf.mxu3  ;;  %v18593_v22 = vld [vmem:[%s19566_s7 + $0x1844] sm:$0xf]  ;;  %v11109_v46 = vpop.f32.mrf.mxu0  ;;  %v15332_v59 = vld [vmem:[%s19566_s7 + $0x19d8] sm:$0xf0]  ;;  %v18635_v33 = vld [vmem:[%s19566_s7 + $0x1994] sm:$0xf] }
 0x55a   : > { %11396 = vmatpush.bf16.msrb.mxu1 %v15047_v6  ;;  %v18503_v6 = vld [vmem:[%s19566_s7 + $0x1574] sm:$0xf]  ;;  %v18641_v24 = vld [vmem:[%s19566_s7 + $0x19c4] sm:$0xf] }
 0x55b   : > { %11410 = vmatpush.bf16.msrb.mxu2 %v15239_v3  ;;  %v14780_v3 = vld [vmem:[%s19566_s7 + $0x1588] sm:$0xf0]  ;;  %v11123_v1 = vpop.f32.mrf.mxu1  ;;  %v18773_v23 = vld [vmem:[%s19566_s7 + $0x1de4] sm:$0xf] }
 0x55c   : > { %11424 = vmatpush.bf16.msrb.mxu3 %v15431_v19  ;;  %v15164_v19 = vld [vmem:[%s19566_s7 + $0x1888] sm:$0xf0]  ;;  %v14783_v62 = vor.u32 %v18503_v6, %v14780_v3 }
 0x55d   : > { %11383 = vmatpush.bf16.msrb.mxu0 %v14831_v37  ;;  %v15167_v40 = vor.u32 %v18599_v41, %v15164_v19  ;;  %v14756_v37 = vld [vmem:[%s19566_s7 + $0x1558] sm:$0xf0]  ;;  %v14924_v3 = vld [vmem:[%s19566_s7 + $0x16a8] sm:$0xf0]  ;;  %v18725_v19 = vld [vmem:[%s19566_s7 + $0x1c64] sm:$0xf] }
 0x55e   : > { %11397 = vmatpush.bf16.msrb.mxu1 %v15023_v44  ;;  %v18545_v44 = vld [vmem:[%s19566_s7 + $0x16c4] sm:$0xf]  ;;  %v14759_v12 = vor.u32 %v18497_v0, %v14756_v37  ;;  %v15308_v41 = vld [vmem:[%s19566_s7 + $0x19a8] sm:$0xf0]  ;;  %v16052_v37 = vld [vmem:[%s19566_s7 + $0x1f78] sm:$0xf0] }
 0x55f   : > { %11411 = vmatpush.bf16.msrb.mxu2 %v15215_v30  ;;  %v11068_v30 = vadd.f32 %v22936_v25, %v11054_v18  ;;  %v18491_v25 = vld [vmem:[%s19566_s7 + $0x1514] sm:$0xf]  ;;  %v15335_v18 = vor.u32 %v18641_v24, %v15332_v59  ;;  %v18821_v0 = vld [vmem:[%s19566_s7 + $0x1f64] sm:$0xf]  ;;  %v15671_v24 = vor.u32 %v18725_v19, %v15668_v42 }
 0x560   : > { %11425 = vmatpush.bf16.msrb.mxu3 %v15407_v11  ;;  %v15140_v11 = vld [vmem:[%s19566_s7 + $0x1858] sm:$0xf0] }
 0x561   : > { %11384 = vmatpush.bf16.msrb.mxu0 %v14807_v9  ;;  %v11082_v35 = vadd.f32 %v11081_v8, %v11068_v30  ;;  %v14732_v9 = vld [vmem:[%s19566_s7 + $0x1528] sm:$0xf0]  ;;  %v15143_v6 = vor.u32 %v18593_v22, %v15140_v11  ;;  %v18539_v8 = vld [vmem:[%s19566_s7 + $0x1694] sm:$0xf]  ;;  %v16244_v22 = vld [vmem:[%s19566_s7 + $0x20f8] sm:$0xf0]  ;;  %v15311_v11 = vor.u32 %v18635_v33, %v15308_v41 }
 0x562   : > { %11398 = vmatpush.bf16.msrb.mxu1 %v14999_v34  ;;  %v22994_v34 = vpop.f32.mrf.mxu2  ;;  %v14927_v30 = vor.u32 %v18539_v8, %v14924_v3  ;;  %v18815_v8 = vld [vmem:[%s19566_s7 + $0x1f34] sm:$0xf]  ;;  %v16028_v3 = vld [vmem:[%s19566_s7 + $0x1f48] sm:$0xf0] }
 0x563   : > { %11412 = vmatpush.bf16.msrb.mxu2 %v15191_v36  ;;  %v14951_v36 = vor.u32 %v18545_v44, %v14948_v16  ;;  %v23008_v44 = vpop.f32.mrf.mxu3  ;;  %v18869_v16 = vld [vmem:[%s19566_s7 + $0x20e4] sm:$0xf]  ;;  %v23022_v41 = vpop.f32.mrf.mxu1 }
 0x564   : > { %11426 = vmatpush.bf16.msrb.mxu3 %v15383_v4  ;;  %v15116_v4 = vld [vmem:[%s19566_s7 + $0x1828] sm:$0xf0] }
 0x565   : > { %11385 = vmatpush.bf16.msrb.mxu0 %v14783_v62  ;;  %v11096_v62 = vadd.f32 %v11095_v32, %v11082_v35  ;;  %v16055_v35 = vor.u32 %v18821_v0, %v16052_v37  ;;  %v15812_v37 = vld [vmem:[%s19566_s7 + $0x1d98] sm:$0xf0] }
 0x566   : > { %11399 = vmatpush.bf16.msrb.mxu1 %v14975_v10  ;;  %v14735_v10 = vor.u32 %v18491_v25, %v14732_v9  ;;  %v15644_v25 = vld [vmem:[%s19566_s7 + $0x1c48] sm:$0xf0]  ;;  %v18767_v9 = vld [vmem:[%s19566_s7 + $0x1db4] sm:$0xf] }
 0x567   : > { %11413 = vmatpush.bf16.msrb.mxu2 %v15167_v40  ;;  %v15860_v40 = vld [vmem:[%s19566_s7 + $0x1df8] sm:$0xf0]  ;;  %v11110_v32 = vadd.f32 %v11109_v46, %v11096_v62  ;;  %v18863_v46 = vld [vmem:[%s19566_s7 + $0x20b4] sm:$0xf]  ;;  %v18713_v62 = vld [vmem:[%s19566_s7 + $0x1c04] sm:$0xf] }
 0x568   : > { %11427 = vmatpush.bf16.msrb.mxu3 %v15359_v43  ;;  %v15119_v43 = vor.u32 %v18587_v49, %v15116_v4  ;;  %v15863_v59 = vor.u32 %v18773_v23, %v15860_v40  ;;  %v23018_v4 = vpop.f32.mrf.mxu0  ;;  %v16031_v23 = vor.u32 %v18815_v8, %v16028_v3  ;;  %v18761_v40 = vld [vmem:[%s19566_s7 + $0x1d84] sm:$0xf]  ;;  %v16172_v8 = vld [vmem:[%s19566_s7 + $0x2068] sm:$0xf0] }
 0x569   : > { %11386 = vmatpush.bf16.msrb.mxu0 %v14759_v12  ;;  %v18719_v12 = vld [vmem:[%s19566_s7 + $0x1c34] sm:$0xf]  ;;  %v11124_v33 = vadd.f32 %v11123_v1, %v11110_v32  ;;  %v16196_v32 = vld [vmem:[%s19566_s7 + $0x2098] sm:$0xf0] }
 0x56a   : > { %11400 = vmatpush.bf16.msrb.mxu1 %v14951_v36  ;;  %v16247_v36 = vor.u32 %v18869_v16, %v16244_v22  ;;  %v11137_v49 = vpop.f32.mrf.mxu2  ;;  %v15647_v19 = vor.u32 %v18719_v12, %v15644_v25  ;;  %v18857_v22 = vld [vmem:[%s19566_s7 + $0x2084] sm:$0xf]  ;;  %v15788_v25 = vld [vmem:[%s19566_s7 + $0x1d68] sm:$0xf0] }
 0x56b   : > { %11414 = vmatpush.bf16.msrb.mxu2 %v15143_v6  ;;  %v15836_v6 = vld [vmem:[%s19566_s7 + $0x1dc8] sm:$0xf0]  ;;  %v11138_v0 = vadd.f32 %v11137_v49, %v11124_v33  ;;  %v11151_v16 = vpop.f32.mrf.mxu3 }
 0x56c   : > { %11428 = vmatpush.bf16.msrb.mxu3 %v15335_v18  ;;  %v16220_v18 = vld [vmem:[%s19566_s7 + $0x20c8] sm:$0xf0]  ;;  %v15839_v42 = vor.u32 %v18767_v9, %v15836_v6  ;;  %v18803_v9 = vld [vmem:[%s19566_s7 + $0x1ed4] sm:$0xf] }
 0x56d   : > { %11387 = vmatpush.bf16.msrb.mxu0 %v14735_v10  ;;  %v15620_v10 = vld [vmem:[%s19566_s7 + $0x1c18] sm:$0xf0]  ;;  %v16223_v1 = vor.u32 %v18863_v46, %v16220_v18  ;;  %v11152_v12 = vadd.f32 %v11151_v16, %v11138_v0  ;;  %v18851_v6 = vld [vmem:[%s19566_s7 + $0x2054] sm:$0xf]  ;;  %v18797_v0 = vld [vmem:[%s19566_s7 + $0x1ea4] sm:$0xf] }
 0x56e   : > { %11401 = vmatpush.bf16.msrb.mxu1 %v14927_v30  ;;  %v18809_v30 = vld [vmem:[%s19566_s7 + $0x1f04] sm:$0xf]  ;;  %v11179_v46 = vpop.f32.mrf.mxu1 }
 0x56f   : > { %11415 = vmatpush.bf16.msrb.mxu2 %v15119_v43  ;;  %v16004_v43 = vld [vmem:[%s19566_s7 + $0x1f18] sm:$0xf0] }
 0x570   : > { %11429 = vmatpush.bf16.msrb.mxu3 %v15311_v11  ;;  %11388 = vmatmul.bf16.vlgmr.msrb.gmra.mxu0 %v19924_v39  ;;  %v15623_v39 = vor.u32 %v18713_v62, %v15620_v10  ;;  %v15815_v11 = vor.u32 %v18761_v40, %v15812_v37  ;;  %v16175_v62 = vor.u32 %v18851_v6, %v16172_v8  ;;  %v15764_v40 = vld [vmem:[%s19566_s7 + $0x1d38] sm:$0xf0]  ;;  %v18845_v37 = vld [vmem:[%s19566_s7 + $0x2024] sm:$0xf] }
 0x571   : > { %11436 = vmatpush.bf16.msra.mxu0 %v15671_v24  ;;  %11402 = vmatmul.bf16.vlgmr.msrb.gmra.mxu1 %v19930_v47  ;;  %v16007_v24 = vor.u32 %v18809_v30, %v16004_v43  ;;  %v16199_v47 = vor.u32 %v18857_v22, %v16196_v32  ;;  %v16148_v30 = vld [vmem:[%s19566_s7 + $0x2038] sm:$0xf0]  ;;  %v11605_v43 = vmul.f32 %v21200_v58, %v21200_v58  ;;  %v18689_v8 = vld [vmem:[%s19566_s7 + $0x1b44] sm:$0xf] }
 0x572   : > { %11450 = vmatpush.bf16.msra.mxu1 %v15863_v59  ;;  %11416 = vmatmul.bf16.vlgmr.msrb.gmra.mxu2 %v20003_v52  ;;  %v18707_v59 = vld [vmem:[%s19566_s7 + $0x1bd4] sm:$0xf]  ;;  %v16151_v58 = vor.u32 %v18845_v37, %v16148_v30  ;;  %v15692_v30 = vld [vmem:[%s19566_s7 + $0x1ca8] sm:$0xf0] }
 0x573   : > { %11464 = vmatpush.bf16.msra.mxu2 %v16055_v35  ;;  %11430 = vmatmul.bf16.vlgmr.msrb.gmra.mxu3 %v20010_v57  ;;  %v15596_v35 = vld [vmem:[%s19566_s7 + $0x1be8] sm:$0xf0]  ;;  %v18755_v52 = vld [vmem:[%s19566_s7 + $0x1d54] sm:$0xf] }
 0x574   : > { %11478 = vmatpush.bf16.msra.mxu3 %v16247_v36  ;;  %v15980_v57 = vld [vmem:[%s19566_s7 + $0x1ee8] sm:$0xf0]  ;;  %v11165_v36 = vpop.f32.mrf.mxu0  ;;  %v15599_v49 = vor.u32 %v18707_v59, %v15596_v35  ;;  %v15791_v18 = vor.u32 %v18755_v52, %v15788_v25  ;;  %v18743_v59 = vld [vmem:[%s19566_s7 + $0x1cf4] sm:$0xf] }
 0x575   : > { %11437 = vmatpush.bf16.msra.mxu0 %v15647_v19  ;;  %v11166_v3 = vadd.f32 %v11165_v36, %v11152_v12  ;;  %v15983_v33 = vor.u32 %v18803_v9, %v15980_v57  ;;  %v18701_v19 = vld [vmem:[%s19566_s7 + $0x1ba4] sm:$0xf]  ;;  %v15740_v52 = vld [vmem:[%s19566_s7 + $0x1d08] sm:$0xf0]  ;;  %v18791_v12 = vld [vmem:[%s19566_s7 + $0x1e74] sm:$0xf] }
 0x576   : > { %11451 = vmatpush.bf16.msra.mxu1 %v15839_v42  ;;  %v15572_v42 = vld [vmem:[%s19566_s7 + $0x1bb8] sm:$0xf0]  ;;  %v18839_v25 = vld [vmem:[%s19566_s7 + $0x1ff4] sm:$0xf]  ;;  %v16124_v9 = vld [vmem:[%s19566_s7 + $0x2008] sm:$0xf0]  ;;  %v15743_v36 = vor.u32 %v18743_v59, %v15740_v52 }
 0x577   : > { %11465 = vmatpush.bf16.msra.mxu2 %v16031_v23  ;;  %v18749_v23 = vld [vmem:[%s19566_s7 + $0x1d24] sm:$0xf]  ;;  %v11180_v10 = vadd.f32 %v11179_v46, %v11166_v3  ;;  %v15575_v22 = vor.u32 %v18701_v19, %v15572_v42  ;;  %v15524_v3 = vld [vmem:[%s19566_s7 + $0x1b58] sm:$0xf0]  ;;  %v16127_v46 = vor.u32 %v18839_v25, %v16124_v9  ;;  %v18731_v37 = vld [vmem:[%s19566_s7 + $0x1c94] sm:$0xf] }
 0x578   : > { %11479 = vmatpush.bf16.msra.mxu3 %v16223_v1  ;;  %v15956_v1 = vld [vmem:[%s19566_s7 + $0x1eb8] sm:$0xf0]  ;;  %v15767_v32 = vor.u32 %v18749_v23, %v15764_v40  ;;  %v18833_v42 = vld [vmem:[%s19566_s7 + $0x1fc4] sm:$0xf]  ;;  %v15500_v40 = vld [vmem:[%s19566_s7 + $0x1b28] sm:$0xf0]  ;;  %v15695_v25 = vor.u32 %v18731_v37, %v15692_v30 }
 0x579   : > { %11438 = vmatpush.bf16.msra.mxu0 %v15623_v39  ;;  %v11611_v16 = vmul.f32 %v11180_v10, %v11180_v10  ;;  %v15959_v39 = vor.u32 %v18797_v0, %v15956_v1  ;;  %v15908_v19 = vld [vmem:[%s19566_s7 + $0x1e58] sm:$0xf0]  ;;  %v18683_v10 = vld [vmem:[%s19566_s7 + $0x1b14] sm:$0xf]  ;;  %v18965_v59 = vld [vmem:[%s19566_s7 + $0x23e4] sm:$0xf] }
 0x57a   : > { %11452 = vmatpush.bf16.msra.mxu1 %v15815_v11  ;;  %v18695_v11 = vld [vmem:[%s19566_s7 + $0x1b74] sm:$0xf]  ;;  %v16100_v23 = vld [vmem:[%s19566_s7 + $0x1fd8] sm:$0xf0] }
 0x57b   : > { %11466 = vmatpush.bf16.msra.mxu2 %v16007_v24  ;;  %v15548_v24 = vld [vmem:[%s19566_s7 + $0x1b88] sm:$0xf0]  ;;  %v23057_v35 = vadd.f32 %v11611_v16, %v11605_v43  ;;  %v18779_v43 = vld [vmem:[%s19566_s7 + $0x1e14] sm:$0xf]  ;;  %v16103_v16 = vor.u32 %v18833_v42, %v16100_v23  ;;  %v16628_v52 = vld [vmem:[%s19566_s7 + $0x23f8] sm:$0xf0] }
 0x57c   : > { %11480 = vmatpush.bf16.msra.mxu3 %v16199_v47  ;;  %v15932_v47 = vld [vmem:[%s19566_s7 + $0x1e88] sm:$0xf0]  ;;  %v15551_v57 = vor.u32 %v18695_v11, %v15548_v24  ;;  %v18917_v11 = vld [vmem:[%s19566_s7 + $0x2264] sm:$0xf]  ;;  %v16436_v24 = vld [vmem:[%s19566_s7 + $0x2278] sm:$0xf0] }
 0x57d   : > { %11439 = vmatpush.bf16.msra.mxu0 %v15599_v49  ;;  %v15935_v6 = vor.u32 %v18791_v12, %v15932_v47  ;;  %v18737_v49 = vld [vmem:[%s19566_s7 + $0x1cc4] sm:$0xf]  ;;  %v16820_v47 = vld [vmem:[%s19566_s7 + $0x2578] sm:$0xf0]  ;;  %v16604_v42 = vld [vmem:[%s19566_s7 + $0x23c8] sm:$0xf0] }
 0x57e   : > { %11453 = vmatpush.bf16.msra.mxu1 %v15791_v18  ;;  %v15716_v18 = vld [vmem:[%s19566_s7 + $0x1cd8] sm:$0xf0]  ;;  %v19013_v12 = vld [vmem:[%s19566_s7 + $0x2564] sm:$0xf]  ;;  %v19007_v23 = vld [vmem:[%s19566_s7 + $0x2534] sm:$0xf] }
 0x57f   : > { %11467 = vmatpush.bf16.msra.mxu2 %v15983_v33  ;;  %v18785_v33 = vld [vmem:[%s19566_s7 + $0x1e44] sm:$0xf]  ;;  %v15719_v0 = vor.u32 %v18737_v49, %v15716_v18  ;;  %v16823_v49 = vor.u32 %v19013_v12, %v16820_v47  ;;  %v16412_v18 = vld [vmem:[%s19566_s7 + $0x2248] sm:$0xf0]  ;;  %v16964_v47 = vld [vmem:[%s19566_s7 + $0x2698] sm:$0xf0] }
 0x580   : > { %11481 = vmatpush.bf16.msra.mxu3 %v16175_v62  ;;  %v15527_v62 = vor.u32 %v18689_v8, %v15524_v3  ;;  %v15911_v1 = vor.u32 %v18785_v33, %v15908_v19  ;;  %v16439_v8 = vor.u32 %v18917_v11, %v16436_v24  ;;  %v16631_v3 = vor.u32 %v18965_v59, %v16628_v52  ;;  %v18959_v33 = vld [vmem:[%s19566_s7 + $0x23b4] sm:$0xf]  ;;  %v16580_v11 = vld [vmem:[%s19566_s7 + $0x2398] sm:$0xf0]  ;;  %v19001_v24 = vld [vmem:[%s19566_s7 + $0x2504] sm:$0xf] }
 0x581   : > { %11440 = vmatpush.bf16.msra.mxu0 %v15575_v22  ;;  %v15884_v22 = vld [vmem:[%s19566_s7 + $0x1e28] sm:$0xf0]  ;;  %v16772_v59 = vld [vmem:[%s19566_s7 + $0x2518] sm:$0xf0]  ;;  %v19049_v12 = vld [vmem:[%s19566_s7 + $0x2684] sm:$0xf] }
 0x582   : > { %11454 = vmatpush.bf16.msra.mxu1 %v15767_v32  ;;  %v18827_v32 = vld [vmem:[%s19566_s7 + $0x1f94] sm:$0xf]  ;;  %v15887_v9 = vor.u32 %v18779_v43, %v15884_v22  ;;  %v16607_v43 = vor.u32 %v18959_v33, %v16604_v42  ;;  %v18953_v22 = vld [vmem:[%s19566_s7 + $0x2384] sm:$0xf]  ;;  %v16940_v42 = vld [vmem:[%s19566_s7 + $0x2668] sm:$0xf0] }
 0x583   : > { %11468 = vmatpush.bf16.msra.mxu2 %v15959_v39  ;;  %v16076_v39 = vld [vmem:[%s19566_s7 + $0x1fa8] sm:$0xf0] }
 0x584   : > { %11482 = vmatpush.bf16.msra.mxu3 %v16151_v58  ;;  %v15503_v58 = vor.u32 %v18683_v10, %v15500_v40  ;;  %v9110_v10 = vadd.f32 %v20102_v29, %v20086_v14  ;;  %v19055_v40 = vld [vmem:[%s19566_s7 + $0x26b4] sm:$0xf]  ;;  %v18905_v14 = vld [vmem:[%s19566_s7 + $0x2204] sm:$0xf]  ;;  %v16388_v29 = vld [vmem:[%s19566_s7 + $0x2218] sm:$0xf0] }
 0x585   : > { %11441 = vmatpush.bf16.msra.mxu0 %v15551_v57  ;;  %v19061_v57 = vld [vmem:[%s19566_s7 + $0x26e4] sm:$0xf] }
 0x586   : > { %11455 = vmatpush.bf16.msra.mxu1 %v15743_v36  ;;  %v17012_v36 = vld [vmem:[%s19566_s7 + $0x26f8] sm:$0xf0] }
 0x587   : > { %11469 = vmatpush.bf16.msra.mxu2 %v15935_v6  ;;  %v16079_v6 = vor.u32 %v18827_v32, %v16076_v39  ;;  %v17015_v19 = vor.u32 %v19061_v57, %v17012_v36  ;;  %v23674_v32 = vld [vmem:[#allocation104_spill] sm:$0xff]  ;;  %v16364_v36 = vld [vmem:[%s19566_s7 + $0x21e8] sm:$0xf0] }
 0x588   : > { %11483 = vmatpush.bf16.msra.mxu3 %v16127_v46  ;;  %v18911_v46 = vld [vmem:[%s19566_s7 + $0x2234] sm:$0xf] }
 0x589   : > { %11442 = vmatpush.bf16.msra.mxu0 %v15527_v62  ;;  %v16796_v62 = vld [vmem:[%s19566_s7 + $0x2548] sm:$0xf0]  ;;  %v16415_v30 = vor.u32 %v18911_v46, %v16412_v18  ;;  %v18899_v57 = vld [vmem:[%s19566_s7 + $0x21d4] sm:$0xf]  ;;  %v23677_v18 = vld [vmem:[#allocation9_spill] sm:$0xff] }
 0x58a   : > { %11456 = vmatpush.bf16.msra.mxu1 %v15719_v0  ;;  %v16988_v0 = vld [vmem:[%s19566_s7 + $0x26c8] sm:$0xf0] }
 0x58b   : > { %11470 = vmatpush.bf16.msra.mxu2 %v15911_v1  ;;  %v23673_v1 = vld [vmem:[#allocation103_spill] sm:$0xff] }
 0x58c   : > { %11484 = vmatpush.bf16.msra.mxu3 %v16103_v16  ;;  %v10370_v37 = vadd.f32 %v23673_v1, %v21883_v51  ;;  %v16799_v16 = vor.u32 %v19007_v23, %v16796_v62  ;;  %v16991_v51 = vor.u32 %v19055_v40, %v16988_v0  ;;  %v16748_v46 = vld [vmem:[%s19566_s7 + $0x24e8] sm:$0xf0]  ;;  %v23678_v23 = vld [vmem:[#allocation106_spill] sm:$0xff] }
 0x58d   : > { %11443 = vmatpush.bf16.msra.mxu0 %v15503_v58  ;;  %v23675_v58 = vld [vmem:[#allocation8_spill] sm:$0xff]  ;;  %v18893_v1 = vld [vmem:[%s19566_s7 + $0x21a4] sm:$0xf] }
 0x58e   : > { %11457 = vmatpush.bf16.msra.mxu1 %v15695_v25  ;;  %v10384_v39 = vadd.f32 %v23674_v32, %v10370_v37  ;;  %v9124_v52 = vadd.f32 %v23675_v58, %v9110_v10  ;;  %v16583_v25 = vor.u32 %v18953_v22, %v16580_v11  ;;  %v16367_v10 = vor.u32 %v18899_v57, %v16364_v36  ;;  %v16340_v37 = vld [vmem:[%s19566_s7 + $0x21b8] sm:$0xf0]  ;;  %v19037_v11 = vld [vmem:[%s19566_s7 + $0x2624] sm:$0xf]  ;;  %v18887_v57 = vld [vmem:[%s19566_s7 + $0x2174] sm:$0xf] }
 0x58f   : > { %11471 = vmatpush.bf16.msra.mxu2 %v15887_v9  ;;  %v16775_v9 = vor.u32 %v19001_v24, %v16772_v59  ;;  %v16532_v32 = vld [vmem:[%s19566_s7 + $0x2338] sm:$0xf0]  ;;  %v23682_v59 = vld [vmem:[#allocation44_spill] sm:$0xff]  ;;  %v16316_v36 = vld [vmem:[%s19566_s7 + $0x2188] sm:$0xf0] }
 0x590   : > { %11485 = vmatpush.bf16.msra.mxu3 %v16079_v6  ;;  %11444 = vmatmul.bf16.vlgmr.msra.gmra.mxu0 %v20008_v56  ;;  %v16391_v56 = vor.u32 %v18905_v14, %v16388_v29  ;;  %v23676_v6 = vld [vmem:[#allocation105_spill] sm:$0xff]  ;;  %v9138_v33 = vadd.f32 %v23677_v18, %v9124_v52  ;;  %v23683_v52 = vld [vmem:[#allocation107_spill] sm:$0xff]  ;;  %v23686_v18 = vld [vmem:[#allocation16_spill] sm:$0xff] }
 0x591   : > { %11492 = vmatpush.bf16.msrb.mxu0 %v16439_v8  ;;  %11458 = vmatmul.bf16.vlgmr.msra.gmra.mxu1 %v20014_v61  ;;  %v10398_v61 = vadd.f32 %v23676_v6, %v10384_v39  ;;  %v10790_v8 = vadd.f32 %v22665_v27, %v22660_v63  ;;  %v23679_v63 = vld [vmem:[#allocation11_spill] sm:$0xff]  ;;  %v18989_v39 = vld [vmem:[%s19566_s7 + $0x24a4] sm:$0xf]  ;;  %v16916_v24 = vld [vmem:[%s19566_s7 + $0x2638] sm:$0xf0] }
 0x592   : > { %11506 = vmatpush.bf16.msrb.mxu1 %v16631_v3  ;;  %11472 = vmatmul.bf16.vlgmr.msra.gmra.mxu2 %v20091_v20  ;;  %v18947_v20 = vld [vmem:[%s19566_s7 + $0x2354] sm:$0xf]  ;;  %v16556_v3 = vld [vmem:[%s19566_s7 + $0x2368] sm:$0xf0]  ;;  %v9152_v27 = vadd.f32 %v23679_v63, %v9138_v33 }
 0x593   : > { %11520 = vmatpush.bf16.msrb.mxu2 %v16823_v49  ;;  %11486 = vmatmul.bf16.vlgmr.msra.gmra.mxu3 %v20098_v26  ;;  %v16967_v26 = vor.u32 %v19049_v12, %v16964_v47  ;;  %v18995_v49 = vld [vmem:[%s19566_s7 + $0x24d4] sm:$0xf]  ;;  %v10412_v62 = vadd.f32 %v23678_v23, %v10398_v61  ;;  %v16559_v40 = vor.u32 %v18947_v20, %v16556_v3  ;;  %v16508_v3 = vld [vmem:[%s19566_s7 + $0x2308] sm:$0xf0]  ;;  %v23687_v23 = vld [vmem:[#allocation45_spill] sm:$0xff] }
 0x594   : > { %11534 = vmatpush.bf16.msrb.mxu3 %v17015_v19  ;;  %v19043_v19 = vld [vmem:[%s19566_s7 + $0x2654] sm:$0xf]  ;;  %v16751_v0 = vor.u32 %v18995_v49, %v16748_v46  ;;  %v10804_v29 = vadd.f32 %v22688_v15, %v10790_v8  ;;  %v16343_v47 = vor.u32 %v18893_v1, %v16340_v37  ;;  %v23684_v15 = vld [vmem:[#allocation14_spill] sm:$0xff]  ;;  %v16700_v46 = vld [vmem:[%s19566_s7 + $0x2488] sm:$0xf0] }
 0x595   : > { %11493 = vmatpush.bf16.msrb.mxu0 %v16415_v30  ;;  %v18941_v30 = vld [vmem:[%s19566_s7 + $0x2324] sm:$0xf]  ;;  %v16943_v22 = vor.u32 %v19043_v19, %v16940_v42  ;;  %v10426_v12 = vadd.f32 %v23683_v52, %v10412_v62  ;;  %v18935_v20 = vld [vmem:[%s19566_s7 + $0x22f4] sm:$0xf]  ;;  %v16892_v42 = vld [vmem:[%s19566_s7 + $0x2608] sm:$0xf0] }
 0x596   : > { %11507 = vmatpush.bf16.msrb.mxu1 %v16607_v43  ;;  %v23680_v43 = vld [vmem:[#allocation42_spill] sm:$0xff]  ;;  %v23685_v6 = vld [vmem:[#allocation108_spill] sm:$0xff]  ;;  %v10818_v8 = vadd.f32 %v22704_v53, %v10804_v29  ;;  %v16319_v53 = vor.u32 %v18887_v57, %v16316_v36  ;;  %v16511_v63 = vor.u32 %v18935_v20, %v16508_v3  ;;  %v16460_v36 = vld [vmem:[%s19566_s7 + $0x22a8] sm:$0xf0] }
 0x597   : > { %11521 = vmatpush.bf16.msrb.mxu2 %v16799_v16  ;;  %v23681_v16 = vld [vmem:[#allocation43_spill] sm:$0xff]  ;;  %v10440_v61 = vadd.f32 %v23685_v6, %v10426_v12  ;;  %v18983_v49 = vld [vmem:[%s19566_s7 + $0x2474] sm:$0xf]  ;;  %v18929_v1 = vld [vmem:[%s19566_s7 + $0x22c4] sm:$0xf] }
 0x598   : > { %11535 = vmatpush.bf16.msrb.mxu3 %v16991_v51  ;;  %v9530_v14 = vadd.f32 %v23681_v16, %v23680_v43  ;;  %v16724_v51 = vld [vmem:[%s19566_s7 + $0x24b8] sm:$0xf0]  ;;  %v19031_v19 = vld [vmem:[%s19566_s7 + $0x25f4] sm:$0xf]  ;;  %v23688_v37 = vld [vmem:[#allocation46_spill] sm:$0xff] }
 0x599   : > { %11494 = vmatpush.bf16.msrb.mxu0 %v16391_v56  ;;  %v9166_v56 = vadd.f32 %v23684_v15, %v9152_v27  ;;  %v16703_v27 = vor.u32 %v18983_v49, %v16700_v46  ;;  %v23689_v43 = vld [vmem:[#allocation109_spill] sm:$0xff]  ;;  %v18977_v29 = vld [vmem:[%s19566_s7 + $0x2444] sm:$0xf]  ;;  %v18875_v12 = vld [vmem:[%s19566_s7 + $0x2114] sm:$0xf] }
 0x59a   : > { %11508 = vmatpush.bf16.msrb.mxu1 %v16583_v25  ;;  %v9544_v58 = vadd.f32 %v23682_v59, %v9530_v14  ;;  %v16535_v25 = vor.u32 %v18941_v30, %v16532_v32  ;;  %v10454_v16 = vadd.f32 %v23689_v43, %v10440_v61  ;;  %v16484_v14 = vld [vmem:[%s19566_s7 + $0x22d8] sm:$0xf0]  ;;  %v23692_v15 = vld [vmem:[#allocation19_spill] sm:$0xff]  ;;  %v18923_v57 = vld [vmem:[%s19566_s7 + $0x2294] sm:$0xf] }
 0x59b   : > { %11522 = vmatpush.bf16.msrb.mxu2 %v16775_v9  ;;  %v16727_v9 = vor.u32 %v18989_v39, %v16724_v51  ;;  %v9180_v33 = vadd.f32 %v23686_v18, %v9166_v56  ;;  %v23690_v32 = vld [vmem:[#allocation17_spill] sm:$0xff]  ;;  %v19025_v51 = vld [vmem:[%s19566_s7 + $0x25c4] sm:$0xf]  ;;  %v23693_v20 = vld [vmem:[#allocation47_spill] sm:$0xff] }
 0x59c   : > { %11536 = vmatpush.bf16.msrb.mxu3 %v16967_v26  ;;  %v16919_v26 = vor.u32 %v19037_v11, %v16916_v24  ;;  %v9558_v62 = vadd.f32 %v23687_v23, %v9544_v58  ;;  %v16868_v11 = vld [vmem:[%s19566_s7 + $0x25d8] sm:$0xf0]  ;;  %v23691_v24 = vld [vmem:[#allocation110_spill] sm:$0xff]  ;;  %v19019_v3 = vld [vmem:[%s19566_s7 + $0x2594] sm:$0xf] }
 0x59d   : > { %11495 = vmatpush.bf16.msrb.mxu0 %v16367_v10  ;;  %v10832_v10 = vadd.f32 %v22722_v21, %v10818_v8  ;;  %v16895_v21 = vor.u32 %v19031_v19, %v16892_v42  ;;  %v9194_v39 = vadd.f32 %v23690_v32, %v9180_v33  ;;  %v10468_v59 = vadd.f32 %v23691_v24, %v10454_v16  ;;  %v16844_v49 = vld [vmem:[%s19566_s7 + $0x25a8] sm:$0xf0]  ;;  %v19109_v46 = vld [vmem:[%s19566_s7 + $0x2864] sm:$0xf]  ;;  %v17204_v18 = vld [vmem:[%s19566_s7 + $0x2878] sm:$0xf0] }
 0x59e   : > { %11509 = vmatpush.bf16.msrb.mxu1 %v16559_v40  ;;  %v18881_v40 = vld [vmem:[%s19566_s7 + $0x2144] sm:$0xf]  ;;  %v9572_v30 = vadd.f32 %v23688_v37, %v9558_v62  ;;  %v16871_v8 = vor.u32 %v19025_v51, %v16868_v11  ;;  %v23694_v19 = vld [vmem:[#allocation48_spill] sm:$0xff]  ;;  %v23695_v23 = vld [vmem:[#allocation111_spill] sm:$0xff] }
 0x59f   : > { %11523 = vmatpush.bf16.msrb.mxu2 %v16751_v0  ;;  %v16292_v0 = vld [vmem:[%s19566_s7 + $0x2158] sm:$0xf0]  ;;  %v10846_v58 = vadd.f32 %v22726_v55, %v10832_v10  ;;  %v9208_v56 = vadd.f32 %v23692_v15, %v9194_v39  ;;  %v18971_v55 = vld [vmem:[%s19566_s7 + $0x2414] sm:$0xf]  ;;  %v19157_v33 = vld [vmem:[%s19566_s7 + $0x29e4] sm:$0xf]  ;;  %v10482_v62 = vadd.f32 %v23695_v23, %v10468_v59 }
 0x5a0   : > { %11537 = vmatpush.bf16.msrb.mxu3 %v16943_v22  ;;  %v16676_v22 = vld [vmem:[%s19566_s7 + $0x2458] sm:$0xf0]  ;;  %v16295_v52 = vor.u32 %v18881_v40, %v16292_v0  ;;  %v9586_v6 = vadd.f32 %v23693_v20, %v9572_v30  ;;  %v16463_v0 = vor.u32 %v18923_v57, %v16460_v36  ;;  %v19253_v37 = vld [vmem:[%s19566_s7 + $0x2ce4] sm:$0xf]  ;;  %v23697_v43 = vld [vmem:[#allocation112_spill] sm:$0xff] }
 0x5a1   : > { %11496 = vmatpush.bf16.msrb.mxu0 %v16343_v47  ;;  %v16268_v47 = vld [vmem:[%s19566_s7 + $0x2128] sm:$0xf0]  ;;  %v10860_v61 = vadd.f32 %v22754_v13, %v10846_v58  ;;  %v23696_v13 = vld [vmem:[#allocation21_spill] sm:$0xff]  ;;  %v10496_v16 = vadd.f32 %v23697_v43, %v10482_v62  ;;  %v19103_v11 = vld [vmem:[%s19566_s7 + $0x2834] sm:$0xf] }
 0x5a2   : > { %11510 = vmatpush.bf16.msrb.mxu1 %v16535_v25  ;;  %v16487_v25 = vor.u32 %v18929_v1, %v16484_v14  ;;  %v9600_v42 = vadd.f32 %v23694_v19, %v9586_v6  ;;  %v16271_v10 = vor.u32 %v18875_v12, %v16268_v47  ;;  %v9222_v40 = vadd.f32 %v23696_v13, %v9208_v56  ;;  %v17780_v30 = vld [vmem:[%s19566_s7 + $0x2cf8] sm:$0xf0]  ;;  %v17180_v24 = vld [vmem:[%s19566_s7 + $0x2848] sm:$0xf0]  ;;  %v19151_v59 = vld [vmem:[%s19566_s7 + $0x29b4] sm:$0xf] }
 0x5a3   : > { %11524 = vmatpush.bf16.msrb.mxu2 %v16727_v9  ;;  %v16679_v9 = vor.u32 %v18977_v29, %v16676_v22  ;;  %v16847_v14 = vor.u32 %v19019_v3, %v16844_v49  ;;  %v17207_v29 = vor.u32 %v19109_v46, %v17204_v18  ;;  %v23698_v22 = vld [vmem:[#allocation22_spill] sm:$0xff]  ;;  %v23699_v58 = vld [vmem:[#allocation49_spill] sm:$0xff]  ;;  %v17783_v15 = vor.u32 %v19253_v37, %v17780_v30  ;;  %v19199_v56 = vld [vmem:[%s19566_s7 + $0x2b34] sm:$0xf] }
 0x5a4   : > { %11538 = vmatpush.bf16.msrb.mxu3 %v16919_v26  ;;  %v16652_v26 = vld [vmem:[%s19566_s7 + $0x2428] sm:$0xf0]  ;;  %v9236_v32 = vadd.f32 %v23698_v22, %v9222_v40  ;;  %v23700_v12 = vld [vmem:[#allocation133_spill] sm:$0xff]  ;;  %v23701_v36 = vld [vmem:[#allocation50_spill] sm:$0xff] }
 0x5a5   : > { %11497 = vmatpush.bf16.msrb.mxu0 %v16319_v53  ;;  %v17396_v53 = vld [vmem:[%s19566_s7 + $0x29f8] sm:$0xf0]  ;;  %v16655_v1 = vor.u32 %v18971_v55, %v16652_v26  ;;  %v17756_v57 = vld [vmem:[%s19566_s7 + $0x2cc8] sm:$0xf0]  ;;  %v19097_v46 = vld [vmem:[%s19566_s7 + $0x2804] sm:$0xf] }
 0x5a6   : > { %11511 = vmatpush.bf16.msrb.mxu1 %v16511_v63  ;;  %v19205_v63 = vld [vmem:[%s19566_s7 + $0x2b64] sm:$0xf]  ;;  %v17399_v39 = vor.u32 %v19157_v33, %v17396_v53  ;;  %v23702_v20 = vld [vmem:[#allocation113_spill] sm:$0xff]  ;;  %v23707_v40 = vld [vmem:[#allocation24_spill] sm:$0xff] }
 0x5a7   : > { %11525 = vmatpush.bf16.msrb.mxu2 %v16703_v27  ;;  %v17588_v27 = vld [vmem:[%s19566_s7 + $0x2b78] sm:$0xf0]  ;;  %v10510_v6 = vadd.f32 %v23702_v20, %v10496_v16  ;;  %v19145_v33 = vld [vmem:[%s19566_s7 + $0x2984] sm:$0xf]  ;;  %v23709_v37 = vld [vmem:[#allocation7_spill] sm:$0xff] }
 0x5a8   : > { %11539 = vmatpush.bf16.msrb.mxu3 %v16895_v21  ;;  %v10874_v21 = vadd.f32 %v22766_v7, %v10860_v61  ;;  %v17591_v51 = vor.u32 %v19205_v63, %v17588_v27  ;;  %v17372_v7 = vld [vmem:[%s19566_s7 + $0x29c8] sm:$0xf0]  ;;  %v17183_v61 = vor.u32 %v19103_v11, %v17180_v24  ;;  %v17156_v18 = vld [vmem:[%s19566_s7 + $0x2818] sm:$0xf0]  ;;  %v23704_v19 = vld [vmem:[#allocation114_spill] sm:$0xff] }
 0x5a9   : > { %11498 = vmatpush.bf16.msrb.mxu0 %v16295_v52  ;;  %v9614_v52 = vadd.f32 %v23699_v58, %v9600_v42  ;;  %v17375_v3 = vor.u32 %v19151_v59, %v17372_v7  ;;  %v10524_v42 = vadd.f32 %v23704_v19, %v10510_v6  ;;  %v23705_v23 = vld [vmem:[#allocation134_spill] sm:$0xff]  ;;  %v17348_v63 = vld [vmem:[%s19566_s7 + $0x2998] sm:$0xf0]  ;;  %v23710_v16 = vld [vmem:[#allocation51_spill] sm:$0xff]  ;;  %v17159_v22 = vor.u32 %v19097_v46, %v17156_v18 }
 0x5aa   : > { %11512 = vmatpush.bf16.msrb.mxu1 %v16487_v25  ;;  %v10888_v47 = vadd.f32 %v23700_v12, %v10874_v21  ;;  %v17564_v25 = vld [vmem:[%s19566_s7 + $0x2b48] sm:$0xf0]  ;;  %v19193_v27 = vld [vmem:[%s19566_s7 + $0x2b04] sm:$0xf]  ;;  %v17540_v13 = vld [vmem:[%s19566_s7 + $0x2b18] sm:$0xf0] }
 0x5ab   : > { %11526 = vmatpush.bf16.msrb.mxu2 %v16679_v9  ;;  %v19247_v9 = vld [vmem:[%s19566_s7 + $0x2cb4] sm:$0xf]  ;;  %v9628_v55 = vadd.f32 %v23701_v36, %v9614_v52  ;;  %v17567_v49 = vor.u32 %v19199_v56, %v17564_v25  ;;  %v19241_v30 = vld [vmem:[%s19566_s7 + $0x2c84] sm:$0xf]  ;;  %v17732_v43 = vld [vmem:[%s19566_s7 + $0x2c98] sm:$0xf0] }
 0x5ac   : > { %11540 = vmatpush.bf16.msrb.mxu3 %v16871_v8  ;;  %v23703_v8 = vld [vmem:[#allocation23_spill] sm:$0xff]  ;;  %v10902_v62 = vadd.f32 %v23705_v23, %v10888_v47  ;;  %v17759_v53 = vor.u32 %v19247_v9, %v17756_v57  ;;  %v19139_v24 = vld [vmem:[%s19566_s7 + $0x2954] sm:$0xf]  ;;  %v23714_v9 = vld [vmem:[#allocation25_spill] sm:$0xff] }
 0x5ad   : > { %11499 = vmatpush.bf16.msrb.mxu0 %v16271_v10  ;;  %v9250_v26 = vadd.f32 %v23703_v8, %v9236_v32  ;;  %v23706_v10 = vld [vmem:[#allocation6_spill] sm:$0xff]  ;;  %v9642_v21 = vadd.f32 %v23710_v16, %v9628_v55  ;;  %v17351_v32 = vor.u32 %v19145_v33, %v17348_v63  ;;  %v17132_v11 = vld [vmem:[%s19566_s7 + $0x27e8] sm:$0xf0]  ;;  %v23712_v59 = vld [vmem:[#allocation52_spill] sm:$0xff] }
 0x5ae   : > { %11513 = vmatpush.bf16.msrb.mxu1 %v16463_v0  ;;  %v23713_v52 = vld [vmem:[#allocation115_spill] sm:$0xff]  ;;  %v19235_v56 = vld [vmem:[%s19566_s7 + $0x2c54] sm:$0xf]  ;;  %v23716_v46 = vld [vmem:[#allocation26_spill] sm:$0xff] }
 0x5af   : > { %11527 = vmatpush.bf16.msrb.mxu2 %v16655_v1  ;;  %v9264_v0 = vadd.f32 %v23707_v40, %v9250_v26  ;;  %v23708_v1 = vld [vmem:[#allocation10_spill] sm:$0xff]  ;;  %v9656_v58 = vadd.f32 %v23712_v59, %v9642_v21  ;;  %v10538_v12 = vadd.f32 %v23713_v52, %v10524_v42  ;;  %v17324_v47 = vld [vmem:[%s19566_s7 + $0x2968] sm:$0xf0]  ;;  %v23715_v36 = vld [vmem:[#allocation116_spill] sm:$0xff] }
 0x5b0   : > { %11541 = vmatpush.bf16.msrb.mxu3 %v16847_v14  ;;  %11500 = vmatmul.bf16.vlgmr.msrb.gmra.mxu0 %v23706_v10  ;;  %v10916_v14 = vadd.f32 %v22815_v31, %v10902_v62  ;;  %v17735_v31 = vor.u32 %v19241_v30, %v17732_v43  ;;  %v17516_v7 = vld [vmem:[%s19566_s7 + $0x2ae8] sm:$0xf0]  ;;  %v19085_v26 = vld [vmem:[%s19566_s7 + $0x27a4] sm:$0xf]  ;;  %v23717_v33 = vld [vmem:[#allocation53_spill] sm:$0xff] }
 0x5b1   : > { %11548 = vmatpush.bf16.msra.mxu0 %v17207_v29  ;;  %11514 = vmatmul.bf16.vlgmr.msrb.gmra.mxu1 %v23709_v37  ;;  %v23711_v29 = vld [vmem:[#allocation13_spill] sm:$0xff]  ;;  %v17708_v25 = vld [vmem:[%s19566_s7 + $0x2c68] sm:$0xf0]  ;;  %v9278_v57 = vadd.f32 %v23714_v9, %v9264_v0  ;;  %v10552_v55 = vadd.f32 %v23715_v36, %v10538_v12  ;;  %v9670_v19 = vadd.f32 %v23717_v33, %v9656_v58  ;;  %v19181_v62 = vld [vmem:[%s19566_s7 + $0x2aa4] sm:$0xf] }
 0x5b2   : > { %11562 = vmatpush.bf16.msra.mxu1 %v17399_v39  ;;  %11528 = vmatmul.bf16.vlgmr.msrb.gmra.mxu2 %v23708_v1  ;;  %v17543_v39 = vor.u32 %v19193_v27, %v17540_v13  ;;  %v10930_v20 = vadd.f32 %v22826_v60, %v10916_v14  ;;  %v17711_v60 = vor.u32 %v19235_v56, %v17708_v25  ;;  %v17300_v23 = vld [vmem:[%s19566_s7 + $0x2938] sm:$0xf0]  ;;  %v23718_v27 = vld [vmem:[#allocation54_spill] sm:$0xff]  ;;  %v19079_v30 = vld [vmem:[%s19566_s7 + $0x2774] sm:$0xf] }
 0x5b3   : > { %11576 = vmatpush.bf16.msra.mxu2 %v17591_v51  ;;  %11542 = vmatmul.bf16.vlgmr.msrb.gmra.mxu3 %v23711_v29  ;;  %v19091_v51 = vld [vmem:[%s19566_s7 + $0x27d4] sm:$0xf]  ;;  %v9292_v18 = vadd.f32 %v23716_v46, %v9278_v57  ;;  %v17492_v10 = vld [vmem:[%s19566_s7 + $0x2ab8] sm:$0xf0]  ;;  %v9684_v13 = vadd.f32 %v23718_v27, %v9670_v19  ;;  %v17084_v43 = vld [vmem:[%s19566_s7 + $0x2788] sm:$0xf0] }
 0x5b4   : > { %11590 = vmatpush.bf16.msra.mxu3 %v17783_v15  ;;  %v19187_v15 = vld [vmem:[%s19566_s7 + $0x2ad4] sm:$0xf]  ;;  %v17135_v6 = vor.u32 %v19091_v51, %v17132_v11  ;;  %v10944_v42 = vadd.f32 %v22843_v2, %v10930_v20  ;;  %v17684_v63 = vld [vmem:[%s19566_s7 + $0x2c38] sm:$0xf0]  ;;  %v17495_v37 = vor.u32 %v19181_v62, %v17492_v10  ;;  %v23720_v21 = vld [vmem:[#allocation27_spill] sm:$0xff] }
 0x5b5   : > { %11549 = vmatpush.bf16.msra.mxu0 %v17183_v61  ;;  %v17327_v61 = vor.u32 %v19139_v24, %v17324_v47  ;;  %v17519_v8 = vor.u32 %v19187_v15, %v17516_v7  ;;  %v23719_v40 = vld [vmem:[#allocation117_spill] sm:$0xff]  ;;  %v19127_v16 = vld [vmem:[%s19566_s7 + $0x28f4] sm:$0xf]  ;;  %v9306_v14 = vadd.f32 %v23720_v21, %v9292_v18  ;;  %v23721_v29 = vld [vmem:[#allocation118_spill] sm:$0xff] }
 0x5b6   : > { %11563 = vmatpush.bf16.msra.mxu1 %v17375_v3  ;;  %v17108_v3 = vld [vmem:[%s19566_s7 + $0x27b8] sm:$0xf0]  ;;  %v10566_v0 = vadd.f32 %v23719_v40, %v10552_v55  ;;  %v17276_v51 = vld [vmem:[%s19566_s7 + $0x2908] sm:$0xf0]  ;;  %v19175_v11 = vld [vmem:[%s19566_s7 + $0x2a74] sm:$0xf] }
 0x5b7   : > { %11577 = vmatpush.bf16.msra.mxu2 %v17567_v49  ;;  %v19133_v49 = vld [vmem:[%s19566_s7 + $0x2924] sm:$0xf]  ;;  %v17111_v1 = vor.u32 %v19085_v26, %v17108_v3  ;;  %v17468_v24 = vld [vmem:[%s19566_s7 + $0x2a88] sm:$0xf0]  ;;  %v19223_v59 = vld [vmem:[%s19566_s7 + $0x2bf4] sm:$0xf]  ;;  %v17279_v7 = vor.u32 %v19127_v16, %v17276_v51 }
 0x5b8   : > { %11591 = vmatpush.bf16.msra.mxu3 %v17759_v53  ;;  %v19229_v53 = vld [vmem:[%s19566_s7 + $0x2c24] sm:$0xf]  ;;  %v17303_v2 = vor.u32 %v19133_v49, %v17300_v23  ;;  %v17660_v58 = vld [vmem:[%s19566_s7 + $0x2c08] sm:$0xf0]  ;;  %v23722_v52 = vld [vmem:[#allocation28_spill] sm:$0xff]  ;;  %v17471_v56 = vor.u32 %v19175_v11, %v17468_v24 }
 0x5b9   : > { %11550 = vmatpush.bf16.msra.mxu0 %v17159_v22  ;;  %v10580_v22 = vadd.f32 %v23721_v29, %v10566_v0  ;;  %v9320_v12 = vadd.f32 %v23722_v52, %v9306_v14  ;;  %v19073_v25 = vld [vmem:[%s19566_s7 + $0x2744] sm:$0xf]  ;;  %v17060_v9 = vld [vmem:[%s19566_s7 + $0x2758] sm:$0xf0]  ;;  %v23724_v36 = vld [vmem:[#allocation56_spill] sm:$0xff] }
 0x5ba   : > { %11564 = vmatpush.bf16.msra.mxu1 %v17351_v32  ;;  %v10958_v32 = vadd.f32 %v22849_v50, %v10944_v42  ;;  %v17087_v50 = vor.u32 %v19079_v30, %v17084_v43  ;;  %v19121_v57 = vld [vmem:[%s19566_s7 + $0x28c4] sm:$0xf]  ;;  %v23725_v20 = vld [vmem:[#allocation119_spill] sm:$0xff]  ;;  %v17444_v26 = vld [vmem:[%s19566_s7 + $0x2a58] sm:$0xf0] }
 0x5bb   : > { %11578 = vmatpush.bf16.msra.mxu2 %v17543_v39  ;;  %v17687_v39 = vor.u32 %v19229_v53, %v17684_v63  ;;  %v19217_v3 = vld [vmem:[%s19566_s7 + $0x2bc4] sm:$0xf]  ;;  %v17636_v49 = vld [vmem:[%s19566_s7 + $0x2bd8] sm:$0xf0]  ;;  %v23727_v33 = vld [vmem:[#allocation120_spill] sm:$0xff] }
 0x5bc   : > { %11592 = vmatpush.bf16.msra.mxu3 %v17735_v31  ;;  %v23723_v31 = vld [vmem:[#allocation55_spill] sm:$0xff]  ;;  %v10972_v15 = vadd.f32 %v22879_v17, %v10958_v32  ;;  %v17252_v17 = vld [vmem:[%s19566_s7 + $0x28d8] sm:$0xf0]  ;;  %v19067_v10 = vld [vmem:[%s19566_s7 + $0x2714] sm:$0xf] }
 0x5bd   : > { %11551 = vmatpush.bf16.msra.mxu0 %v17135_v6  ;;  %v9698_v47 = vadd.f32 %v23723_v31, %v9684_v13  ;;  %v10594_v6 = vadd.f32 %v23725_v20, %v10580_v22  ;;  %v23726_v46 = vld [vmem:[#allocation29_spill] sm:$0xff]  ;;  %v17255_v23 = vor.u32 %v19121_v57, %v17252_v17  ;;  %v17036_v53 = vld [vmem:[%s19566_s7 + $0x2728] sm:$0xf0]  ;;  %v19115_v63 = vld [vmem:[%s19566_s7 + $0x2894] sm:$0xf] }
 0x5be   : > { %11565 = vmatpush.bf16.msra.mxu1 %v17327_v61  ;;  %v17663_v61 = vor.u32 %v19223_v59, %v17660_v58  ;;  %v9334_v18 = vadd.f32 %v23726_v46, %v9320_v12  ;;  %v10986_v42 = vadd.f32 %v22890_v5, %v10972_v15  ;;  %v23728_v27 = vld [vmem:[#allocation30_spill] sm:$0xff]  ;;  %v23729_v40 = vld [vmem:[#allocation57_spill] sm:$0xff]  ;;  %v17420_v30 = vld [vmem:[%s19566_s7 + $0x2a28] sm:$0xf0]  ;;  %v17039_v32 = vor.u32 %v19067_v10, %v17036_v53 }
 0x5bf   : > { %11579 = vmatpush.bf16.msra.mxu2 %v17519_v8  ;;  %v9712_v55 = vadd.f32 %v23724_v36, %v9698_v47  ;;  %v19169_v8 = vld [vmem:[%s19566_s7 + $0x2a44] sm:$0xf]  ;;  %v10608_v19 = vadd.f32 %v23727_v33, %v10594_v6  ;;  %v19211_v43 = vld [vmem:[%s19566_s7 + $0x2b94] sm:$0xf]  ;;  %v17612_v16 = vld [vmem:[%s19566_s7 + $0x2ba8] sm:$0xf0] }
 0x5c0   : > { %11593 = vmatpush.bf16.msra.mxu3 %v17711_v60  ;;  %v17063_v60 = vor.u32 %v19073_v25, %v17060_v9  ;;  %v17447_v62 = vor.u32 %v19169_v8, %v17444_v26  ;;  %v9348_v13 = vadd.f32 %v23728_v27, %v9334_v18  ;;  %v11000_v5 = vadd.f32 %v22905_v28, %v10986_v42  ;;  %v23730_v21 = vld [vmem:[#allocation58_spill] sm:$0xff]  ;;  %v23731_v29 = vld [vmem:[#allocation121_spill] sm:$0xff]  ;;  %v23732_v51 = vld [vmem:[#allocation31_spill] sm:$0xff]  ;;  %v23302_v25 = vpop.f32.mrf.mxu2  ;;  %v23304_v9 = vpop.f32.mrf.mxu3 }
 0x5c1   : > { %11552 = vmatpush.bf16.msra.mxu0 %v17111_v1  ;;  %v9726_v0 = vadd.f32 %v23729_v40, %v9712_v55  ;;  %v17639_v1 = vor.u32 %v19217_v3, %v17636_v49  ;;  %v10622_v22 = vadd.f32 %v23731_v29, %v10608_v19  ;;  %v23733_v24 = vld [vmem:[#allocation122_spill] sm:$0xff]  ;;  %v23734_v58 = vld [vmem:[#allocation135_spill] sm:$0xff]  ;;  %v17615_v12 = vor.u32 %v19211_v43, %v17612_v16  ;;  %v23735_v47 = vld [vmem:[#allocation32_spill] sm:$0xff] }
 0x5c2   : > { %11566 = vmatpush.bf16.msra.mxu1 %v17303_v2  ;;  %v17228_v2 = vld [vmem:[%s19566_s7 + $0x28a8] sm:$0xf0]  ;;  %v9362_v11 = vadd.f32 %v23732_v51, %v9348_v13  ;;  %v11014_v52 = vadd.f32 %v23734_v58, %v11000_v5  ;;  %v23737_v36 = vld [vmem:[#allocation60_spill] sm:$0xff]  ;;  %v11654_v18 = vld [vmem:[%s23293_s15 + $0xf0] sm:$0xff] }
 0x5c3   : > { %11580 = vmatpush.bf16.msra.mxu2 %v17495_v37  ;;  %v19163_v37 = vld [vmem:[%s19566_s7 + $0x2a14] sm:$0xf]  ;;  %v9740_v14 = vadd.f32 %v23730_v21, %v9726_v0  ;;  %v17231_v28 = vor.u32 %v19115_v63, %v17228_v2  ;;  %v10636_v59 = vadd.f32 %v23733_v24, %v10622_v22  ;;  %v11639_v31 = vld [vmem:[%s23293_s15 + $0x78] sm:$0xff]  ;;  %v23743_v33 = vld [vmem:[#allocation18_spill] sm:$0xff]  ;;  %v23341_v24 = vpop.f32.mrf.mxu0 }
 0x5c4   : > { %11594 = vmatpush.bf16.msra.mxu3 %v17687_v39  ;;  %v17423_v39 = vor.u32 %v19163_v37, %v17420_v30  ;;  %v9376_v15 = vadd.f32 %v23735_v47, %v9362_v11  ;;  %v11655_v57 = vld [vmem:[%s23293_s15 + $0xf8] sm:$0xff]  ;;  %v23740_v8 = vld [vmem:[#allocation124_spill] sm:$0xff]  ;;  %v11637_v42 = vld [vmem:[%s23293_s15 + $0x68] sm:$0xff] }
 0x5c5   : > { %11553 = vmatpush.bf16.msra.mxu0 %v17087_v50  ;;  %v23736_v50 = vld [vmem:[#allocation59_spill] sm:$0xff]  ;;  %v23741_v49 = vld [vmem:[#allocation12_spill] sm:$0xff]  ;;  %v23747_v27 = vld [vmem:[#allocation62_spill] sm:$0xff] }
 0x5c6   : > { %11567 = vmatpush.bf16.msra.mxu1 %v17279_v7  ;;  %v9754_v7 = vadd.f32 %v23736_v50, %v9740_v14  ;;  %v23738_v20 = vld [vmem:[#allocation123_spill] sm:$0xff]  ;;  %v23744_v19 = vld [vmem:[#allocation20_spill] sm:$0xff]  ;;  %v23748_v40 = vld [vmem:[#allocation125_spill] sm:$0xff] }
 0x5c7   : > { %11581 = vmatpush.bf16.msra.mxu2 %v17471_v56  ;;  %v11028_v56 = vadd.f32 %v22942_v54, %v11014_v52  ;;  %v10650_v6 = vadd.f32 %v23738_v20, %v10636_v59  ;;  %v11638_v54 = vld [vmem:[%s23293_s15 + $0x70] sm:$0xff]  ;;  %v23742_v46 = vld [vmem:[#allocation15_spill] sm:$0xff]  ;;  %v11636_v63 = vld [vmem:[%s23293_s15 + $0x60] sm:$0xff] }
 0x5c8   : > { %11595 = vmatpush.bf16.msra.mxu3 %v17663_v61  ;;  %v9768_v55 = vadd.f32 %v23737_v36, %v9754_v7  ;;  %v23739_v61 = vld [vmem:[#allocation33_spill] sm:$0xff]  ;;  %v23326_v5 = vpop.f32.mrf.mxu2  ;;  %v11652_v2 = vld [vmem:[%s23293_s15 + $0xe0] sm:$0xff]  ;;  %v23749_v37 = vld [vmem:[#allocation35_spill] sm:$0xff] }
 0x5c9   : > { %11554 = vmatpush.bf16.msra.mxu0 %v17063_v60  ;;  %v9390_v17 = vadd.f32 %v23739_v61, %v9376_v15  ;;  %v10664_v26 = vadd.f32 %v23740_v8, %v10650_v6  ;;  %v11042_v3 = vadd.f32 %v22956_v48, %v11028_v56  ;;  %v23745_v60 = vld [vmem:[#allocation34_spill] sm:$0xff]  ;;  %v11653_v48 = vld [vmem:[%s23293_s15 + $0xe8] sm:$0xff]  ;;  %v11651_v14 = vld [vmem:[%s23293_s15 + $0xd8] sm:$0xff] }
 0x5ca   : > { %11568 = vmatpush.bf16.msra.mxu1 %v17255_v23  ;;  %v23750_v43 = vld [vmem:[#allocation126_spill] sm:$0xff]  ;;  %v23751_v22 = vld [vmem:[#allocation36_spill] sm:$0xff]  ;;  %v23754_v52 = vld [vmem:[#allocation127_spill] sm:$0xff] }
 0x5cb   : > { %11582 = vmatpush.bf16.msra.mxu2 %v17447_v62  ;;  %v9404_v23 = vadd.f32 %v23745_v60, %v9390_v17  ;;  %v23746_v62 = vld [vmem:[#allocation61_spill] sm:$0xff]  ;;  %v11056_v53 = vadd.f32 %v22967_v38, %v11042_v3  ;;  %v10678_v0 = vadd.f32 %v23748_v40, %v10664_v26  ;;  %v11635_v38 = vld [vmem:[%s23293_s15 + $0x58] sm:$0xff]  ;;  %v11634_v29 = vld [vmem:[%s23293_s15 + $0x50] sm:$0xff] }
 0x5cc   : > { %11596 = vmatpush.bf16.msra.mxu3 %v17639_v1  ;;  %v9782_v10 = vadd.f32 %v23746_v62, %v9768_v55  ;;  %v23328_v1 = vpop.f32.mrf.mxu3  ;;  %v11650_v11 = vld [vmem:[%s23293_s15 + $0xd0] sm:$0xff]  ;;  %v23753_v59 = vld [vmem:[#allocation64_spill] sm:$0xff]  ;;  %v23755_v15 = vld [vmem:[#allocation37_spill] sm:$0xff] }
 0x5cd   : > { %11555 = vmatpush.bf16.msra.mxu0 %v17039_v32  ;;  %v9418_v30 = vadd.f32 %v23749_v37, %v9404_v23  ;;  %v10692_v16 = vadd.f32 %v23750_v43, %v10678_v0  ;;  %v11070_v21 = vadd.f32 %v22972_v45, %v11056_v53  ;;  %v11633_v45 = vld [vmem:[%s23293_s15 + $0x48] sm:$0xff]  ;;  %v11632_v47 = vld [vmem:[%s23293_s15 + $0x40] sm:$0xff]  ;;  %v11631_v55 = vld [vmem:[%s23293_s15 + $0x38] sm:$0xff] }
 0x5ce   : > { %11569 = vmatpush.bf16.msra.mxu1 %v17231_v28  ;;  %v9796_v13 = vadd.f32 %v23747_v27, %v9782_v10  ;;  %v23752_v28 = vld [vmem:[#allocation63_spill] sm:$0xff]  ;;  %v23756_v50 = vld [vmem:[#allocation129_spill] sm:$0xff]  ;;  %v11648_v36 = vld [vmem:[%s23293_s15 + $0xc0] sm:$0xff] }
 0x5cf   : > { %11583 = vmatpush.bf16.msra.mxu2 %v17423_v39  ;;  %v9432_v32 = vadd.f32 %v23751_v22, %v9418_v30  ;;  %v11084_v51 = vadd.f32 %v22994_v34, %v11070_v21  ;;  %v23757_v20 = vld [vmem:[#allocation38_spill] sm:$0xff]  ;;  %v23761_v60 = vld [vmem:[#allocation39_spill] sm:$0xff]  ;;  %v23763_v27 = vld [vmem:[#allocation40_spill] sm:$0xff] }
 0x5d0   : > { %11597 = vmatpush.bf16.msra.mxu3 %v17615_v12  ;;  %11556 = vmatmul.bf16.vlgmr.msra.gmra.mxu0 %v23741_v49  ;;  %v9810_v39 = vadd.f32 %v23752_v28, %v9796_v13  ;;  %v10706_v12 = vadd.f32 %v23754_v52, %v10692_v16  ;;  %v23358_v8 = vpop.f32.mrf.mxu2  ;;  %v11630_v3 = vld [vmem:[%s23293_s15 + $0x30] sm:$0xff]  ;;  %v23762_v62 = vld [vmem:[#allocation131_spill] sm:$0xff]  ;;  %v11644_v37 = vld [vmem:[%s23293_s15 + $0xa0] sm:$0xff] }
 0x5d1   : > { %11674 = vmatpush.msrb.mxu0 %v11639_v31  ;;  %11570 = vmatmul.bf16.vlgmr.msra.gmra.mxu1 %v23742_v46  ;;  %v9446_v34 = vadd.f32 %v23755_v15, %v9432_v32  ;;  %v11098_v56 = vadd.f32 %v23008_v44, %v11084_v51  ;;  %v11647_v44 = vld [vmem:[%s23293_s15 + $0xb8] sm:$0xff]  ;;  %v23759_v49 = vld [vmem:[#allocation66_spill] sm:$0xff]  ;;  %v23765_v30 = vld [vmem:[#allocation68_spill] sm:$0xff] }
 0x5d2   : > { %11697 = vmatpush.msrb.mxu1 %v11655_v57  ;;  %11584 = vmatmul.bf16.vlgmr.msra.gmra.mxu2 %v23743_v33  ;;  %v9824_v58 = vadd.f32 %v23753_v59, %v9810_v39  ;;  %v10720_v7 = vadd.f32 %v23756_v50, %v10706_v12  ;;  %v23351_v57 = vpop.f32.mrf.mxu1  ;;  %v23764_v40 = vld [vmem:[#allocation67_spill] sm:$0xff]  ;;  %v23766_v16 = vld [vmem:[#allocation132_spill] sm:$0xff]  ;;  %v11642_v51 = vld [vmem:[%s23293_s15 + $0x90] sm:$0xff] }
 0x5d3   : > { %11598 = vmatmul.bf16.vlgmr.msra.gmra.mxu3 %v23744_v19  ;;  %11675 = vmatpush.msrb.mxu0 %v11638_v54  ;;  %v9460_v6 = vadd.f32 %v23757_v20, %v9446_v34  ;;  %v11112_v17 = vadd.f32 %v23018_v4, %v11098_v56  ;;  %v11646_v19 = vld [vmem:[%s23293_s15 + $0xb0] sm:$0xff]  ;;  %v11629_v4 = vld [vmem:[%s23293_s15 + $0x28] sm:$0xff]  ;;  %v11640_v50 = vld [vmem:[%s23293_s15 + $0x80] sm:$0xff] }
 0x5d4   : > { %19257 = vmatpush.msrb.mxu3 %v11639_v31  ;;  %11698 = vmatpush.msrb.mxu1 %v11654_v18  ;;  %v11649_v31 = vld [vmem:[%s23293_s15 + $0xc8] sm:$0xff]  ;;  %v23360_v26 = vpop.f32.mrf.mxu3  ;;  %v23760_v18 = vld [vmem:[#allocation130_spill] sm:$0xff] }
 0x5d5   : > { %11676 = vmatpush.msrb.mxu0 %v11637_v42  ;;  %v10734_v33 = vadd.f32 %v23760_v18, %v10720_v7  ;;  %v9474_v23 = vadd.f32 %v23761_v60, %v9460_v6  ;;  %v11126_v53 = vadd.f32 %v23022_v41, %v11112_v17  ;;  %v11627_v41 = vld [vmem:[%s23293_s15 + $0x18] sm:$0xff]  ;;  %v11641_v12 = vld [vmem:[%s23293_s15 + $0x88] sm:$0xff]  ;;  %v23769_v15 = vld [vmem:[#allocation70_spill] sm:$0xff] }
 0x5d6   : > { %19258 = vmatpush.msrb.mxu3 %v11638_v54  ;;  %11699 = vmatpush.msrb.mxu1 %v11653_v48  ;;  %v23758_v54 = vld [vmem:[#allocation65_spill] sm:$0xff] }
 0x5d7   : > { %11677 = vmatpush.msrb.mxu0 %v11636_v63  ;;  %v9838_v61 = vadd.f32 %v23758_v54, %v9824_v58  ;;  %v10748_v10 = vadd.f32 %v23762_v62, %v10734_v33  ;;  %v11645_v48 = vld [vmem:[%s23293_s15 + $0xa8] sm:$0xff]  ;;  %v9488_v13 = vadd.f32 %v23763_v27, %v9474_v23  ;;  %v23772_v62 = vld [vmem:[#allocation72_spill] sm:$0xff]  ;;  %v23774_v27 = vld [vmem:[#allocation74_spill] sm:$0xff] }
 0x5d8   : > { %19259 = vmatpush.msrb.mxu3 %v11637_v42  ;;  %11700 = vmatpush.msrb.mxu1 %v11652_v2  ;;  %v23367_v42 = vpop.f32.mrf.mxu0  ;;  %v11140_v2 = vadd.f32 %v23302_v25, %v11126_v53  ;;  %v23767_v25 = vld [vmem:[#allocation41_spill] sm:$0xff]  ;;  %v11249_v28 = vpop.f32.mrf.mxu2 }
 0x5d9   : > { %11678 = vmatpush.msrb.mxu0 %v11635_v38  ;;  %v9852_v46 = vadd.f32 %v23759_v49, %v9838_v61  ;;  %v10762_v21 = vadd.f32 %v23766_v16, %v10748_v10  ;;  %v9502_v22 = vadd.f32 %v23767_v25, %v9488_v13  ;;  %v23773_v10 = vld [vmem:[#allocation73_spill] sm:$0xff] }
 0x5da   : > { %19260 = vmatpush.msrb.mxu3 %v11636_v63  ;;  %11701 = vmatpush.msrb.mxu1 %v11651_v14  ;;  %v11628_v63 = vld [vmem:[%s23293_s15 + $0x20] sm:$0xff]  ;;  %v11643_v14 = vld [vmem:[%s23293_s15 + $0x98] sm:$0xff]  ;;  %v11154_v32 = vadd.f32 %v23304_v9, %v11140_v2  ;;  %v9950_v53 = vadd.f32 %v23773_v10, %v23772_v62  ;;  %v11210_v2 = vadd.f32 %v23360_v26, %v23358_v8 }
 0x5db   : > { %11679 = vmatpush.msrb.mxu0 %v11634_v29  ;;  %v9866_v0 = vadd.f32 %v23764_v40, %v9852_v46  ;;  %v11613_v58 = vmul.f32 %v10762_v21, %v10762_v21  ;;  %v11624_v9 = vld [vmem:[%s23293_s15] sm:$0xff] }
 0x5dc   : > { %19261 = vmatpush.msrb.mxu3 %v11635_v38  ;;  %11702 = vmatpush.msrb.mxu1 %v11650_v11  ;;  %v23378_v38 = vpop.f32.mrf.mxu1  ;;  %v11263_v39 = vpop.f32.mrf.mxu3  ;;  %v11625_v11 = vld [vmem:[%s23293_s15 + $0x8] sm:$0xff]  ;;  %v11168_v52 = vadd.f32 %v23341_v24, %v11154_v32  ;;  %v23770_v24 = vld [vmem:[#allocation128_spill] sm:$0xff]  ;;  %v9964_v13 = vadd.f32 %v23774_v27, %v9950_v53 }
 0x5dd   : > { %11680 = vmatpush.msrb.mxu0 %v11633_v45  ;;  %v9880_v43 = vadd.f32 %v23765_v30, %v9866_v0  ;;  %v23784_v53 = vld [vmem:[#allocation84_spill] sm:$0xff] }
 0x5de   : > { %19262 = vmatpush.msrb.mxu3 %v11634_v29  ;;  %11703 = vmatpush.msrb.mxu1 %v11649_v31  ;;  %v11626_v29 = vld [vmem:[%s23293_s15 + $0x10] sm:$0xff]  ;;  %v11182_v56 = vadd.f32 %v23351_v57, %v11168_v52  ;;  %v11671_v52 = vld [vmem:[%s23293_s15 + $0x178] sm:$0xff] }
 0x5df   : > { %11681 = vmatpush.msrb.mxu0 %v11632_v47  ;;  %11720 = vmatpush.msrb.mxu2 %v11671_v52 }
 0x5e0   : > { %19263 = vmatpush.msrb.mxu3 %v11633_v45  ;;  %11704 = vmatpush.msrb.mxu1 %v11648_v36  ;;  %v23768_v45 = vld [vmem:[#allocation69_spill] sm:$0xff]  ;;  %v11223_v31 = vpop.f32.mrf.mxu0  ;;  %v11614_v6 = vmul.f32 %v11182_v56, %v11182_v56  ;;  %v11251_v54 = vpop.f32.mrf.mxu2 }
 0x5e1   : > { %11682 = vmatpush.msrb.mxu0 %v11631_v55  ;;  %v9894_v59 = vadd.f32 %v23768_v45, %v9880_v43 }
 0x5e2   : > { %19264 = vmatpush.msrb.mxu3 %v11632_v47  ;;  %11705 = vmatpush.msrb.mxu1 %v11647_v44  ;;  %v11607_v47 = vmul.f32 %v9502_v22, %v9502_v22 }
 0x5e3   : > { %11683 = vmatpush.msrb.mxu0 %v11630_v3  ;;  %v9908_v34 = vadd.f32 %v23769_v15, %v9894_v59 }
 0x5e4   : > { %19265 = vmatpush.msrb.mxu3 %v11631_v55  ;;  %11706 = vmatpush.msrb.mxu1 %v11646_v19  ;;  %v11619_v7 = vadd.f32 %v11613_v58, %v11607_v47  ;;  %v11237_v36 = vpop.f32.mrf.mxu1  ;;  %v23771_v55 = vld [vmem:[#allocation71_spill] sm:$0xff]  ;;  %v11265_v61 = vpop.f32.mrf.mxu3  ;;  %v11208_v19 = vadd.f32 %v23328_v1, %v23326_v5 }
 0x5e5   : > { %11684 = vmatpush.msrb.mxu0 %v11629_v4  ;;  %v9922_v20 = vadd.f32 %v23771_v55, %v9908_v34  ;;  %v23775_v5 = vld [vmem:[#allocation75_spill] sm:$0xff] }
 0x5e6   : > { %19266 = vmatpush.msrb.mxu3 %v11630_v3  ;;  %11707 = vmatpush.msrb.mxu1 %v11645_v48  ;;  %v11222_v23 = vadd.f32 %v23367_v42, %v11208_v19  ;;  %v9978_v1 = vadd.f32 %v23775_v5, %v9964_v13  ;;  %v23776_v42 = vld [vmem:[#allocation76_spill] sm:$0xff]  ;;  %v23783_v19 = vld [vmem:[#allocation83_spill] sm:$0xff] }
 0x5e7   : > { %11685 = vmatpush.msrb.mxu0 %v11628_v63  ;;  %v11608_v44 = vmul.f32 %v9922_v20, %v9922_v20  ;;  %v11664_v13 = vld [vmem:[%s23293_s15 + $0x140] sm:$0xff] }
 0x5e8   : > { %19267 = vmatpush.msrb.mxu3 %v11629_v4  ;;  %11708 = vmatpush.msrb.mxu1 %v11644_v37  ;;  %v11277_v17 = vpop.f32.mrf.mxu0  ;;  %v11305_v57 = vpop.f32.mrf.mxu2  ;;  %v9992_v43 = vadd.f32 %v23776_v42, %v9978_v1 }
 0x5e9   : > { %11686 = vmatpush.msrb.mxu0 %v11627_v41  ;;  %v11620_v3 = vadd.f32 %v11614_v6, %v11608_v44 }
 0x5ea   : > { %19268 = vmatpush.msrb.mxu3 %v11628_v63  ;;  %11709 = vmatpush.msrb.mxu1 %v11643_v14  ;;  %v11236_v63 = vadd.f32 %v23378_v38, %v11222_v23  ;;  %v23777_v38 = vld [vmem:[#allocation77_spill] sm:$0xff] }
 0x5eb   : > { %11687 = vmatpush.msrb.mxu0 %v11626_v29  ;;  %v10006_v25 = vadd.f32 %v23777_v38, %v9992_v43  ;;  %v11663_v43 = vld [vmem:[%s23293_s15 + $0x138] sm:$0xff] }
 0x5ec   : > { %19269 = vmatpush.msrb.mxu3 %v11627_v41  ;;  %11710 = vmatpush.msrb.mxu1 %v11642_v51  ;;  %v11291_v49 = vpop.f32.mrf.mxu1  ;;  %v11319_v46 = vpop.f32.mrf.mxu3  ;;  %v11250_v37 = vadd.f32 %v11249_v28, %v11236_v63  ;;  %v11224_v41 = vadd.f32 %v11223_v31, %v11210_v2 }
 0x5ed   : > { %11688 = vmatpush.msrb.mxu0 %v11625_v11 }
 0x5ee   : > { %19270 = vmatpush.msrb.mxu3 %v11626_v29  ;;  %11711 = vmatpush.msrb.mxu1 %v11641_v12  ;;  %v11264_v16 = vadd.f32 %v11263_v39, %v11250_v37  ;;  %v11238_v14 = vadd.f32 %v11237_v36, %v11224_v41  ;;  %v23779_v12 = vld [vmem:[#allocation79_spill] sm:$0xff]  ;;  %v11670_v36 = vld [vmem:[%s23293_s15 + $0x170] sm:$0xff]  ;;  %v23785_v37 = vld [vmem:[#allocation85_spill] sm:$0xff] }
 0x5ef   : > { %11689 = vmatpush.msrb.mxu0 %v11624_v9  ;;  %11721 = vmatpush.msrb.mxu2 %v11670_v36  ;;  %v23786_v41 = vld [vmem:[#allocation86_spill] sm:$0xff]  ;;  %v11657_v36 = vld [vmem:[%s23293_s15 + $0x108] sm:$0xff] }
 0x5f0   : > { %19271 = vmatpush.msrb.mxu3 %v11625_v11  ;;  %11712 = vmatpush.msrb.mxu1 %v11640_v50  ;;  %v11279_v18 = vpop.f32.mrf.mxu0  ;;  %v11307_v4 = vpop.f32.mrf.mxu2  ;;  %v11278_v29 = vadd.f32 %v11277_v17, %v11264_v16  ;;  %v11252_v22 = vadd.f32 %v11251_v54, %v11238_v14  ;;  %v23778_v11 = vld [vmem:[#allocation78_spill] sm:$0xff]  ;;  %v11669_v54 = vld [vmem:[%s23293_s15 + $0x168] sm:$0xff] }
 0x5f1   : > { %11690 = vmatmul.f32.vlgmr.msrb.gmra.mxu0 %v23770_v24  ;;  %11713 = vmatmul.f32.vlgmr.msrb.gmra.mxu1 %v23057_v35  ;;  %v10020_v45 = vadd.f32 %v23778_v11, %v10006_v25  ;;  %v23781_v24 = vld [vmem:[#allocation81_spill] sm:$0xff]  ;;  %v23782_v17 = vld [vmem:[#allocation82_spill] sm:$0xff] }
 0x5f2   : > { %19272 = vmatpush.msrb.mxu3 %v11624_v9  ;;  %v11292_v8 = vadd.f32 %v11291_v49, %v11278_v29  ;;  %v11266_v28 = vadd.f32 %v11265_v61, %v11252_v22  ;;  %v23780_v9 = vld [vmem:[#allocation80_spill] sm:$0xff]  ;;  %11722 = vmatpush.msrb.mxu2 %v11669_v54  ;;  %v11667_v49 = vld [vmem:[%s23293_s15 + $0x158] sm:$0xff]  ;;  %v11661_v25 = vld [vmem:[%s23293_s15 + $0x128] sm:$0xff] }
 0x5f3   : > { %11693 = vmatmul.f32.vlgmr.msrb.gmra.mxu3 %v11619_v7  ;;  %v10034_v39 = vadd.f32 %v23779_v12, %v10020_v45  ;;  %v11668_v61 = vld [vmem:[%s23293_s15 + $0x160] sm:$0xff]  ;;  %v23789_v12 = vld [vmem:[#allocation89_spill] sm:$0xff]  ;;  %v23791_v54 = vld [vmem:[#allocation91_spill] sm:$0xff] }
 0x5f4   : > { %v11293_v33 = vpop.f32.mrf.mxu1  ;;  %v11321_v60 = vpop.f32.mrf.mxu3  ;;  %v11306_v59 = vadd.f32 %v11305_v57, %v11292_v8  ;;  %v11280_v31 = vadd.f32 %v11279_v18, %v11266_v28  ;;  %11723 = vmatpush.msrb.mxu2 %v11668_v61  ;;  %v11660_v28 = vld [vmem:[%s23293_s15 + $0x120] sm:$0xff] }
 0x5f5   : > { %v10048_v47 = vadd.f32 %v23780_v9, %v10034_v39  ;;  %v11658_v9 = vld [vmem:[%s23293_s15 + $0x110] sm:$0xff] }
 0x5f6   : > { %v11320_v15 = vadd.f32 %v11319_v46, %v11306_v59  ;;  %v11294_v7 = vadd.f32 %v11293_v33, %v11280_v31  ;;  %v11666_v33 = vld [vmem:[%s23293_s15 + $0x150] sm:$0xff]  ;;  %11724 = vmatpush.msrb.mxu2 %v11667_v49 }
 0x5f7   : > { %v10062_v55 = vadd.f32 %v23781_v24, %v10048_v47 }
 0x5f8   : > { %v11333_v35 = vpop.f32.mrf.mxu0  ;;  %v11361_v40 = vpop.f32.mrf.mxu2  ;;  %v11308_v20 = vadd.f32 %v11307_v4, %v11294_v7  ;;  %v11665_v4 = vld [vmem:[%s23293_s15 + $0x148] sm:$0xff]  ;;  %11725 = vmatpush.msrb.mxu2 %v11666_v33 }
 0x5f9   : > { %11716 = vmatmul.f32.gmra.mxu1 %v11620_v3  ;;  %v11334_v56 = vadd.f32 %v11333_v35, %v11320_v15  ;;  %v10076_v44 = vadd.f32 %v23782_v17, %v10062_v55 }
 0x5fa   : > { %v11322_v46 = vadd.f32 %v11321_v60, %v11308_v20  ;;  %11726 = vmatpush.msrb.mxu2 %v11665_v4  ;;  %v11656_v20 = vld [vmem:[%s23293_s15 + $0x100] sm:$0xff] }
 0x5fb   : > { %v10090_v23 = vadd.f32 %v23783_v19, %v10076_v44  ;;  %v23792_v44 = vld [vmem:[#allocation92_spill] sm:$0xff]  ;;  %v23793_v19 = vld [vmem:[#allocation93_spill] sm:$0xff] }
 0x5fc   : > { %v11347_v48 = vpop.f32.mrf.mxu1  ;;  %v11375_v0 = vpop.f32.mrf.mxu3  ;;  %11727 = vmatpush.msrb.mxu2 %v11664_v13  ;;  %v23795_v13 = vld [vmem:[#allocation95_spill] sm:$0xff] }
 0x5fd   : > { %v11348_v3 = vadd.f32 %v11347_v48, %v11334_v56  ;;  %v10104_v63 = vadd.f32 %v23784_v53, %v10090_v23 }
 0x5fe   : > { %11728 = vmatpush.msrb.mxu2 %v11663_v43 }
 0x5ff   : > { %v11362_v18 = vadd.f32 %v11361_v40, %v11348_v3  ;;  %v10118_v5 = vadd.f32 %v23785_v37, %v10104_v63 }
 0x600   : > { %v11335_v30 = vpop.f32.mrf.mxu0  ;;  %v11363_v32 = vpop.f32.mrf.mxu2 }
 0x601   : > { %v11336_v35 = vadd.f32 %v11335_v30, %v11322_v46  ;;  %v11376_v27 = vadd.f32 %v11375_v0, %v11362_v18  ;;  %v10132_v30 = vadd.f32 %v23786_v41, %v10118_v5  ;;  %v11662_v0 = vld [vmem:[%s23293_s15 + $0x130] sm:$0xff]  ;;  %v23796_v5 = vld [vmem:[#allocation96_spill] sm:$0xff] }
 0x602   : > { %11729 = vmatpush.msrb.mxu2 %v11662_v0 }
 0x604   : > { %v11349_v21 = vpop.f32.mrf.mxu1  ;;  %v11377_v51 = vpop.f32.mrf.mxu3  ;;  %11730 = vmatpush.msrb.mxu2 %v11661_v25 }
 0x605   : > { %v11350_v60 = vadd.f32 %v11349_v21, %v11336_v35  ;;  %v23787_v21 = vld [vmem:[#allocation87_spill] sm:$0xff] }
 0x606   : > { %v10146_v22 = vadd.f32 %v23787_v21, %v10132_v30  ;;  %11731 = vmatpush.msrb.mxu2 %v11660_v28 }
 0x607   : > { %v11364_v1 = vadd.f32 %v11363_v32, %v11350_v60  ;;  %v23788_v32 = vld [vmem:[#allocation88_spill] sm:$0xff] }
 0x608   : > { %v11389_v26 = vpop.f32.mrf.mxu0  ;;  %v11417_v34 = vpop.f32.mrf.mxu2  ;;  %v10160_v8 = vadd.f32 %v23788_v32, %v10146_v22 }
 0x609   : > { %v11390_v40 = vadd.f32 %v11389_v26, %v11376_v27  ;;  %v11378_v29 = vadd.f32 %v11377_v51, %v11364_v1  ;;  %v11659_v51 = vld [vmem:[%s23293_s15 + $0x118] sm:$0xff] }
 0x60a   : > { %11732 = vmatpush.msrb.mxu2 %v11659_v51  ;;  %v10174_v39 = vadd.f32 %v23789_v12, %v10160_v8  ;;  %v23801_v12 = vld [vmem:[#allocation101_spill] sm:$0xff] }
 0x60c   : > { %v11403_v58 = vpop.f32.mrf.mxu1  ;;  %v11431_v50 = vpop.f32.mrf.mxu3  ;;  %11733 = vmatpush.msrb.mxu2 %v11658_v9 }
 0x60d   : > { %v11404_v42 = vadd.f32 %v11403_v58, %v11390_v40 }
 0x60e   : > { %11734 = vmatpush.msrb.mxu2 %v11657_v36 }
 0x60f   : > { %v11418_v38 = vadd.f32 %v11417_v34, %v11404_v42  ;;  %v23790_v34 = vld [vmem:[#allocation90_spill] sm:$0xff] }
 0x610   : > { %v11391_v6 = vpop.f32.mrf.mxu0  ;;  %v11419_v62 = vpop.f32.mrf.mxu2  ;;  %v10188_v7 = vadd.f32 %v23790_v34, %v10174_v39  ;;  %11735 = vmatpush.msrb.mxu2 %v11656_v20 }
 0x611   : > { %v11392_v11 = vadd.f32 %v11391_v6, %v11378_v29  ;;  %v11432_v26 = vadd.f32 %v11431_v50, %v11418_v38  ;;  %v23798_v38 = vld [vmem:[#allocation98_spill] sm:$0xff] }
 0x612   : > { %v10202_v61 = vadd.f32 %v23791_v54, %v10188_v7  ;;  %v23802_v7 = vld [vmem:[#allocation102_spill] sm:$0xff] }
 0x614   : > { %v11405_v57 = vpop.f32.mrf.mxu1  ;;  %v11433_v10 = vpop.f32.mrf.mxu3  ;;  %v10216_v3 = vadd.f32 %v23792_v44, %v10202_v61  ;;  %v11672_v44 = vld [vmem:[#allocation2] sm:$0xff] }
 0x615   : > { %v11406_v58 = vadd.f32 %v11405_v57, %v11392_v11 }
 0x616   : > { %v10230_v23 = vadd.f32 %v23793_v19, %v10216_v3  ;;  %v11673_v19 = vld [vmem:[#allocation2 + $0x8] sm:$0xff] }
 0x617   : > { %v11420_v31 = vadd.f32 %v11419_v62, %v11406_v58  ;;  %v23794_v62 = vld [vmem:[#allocation94_spill] sm:$0xff] }
 0x618   : > { %v11445_v48 = vpop.f32.mrf.mxu0  ;;  %v11473_v16 = vpop.f32.mrf.mxu2 }
 0x619   : > { %v11446_v52 = vadd.f32 %v11445_v48, %v11432_v26  ;;  %v11434_v24 = vadd.f32 %v11433_v10, %v11420_v31  ;;  %v10244_v10 = vadd.f32 %v23794_v62, %v10230_v23  ;;  %v23799_v26 = vld [vmem:[#allocation99_spill] sm:$0xff] }
 0x61b   : > { %v10258_v60 = vadd.f32 %v23795_v13, %v10244_v10 }
 0x61c   : > { %v11459_v2 = vpop.f32.mrf.mxu1  ;;  %v11487_v14 = vpop.f32.mrf.mxu3 }
 0x61d   : > { %v11460_v56 = vadd.f32 %v11459_v2, %v11446_v52  ;;  %v10272_v1 = vadd.f32 %v23796_v5, %v10258_v60  ;;  %v23800_v52 = vld [vmem:[#allocation100_spill] sm:$0xff] }
 0x61e   : > { %v11606_v51 = vmul.f32 %v23800_v52, %v23800_v52 }
 0x61f   : > { %v11474_v55 = vadd.f32 %v11473_v16, %v11460_v56 }
 0x620   : > { %v11447_v45 = vpop.f32.mrf.mxu0  ;;  %v11475_v47 = vpop.f32.mrf.mxu2 }
 0x621   : > { %v11448_v17 = vadd.f32 %v11447_v45, %v11434_v24  ;;  %v11488_v49 = vadd.f32 %v11487_v14, %v11474_v55  ;;  %v23797_v14 = vld [vmem:[#allocation97_spill] sm:$0xff] }
 0x622   : > { %v10286_v0 = vadd.f32 %v23797_v14, %v10272_v1 }
 0x624   : > { %v11461_v59 = vpop.f32.mrf.mxu1  ;;  %v11489_v15 = vpop.f32.mrf.mxu3  ;;  %v10300_v25 = vadd.f32 %v23798_v38, %v10286_v0 }
 0x625   : > { %v11462_v18 = vadd.f32 %v11461_v59, %v11448_v17 }
 0x626   : > { %v10314_v28 = vadd.f32 %v23799_v26, %v10300_v25 }
 0x627   : > { %v11476_v35 = vadd.f32 %v11475_v47, %v11462_v18 }
 0x628   : > { %v10328_v39 = vadd.f32 %v23801_v12, %v10314_v28 }
 0x629   : > { %v11490_v27 = vadd.f32 %v11489_v15, %v11476_v35 }
 0x62a   : > { %v10342_v56 = vadd.f32 %v23802_v7, %v10328_v39 }
 0x62c   : > { %v11609_v55 = vmul.f32 %v10342_v56, %v10342_v56 }
 0x62d   : > { %v11501_v50 = vpop.f32.mrf.mxu0 }
 0x62e   : > { %v11515_v6 = vpop.f32.mrf.mxu1  ;;  %v11502_v33 = vadd.f32 %v11501_v50, %v11488_v49 }
 0x630   : > { %v11516_v53 = vadd.f32 %v11515_v6, %v11502_v33 }
 0x635   : > { %v11529_v57 = vpop.f32.mrf.mxu2  ;;  %v11503_v4 = vpop.f32.mrf.mxu0 }
 0x636   : > { %v11543_v46 = vpop.f32.mrf.mxu3  ;;  %v11517_v63 = vpop.f32.mrf.mxu1  ;;  %v11530_v48 = vadd.f32 %v11529_v57, %v11516_v53  ;;  %v11504_v40 = vadd.f32 %v11503_v4, %v11490_v27 }
 0x638   : > { %v11544_v41 = vadd.f32 %v11543_v46, %v11530_v48  ;;  %v11518_v42 = vadd.f32 %v11517_v63, %v11504_v40 }
 0x63d   : > { %v11531_v2 = vpop.f32.mrf.mxu2 }
 0x63e   : > { %v11545_v37 = vpop.f32.mrf.mxu3  ;;  %v11532_v29 = vadd.f32 %v11531_v2, %v11518_v42 }
 0x640   : > { %v11546_v45 = vadd.f32 %v11545_v37, %v11532_v29 }
 0x64d   : > { %v11557_v30 = vpop.f32.mrf.mxu0 }
 0x64e   : > { %v11558_v43 = vadd.f32 %v11557_v30, %v11544_v41  ;;  %v11571_v16 = vpop.f32.mrf.mxu1 }
 0x650   : > { %v11572_v21 = vadd.f32 %v11571_v16, %v11558_v43 }
 0x655   : > { %v11585_v22 = vpop.f32.mrf.mxu2  ;;  %v11559_v8 = vpop.f32.mrf.mxu0 }
 0x656   : > { %v11599_v11 = vpop.f32.mrf.mxu3  ;;  %v11586_v32 = vadd.f32 %v11585_v22, %v11572_v21  ;;  %v11560_v58 = vadd.f32 %v11559_v8, %v11546_v45  ;;  %v11573_v9 = vpop.f32.mrf.mxu1 }
 0x658   : > { %v11600_v59 = vadd.f32 %v11599_v11, %v11586_v32  ;;  %v11574_v15 = vadd.f32 %v11573_v9, %v11560_v58 }
 0x65a   : > { %v11612_v31 = vmul.f32 %v11600_v59, %v11600_v59 }
 0x65c   : > { %v11618_v47 = vadd.f32 %v11612_v31, %v11606_v51 }
 0x65d   : > { %v11587_v34 = vpop.f32.mrf.mxu2 }
 0x65e   : > { %v11588_v50 = vadd.f32 %v11587_v34, %v11574_v15  ;;  %11736 = vmatmul.f32.vlgmr.msrb.gmra.mxu2 %v11618_v47  ;;  %v11601_v36 = vpop.f32.mrf.mxu3 }
 0x660   : > { %v11602_v24 = vadd.f32 %v11601_v36, %v11588_v50 }
 0x662   : > { %v11615_v20 = vmul.f32 %v11602_v24, %v11602_v24 }
 0x664   : > { %v11621_v6 = vadd.f32 %v11615_v20, %v11609_v55 }
 0x666   : > { %11739 = vmatmul.f32.gmra.mxu2 %v11621_v6 }
 0x66e   : > { %v11714_v54 = vpop.f32.mrf.mxu1  ;;  %v11691_v61 = vpop.f32.mrf.mxu0 }
 0x66f   : > { %v11715_v17 = vadd.f32 %v11714_v54, %v11691_v61 }
 0x676   : > { %v11717_v46 = vpop.f32.mrf.mxu1  ;;  %v11694_v18 = vpop.f32.mrf.mxu3 }
 0x677   : > { %v11718_v33 = vadd.f32 %v11717_v46, %v11694_v18 }
 0x6e1   : > { %v11737_v3 = vpop.f32.mrf.mxu2 }
 0x6e2   : > { %v11738_v49 = vadd.f32 %v11737_v3, %v11715_v17 }
 0x6e4   : > { %v11743_v57 = vadd.f32 %v11738_v49, %v11672_v44 }
 0x6e6   : > { %11745 = vst [vmem:[#allocation2] sm:$0xff] %v11743_v57 }
 0x6e9   : > { %v11740_v23 = vpop.f32.mrf.mxu2 }
 0x6ea   : > { %v11741_v35 = vadd.f32 %v11740_v23, %v11718_v33  ;;  %11750 = sbr.rel (%p17784_p2) target bundleno = 1935 (0x78f), region = 48 }
 0x6ec   : > { %v11744_v4 = vadd.f32 %v11741_v35, %v11673_v19 }
 0x6ee   : > { %11746 = vst [vmem:[#allocation2 + $0x8] sm:$0xff] %v11744_v4 }
 0x6ef   : > { %v11774_v62 = vld [vmem:[%s23532_s3 + $0x78] sm:$0xff]  ;;  %v11773_v10 = vld [vmem:[%s23532_s3 + $0x70] sm:$0xff]  ;;  %v11772_v53 = vld [vmem:[%s23532_s3 + $0x68] sm:$0xff] }
 0x6f0   : > { %11775 = vmatpush.msra.mxu0 %v11774_v62  ;;  %19273 = vmatpush.msra.mxu1 %v11774_v62  ;;  %v11771_v63 = vld [vmem:[%s23532_s3 + $0x60] sm:$0xff]  ;;  %v11770_v27 = vld [vmem:[%s23532_s3 + $0x58] sm:$0xff]  ;;  %v11769_v48 = vld [vmem:[%s23532_s3 + $0x50] sm:$0xff] }
 0x6f1   : > { %v11768_v13 = vld [vmem:[%s23532_s3 + $0x48] sm:$0xff]  ;;  %v11751_v60 = vld [vmem:[#allocation2] sm:$0xff]  ;;  %v11766_v37 = vld [vmem:[%s23532_s3 + $0x38] sm:$0xff] }
 0x6f2   : > { %11776 = vmatpush.msra.mxu0 %v11773_v10  ;;  %19274 = vmatpush.msra.mxu1 %v11773_v10  ;;  %v11767_v40 = vld [vmem:[%s23532_s3 + $0x40] sm:$0xff]  ;;  %v11753_v5 = vadd.f32 1e-06, %v11751_v60  ;;  %v11765_v41 = vld [vmem:[%s23532_s3 + $0x30] sm:$0xff]  ;;  %v11764_v30 = vld [vmem:[%s23532_s3 + $0x28] sm:$0xff] }
 0x6f3   : > { %v11763_v42 = vld [vmem:[%s23532_s3 + $0x20] sm:$0xff]  ;;  %v11762_v43 = vld [vmem:[%s23532_s3 + $0x18] sm:$0xff]  ;;  %v11761_v14 = vld [vmem:[%s23532_s3 + $0x10] sm:$0xff] }
 0x6f4   : > { %11777 = vmatpush.msra.mxu0 %v11772_v53  ;;  %19275 = vmatpush.msra.mxu1 %v11772_v53  ;;  %19367 = vlog2.f32 %v11753_v5  ;;  %v11760_v29 = vld [vmem:[%s23532_s3 + $0x8] sm:$0xff]  ;;  %v11759_v38 = vld [vmem:[%s23532_s3] sm:$0xff] }
 0x6f5   : > { %v11752_v2 = vld [vmem:[#allocation2 + $0x8] sm:$0xff] }
 0x6f6   : > { %11778 = vmatpush.msra.mxu0 %v11771_v63  ;;  %19276 = vmatpush.msra.mxu1 %v11771_v63  ;;  %v11754_v1 = vadd.f32 1e-06, %v11752_v2 }
 0x6f8   : > { %11779 = vmatpush.msra.mxu0 %v11770_v27  ;;  %19277 = vmatpush.msra.mxu1 %v11770_v27  ;;  %19369 = vlog2.f32 %v11754_v1 }
 0x6fa   : > { %11780 = vmatpush.msra.mxu0 %v11769_v48  ;;  %19278 = vmatpush.msra.mxu1 %v11769_v48  ;;  %v19368_v16 = vpop.eup %19367 }
 0x6fb   : > { %v11756_v25 = vmul.f32 0.6931472, %v19368_v16 }
 0x6fc   : > { %11781 = vmatpush.msra.mxu0 %v11768_v13  ;;  %19279 = vmatpush.msra.mxu1 %v11768_v13 }
 0x6fe   : > { %11782 = vmatpush.msra.mxu0 %v11767_v40  ;;  %19280 = vmatpush.msra.mxu1 %v11767_v40  ;;  %v19370_v0 = vpop.eup %19369 }
 0x6ff   : > { %v11758_v21 = vmul.f32 0.6931472, %v19370_v0 }
 0x700   : > { %11783 = vmatpush.msra.mxu0 %v11766_v37  ;;  %19281 = vmatpush.msra.mxu1 %v11766_v37 }
 0x702   : > { %11784 = vmatpush.msra.mxu0 %v11765_v41  ;;  %19282 = vmatpush.msra.mxu1 %v11765_v41 }
 0x704   : > { %11785 = vmatpush.msra.mxu0 %v11764_v30  ;;  %19283 = vmatpush.msra.mxu1 %v11764_v30 }
 0x706   : > { %11786 = vmatpush.msra.mxu0 %v11763_v42  ;;  %19284 = vmatpush.msra.mxu1 %v11763_v42 }
 0x708   : > { %11787 = vmatpush.msra.mxu0 %v11762_v43  ;;  %19285 = vmatpush.msra.mxu1 %v11762_v43 }
 0x70a   : > { %11788 = vmatpush.msra.mxu0 %v11761_v14  ;;  %19286 = vmatpush.msra.mxu1 %v11761_v14 }
 0x70c   : > { %11789 = vmatpush.msra.mxu0 %v11760_v29  ;;  %19287 = vmatpush.msra.mxu1 %v11760_v29 }
 0x70e   : > { %11790 = vmatpush.msra.mxu0 %v11759_v38  ;;  %19288 = vmatpush.msra.mxu1 %v11759_v38 }
 0x70f   : > { %11791 = vmatmul.f32.vlgmr.msra.gmra.mxu0 %v11756_v25  ;;  %11794 = vmatmul.f32.vlgmr.msra.gmra.mxu1 %v11758_v21 }
 0x78c   : > { %v11792_v22 = vpop.f32.mrf.mxu0  ;;  %v11795_v11 = vpop.f32.mrf.mxu1 }
 0x78d   : > { %11798 = vst [vmem:[%s19576_s10] sm:$0xff] %v11792_v22 }
 0x78e   : > { %11799 = vst [vmem:[%s19576_s10 + $0x8] sm:$0xff] %v11795_v11 }
 0x78f PF: > { %s17_s22 = sadd.s32 1, %s19467_s22   ;;  %s23803_s15 = smov %s19443_s16 }
 0x790   : > { %p14_p3 = scmp.ge.s32.totalorder %s17_s22, 12   ;;  %s23804_s16 = smov %s19447_s17 }
 0x791   : > { %s23805_s17 = smov %s19551_s28  ;;  %s23806_s18 = smov %s19459_s20 }
 0x792   : > { %s23807_s19 = smov %s19463_s21  ;;  %s23808_s20 = smov %s23811_s24 }
 0x793   : > { %s23809_s21 = smov %s23815_s25  ;;  %16 = sbr.rel (!%p14_p3) target bundleno = 5 (0x5), region = 88 }
 0x798   :  { %11822 = vsyncpa [#allocation4], 1 }
 0x799   :  { %11824 = vsyncpa [#allocation4 + $0x1], 1 }

</bundles_post_ra>
